<compile_context>
chip_gen: v6e
topology: v6e:2x2x1
jax: 0.10.0
libtpu: 0.0.40
codegen_flags: <defaults>
</compile_context>

<pallas_src>
import functools
import math

import jax
import jax.numpy as jnp
from jax.experimental import pallas as pl
from jax.experimental.pallas import tpu as pltpu


# ----------------------------------------------------------------------------
# Pallas kernel: tiled GEMM with fused bias add + optional ReLU.
# Grid = (N_tiles, K_tiles); reduction axis (K) is last / "arbitrary".
# The f32 output block is the accumulator (its block index is constant in k).
# ----------------------------------------------------------------------------
def _matmul_bias_relu_kernel(a_ref, b_ref, bias_ref, o_ref, *, apply_relu):
    k = pl.program_id(1)

    @pl.when(k == 0)
    def _():
        # initialize the resident output block with the (broadcast) bias
        o_ref[...] = jnp.zeros_like(o_ref) + bias_ref[...]

    o_ref[...] += jnp.dot(
        a_ref[...], b_ref[...], preferred_element_type=jnp.float32
    )

    if apply_relu:
        @pl.when(k == pl.num_programs(1) - 1)
        def _():
            o_ref[...] = jnp.maximum(o_ref[...], 0.0)


def _round_up(x, m):
    return ((x + m - 1) // m) * m


def _pick_tk(kp, max_tk):
    """Largest multiple of 128 that divides kp exactly and is <= max_tk."""
    best = 128
    t = 128
    while t <= min(kp, max_tk):
        if kp % t == 0:
            best = t
        t += 128
    return best


def matmul_bias_relu(a, b, bias, *, apply_relu, tn=1024,
                     max_weight_tile_bytes=8 * 1024 * 1024):
    """relu?(a @ b + bias).  a: (M, K), b: (K, Nc), bias: (Nc,) -> (M, Nc) f32.

    a / b are fed to the MXU in bfloat16 with an f32 accumulator; bias and the
    output stay f32.
    """
    M, K = a.shape
    Kb, Nc = b.shape
    assert K == Kb and Nc % tn == 0

    a = a.astype(jnp.bfloat16)
    b = b.astype(jnp.bfloat16)
    bias = bias.reshape(1, Nc).astype(jnp.float32)

    # Minimal alignment padding: M to sublane (8), K to lane (128). The padded
    # rows/cols are zero so they contribute nothing to the reduction.
    Mp = _round_up(M, 8)
    Kp = _round_up(K, 128)
    if Mp != M or Kp != K:
        a = jnp.pad(a, ((0, Mp - M), (0, Kp - K)))
    if Kp != K:
        b = jnp.pad(b, ((0, Kp - K), (0, 0)))

    # K tile: largest 128-multiple divisor of Kp whose bf16 weight tile stays
    # within the per-buffer budget (Pallas double-buffers the weight input).
    max_tk = max(128, max_weight_tile_bytes // (tn * 2))
    tk = _pick_tk(Kp, max_tk)

    grid = (Nc // tn, Kp // tk)   # j (parallel) outer, k (reduction) innermost
    out = pl.pallas_call(
        functools.partial(_matmul_bias_relu_kernel, apply_relu=apply_relu),
        out_shape=jax.ShapeDtypeStruct((Mp, Nc), jnp.float32),
        grid_spec=pltpu.PrefetchScalarGridSpec(
            num_scalar_prefetch=0,
            grid=grid,
            in_specs=[
                pl.BlockSpec((Mp, tk), lambda j, k: (0, k)),   # activation tile
                pl.BlockSpec((tk, tn), lambda j, k: (k, j)),   # weight tile
                pl.BlockSpec((1, tn), lambda j, k: (0, j)),    # bias tile
            ],
            out_specs=pl.BlockSpec((Mp, tn), lambda j, k: (0, j)),
        ),
        compiler_params=pltpu.CompilerParams(
            dimension_semantics=("parallel", "arbitrary"),
            # ~13-16 MB of double-buffered bf16 weights per step; raise the
            # scoped VMEM limit above v5e's 16 MiB default (fits v6e/v7x too).
            vmem_limit_bytes=32 * 1024 * 1024,
        ),
    )(a, b, bias)
    return out[:M]


# ----------------------------------------------------------------------------
# Conv1d(k=3, stride=1, pad=1) via im2col + the Pallas GEMM kernel.
# ----------------------------------------------------------------------------
def conv1d_pallas(x, w, b, *, apply_relu):
    """x: (N, C_in, L); w: (C_out, C_in, 3); b: (C_out,) -> (N, C_out, L) f32."""
    N, C_in, L = x.shape
    C_out, _, ks = w.shape
    assert ks == 3

    # im2col as 3 shifted slices + concat (cheap copies, no gather).
    # K ordering is [tap, channel]: patches[n*L + l, t*C_in + c] = x_pad[n, c, l+t]
    xp = jnp.pad(x, ((0, 0), (0, 0), (1, 1)))                          # (N, C, L+2)
    taps = jnp.stack([xp[:, :, t:t + L] for t in range(ks)], axis=0)   # (3, N, C, L)
    patches = jnp.transpose(taps, (1, 3, 0, 2)).reshape(N * L, ks * C_in)

    # weights flattened to (K, C_out) with matching [tap, channel] ordering:
    # W[t*C_in + c, co] = w[co, c, t]
    W = jnp.transpose(w, (2, 1, 0)).reshape(ks * C_in, C_out)

    out = matmul_bias_relu(patches, W, b, apply_relu=apply_relu)       # (N*L, C_out)
    return jnp.transpose(out.reshape(N, L, C_out), (0, 2, 1))


# ----------------------------------------------------------------------------
# CNNModel.forward
# ----------------------------------------------------------------------------
def cnn_model_forward(x, params):
    w1, b1, w2, b2 = params
    out = conv1d_pallas(x, w1, b1, apply_relu=True)    # out = relu(cnn1(x))
    # The reference forward passes `x` (1025 ch) into cnn2 (expects 4096 ch),
    # which would raise in PyTorch; implementing the intended chain instead.
    out = conv1d_pallas(out, w2, b2, apply_relu=True)  # out = relu(cnn2(out))
    # TODO(synk): self.cnn3 is referenced in forward() but never defined in
    # __init__, so there are no weights to apply — omitted.
    return out


if __name__ == "__main__":
    C_IN, C_HID, KS = 1025, 4096, 3   # channel sizes fixed by the module
    N, L = 2, 8                       # small batch / sequence length

    key = jax.random.PRNGKey(0)
    k1, k2, k3, k4, kx = jax.random.split(key, 5)

    # deterministic init matching PyTorch Conv1d default: U(-1/sqrt(fan_in), ..)
    def uinit(k, shape, fan_in):
        bound = 1.0 / math.sqrt(fan_in)
        return jax.random.uniform(k, shape, jnp.float32, -bound, bound)

    w1 = uinit(k1, (C_HID, C_IN, KS), C_IN * KS)
    b1 = uinit(k2, (C_HID,), C_IN * KS)
    w2 = uinit(k3, (C_HID, C_HID, KS), C_HID * KS)
    b2 = uinit(k4, (C_HID,), C_HID * KS)

    x = jax.random.normal(kx, (N, C_IN, L), jnp.float32)

    out = cnn_model_forward(x, (w1, b1, w2, b2))
    jax.block_until_ready(out)
    assert out.shape == (N, C_HID, L), out.shape
    print("KERNEL_OK")
</pallas_src>

<mosaic_0001>
module attributes {stable_mosaic.version = 11 : i64} {
  func.func @_matmul_bias_relu_kernel(%arg0: i32, %arg1: i32, %arg2: memref<16x3200xbf16, #tpu.memory_space<vmem>>, %arg3: memref<3200x1024xbf16, #tpu.memory_space<vmem>>, %arg4: memref<1x1024xf32, #tpu.memory_space<vmem>>, %arg5: memref<16x1024xf32, #tpu.memory_space<vmem>>) attributes {dimension_semantics = [#tpu.dimension_semantics<parallel>, #tpu.dimension_semantics<arbitrary>], iteration_bounds = array<i64: 4, 1>, scalar_prefetch = 0 : i64, scratch_operands = 0 : i64, tpu.core_type = #tpu.core_type<tc>, window_params = [{transform_indices = @transform_0, window_bounds = array<i64: 16, 3200>}, {transform_indices = @transform_1, window_bounds = array<i64: 3200, 1024>}, {transform_indices = @transform_2, window_bounds = array<i64: 1, 1024>}, {transform_indices = @transform_3, window_bounds = array<i64: 16, 1024>}]} {
    %c0_i32 = arith.constant 0 : i32
    %0 = arith.cmpi eq, %arg1, %c0_i32 : i32
    %1 = arith.extui %0 : i1 to i32
    %c0_i32_0 = arith.constant 0 : i32
    %2 = arith.cmpi ne, %1, %c0_i32_0 : i32
    scf.if %2 {
      %cst_10 = arith.constant 0.000000e+00 : f32
      %12 = vector.broadcast %cst_10 : f32 to vector<16x1024xf32>
      %c0_11 = arith.constant 0 : index
      %c0_12 = arith.constant 0 : index
      %13 = vector.load %arg4[%c0_11, %c0_12] : memref<1x1024xf32, #tpu.memory_space<vmem>>, vector<1x1024xf32>
      %14 = vector.broadcast %13 : vector<1x1024xf32> to vector<16x1024xf32>
      %15 = arith.addf %12, %14 : vector<16x1024xf32>
      %c0_13 = arith.constant 0 : index
      %c0_14 = arith.constant 0 : index
      %16 = vector.load %arg5[%c0_13, %c0_14] : memref<16x1024xf32, #tpu.memory_space<vmem>>, vector<16x1024xf32>
      tpu.vector_store %arg5[%c0_13, %c0_14], %15 {strides = array<i32>} : memref<16x1024xf32, #tpu.memory_space<vmem>>, vector<16x1024xf32>,
    } else {
    }
    %c0 = arith.constant 0 : index
    %c0_1 = arith.constant 0 : index
    %3 = vector.load %arg5[%c0, %c0_1] : memref<16x1024xf32, #tpu.memory_space<vmem>>, vector<16x1024xf32>
    %c0_2 = arith.constant 0 : index
    %c0_3 = arith.constant 0 : index
    %4 = vector.load %arg2[%c0_2, %c0_3] : memref<16x3200xbf16, #tpu.memory_space<vmem>>, vector<16x3200xbf16>
    %c0_4 = arith.constant 0 : index
    %c0_5 = arith.constant 0 : index
    %5 = vector.load %arg3[%c0_4, %c0_5] : memref<3200x1024xbf16, #tpu.memory_space<vmem>>, vector<3200x1024xbf16>
    %cst = arith.constant dense<0.000000e+00> : vector<16x1024xf32>
    %6 = tpu.matmul %4, %5, %cst {dimension_numbers = #tpu.dot_dimension_numbers<[1], [0], [0], [1], [0, 0, 1, 1], [], []>} : vector<16x3200xbf16>, vector<3200x1024xbf16>, vector<16x1024xf32> -> vector<16x1024xf32>
    %7 = arith.addf %3, %6 : vector<16x1024xf32>
    %c0_6 = arith.constant 0 : index
    %c0_7 = arith.constant 0 : index
    %8 = vector.load %arg5[%c0_6, %c0_7] : memref<16x1024xf32, #tpu.memory_space<vmem>>, vector<16x1024xf32>
    tpu.vector_store %arg5[%c0_6, %c0_7], %7 {strides = array<i32>} : memref<16x1024xf32, #tpu.memory_space<vmem>>, vector<16x1024xf32>,
    %c0_i32_8 = arith.constant 0 : i32
    %9 = arith.cmpi eq, %arg1, %c0_i32_8 : i32
    %10 = arith.extui %9 : i1 to i32
    %c0_i32_9 = arith.constant 0 : i32
    %11 = arith.cmpi ne, %10, %c0_i32_9 : i32
    scf.if %11 {
      %c0_10 = arith.constant 0 : index
      %c0_11 = arith.constant 0 : index
      %12 = vector.load %arg5[%c0_10, %c0_11] : memref<16x1024xf32, #tpu.memory_space<vmem>>, vector<16x1024xf32>
      %cst_12 = arith.constant 0.000000e+00 : f32
      %13 = vector.broadcast %cst_12 : f32 to vector<16x1024xf32>
      %14 = arith.maximumf %12, %13 : vector<16x1024xf32>
      %c0_13 = arith.constant 0 : index
      %c0_14 = arith.constant 0 : index
      %15 = vector.load %arg5[%c0_13, %c0_14] : memref<16x1024xf32, #tpu.memory_space<vmem>>, vector<16x1024xf32>
      tpu.vector_store %arg5[%c0_13, %c0_14], %14 {strides = array<i32>} : memref<16x1024xf32, #tpu.memory_space<vmem>>, vector<16x1024xf32>,
    } else {
    }
    return
  }
  func.func @transform_0(%arg0: i32, %arg1: i32) -> (i32, i32) {
    %c0_i32 = arith.constant 0 : i32
    %c0_i32_0 = arith.constant 0 : i32
    return %c0_i32, %arg1 : i32, i32
  }
  func.func @transform_1(%arg0: i32, %arg1: i32) -> (i32, i32) {
    %c0_i32 = arith.constant 0 : i32
    return %arg1, %arg0 : i32, i32
  }
  func.func @transform_2(%arg0: i32, %arg1: i32) -> (i32, i32) {
    %c0_i32 = arith.constant 0 : i32
    %c0_i32_0 = arith.constant 0 : i32
    return %c0_i32, %arg0 : i32, i32
  }
  func.func @transform_3(%arg0: i32, %arg1: i32) -> (i32, i32) {
    %c0_i32 = arith.constant 0 : i32
    %c0_i32_0 = arith.constant 0 : i32
    return %c0_i32, %arg0 : i32, i32
  }
}

</mosaic_0001>

<bundles_post_ra>
// kernel: tpu_custom_call.1
= control target key start
LH: loop header
LB: loop body
LE: loop exit
PB: predicated region body
PF: predicated region fallthrough
CT: control target
= control target key end

     0   :  { %8 = vsyncpa [#allocation3], 0  ;;  %s16850_s0 = inlined_call_operand.hbm [shape: bf16[16,3200], index: 0, kind: input, shape index: {}]   ;;  %s16851_s1 = inlined_call_operand.hbm [shape: bf16[3200,4096], index: 1, kind: input, shape index: {}]   ;;  %s16852_s2 = inlined_call_operand.hbm [shape: f32[1,4096], index: 2, kind: input, shape index: {}]   ;;  %s16853_s3 = inlined_call_operand.hbm [shape: f32[16,4096], index: 3, kind: output, shape index: {}]  }
   0x1   :  { %9 = vsyncpa [#allocation6], 0 }
   0x2   :  { %11 = vsyncpa [#allocation6 + $0x1], 0 }
   0x3   :  { %12 = vsyncpa [#allocation4], 0 }
   0x4   :  { %14 = vsyncpa [#allocation4 + $0x1], 0  ;;  %s14611_s12 = smov 0   ;;  %s14613_s13 = smov 0  }
   0x5   :  { %s14615_s14 = smov 0   ;;  %s14617_s15 = smov 0  }
   0x6   :  { %s14619_s16 = smov 0   ;;  %s14621_s17 = smov 0  }
   0x7 LB: > { %s32_s18 = sadd.s32 1, %s14572_s16  ;;  %s67_s19 = sadd.s32 1, %s14564_s14  ;;  %s14576_s17 = sphi %s14621_s17, %s20_s17   ;;  %s14572_s16 = sphi %s14619_s16, %s16872_s16   ;;  %s14568_s15 = sphi %s14617_s15, %s16871_s15   ;;  %s14564_s14 = sphi %s14615_s14, %s16870_s14   ;;  %s14560_s13 = sphi %s14613_s13, %s16869_s13   ;;  %s14556_s12 = sphi %s14611_s12, %s16868_s12  }
   0x8   : > { %p34_p0 = scmp.ge.s32.totalorder %s32_s18, 4  ;;  %p74_p1 = scmp.ne.s32.totalorder %s14564_s14, %s14560_s13 }
   0x9   : > { %p75_p2 = scmp.eq.s32.totalorder %s14576_s17, 0  ;;  %p14234_p4 = scmp.lt.s32.totalorder %s14576_s17, 4 }
   0xa   : > { %s16874_s18 = smov (%p34_p0, %s32_s18), 0  ;;  %s172_s21 = sand.u32 1, %s14576_s17  }
   0xb   : > { %p76_p3 = por %p75_p2, %p74_p1  ;;  %s63_s20 = ssub.s32 %s14572_s16, %s16874_s18 }
   0xc   : > { %p65_p5 = scmp.eq.s32.totalorder %s63_s20, 0  ;;  %s174_s22 = sand.u32 1, %s14564_s14  }
   0xd   : > { %s14203_s23 = sshll.u32 %s14572_s16, 9  ;;  %s14206_s25 = smul.u32 12800, %s174_s22 }
   0xe   : > { %s14658_s24 = scalar_select %p65_p5, %s14564_s14, %s67_s19  }
   0xf   : > { %s185_s28 = scalar_lea.hbm %s16851_s1, %s14203_s23  ;;  %p14665_p6 = pnand %p14234_p4, %p76_p3 }
  0x10   : > { %s176_s30 = scalar_lea.vmem [#allocation5], %s14206_s25  ;;  %s14669_s5 = scalar_lea.sflag [#allocation6], %s172_s21 }
  0x11   : > { %s186_s4 = sshll.u32 %s176_s30, 4  ;;  %p16855_p7 = pneg %p14665_p6  ;;  %s187_s4 = int_to_ptr.vmem [resolvable:$true] %s186_s4 }
  0x12   : > { %s14423_s6 = scalar_lea.vmem %s187_s4, 204800  ;;  %s14578_s7 = smov [#allocation5]  }
  0x13   : > { %p14424_p8 = scmp.ne.s32.totalorder %s187_s4, %s14423_s6  ;;  %s14428_s8 = sshll.u32 %s14578_s7, 4  ;;  %s14429_s8 = int_to_ptr.vmem [resolvable:$false] %s14428_s8 }
  0x14   : > { %s14430_s9 = scalar_lea.vmem %s14429_s8, 409600  ;;  %p14431_p11 = scmp.lt.s32.totalorder %s187_s4, %s14429_s8 }
  0x15   : > { %p14426_p9 = pnand %p14424_p8, %p16855_p7  ;;  %p14432_p12 = scmp.lt.s32.totalorder %s14430_s9, %s14423_s6 }
  0x17   : > { %p14427_p10 = pneg %p14426_p9  ;;  %p14433_p13 = por %p14432_p12, %p14431_p11 }
  0x19   : > { %p14434_p0 = pnand %p14433_p13, %p14427_p10 }
  0x1b   : > { %14437 = shalt.err (!%p14434_p0)
}
  0x1c   : > { %s14579_s10 = smov 2048   ;;  %s14580_s11 = smov 512  }
  0x1d   : > { %s14581_s19 = smov 32   ;;  %s14680_s20 = sadd.s32 4294967295, %s14576_s17  }
  0x1e   : > { %14225 = dma.hbm_to_vmem [thread:$0]  (!%p14665_p6), %s185_s28, 204800, %s187_s4, %s14669_s5, %s14579_s10, %s14580_s11, %s14581_s19  }
  0x1f   : > { %s12560_s21 = sadd.s32 4294967294, %s14576_s17   ;;  %p80_p2 = scmp.ne.s32.totalorder %s14560_s13, %s14556_s12 }
  0x20   : > { %p16854_p3 = scmp.eq.s32.totalorder %s14680_s20, 0  ;;  %p130_p4 = scmp.eq.s32.totalorder %s14680_s20, 3 }
  0x21   : > { %p136_p5 = scmp.eq.s32.totalorder %s12560_s21, 3  ;;  %p12561_p9 = scmp.ge.s32.totalorder %s14576_s17, 1 }
  0x22   : > { %p14689_p8 = por %p16854_p3, %p80_p2  ;;  %p14697_p10 = por %p130_p4, %p74_p1 }
  0x23   : > { %p14701_p11 = por %p136_p5, %p80_p2  ;;  %p143_p12 = scmp.lt.s32.totalorder %s14576_s17, 5 }
  0x24   : > { %s16859_s25 = scalar_select %p14697_p10, 1, 0 }
  0x25   : > { %s16860_s26 = scalar_select %p14701_p11, 1, 0 }
  0x26   : > { %p14706_p13 = pnand %p12561_p9, %p143_p12  ;;  %s14582_s28 = smov [#allocation2]  }
  0x27   : > { %s158_s30 = sshll.u32 %s14582_s28, 4  ;;  %s12566_s4 = sshll.u32 %s174_s22, 3  ;;  %s159_s30 = int_to_ptr.vmem [resolvable:$true] %s158_s30 }
  0x28   : > { %p14218_p0 = pneg %p14706_p13  ;;  %s14204_s6 = sshll.u32 %s14572_s16, 7 }
  0x29   : > { %s14724_s10 = scalar_lea.hbm %s16852_s2, %s14204_s6  ;;  %s200_s11 = scalar_lea.vmem [#allocation7], %s12566_s4 }
  0x2a   : > { %p14717_p1 = pnand %p14218_p0, %p16854_p3  ;;  %s208_s19 = sshll.u32 %s200_s11, 4  ;;  %s209_s19 = int_to_ptr.vmem [resolvable:$true] %s208_s19 }
  0x2b   : > { %s14449_s21 = scalar_lea.vmem %s159_s30, 3200  ;;  %p14457_p12 = scmp.lt.s32.totalorder %s159_s30, %s159_s30 }
  0x2c   : > { %p14440_p2 = pneg %p14717_p1  ;;  %p14450_p4 = scmp.ne.s32.totalorder %s159_s30, %s14449_s21 }
  0x2d   : > { %p14458_p0 = scmp.lt.s32.totalorder %s14449_s21, %s14449_s21 }
  0x2e   : > { %p14452_p5 = pnand %p14450_p4, %p14440_p2 }
  0x2f   : > { %p14459_p3 = por %p14458_p0, %p14457_p12 }
  0x30   : > { %p14453_p9 = pneg %p14452_p5 }
  0x32   : > { %p14460_p7 = pnand %p14459_p3, %p14453_p9 }
  0x34   : > { %14463 = shalt.err (!%p14460_p7)
}
  0x35   : > { %s14583_s22 = smov 1600   ;;  %s14584_s28 = smov 100  }
  0x36   : > { %14221 = dma.hbm_to_vmem [thread:$0]  (!%p14717_p1), %s16850_s0, 3200, %s159_s30, [#allocation3], %s14583_s22, %s14583_s22, %s14584_s28  }
  0x37   : > { %s14477_s8 = scalar_lea.vmem %s209_s19, 128  ;;  %p16863_p10 = pneg %p14665_p6 }
  0x38   : > { %p14478_p11 = scmp.ne.s32.totalorder %s209_s19, %s14477_s8  ;;  %s14585_s9 = smov [#allocation7]  }
  0x39   : > { %s14482_s11 = sshll.u32 %s14585_s9, 4  ;;  %s14483_s11 = int_to_ptr.vmem [resolvable:$false] %s14482_s11 }
  0x3a   : > { %p14480_p2 = pnand %p14478_p11, %p16863_p10  ;;  %s14484_s21 = scalar_lea.vmem %s14483_s11, 256 }
  0x3b   : > { %p14485_p7 = scmp.lt.s32.totalorder %s209_s19, %s14483_s11  ;;  %p14486_p3 = scmp.lt.s32.totalorder %s14484_s21, %s14477_s8 }
  0x3c   : > { %p14481_p4 = pneg %p14480_p2 }
  0x3d   : > { %p14487_p5 = por %p14486_p3, %p14485_p7 }
  0x3f   : > { %p14488_p9 = pnand %p14487_p5, %p14481_p4 }
  0x41   : > { %14491 = shalt.err (!%p14488_p9)
}
  0x42   : > { %14228 = dma.hbm_to_vmem [thread:$0]  (!%p14665_p6), %s14724_s10, 128, %s209_s19, %s14669_s5  }
  0x43   : > { %217 = sbr.rel (%p14706_p13) target bundleno = 1912 (0x778), region = 32  ;;  %p16864_p10 = scmp.eq.s32.totalorder (!%p14706_p13), %s14680_s20, 0 }
  0x48   : > { %14543 = dma.done.wait (%p16864_p10), [#allocation3], 3200   ;;  %p16865_p11 = pmov %p16864_p10 }
  0x49   : > { %s223_s30 = sand.u32 1, %s14680_s20   ;;  %s14748_s7 = sand.u32 1, %s14560_s13  }
  0x4a   : > { %14545 = vsyncadd (%p16865_p11), [#allocation3], 4294964096  ;;  %s14207_s29 = smul.u32 12800, %s14748_s7  ;;  %s224_s22 = scalar_lea.sflag [#allocation6], %s223_s30 }
  0x4c   : > { %s14751_s28 = scalar_lea.vmem [#allocation5], %s14207_s29 }
  0x4d   : > { %14547 = dma.done.wait (%p14689_p8), %s224_s22, 204928  }
  0x4e   : > { %14549 = vsyncadd (%p14689_p8), %s224_s22, 4294762368  ;;  %v438_v0 = vld [vmem:[%s14751_s28 + $0x1c0] sm:$0xff]  ;;  %s12571_s5 = sshll.u32 %s14748_s7, 3  ;;  %s12572_s23 = sshll.u32 %s14748_s7, 7 }
  0x4f   : > { %v442_v1 = vld [vmem:[%s14751_s28 + $0x1e0] sm:$0xff]  ;;  %s15487_s20 = scalar_lea.vmem [#allocation7], %s12571_s5  ;;  %s15506_s27 = scalar_lea.vmem [#allocation8], %s12572_s23 }
  0x50   : > { %v566_v2 = vld [vmem:[%s14751_s28 + $0x5c0] sm:$0xff]  ;;  %v12655_v3 = vcombine.high %v438_v0, %v442_v1  ;;  %v12654_v5 = vcombine.low %v438_v0, %v442_v1  ;;  %s14205_s10 = sshll.u32 %s14568_s15, 10  ;;  %s12441_s19 = sshll.u32 %s15506_s27, 4  ;;  %s16801_s19 = int_to_ptr.vmem [resolvable:$true] %s12441_s19 }
  0x51   : > { %v570_v4 = vld [vmem:[%s14751_s28 + $0x5e0] sm:$0xff]  ;;  %s16799_s8 = scalar_lea.hbm %s16853_s3, %s14205_s10  ;;  %s12428_s15 = scalar_lea.sflag [#allocation4], %s14748_s7 }
  0x52   : > { %v430_v6 = vld [vmem:[%s14751_s28 + $0x180] sm:$0xff]  ;;  %v12783_v8 = vcombine.high %v566_v2, %v570_v4  ;;  %v12782_v9 = vcombine.low %v566_v2, %v570_v4  ;;  %10108 = vmatprep.subr.bf16.mxu0 %v12655_v3  ;;  %s14492_s9 = scalar_lea.vmem %s16801_s19, 2048  ;;  %p16866_p8 = scmp.ne.s32.totalorder %s16859_s25, 0 }
  0x53   : > { %v434_v7 = vld [vmem:[%s14751_s28 + $0x1a0] sm:$0xff]  ;;  %10109 = vmatpush1.bf16.msra.mxu0 %v12654_v5  ;;  %p14493_p6 = scmp.ne.s32.totalorder %s16801_s19, %s14492_s9  ;;  %s14587_s11 = smov [#allocation8]  }
  0x54   : > { %v12647_v10 = vcombine.high %v430_v6, %v434_v7  ;;  %v558_v11 = vld [vmem:[%s14751_s28 + $0x580] sm:$0xff]  ;;  %10151 = vmatprep.subr.bf16.mxu1 %v12783_v8  ;;  %v12646_v18 = vcombine.low %v430_v6, %v434_v7  ;;  %s14496_s21 = sshll.u32 %s14587_s11, 4  ;;  %s14497_s21 = int_to_ptr.vmem [resolvable:$false] %s14496_s21 }
  0x55   : > { %v562_v12 = vld [vmem:[%s14751_s28 + $0x5a0] sm:$0xff]  ;;  %10152 = vmatpush1.bf16.msra.mxu1 %v12782_v9  ;;  %p14494_p13 = pnand %p14493_p6, %p16866_p8  ;;  %s14498_s30 = scalar_lea.vmem %s14497_s21, 4096 }
  0x56   : > { %v422_v13 = vld [vmem:[%s14751_s28 + $0x140] sm:$0xff]  ;;  %v12775_v14 = vcombine.high %v558_v11, %v562_v12  ;;  %10110 = vmatprep.subr.bf16.mxu0 %v12647_v10  ;;  %v12774_v19 = vcombine.low %v558_v11, %v562_v12  ;;  %p14499_p12 = scmp.lt.s32.totalorder %s16801_s19, %s14497_s21  ;;  %p14500_p0 = scmp.lt.s32.totalorder %s14498_s30, %s14492_s9 }
  0x57   : > { %v426_v15 = vld [vmem:[%s14751_s28 + $0x160] sm:$0xff]  ;;  %10111 = vmatpush1.bf16.msra.mxu0 %v12646_v18  ;;  %p14495_p1 = pneg %p14494_p13 }
  0x58   : > { %v550_v16 = vld [vmem:[%s14751_s28 + $0x540] sm:$0xff]  ;;  %v12639_v20 = vcombine.high %v422_v13, %v426_v15  ;;  %10153 = vmatprep.subr.bf16.mxu1 %v12775_v14  ;;  %v12638_v26 = vcombine.low %v422_v13, %v426_v15  ;;  %p14501_p2 = por %p14500_p0, %p14499_p12 }
  0x59   : > { %v554_v17 = vld [vmem:[%s14751_s28 + $0x560] sm:$0xff]  ;;  %10154 = vmatpush1.bf16.msra.mxu1 %v12774_v19 }
  0x5a   : > { %v12767_v21 = vcombine.high %v550_v16, %v554_v17  ;;  %v414_v22 = vld [vmem:[%s14751_s28 + $0x100] sm:$0xff]  ;;  %10112 = vmatprep.subr.bf16.mxu0 %v12639_v20  ;;  %v12766_v27 = vcombine.low %v550_v16, %v554_v17  ;;  %p14502_p4 = pnand %p14501_p2, %p14495_p1 }
  0x5b   : > { %v418_v23 = vld [vmem:[%s14751_s28 + $0x120] sm:$0xff]  ;;  %10113 = vmatpush1.bf16.msra.mxu0 %v12638_v26 }
  0x5c   : > { %v542_v24 = vld [vmem:[%s14751_s28 + $0x500] sm:$0xff]  ;;  %v12631_v28 = vcombine.high %v414_v22, %v418_v23  ;;  %10155 = vmatprep.subr.bf16.mxu1 %v12767_v21  ;;  %v12630_v34 = vcombine.low %v414_v22, %v418_v23 }
  0x5d   : > { %v546_v25 = vld [vmem:[%s14751_s28 + $0x520] sm:$0xff]  ;;  %10156 = vmatpush1.bf16.msra.mxu1 %v12766_v27 }
  0x5e   : > { %v12759_v29 = vcombine.high %v542_v24, %v546_v25  ;;  %v406_v30 = vld [vmem:[%s14751_s28 + $0xc0] sm:$0xff]  ;;  %10114 = vmatprep.subr.bf16.mxu0 %v12631_v28  ;;  %v12758_v35 = vcombine.low %v542_v24, %v546_v25 }
  0x5f   : > { %v410_v31 = vld [vmem:[%s14751_s28 + $0xe0] sm:$0xff]  ;;  %10115 = vmatpush1.bf16.msra.mxu0 %v12630_v34 }
  0x60   : > { %v534_v32 = vld [vmem:[%s14751_s28 + $0x4c0] sm:$0xff]  ;;  %v12623_v36 = vcombine.high %v406_v30, %v410_v31  ;;  %10157 = vmatprep.subr.bf16.mxu1 %v12759_v29  ;;  %v12622_v42 = vcombine.low %v406_v30, %v410_v31 }
  0x61   : > { %v538_v33 = vld [vmem:[%s14751_s28 + $0x4e0] sm:$0xff]  ;;  %10158 = vmatpush1.bf16.msra.mxu1 %v12758_v35 }
  0x62   : > { %v12751_v37 = vcombine.high %v534_v32, %v538_v33  ;;  %v398_v38 = vld [vmem:[%s14751_s28 + $0x80] sm:$0xff]  ;;  %10116 = vmatprep.subr.bf16.mxu0 %v12623_v36  ;;  %v12750_v43 = vcombine.low %v534_v32, %v538_v33 }
  0x63   : > { %v402_v39 = vld [vmem:[%s14751_s28 + $0xa0] sm:$0xff]  ;;  %10117 = vmatpush1.bf16.msra.mxu0 %v12622_v42 }
  0x64   : > { %v526_v40 = vld [vmem:[%s14751_s28 + $0x480] sm:$0xff]  ;;  %v12615_v44 = vcombine.high %v398_v38, %v402_v39  ;;  %10159 = vmatprep.subr.bf16.mxu1 %v12751_v37  ;;  %v12614_v50 = vcombine.low %v398_v38, %v402_v39 }
  0x65   : > { %v530_v41 = vld [vmem:[%s14751_s28 + $0x4a0] sm:$0xff]  ;;  %10160 = vmatpush1.bf16.msra.mxu1 %v12750_v43 }
  0x66   : > { %v12743_v45 = vcombine.high %v526_v40, %v530_v41  ;;  %v390_v46 = vld [vmem:[%s14751_s28 + $0x40] sm:$0xff]  ;;  %10118 = vmatprep.subr.bf16.mxu0 %v12615_v44  ;;  %v12742_v52 = vcombine.low %v526_v40, %v530_v41 }
  0x67   : > { %v394_v47 = vld [vmem:[%s14751_s28 + $0x60] sm:$0xff]  ;;  %10119 = vmatpush1.bf16.msra.mxu0 %v12614_v50 }
  0x68   : > { %v518_v48 = vld [vmem:[%s14751_s28 + $0x440] sm:$0xff]  ;;  %v12607_v53 = vcombine.high %v390_v46, %v394_v47  ;;  %10161 = vmatprep.subr.bf16.mxu1 %v12743_v45  ;;  %v12606_v60 = vcombine.low %v390_v46, %v394_v47 }
  0x69   : > { %v522_v49 = vld [vmem:[%s14751_s28 + $0x460] sm:$0xff]  ;;  %10162 = vmatpush1.bf16.msra.mxu1 %v12742_v52 }
  0x6a   : > { %v382_v51 = vld [vmem:[%s14751_s28] sm:$0xff]  ;;  %v12735_v55 = vcombine.high %v518_v48, %v522_v49  ;;  %10120 = vmatprep.subr.bf16.mxu0 %v12607_v53  ;;  %v12734_v61 = vcombine.low %v518_v48, %v522_v49 }
  0x6b   : > { %v386_v54 = vld [vmem:[%s14751_s28 + $0x20] sm:$0xff]  ;;  %10121 = vmatpush1.bf16.msra.mxu0 %v12606_v60 }
  0x6c   : > { %v14295_v56 = vld [vmem:[#allocation2 + $0x4] ss:$100 sps:$4 sm:$0xff]   ;;  %v14297_v59 = vld [vmem:[#allocation2 + $0xc] ss:$100 sps:$4 sm:$0xff]   ;;  %v12599_v62 = vcombine.high %v382_v51, %v386_v54  ;;  %10163 = vmatprep.subr.bf16.mxu1 %v12735_v55  ;;  %v12598_v4 = vcombine.low %v382_v51, %v386_v54 }
  0x6d   : > { %v510_v57 = vld [vmem:[%s14751_s28 + $0x400] sm:$0xff]  ;;  %10140 = vmatprep.mubr.bf16.mxu0 %v14295_v56  ;;  %10183 = vmatprep.mubr.bf16.mxu1 %v14297_v59 }
  0x6e   : > { %v514_v58 = vld [vmem:[%s14751_s28 + $0x420] sm:$0xff]  ;;  %10164 = vmatpush1.bf16.msra.mxu1 %v12734_v61  ;;  %10122 = vmatprep.subr.bf16.mxu0 %v12599_v62 }
  0x6f   : > { %v12727_v63 = vcombine.high %v510_v57, %v514_v58  ;;  %v502_v0 = vld [vmem:[%s14751_s28 + $0x3c0] sm:$0xff]  ;;  %v12726_v5 = vcombine.low %v510_v57, %v514_v58  ;;  %10123 = vmatpush1.bf16.msra.mxu0 %v12598_v4 }
  0x70   : > { %v506_v1 = vld [vmem:[%s14751_s28 + $0x3e0] sm:$0xff] }
  0x71   : > { %v630_v2 = vld [vmem:[%s14751_s28 + $0x7c0] sm:$0xff]  ;;  %v12719_v6 = vcombine.high %v502_v0, %v506_v1  ;;  %10165 = vmatprep.subr.bf16.mxu1 %v12727_v63  ;;  %v12718_v12 = vcombine.low %v502_v0, %v506_v1 }
  0x72   : > { %v634_v3 = vld [vmem:[%s14751_s28 + $0x7e0] sm:$0xff]  ;;  %10166 = vmatpush1.bf16.msra.mxu1 %v12726_v5 }
  0x73   : > { %v12847_v7 = vcombine.high %v630_v2, %v634_v3  ;;  %v494_v8 = vld [vmem:[%s14751_s28 + $0x380] sm:$0xff]  ;;  %10124 = vmatprep.subr.bf16.mxu0 %v12719_v6  ;;  %v12846_v13 = vcombine.low %v630_v2, %v634_v3 }
  0x74   : > { %v498_v9 = vld [vmem:[%s14751_s28 + $0x3a0] sm:$0xff]  ;;  %10125 = vmatpush2.bf16.msra.mxu0 %v12718_v12 }
  0x75   : > { %v622_v10 = vld [vmem:[%s14751_s28 + $0x780] sm:$0xff]  ;;  %v12711_v14 = vcombine.high %v494_v8, %v498_v9  ;;  %10167 = vmatprep.subr.bf16.mxu1 %v12847_v7  ;;  %v12710_v20 = vcombine.low %v494_v8, %v498_v9 }
  0x76   : > { %v626_v11 = vld [vmem:[%s14751_s28 + $0x7a0] sm:$0xff]  ;;  %10168 = vmatpush2.bf16.msra.mxu1 %v12846_v13 }
  0x77   : > { %v12839_v15 = vcombine.high %v622_v10, %v626_v11  ;;  %v486_v16 = vld [vmem:[%s14751_s28 + $0x340] sm:$0xff]  ;;  %10126 = vmatprep.subr.bf16.mxu0 %v12711_v14  ;;  %v12838_v21 = vcombine.low %v622_v10, %v626_v11  ;;  %v14299_v10 = vld [vmem:[#allocation2] ss:$100 sps:$4 sm:$0xff]  }
  0x78   : > { %v490_v17 = vld [vmem:[%s14751_s28 + $0x360] sm:$0xff]  ;;  %10127 = vmatpush2.bf16.msra.mxu0 %v12710_v20  ;;  %v14301_v20 = vld [vmem:[#allocation2 + $0x14] ss:$100 sps:$4 sm:$0xff]  }
  0x79   : > { %v614_v18 = vld [vmem:[%s14751_s28 + $0x740] sm:$0xff]  ;;  %v12703_v22 = vcombine.high %v486_v16, %v490_v17  ;;  %10169 = vmatprep.subr.bf16.mxu1 %v12839_v15  ;;  %v12702_v28 = vcombine.low %v486_v16, %v490_v17 }
  0x7a   : > { %v618_v19 = vld [vmem:[%s14751_s28 + $0x760] sm:$0xff]  ;;  %10170 = vmatpush2.bf16.msra.mxu1 %v12838_v21 }
  0x7b   : > { %v12831_v23 = vcombine.high %v614_v18, %v618_v19  ;;  %v478_v24 = vld [vmem:[%s14751_s28 + $0x300] sm:$0xff]  ;;  %10128 = vmatprep.subr.bf16.mxu0 %v12703_v22  ;;  %v12830_v29 = vcombine.low %v614_v18, %v618_v19 }
  0x7c   : > { %v482_v25 = vld [vmem:[%s14751_s28 + $0x320] sm:$0xff]  ;;  %10129 = vmatpush2.bf16.msra.mxu0 %v12702_v28 }
  0x7d   : > { %v606_v26 = vld [vmem:[%s14751_s28 + $0x700] sm:$0xff]  ;;  %v12695_v30 = vcombine.high %v478_v24, %v482_v25  ;;  %10171 = vmatprep.subr.bf16.mxu1 %v12831_v23  ;;  %v12694_v36 = vcombine.low %v478_v24, %v482_v25  ;;  %v14303_v23 = vld [vmem:[#allocation2 + $0x1c] ss:$100 sps:$4 sm:$0xff]  }
  0x7e   : > { %v610_v27 = vld [vmem:[%s14751_s28 + $0x720] sm:$0xff]  ;;  %10172 = vmatpush2.bf16.msra.mxu1 %v12830_v29 }
  0x7f   : > { %v12823_v31 = vcombine.high %v606_v26, %v610_v27  ;;  %v470_v32 = vld [vmem:[%s14751_s28 + $0x2c0] sm:$0xff]  ;;  %10130 = vmatprep.subr.bf16.mxu0 %v12695_v30  ;;  %v12822_v37 = vcombine.low %v606_v26, %v610_v27 }
  0x80   : > { %v474_v33 = vld [vmem:[%s14751_s28 + $0x2e0] sm:$0xff]  ;;  %10131 = vmatpush2.bf16.msra.mxu0 %v12694_v36 }
  0x81   : > { %v598_v34 = vld [vmem:[%s14751_s28 + $0x6c0] sm:$0xff]  ;;  %v12687_v38 = vcombine.high %v470_v32, %v474_v33  ;;  %10173 = vmatprep.subr.bf16.mxu1 %v12823_v31  ;;  %v12686_v44 = vcombine.low %v470_v32, %v474_v33 }
  0x82   : > { %v602_v35 = vld [vmem:[%s14751_s28 + $0x6e0] sm:$0xff]  ;;  %10174 = vmatpush2.bf16.msra.mxu1 %v12822_v37 }
  0x83   : > { %v462_v39 = vld [vmem:[%s14751_s28 + $0x280] sm:$0xff]  ;;  %v12815_v40 = vcombine.high %v598_v34, %v602_v35  ;;  %10132 = vmatprep.subr.bf16.mxu0 %v12687_v38  ;;  %v12814_v45 = vcombine.low %v598_v34, %v602_v35 }
  0x84   : > { %v466_v41 = vld [vmem:[%s14751_s28 + $0x2a0] sm:$0xff]  ;;  %10133 = vmatpush2.bf16.msra.mxu0 %v12686_v44 }
  0x85   : > { %v590_v42 = vld [vmem:[%s14751_s28 + $0x680] sm:$0xff]  ;;  %v12679_v46 = vcombine.high %v462_v39, %v466_v41  ;;  %10175 = vmatprep.subr.bf16.mxu1 %v12815_v40  ;;  %v12678_v52 = vcombine.low %v462_v39, %v466_v41 }
  0x86   : > { %v594_v43 = vld [vmem:[%s14751_s28 + $0x6a0] sm:$0xff]  ;;  %10176 = vmatpush2.bf16.msra.mxu1 %v12814_v45 }
  0x87   : > { %v12807_v47 = vcombine.high %v590_v42, %v594_v43  ;;  %v454_v48 = vld [vmem:[%s14751_s28 + $0x240] sm:$0xff]  ;;  %10134 = vmatprep.subr.bf16.mxu0 %v12679_v46  ;;  %v12806_v53 = vcombine.low %v590_v42, %v594_v43 }
  0x88   : > { %v458_v49 = vld [vmem:[%s14751_s28 + $0x260] sm:$0xff]  ;;  %10135 = vmatpush2.bf16.msra.mxu0 %v12678_v52 }
  0x89   : > { %v582_v50 = vld [vmem:[%s14751_s28 + $0x640] sm:$0xff]  ;;  %v12671_v54 = vcombine.high %v454_v48, %v458_v49  ;;  %10177 = vmatprep.subr.bf16.mxu1 %v12807_v47  ;;  %v12670_v60 = vcombine.low %v454_v48, %v458_v49 }
  0x8a   : > { %v586_v51 = vld [vmem:[%s14751_s28 + $0x660] sm:$0xff]  ;;  %10178 = vmatpush2.bf16.msra.mxu1 %v12806_v53 }
  0x8b   : > { %v12799_v55 = vcombine.high %v582_v50, %v586_v51  ;;  %v446_v56 = vld [vmem:[%s14751_s28 + $0x200] sm:$0xff]  ;;  %10136 = vmatprep.subr.bf16.mxu0 %v12671_v54  ;;  %v12798_v61 = vcombine.low %v582_v50, %v586_v51 }
  0x8c   : > { %v450_v57 = vld [vmem:[%s14751_s28 + $0x220] sm:$0xff]  ;;  %10137 = vmatpush2.bf16.msra.mxu0 %v12670_v60 }
  0x8d   : > { %v574_v58 = vld [vmem:[%s14751_s28 + $0x600] sm:$0xff]  ;;  %v12663_v62 = vcombine.high %v446_v56, %v450_v57  ;;  %10179 = vmatprep.subr.bf16.mxu1 %v12799_v55  ;;  %v12662_v4 = vcombine.low %v446_v56, %v450_v57 }
  0x8e   : > { %v578_v59 = vld [vmem:[%s14751_s28 + $0x620] sm:$0xff]  ;;  %10180 = vmatpush2.bf16.msra.mxu1 %v12798_v61 }
  0x8f   : > { %v12791_v63 = vcombine.high %v574_v58, %v578_v59  ;;  %v694_v0 = vld [vmem:[%s14751_s28 + $0x9c0] sm:$0xff]  ;;  %10138 = vmatprep.subr.bf16.mxu0 %v12663_v62  ;;  %v12790_v5 = vcombine.low %v574_v58, %v578_v59 }
  0x90   : > { %v698_v1 = vld [vmem:[%s14751_s28 + $0x9e0] sm:$0xff]  ;;  %10139 = vmatpush2.bf16.msra.mxu0 %v12662_v4 }
  0x91   : > { %v822_v2 = vld [vmem:[%s14751_s28 + $0xdc0] sm:$0xff]  ;;  %v12911_v6 = vcombine.high %v694_v0, %v698_v1  ;;  %10181 = vmatprep.subr.bf16.mxu1 %v12791_v63  ;;  %v12910_v14 = vcombine.low %v694_v0, %v698_v1 }
  0x92   : > { %v826_v3 = vld [vmem:[%s14751_s28 + $0xde0] sm:$0xff]  ;;  %10182 = vmatpush2.bf16.msra.mxu1 %v12790_v5 }
  0x93   : > { %v13039_v7 = vcombine.high %v822_v2, %v826_v3  ;;  %v686_v8 = vld [vmem:[%s14751_s28 + $0x980] sm:$0xff]  ;;  %10194 = vmatprep.subr.bf16.mxu0 %v12911_v6  ;;  %v13038_v15 = vcombine.low %v822_v2, %v826_v3  ;;  %10141 = vmatmul.mubr.bf16.vlgmr.msra.gmra.mxu0 %v14299_v10 }
  0x94   : > { %v690_v9 = vld [vmem:[%s14751_s28 + $0x9a0] sm:$0xff]  ;;  %10195 = vmatpush1.bf16.msra.mxu0 %v12910_v14  ;;  %10226 = vmatprep.mubr.bf16.mxu0 %v14301_v20 }
  0x95   : > { %v814_v11 = vld [vmem:[%s14751_s28 + $0xd80] sm:$0xff]  ;;  %v12903_v16 = vcombine.high %v686_v8, %v690_v9  ;;  %10237 = vmatprep.subr.bf16.mxu1 %v13039_v7  ;;  %v12902_v24 = vcombine.low %v686_v8, %v690_v9 }
  0x96   : > { %v818_v12 = vld [vmem:[%s14751_s28 + $0xda0] sm:$0xff] }
  0x97   : > { %v14300_v13 = vld [vmem:[#allocation2 + $0x8] ss:$100 sps:$4 sm:$0xff]   ;;  %v13031_v17 = vcombine.high %v814_v11, %v818_v12  ;;  %10196 = vmatprep.subr.bf16.mxu0 %v12903_v16  ;;  %v13030_v25 = vcombine.low %v814_v11, %v818_v12 }
  0x98   : > { %v678_v18 = vld [vmem:[%s14751_s28 + $0x940] sm:$0xff]  ;;  %10184 = vmatmul.mubr.bf16.vlgmr.msra.gmra.mxu1 %v14300_v13  ;;  %10197 = vmatpush1.bf16.msra.mxu0 %v12902_v24 }
  0x99   : > { %v682_v19 = vld [vmem:[%s14751_s28 + $0x960] sm:$0xff]  ;;  %10238 = vmatpush1.bf16.msra.mxu1 %v13038_v15  ;;  %10269 = vmatprep.mubr.bf16.mxu1 %v14303_v23 }
  0x9a   : > { %v806_v21 = vld [vmem:[%s14751_s28 + $0xd40] sm:$0xff]  ;;  %v12895_v26 = vcombine.high %v678_v18, %v682_v19  ;;  %10239 = vmatprep.subr.bf16.mxu1 %v13031_v17  ;;  %v12894_v32 = vcombine.low %v678_v18, %v682_v19 }
  0x9b   : > { %v810_v22 = vld [vmem:[%s14751_s28 + $0xd60] sm:$0xff] }
  0x9c   : > { %v670_v27 = vld [vmem:[%s14751_s28 + $0x900] sm:$0xff]  ;;  %v13023_v28 = vcombine.high %v806_v21, %v810_v22  ;;  %10198 = vmatprep.subr.bf16.mxu0 %v12895_v26  ;;  %v13022_v33 = vcombine.low %v806_v21, %v810_v22 }
  0x9d   : > { %v674_v29 = vld [vmem:[%s14751_s28 + $0x920] sm:$0xff]  ;;  %10240 = vmatpush1.bf16.msra.mxu1 %v13030_v25  ;;  %10199 = vmatpush1.bf16.msra.mxu0 %v12894_v32 }
  0x9e   : > { %v798_v30 = vld [vmem:[%s14751_s28 + $0xd00] sm:$0xff]  ;;  %v12887_v34 = vcombine.high %v670_v27, %v674_v29  ;;  %10241 = vmatprep.subr.bf16.mxu1 %v13023_v28  ;;  %v12886_v40 = vcombine.low %v670_v27, %v674_v29 }
  0x9f   : > { %v802_v31 = vld [vmem:[%s14751_s28 + $0xd20] sm:$0xff] }
  0xa0   : > { %v13015_v35 = vcombine.high %v798_v30, %v802_v31  ;;  %v662_v36 = vld [vmem:[%s14751_s28 + $0x8c0] sm:$0xff]  ;;  %10200 = vmatprep.subr.bf16.mxu0 %v12887_v34  ;;  %v13014_v41 = vcombine.low %v798_v30, %v802_v31 }
  0xa1   : > { %v666_v37 = vld [vmem:[%s14751_s28 + $0x8e0] sm:$0xff]  ;;  %10242 = vmatpush1.bf16.msra.mxu1 %v13022_v33  ;;  %10201 = vmatpush1.bf16.msra.mxu0 %v12886_v40 }
  0xa2   : > { %v790_v38 = vld [vmem:[%s14751_s28 + $0xcc0] sm:$0xff]  ;;  %v12879_v42 = vcombine.high %v662_v36, %v666_v37  ;;  %10243 = vmatprep.subr.bf16.mxu1 %v13015_v35  ;;  %v12878_v48 = vcombine.low %v662_v36, %v666_v37 }
  0xa3   : > { %v794_v39 = vld [vmem:[%s14751_s28 + $0xce0] sm:$0xff] }
  0xa4   : > { %v654_v43 = vld [vmem:[%s14751_s28 + $0x880] sm:$0xff]  ;;  %v13007_v46 = vcombine.high %v790_v38, %v794_v39  ;;  %10202 = vmatprep.subr.bf16.mxu0 %v12879_v42  ;;  %v13006_v49 = vcombine.low %v790_v38, %v794_v39 }
  0xa5   : > { %v658_v44 = vld [vmem:[%s14751_s28 + $0x8a0] sm:$0xff]  ;;  %10244 = vmatpush1.bf16.msra.mxu1 %v13014_v41  ;;  %10203 = vmatpush1.bf16.msra.mxu0 %v12878_v48 }
  0xa6   : > { %v782_v45 = vld [vmem:[%s14751_s28 + $0xc80] sm:$0xff]  ;;  %v12871_v50 = vcombine.high %v654_v43, %v658_v44  ;;  %10245 = vmatprep.subr.bf16.mxu1 %v13007_v46  ;;  %v12870_v56 = vcombine.low %v654_v43, %v658_v44 }
  0xa7   : > { %v786_v47 = vld [vmem:[%s14751_s28 + $0xca0] sm:$0xff] }
  0xa8   : > { %v646_v51 = vld [vmem:[%s14751_s28 + $0x840] sm:$0xff]  ;;  %v12999_v52 = vcombine.high %v782_v45, %v786_v47  ;;  %10204 = vmatprep.subr.bf16.mxu0 %v12871_v50  ;;  %v12998_v57 = vcombine.low %v782_v45, %v786_v47 }
  0xa9   : > { %v650_v53 = vld [vmem:[%s14751_s28 + $0x860] sm:$0xff]  ;;  %10246 = vmatpush1.bf16.msra.mxu1 %v13006_v49  ;;  %10205 = vmatpush1.bf16.msra.mxu0 %v12870_v56 }
  0xaa   : > { %v774_v54 = vld [vmem:[%s14751_s28 + $0xc40] sm:$0xff]  ;;  %v12863_v58 = vcombine.high %v646_v51, %v650_v53  ;;  %10247 = vmatprep.subr.bf16.mxu1 %v12999_v52  ;;  %v12862_v0 = vcombine.low %v646_v51, %v650_v53 }
  0xab   : > { %v778_v55 = vld [vmem:[%s14751_s28 + $0xc60] sm:$0xff] }
  0xac   : > { %v12991_v59 = vcombine.high %v774_v54, %v778_v55  ;;  %v638_v60 = vld [vmem:[%s14751_s28 + $0x800] sm:$0xff]  ;;  %10206 = vmatprep.subr.bf16.mxu0 %v12863_v58  ;;  %v12990_v1 = vcombine.low %v774_v54, %v778_v55 }
  0xad   : > { %v642_v61 = vld [vmem:[%s14751_s28 + $0x820] sm:$0xff]  ;;  %10248 = vmatpush1.bf16.msra.mxu1 %v12998_v57  ;;  %10207 = vmatpush1.bf16.msra.mxu0 %v12862_v0 }
  0xae   : > { %v766_v62 = vld [vmem:[%s14751_s28 + $0xc00] sm:$0xff]  ;;  %v12855_v2 = vcombine.high %v638_v60, %v642_v61  ;;  %10249 = vmatprep.subr.bf16.mxu1 %v12991_v59  ;;  %v12854_v8 = vcombine.low %v638_v60, %v642_v61 }
  0xaf   : > { %v770_v63 = vld [vmem:[%s14751_s28 + $0xc20] sm:$0xff] }
  0xb0   : > { %v12983_v3 = vcombine.high %v766_v62, %v770_v63  ;;  %v758_v4 = vld [vmem:[%s14751_s28 + $0xbc0] sm:$0xff]  ;;  %10208 = vmatprep.subr.bf16.mxu0 %v12855_v2  ;;  %v12982_v9 = vcombine.low %v766_v62, %v770_v63 }
  0xb1   : > { %v762_v5 = vld [vmem:[%s14751_s28 + $0xbe0] sm:$0xff]  ;;  %10250 = vmatpush1.bf16.msra.mxu1 %v12990_v1  ;;  %10209 = vmatpush1.bf16.msra.mxu0 %v12854_v8 }
  0xb2   : > { %v886_v6 = vld [vmem:[%s14751_s28 + $0xfc0] sm:$0xff]  ;;  %v12975_v10 = vcombine.high %v758_v4, %v762_v5  ;;  %10251 = vmatprep.subr.bf16.mxu1 %v12983_v3  ;;  %v12974_v16 = vcombine.low %v758_v4, %v762_v5 }
  0xb3   : > { %v890_v7 = vld [vmem:[%s14751_s28 + $0xfe0] sm:$0xff] }
  0xb4   : > { %v13103_v11 = vcombine.high %v886_v6, %v890_v7  ;;  %v750_v12 = vld [vmem:[%s14751_s28 + $0xb80] sm:$0xff]  ;;  %10210 = vmatprep.subr.bf16.mxu0 %v12975_v10  ;;  %v13102_v17 = vcombine.low %v886_v6, %v890_v7 }
  0xb5   : > { %v754_v13 = vld [vmem:[%s14751_s28 + $0xba0] sm:$0xff]  ;;  %10252 = vmatpush1.bf16.msra.mxu1 %v12982_v9  ;;  %10211 = vmatpush2.bf16.msra.mxu0 %v12974_v16 }
  0xb6   : > { %v878_v14 = vld [vmem:[%s14751_s28 + $0xf80] sm:$0xff]  ;;  %v12967_v18 = vcombine.high %v750_v12, %v754_v13  ;;  %10253 = vmatprep.subr.bf16.mxu1 %v13103_v11  ;;  %v12966_v24 = vcombine.low %v750_v12, %v754_v13 }
  0xb7   : > { %v882_v15 = vld [vmem:[%s14751_s28 + $0xfa0] sm:$0xff] }
  0xb8   : > { %v13095_v19 = vcombine.high %v878_v14, %v882_v15  ;;  %v742_v20 = vld [vmem:[%s14751_s28 + $0xb40] sm:$0xff]  ;;  %10212 = vmatprep.subr.bf16.mxu0 %v12967_v18  ;;  %v13094_v25 = vcombine.low %v878_v14, %v882_v15  ;;  %v14305_v14 = vld [vmem:[#allocation2 + $0x10] ss:$100 sps:$4 sm:$0xff]  }
  0xb9   : > { %v746_v21 = vld [vmem:[%s14751_s28 + $0xb60] sm:$0xff]  ;;  %10254 = vmatpush2.bf16.msra.mxu1 %v13102_v17  ;;  %10213 = vmatpush2.bf16.msra.mxu0 %v12966_v24  ;;  %v14306_v17 = vld [vmem:[#allocation2 + $0x18] ss:$100 sps:$4 sm:$0xff]  }
  0xba   : > { %v870_v22 = vld [vmem:[%s14751_s28 + $0xf40] sm:$0xff]  ;;  %v12959_v26 = vcombine.high %v742_v20, %v746_v21  ;;  %10255 = vmatprep.subr.bf16.mxu1 %v13095_v19  ;;  %v12958_v32 = vcombine.low %v742_v20, %v746_v21 }
  0xbb   : > { %v874_v23 = vld [vmem:[%s14751_s28 + $0xf60] sm:$0xff] }
  0xbc   : > { %v13087_v27 = vcombine.high %v870_v22, %v874_v23  ;;  %v734_v28 = vld [vmem:[%s14751_s28 + $0xb00] sm:$0xff]  ;;  %10214 = vmatprep.subr.bf16.mxu0 %v12959_v26  ;;  %v13086_v33 = vcombine.low %v870_v22, %v874_v23 }
  0xbd   : > { %v738_v29 = vld [vmem:[%s14751_s28 + $0xb20] sm:$0xff]  ;;  %10256 = vmatpush2.bf16.msra.mxu1 %v13094_v25  ;;  %10215 = vmatpush2.bf16.msra.mxu0 %v12958_v32 }
  0xbe   : > { %v862_v30 = vld [vmem:[%s14751_s28 + $0xf00] sm:$0xff]  ;;  %v12951_v34 = vcombine.high %v734_v28, %v738_v29  ;;  %10257 = vmatprep.subr.bf16.mxu1 %v13087_v27  ;;  %v12950_v40 = vcombine.low %v734_v28, %v738_v29 }
  0xbf   : > { %v866_v31 = vld [vmem:[%s14751_s28 + $0xf20] sm:$0xff] }
  0xc0   : > { %v13079_v35 = vcombine.high %v862_v30, %v866_v31  ;;  %v726_v36 = vld [vmem:[%s14751_s28 + $0xac0] sm:$0xff]  ;;  %10216 = vmatprep.subr.bf16.mxu0 %v12951_v34  ;;  %v13078_v41 = vcombine.low %v862_v30, %v866_v31 }
  0xc1   : > { %v730_v37 = vld [vmem:[%s14751_s28 + $0xae0] sm:$0xff]  ;;  %10258 = vmatpush2.bf16.msra.mxu1 %v13086_v33  ;;  %10217 = vmatpush2.bf16.msra.mxu0 %v12950_v40 }
  0xc2   : > { %v854_v38 = vld [vmem:[%s14751_s28 + $0xec0] sm:$0xff]  ;;  %v12943_v42 = vcombine.high %v726_v36, %v730_v37  ;;  %10259 = vmatprep.subr.bf16.mxu1 %v13079_v35  ;;  %v12942_v48 = vcombine.low %v726_v36, %v730_v37 }
  0xc3   : > { %v858_v39 = vld [vmem:[%s14751_s28 + $0xee0] sm:$0xff] }
  0xc4   : > { %v13071_v43 = vcombine.high %v854_v38, %v858_v39  ;;  %v718_v44 = vld [vmem:[%s14751_s28 + $0xa80] sm:$0xff]  ;;  %10218 = vmatprep.subr.bf16.mxu0 %v12943_v42  ;;  %v13070_v49 = vcombine.low %v854_v38, %v858_v39 }
  0xc5   : > { %v722_v45 = vld [vmem:[%s14751_s28 + $0xaa0] sm:$0xff]  ;;  %10260 = vmatpush2.bf16.msra.mxu1 %v13078_v41  ;;  %10219 = vmatpush2.bf16.msra.mxu0 %v12942_v48 }
  0xc6   : > { %v846_v46 = vld [vmem:[%s14751_s28 + $0xe80] sm:$0xff]  ;;  %v12935_v50 = vcombine.high %v718_v44, %v722_v45  ;;  %10261 = vmatprep.subr.bf16.mxu1 %v13071_v43  ;;  %v12934_v56 = vcombine.low %v718_v44, %v722_v45 }
  0xc7   : > { %v850_v47 = vld [vmem:[%s14751_s28 + $0xea0] sm:$0xff] }
  0xc8   : > { %v13063_v51 = vcombine.high %v846_v46, %v850_v47  ;;  %v710_v52 = vld [vmem:[%s14751_s28 + $0xa40] sm:$0xff]  ;;  %10220 = vmatprep.subr.bf16.mxu0 %v12935_v50  ;;  %v13062_v57 = vcombine.low %v846_v46, %v850_v47 }
  0xc9   : > { %v714_v53 = vld [vmem:[%s14751_s28 + $0xa60] sm:$0xff]  ;;  %10262 = vmatpush2.bf16.msra.mxu1 %v13070_v49  ;;  %10221 = vmatpush2.bf16.msra.mxu0 %v12934_v56 }
  0xca   : > { %v838_v54 = vld [vmem:[%s14751_s28 + $0xe40] sm:$0xff]  ;;  %v12927_v58 = vcombine.high %v710_v52, %v714_v53  ;;  %10263 = vmatprep.subr.bf16.mxu1 %v13063_v51  ;;  %v12926_v0 = vcombine.low %v710_v52, %v714_v53 }
  0xcb   : > { %v842_v55 = vld [vmem:[%s14751_s28 + $0xe60] sm:$0xff] }
  0xcc   : > { %v13055_v59 = vcombine.high %v838_v54, %v842_v55  ;;  %v702_v60 = vld [vmem:[%s14751_s28 + $0xa00] sm:$0xff]  ;;  %10222 = vmatprep.subr.bf16.mxu0 %v12927_v58  ;;  %v13054_v1 = vcombine.low %v838_v54, %v842_v55 }
  0xcd   : > { %v706_v61 = vld [vmem:[%s14751_s28 + $0xa20] sm:$0xff]  ;;  %10264 = vmatpush2.bf16.msra.mxu1 %v13062_v57  ;;  %10223 = vmatpush2.bf16.msra.mxu0 %v12926_v0 }
  0xce   : > { %v830_v62 = vld [vmem:[%s14751_s28 + $0xe00] sm:$0xff]  ;;  %v12919_v2 = vcombine.high %v702_v60, %v706_v61  ;;  %10265 = vmatprep.subr.bf16.mxu1 %v13055_v59  ;;  %v12918_v8 = vcombine.low %v702_v60, %v706_v61 }
  0xcf   : > { %v834_v63 = vld [vmem:[%s14751_s28 + $0xe20] sm:$0xff] }
  0xd0   : > { %v13047_v3 = vcombine.high %v830_v62, %v834_v63  ;;  %v950_v4 = vld [vmem:[%s14751_s28 + $0x11c0] sm:$0xff]  ;;  %10224 = vmatprep.subr.bf16.mxu0 %v12919_v2  ;;  %v13046_v9 = vcombine.low %v830_v62, %v834_v63 }
  0xd1   : > { %v954_v5 = vld [vmem:[%s14751_s28 + $0x11e0] sm:$0xff]  ;;  %10266 = vmatpush2.bf16.msra.mxu1 %v13054_v1  ;;  %10225 = vmatpush2.bf16.msra.mxu0 %v12918_v8 }
  0xd2   : > { %v1078_v6 = vld [vmem:[%s14751_s28 + $0x15c0] sm:$0xff]  ;;  %v13167_v10 = vcombine.high %v950_v4, %v954_v5  ;;  %10267 = vmatprep.subr.bf16.mxu1 %v13047_v3  ;;  %v13166_v18 = vcombine.low %v950_v4, %v954_v5 }
  0xd3   : > { %v1082_v7 = vld [vmem:[%s14751_s28 + $0x15e0] sm:$0xff] }
  0xd4   : > { %v13295_v11 = vcombine.high %v1078_v6, %v1082_v7  ;;  %v942_v12 = vld [vmem:[%s14751_s28 + $0x1180] sm:$0xff]  ;;  %10280 = vmatprep.subr.bf16.mxu0 %v13167_v10  ;;  %v13294_v19 = vcombine.low %v1078_v6, %v1082_v7  ;;  %10227 = vmatmul.mubr.bf16.vlgmr.msra.gmra.mxu0 %v14305_v14 }
  0xd5   : > { %v946_v13 = vld [vmem:[%s14751_s28 + $0x11a0] sm:$0xff]  ;;  %10268 = vmatpush2.bf16.msra.mxu1 %v13046_v9  ;;  %10281 = vmatpush1.bf16.msra.mxu0 %v13166_v18 }
  0xd6   : > { %v1070_v15 = vld [vmem:[%s14751_s28 + $0x1580] sm:$0xff]  ;;  %v13159_v20 = vcombine.high %v942_v12, %v946_v13  ;;  %10323 = vmatprep.subr.bf16.mxu1 %v13295_v11  ;;  %v13158_v28 = vcombine.low %v942_v12, %v946_v13 }
  0xd7   : > { %v1074_v16 = vld [vmem:[%s14751_s28 + $0x15a0] sm:$0xff] }
  0xd8   : > { %v13287_v21 = vcombine.high %v1070_v15, %v1074_v16  ;;  %v934_v22 = vld [vmem:[%s14751_s28 + $0x1140] sm:$0xff]  ;;  %10270 = vmatmul.mubr.bf16.vlgmr.msra.gmra.mxu1 %v14306_v17  ;;  %10282 = vmatprep.subr.bf16.mxu0 %v13159_v20  ;;  %v13286_v29 = vcombine.low %v1070_v15, %v1074_v16 }
  0xd9   : > { %v938_v23 = vld [vmem:[%s14751_s28 + $0x1160] sm:$0xff]  ;;  %10324 = vmatpush1.bf16.msra.mxu1 %v13294_v19  ;;  %10283 = vmatpush1.bf16.msra.mxu0 %v13158_v28 }
  0xda   : > { %v14307_v24 = vld [vmem:[#allocation2 + $0x24] ss:$100 sps:$4 sm:$0xff]   ;;  %v14309_v27 = vld [vmem:[#allocation2 + $0x2c] ss:$100 sps:$4 sm:$0xff]   ;;  %v13151_v30 = vcombine.high %v934_v22, %v938_v23  ;;  %10325 = vmatprep.subr.bf16.mxu1 %v13287_v21  ;;  %v13150_v36 = vcombine.low %v934_v22, %v938_v23 }
  0xdb   : > { %v1062_v25 = vld [vmem:[%s14751_s28 + $0x1540] sm:$0xff]  ;;  %10312 = vmatprep.mubr.bf16.mxu0 %v14307_v24  ;;  %10355 = vmatprep.mubr.bf16.mxu1 %v14309_v27 }
  0xdc   : > { %v1066_v26 = vld [vmem:[%s14751_s28 + $0x1560] sm:$0xff]  ;;  %10284 = vmatprep.subr.bf16.mxu0 %v13151_v30 }
  0xdd   : > { %v13279_v31 = vcombine.high %v1062_v25, %v1066_v26  ;;  %v926_v32 = vld [vmem:[%s14751_s28 + $0x1100] sm:$0xff]  ;;  %10326 = vmatpush1.bf16.msra.mxu1 %v13286_v29  ;;  %v13278_v37 = vcombine.low %v1062_v25, %v1066_v26  ;;  %10285 = vmatpush1.bf16.msra.mxu0 %v13150_v36 }
  0xde   : > { %v930_v33 = vld [vmem:[%s14751_s28 + $0x1120] sm:$0xff] }
  0xdf   : > { %v1054_v34 = vld [vmem:[%s14751_s28 + $0x1500] sm:$0xff]  ;;  %v13143_v38 = vcombine.high %v926_v32, %v930_v33  ;;  %10327 = vmatprep.subr.bf16.mxu1 %v13279_v31  ;;  %v13142_v44 = vcombine.low %v926_v32, %v930_v33 }
  0xe0   : > { %v1058_v35 = vld [vmem:[%s14751_s28 + $0x1520] sm:$0xff] }
  0xe1   : > { %v13271_v39 = vcombine.high %v1054_v34, %v1058_v35  ;;  %v918_v40 = vld [vmem:[%s14751_s28 + $0x10c0] sm:$0xff]  ;;  %10328 = vmatpush1.bf16.msra.mxu1 %v13278_v37  ;;  %10286 = vmatprep.subr.bf16.mxu0 %v13143_v38  ;;  %v13270_v45 = vcombine.low %v1054_v34, %v1058_v35 }
  0xe2   : > { %v922_v41 = vld [vmem:[%s14751_s28 + $0x10e0] sm:$0xff]  ;;  %10287 = vmatpush1.bf16.msra.mxu0 %v13142_v44 }
  0xe3   : > { %v1046_v42 = vld [vmem:[%s14751_s28 + $0x14c0] sm:$0xff]  ;;  %v13135_v46 = vcombine.high %v918_v40, %v922_v41  ;;  %10329 = vmatprep.subr.bf16.mxu1 %v13271_v39  ;;  %v13134_v52 = vcombine.low %v918_v40, %v922_v41 }
  0xe4   : > { %v1050_v43 = vld [vmem:[%s14751_s28 + $0x14e0] sm:$0xff] }
  0xe5   : > { %v13263_v47 = vcombine.high %v1046_v42, %v1050_v43  ;;  %v910_v48 = vld [vmem:[%s14751_s28 + $0x1080] sm:$0xff]  ;;  %10330 = vmatpush1.bf16.msra.mxu1 %v13270_v45  ;;  %10288 = vmatprep.subr.bf16.mxu0 %v13135_v46  ;;  %v13262_v53 = vcombine.low %v1046_v42, %v1050_v43 }
  0xe6   : > { %v914_v49 = vld [vmem:[%s14751_s28 + $0x10a0] sm:$0xff]  ;;  %10289 = vmatpush1.bf16.msra.mxu0 %v13134_v52 }
  0xe7   : > { %v1038_v50 = vld [vmem:[%s14751_s28 + $0x1480] sm:$0xff]  ;;  %v13127_v54 = vcombine.high %v910_v48, %v914_v49  ;;  %10331 = vmatprep.subr.bf16.mxu1 %v13263_v47  ;;  %v13126_v60 = vcombine.low %v910_v48, %v914_v49 }
  0xe8   : > { %v1042_v51 = vld [vmem:[%s14751_s28 + $0x14a0] sm:$0xff] }
  0xe9   : > { %v13255_v55 = vcombine.high %v1038_v50, %v1042_v51  ;;  %v902_v56 = vld [vmem:[%s14751_s28 + $0x1040] sm:$0xff]  ;;  %10332 = vmatpush1.bf16.msra.mxu1 %v13262_v53  ;;  %10290 = vmatprep.subr.bf16.mxu0 %v13127_v54  ;;  %v13254_v61 = vcombine.low %v1038_v50, %v1042_v51 }
  0xea   : > { %v906_v57 = vld [vmem:[%s14751_s28 + $0x1060] sm:$0xff]  ;;  %10291 = vmatpush1.bf16.msra.mxu0 %v13126_v60 }
  0xeb   : > { %v1030_v58 = vld [vmem:[%s14751_s28 + $0x1440] sm:$0xff]  ;;  %v13119_v62 = vcombine.high %v902_v56, %v906_v57  ;;  %10333 = vmatprep.subr.bf16.mxu1 %v13255_v55  ;;  %v13118_v4 = vcombine.low %v902_v56, %v906_v57 }
  0xec   : > { %v1034_v59 = vld [vmem:[%s14751_s28 + $0x1460] sm:$0xff] }
  0xed   : > { %v13247_v63 = vcombine.high %v1030_v58, %v1034_v59  ;;  %v894_v0 = vld [vmem:[%s14751_s28 + $0x1000] sm:$0xff]  ;;  %10334 = vmatpush1.bf16.msra.mxu1 %v13254_v61  ;;  %10292 = vmatprep.subr.bf16.mxu0 %v13119_v62  ;;  %v13246_v5 = vcombine.low %v1030_v58, %v1034_v59 }
  0xee   : > { %v898_v1 = vld [vmem:[%s14751_s28 + $0x1020] sm:$0xff]  ;;  %10293 = vmatpush1.bf16.msra.mxu0 %v13118_v4 }
  0xef   : > { %v1022_v2 = vld [vmem:[%s14751_s28 + $0x1400] sm:$0xff]  ;;  %v13111_v6 = vcombine.high %v894_v0, %v898_v1  ;;  %10335 = vmatprep.subr.bf16.mxu1 %v13247_v63  ;;  %v13110_v12 = vcombine.low %v894_v0, %v898_v1 }
  0xf0   : > { %v1026_v3 = vld [vmem:[%s14751_s28 + $0x1420] sm:$0xff] }
  0xf1   : > { %v13239_v7 = vcombine.high %v1022_v2, %v1026_v3  ;;  %v1014_v8 = vld [vmem:[%s14751_s28 + $0x13c0] sm:$0xff]  ;;  %10336 = vmatpush1.bf16.msra.mxu1 %v13246_v5  ;;  %10294 = vmatprep.subr.bf16.mxu0 %v13111_v6  ;;  %v13238_v13 = vcombine.low %v1022_v2, %v1026_v3 }
  0xf2   : > { %v1018_v9 = vld [vmem:[%s14751_s28 + $0x13e0] sm:$0xff]  ;;  %10295 = vmatpush1.bf16.msra.mxu0 %v13110_v12 }
  0xf3   : > { %v1142_v10 = vld [vmem:[%s14751_s28 + $0x17c0] sm:$0xff]  ;;  %v13231_v14 = vcombine.high %v1014_v8, %v1018_v9  ;;  %10337 = vmatprep.subr.bf16.mxu1 %v13239_v7  ;;  %v13230_v20 = vcombine.low %v1014_v8, %v1018_v9 }
  0xf4   : > { %v1146_v11 = vld [vmem:[%s14751_s28 + $0x17e0] sm:$0xff] }
  0xf5   : > { %v13359_v15 = vcombine.high %v1142_v10, %v1146_v11  ;;  %v1006_v16 = vld [vmem:[%s14751_s28 + $0x1380] sm:$0xff]  ;;  %10338 = vmatpush1.bf16.msra.mxu1 %v13238_v13  ;;  %10296 = vmatprep.subr.bf16.mxu0 %v13231_v14  ;;  %v13358_v21 = vcombine.low %v1142_v10, %v1146_v11 }
  0xf6   : > { %v1010_v17 = vld [vmem:[%s14751_s28 + $0x13a0] sm:$0xff]  ;;  %10297 = vmatpush2.bf16.msra.mxu0 %v13230_v20 }
  0xf7   : > { %v1134_v18 = vld [vmem:[%s14751_s28 + $0x1780] sm:$0xff]  ;;  %v13223_v22 = vcombine.high %v1006_v16, %v1010_v17  ;;  %10339 = vmatprep.subr.bf16.mxu1 %v13359_v15  ;;  %v13222_v28 = vcombine.low %v1006_v16, %v1010_v17 }
  0xf8   : > { %v1138_v19 = vld [vmem:[%s14751_s28 + $0x17a0] sm:$0xff] }
  0xf9   : > { %v13351_v23 = vcombine.high %v1134_v18, %v1138_v19  ;;  %v998_v24 = vld [vmem:[%s14751_s28 + $0x1340] sm:$0xff]  ;;  %10340 = vmatpush2.bf16.msra.mxu1 %v13358_v21  ;;  %10298 = vmatprep.subr.bf16.mxu0 %v13223_v22  ;;  %v13350_v29 = vcombine.low %v1134_v18, %v1138_v19  ;;  %v14311_v18 = vld [vmem:[#allocation2 + $0x20] ss:$100 sps:$4 sm:$0xff]  }
  0xfa   : > { %v1002_v25 = vld [vmem:[%s14751_s28 + $0x1360] sm:$0xff]  ;;  %10299 = vmatpush2.bf16.msra.mxu0 %v13222_v28  ;;  %v14313_v28 = vld [vmem:[#allocation2 + $0x34] ss:$100 sps:$4 sm:$0xff]  }
  0xfb   : > { %v1126_v26 = vld [vmem:[%s14751_s28 + $0x1740] sm:$0xff]  ;;  %v13215_v30 = vcombine.high %v998_v24, %v1002_v25  ;;  %10341 = vmatprep.subr.bf16.mxu1 %v13351_v23  ;;  %v13214_v36 = vcombine.low %v998_v24, %v1002_v25 }
  0xfc   : > { %v1130_v27 = vld [vmem:[%s14751_s28 + $0x1760] sm:$0xff] }
  0xfd   : > { %v13343_v31 = vcombine.high %v1126_v26, %v1130_v27  ;;  %v990_v32 = vld [vmem:[%s14751_s28 + $0x1300] sm:$0xff]  ;;  %10342 = vmatpush2.bf16.msra.mxu1 %v13350_v29  ;;  %10300 = vmatprep.subr.bf16.mxu0 %v13215_v30  ;;  %v13342_v37 = vcombine.low %v1126_v26, %v1130_v27 }
  0xfe   : > { %v994_v33 = vld [vmem:[%s14751_s28 + $0x1320] sm:$0xff]  ;;  %10301 = vmatpush2.bf16.msra.mxu0 %v13214_v36 }
  0xff   : > { %v1118_v34 = vld [vmem:[%s14751_s28 + $0x1700] sm:$0xff]  ;;  %v13207_v38 = vcombine.high %v990_v32, %v994_v33  ;;  %10343 = vmatprep.subr.bf16.mxu1 %v13343_v31  ;;  %v13206_v44 = vcombine.low %v990_v32, %v994_v33  ;;  %v14315_v31 = vld [vmem:[#allocation2 + $0x3c] ss:$100 sps:$4 sm:$0xff]  }
 0x100   : > { %v1122_v35 = vld [vmem:[%s14751_s28 + $0x1720] sm:$0xff] }
 0x101   : > { %v13335_v39 = vcombine.high %v1118_v34, %v1122_v35  ;;  %v982_v40 = vld [vmem:[%s14751_s28 + $0x12c0] sm:$0xff]  ;;  %10344 = vmatpush2.bf16.msra.mxu1 %v13342_v37  ;;  %10302 = vmatprep.subr.bf16.mxu0 %v13207_v38  ;;  %v13334_v45 = vcombine.low %v1118_v34, %v1122_v35 }
 0x102   : > { %v986_v41 = vld [vmem:[%s14751_s28 + $0x12e0] sm:$0xff]  ;;  %10303 = vmatpush2.bf16.msra.mxu0 %v13206_v44 }
 0x103   : > { %v1110_v42 = vld [vmem:[%s14751_s28 + $0x16c0] sm:$0xff]  ;;  %v13199_v46 = vcombine.high %v982_v40, %v986_v41  ;;  %10345 = vmatprep.subr.bf16.mxu1 %v13335_v39  ;;  %v13198_v52 = vcombine.low %v982_v40, %v986_v41 }
 0x104   : > { %v1114_v43 = vld [vmem:[%s14751_s28 + $0x16e0] sm:$0xff] }
 0x105   : > { %v13327_v47 = vcombine.high %v1110_v42, %v1114_v43  ;;  %v974_v48 = vld [vmem:[%s14751_s28 + $0x1280] sm:$0xff]  ;;  %10346 = vmatpush2.bf16.msra.mxu1 %v13334_v45  ;;  %10304 = vmatprep.subr.bf16.mxu0 %v13199_v46  ;;  %v13326_v53 = vcombine.low %v1110_v42, %v1114_v43 }
 0x106   : > { %v978_v49 = vld [vmem:[%s14751_s28 + $0x12a0] sm:$0xff]  ;;  %10305 = vmatpush2.bf16.msra.mxu0 %v13198_v52 }
 0x107   : > { %v1102_v50 = vld [vmem:[%s14751_s28 + $0x1680] sm:$0xff]  ;;  %v13191_v54 = vcombine.high %v974_v48, %v978_v49  ;;  %10347 = vmatprep.subr.bf16.mxu1 %v13327_v47  ;;  %v13190_v60 = vcombine.low %v974_v48, %v978_v49 }
 0x108   : > { %v1106_v51 = vld [vmem:[%s14751_s28 + $0x16a0] sm:$0xff] }
 0x109   : > { %v13319_v55 = vcombine.high %v1102_v50, %v1106_v51  ;;  %v966_v56 = vld [vmem:[%s14751_s28 + $0x1240] sm:$0xff]  ;;  %10348 = vmatpush2.bf16.msra.mxu1 %v13326_v53  ;;  %10306 = vmatprep.subr.bf16.mxu0 %v13191_v54  ;;  %v13318_v61 = vcombine.low %v1102_v50, %v1106_v51 }
 0x10a   : > { %v970_v57 = vld [vmem:[%s14751_s28 + $0x1260] sm:$0xff]  ;;  %10307 = vmatpush2.bf16.msra.mxu0 %v13190_v60 }
 0x10b   : > { %v1094_v58 = vld [vmem:[%s14751_s28 + $0x1640] sm:$0xff]  ;;  %v13183_v62 = vcombine.high %v966_v56, %v970_v57  ;;  %10349 = vmatprep.subr.bf16.mxu1 %v13319_v55  ;;  %v13182_v4 = vcombine.low %v966_v56, %v970_v57 }
 0x10c   : > { %v1098_v59 = vld [vmem:[%s14751_s28 + $0x1660] sm:$0xff] }
 0x10d   : > { %v13311_v63 = vcombine.high %v1094_v58, %v1098_v59  ;;  %v958_v0 = vld [vmem:[%s14751_s28 + $0x1200] sm:$0xff]  ;;  %10350 = vmatpush2.bf16.msra.mxu1 %v13318_v61  ;;  %10308 = vmatprep.subr.bf16.mxu0 %v13183_v62  ;;  %v13310_v5 = vcombine.low %v1094_v58, %v1098_v59 }
 0x10e   : > { %v962_v1 = vld [vmem:[%s14751_s28 + $0x1220] sm:$0xff]  ;;  %10309 = vmatpush2.bf16.msra.mxu0 %v13182_v4 }
 0x10f   : > { %v1086_v2 = vld [vmem:[%s14751_s28 + $0x1600] sm:$0xff]  ;;  %v13175_v6 = vcombine.high %v958_v0, %v962_v1  ;;  %10351 = vmatprep.subr.bf16.mxu1 %v13311_v63  ;;  %v13174_v12 = vcombine.low %v958_v0, %v962_v1 }
 0x110   : > { %v1090_v3 = vld [vmem:[%s14751_s28 + $0x1620] sm:$0xff] }
 0x111   : > { %v13303_v7 = vcombine.high %v1086_v2, %v1090_v3  ;;  %v1206_v8 = vld [vmem:[%s14751_s28 + $0x19c0] sm:$0xff]  ;;  %10352 = vmatpush2.bf16.msra.mxu1 %v13310_v5  ;;  %10310 = vmatprep.subr.bf16.mxu0 %v13175_v6  ;;  %v13302_v13 = vcombine.low %v1086_v2, %v1090_v3 }
 0x112   : > { %v1210_v9 = vld [vmem:[%s14751_s28 + $0x19e0] sm:$0xff]  ;;  %10311 = vmatpush2.bf16.msra.mxu0 %v13174_v12 }
 0x113   : > { %v1334_v10 = vld [vmem:[%s14751_s28 + $0x1dc0] sm:$0xff]  ;;  %v13423_v14 = vcombine.high %v1206_v8, %v1210_v9  ;;  %10353 = vmatprep.subr.bf16.mxu1 %v13303_v7  ;;  %v13422_v22 = vcombine.low %v1206_v8, %v1210_v9 }
 0x114   : > { %v1338_v11 = vld [vmem:[%s14751_s28 + $0x1de0] sm:$0xff] }
 0x115   : > { %v13551_v15 = vcombine.high %v1334_v10, %v1338_v11  ;;  %v1198_v16 = vld [vmem:[%s14751_s28 + $0x1980] sm:$0xff]  ;;  %10354 = vmatpush2.bf16.msra.mxu1 %v13302_v13  ;;  %10366 = vmatprep.subr.bf16.mxu0 %v13423_v14  ;;  %v13550_v23 = vcombine.low %v1334_v10, %v1338_v11 }
 0x116   : > { %v1202_v17 = vld [vmem:[%s14751_s28 + $0x19a0] sm:$0xff]  ;;  %10313 = vmatmul.mubr.bf16.vlgmr.msra.gmra.mxu0 %v14311_v18 }
 0x117   : > { %v1326_v19 = vld [vmem:[%s14751_s28 + $0x1d80] sm:$0xff]  ;;  %v13415_v24 = vcombine.high %v1198_v16, %v1202_v17  ;;  %10409 = vmatprep.subr.bf16.mxu1 %v13551_v15  ;;  %10367 = vmatpush1.bf16.msra.mxu0 %v13422_v22  ;;  %v13414_v32 = vcombine.low %v1198_v16, %v1202_v17 }
 0x118   : > { %v1330_v20 = vld [vmem:[%s14751_s28 + $0x1da0] sm:$0xff]  ;;  %10398 = vmatprep.mubr.bf16.mxu0 %v14313_v28 }
 0x119   : > { %v14312_v21 = vld [vmem:[#allocation2 + $0x28] ss:$100 sps:$4 sm:$0xff]   ;;  %v13543_v25 = vcombine.high %v1326_v19, %v1330_v20  ;;  %10368 = vmatprep.subr.bf16.mxu0 %v13415_v24  ;;  %v13542_v33 = vcombine.low %v1326_v19, %v1330_v20 }
 0x11a   : > { %v1190_v26 = vld [vmem:[%s14751_s28 + $0x1940] sm:$0xff]  ;;  %10356 = vmatmul.mubr.bf16.vlgmr.msra.gmra.mxu1 %v14312_v21 }
 0x11b   : > { %v1194_v27 = vld [vmem:[%s14751_s28 + $0x1960] sm:$0xff]  ;;  %10410 = vmatpush1.bf16.msra.mxu1 %v13550_v23  ;;  %10441 = vmatprep.mubr.bf16.mxu1 %v14315_v31 }
 0x11c   : > { %v1318_v29 = vld [vmem:[%s14751_s28 + $0x1d40] sm:$0xff]  ;;  %v13407_v34 = vcombine.high %v1190_v26, %v1194_v27  ;;  %10411 = vmatprep.subr.bf16.mxu1 %v13543_v25  ;;  %10369 = vmatpush1.bf16.msra.mxu0 %v13414_v32  ;;  %v13406_v40 = vcombine.low %v1190_v26, %v1194_v27 }
 0x11d   : > { %v1322_v30 = vld [vmem:[%s14751_s28 + $0x1d60] sm:$0xff] }
 0x11e   : > { %v13535_v35 = vcombine.high %v1318_v29, %v1322_v30  ;;  %v1182_v36 = vld [vmem:[%s14751_s28 + $0x1900] sm:$0xff]  ;;  %10370 = vmatprep.subr.bf16.mxu0 %v13407_v34  ;;  %v13534_v41 = vcombine.low %v1318_v29, %v1322_v30 }
 0x11f   : > { %v1186_v37 = vld [vmem:[%s14751_s28 + $0x1920] sm:$0xff]  ;;  %10412 = vmatpush1.bf16.msra.mxu1 %v13542_v33 }
 0x120   : > { %v1310_v38 = vld [vmem:[%s14751_s28 + $0x1d00] sm:$0xff]  ;;  %v13399_v42 = vcombine.high %v1182_v36, %v1186_v37  ;;  %10413 = vmatprep.subr.bf16.mxu1 %v13535_v35  ;;  %10371 = vmatpush1.bf16.msra.mxu0 %v13406_v40  ;;  %v13398_v48 = vcombine.low %v1182_v36, %v1186_v37 }
 0x121   : > { %v1314_v39 = vld [vmem:[%s14751_s28 + $0x1d20] sm:$0xff] }
 0x122   : > { %v13527_v43 = vcombine.high %v1310_v38, %v1314_v39  ;;  %v1174_v44 = vld [vmem:[%s14751_s28 + $0x18c0] sm:$0xff]  ;;  %10372 = vmatprep.subr.bf16.mxu0 %v13399_v42  ;;  %v13526_v49 = vcombine.low %v1310_v38, %v1314_v39 }
 0x123   : > { %v1178_v45 = vld [vmem:[%s14751_s28 + $0x18e0] sm:$0xff]  ;;  %10414 = vmatpush1.bf16.msra.mxu1 %v13534_v41 }
 0x124   : > { %v1302_v46 = vld [vmem:[%s14751_s28 + $0x1cc0] sm:$0xff]  ;;  %v13391_v50 = vcombine.high %v1174_v44, %v1178_v45  ;;  %10415 = vmatprep.subr.bf16.mxu1 %v13527_v43  ;;  %10373 = vmatpush1.bf16.msra.mxu0 %v13398_v48  ;;  %v13390_v56 = vcombine.low %v1174_v44, %v1178_v45 }
 0x125   : > { %v1306_v47 = vld [vmem:[%s14751_s28 + $0x1ce0] sm:$0xff] }
 0x126   : > { %v13519_v51 = vcombine.high %v1302_v46, %v1306_v47  ;;  %v1166_v52 = vld [vmem:[%s14751_s28 + $0x1880] sm:$0xff]  ;;  %10374 = vmatprep.subr.bf16.mxu0 %v13391_v50  ;;  %v13518_v57 = vcombine.low %v1302_v46, %v1306_v47 }
 0x127   : > { %v1170_v53 = vld [vmem:[%s14751_s28 + $0x18a0] sm:$0xff]  ;;  %10416 = vmatpush1.bf16.msra.mxu1 %v13526_v49 }
 0x128   : > { %v1294_v54 = vld [vmem:[%s14751_s28 + $0x1c80] sm:$0xff]  ;;  %v13383_v58 = vcombine.high %v1166_v52, %v1170_v53  ;;  %10417 = vmatprep.subr.bf16.mxu1 %v13519_v51  ;;  %10375 = vmatpush1.bf16.msra.mxu0 %v13390_v56  ;;  %v13382_v0 = vcombine.low %v1166_v52, %v1170_v53 }
 0x129   : > { %v1298_v55 = vld [vmem:[%s14751_s28 + $0x1ca0] sm:$0xff] }
 0x12a   : > { %v13511_v59 = vcombine.high %v1294_v54, %v1298_v55  ;;  %v1158_v60 = vld [vmem:[%s14751_s28 + $0x1840] sm:$0xff]  ;;  %10376 = vmatprep.subr.bf16.mxu0 %v13383_v58  ;;  %v13510_v1 = vcombine.low %v1294_v54, %v1298_v55 }
 0x12b   : > { %v1162_v61 = vld [vmem:[%s14751_s28 + $0x1860] sm:$0xff]  ;;  %10418 = vmatpush1.bf16.msra.mxu1 %v13518_v57 }
 0x12c   : > { %v1286_v62 = vld [vmem:[%s14751_s28 + $0x1c40] sm:$0xff]  ;;  %v13375_v2 = vcombine.high %v1158_v60, %v1162_v61  ;;  %10419 = vmatprep.subr.bf16.mxu1 %v13511_v59  ;;  %10377 = vmatpush1.bf16.msra.mxu0 %v13382_v0  ;;  %v13374_v8 = vcombine.low %v1158_v60, %v1162_v61 }
 0x12d   : > { %v1290_v63 = vld [vmem:[%s14751_s28 + $0x1c60] sm:$0xff] }
 0x12e   : > { %v13503_v3 = vcombine.high %v1286_v62, %v1290_v63  ;;  %v1150_v4 = vld [vmem:[%s14751_s28 + $0x1800] sm:$0xff]  ;;  %10378 = vmatprep.subr.bf16.mxu0 %v13375_v2  ;;  %v13502_v9 = vcombine.low %v1286_v62, %v1290_v63 }
 0x12f   : > { %v1154_v5 = vld [vmem:[%s14751_s28 + $0x1820] sm:$0xff]  ;;  %10420 = vmatpush1.bf16.msra.mxu1 %v13510_v1 }
 0x130   : > { %v1278_v6 = vld [vmem:[%s14751_s28 + $0x1c00] sm:$0xff]  ;;  %v13367_v10 = vcombine.high %v1150_v4, %v1154_v5  ;;  %10421 = vmatprep.subr.bf16.mxu1 %v13503_v3  ;;  %10379 = vmatpush1.bf16.msra.mxu0 %v13374_v8  ;;  %v13366_v16 = vcombine.low %v1150_v4, %v1154_v5 }
 0x131   : > { %v1282_v7 = vld [vmem:[%s14751_s28 + $0x1c20] sm:$0xff] }
 0x132   : > { %v13495_v11 = vcombine.high %v1278_v6, %v1282_v7  ;;  %v1270_v12 = vld [vmem:[%s14751_s28 + $0x1bc0] sm:$0xff]  ;;  %10380 = vmatprep.subr.bf16.mxu0 %v13367_v10  ;;  %v13494_v17 = vcombine.low %v1278_v6, %v1282_v7 }
 0x133   : > { %v1274_v13 = vld [vmem:[%s14751_s28 + $0x1be0] sm:$0xff]  ;;  %10422 = vmatpush1.bf16.msra.mxu1 %v13502_v9 }
 0x134   : > { %v1398_v14 = vld [vmem:[%s14751_s28 + $0x1fc0] sm:$0xff]  ;;  %v13487_v18 = vcombine.high %v1270_v12, %v1274_v13  ;;  %10423 = vmatprep.subr.bf16.mxu1 %v13495_v11  ;;  %10381 = vmatpush1.bf16.msra.mxu0 %v13366_v16  ;;  %v13486_v24 = vcombine.low %v1270_v12, %v1274_v13 }
 0x135   : > { %v1402_v15 = vld [vmem:[%s14751_s28 + $0x1fe0] sm:$0xff] }
 0x136   : > { %v13615_v19 = vcombine.high %v1398_v14, %v1402_v15  ;;  %v1262_v20 = vld [vmem:[%s14751_s28 + $0x1b80] sm:$0xff]  ;;  %10382 = vmatprep.subr.bf16.mxu0 %v13487_v18  ;;  %v13614_v25 = vcombine.low %v1398_v14, %v1402_v15 }
 0x137   : > { %v1266_v21 = vld [vmem:[%s14751_s28 + $0x1ba0] sm:$0xff]  ;;  %10424 = vmatpush1.bf16.msra.mxu1 %v13494_v17 }
 0x138   : > { %v1390_v22 = vld [vmem:[%s14751_s28 + $0x1f80] sm:$0xff]  ;;  %v13479_v26 = vcombine.high %v1262_v20, %v1266_v21  ;;  %10425 = vmatprep.subr.bf16.mxu1 %v13615_v19  ;;  %10383 = vmatpush2.bf16.msra.mxu0 %v13486_v24  ;;  %v13478_v32 = vcombine.low %v1262_v20, %v1266_v21 }
 0x139   : > { %v1394_v23 = vld [vmem:[%s14751_s28 + $0x1fa0] sm:$0xff] }
 0x13a   : > { %v13607_v27 = vcombine.high %v1390_v22, %v1394_v23  ;;  %v1254_v28 = vld [vmem:[%s14751_s28 + $0x1b40] sm:$0xff]  ;;  %10384 = vmatprep.subr.bf16.mxu0 %v13479_v26  ;;  %v13606_v33 = vcombine.low %v1390_v22, %v1394_v23  ;;  %v14317_v22 = vld [vmem:[#allocation2 + $0x30] ss:$100 sps:$4 sm:$0xff]  }
 0x13b   : > { %v1258_v29 = vld [vmem:[%s14751_s28 + $0x1b60] sm:$0xff]  ;;  %10426 = vmatpush2.bf16.msra.mxu1 %v13614_v25  ;;  %v14318_v25 = vld [vmem:[#allocation2 + $0x38] ss:$100 sps:$4 sm:$0xff]  }
 0x13c   : > { %v1382_v30 = vld [vmem:[%s14751_s28 + $0x1f40] sm:$0xff]  ;;  %v13471_v34 = vcombine.high %v1254_v28, %v1258_v29  ;;  %10427 = vmatprep.subr.bf16.mxu1 %v13607_v27  ;;  %10385 = vmatpush2.bf16.msra.mxu0 %v13478_v32  ;;  %v13470_v40 = vcombine.low %v1254_v28, %v1258_v29 }
 0x13d   : > { %v1386_v31 = vld [vmem:[%s14751_s28 + $0x1f60] sm:$0xff] }
 0x13e   : > { %v13599_v35 = vcombine.high %v1382_v30, %v1386_v31  ;;  %v1246_v36 = vld [vmem:[%s14751_s28 + $0x1b00] sm:$0xff]  ;;  %10386 = vmatprep.subr.bf16.mxu0 %v13471_v34  ;;  %v13598_v41 = vcombine.low %v1382_v30, %v1386_v31 }
 0x13f   : > { %v1250_v37 = vld [vmem:[%s14751_s28 + $0x1b20] sm:$0xff]  ;;  %10428 = vmatpush2.bf16.msra.mxu1 %v13606_v33 }
 0x140   : > { %v1374_v38 = vld [vmem:[%s14751_s28 + $0x1f00] sm:$0xff]  ;;  %v13463_v42 = vcombine.high %v1246_v36, %v1250_v37  ;;  %10429 = vmatprep.subr.bf16.mxu1 %v13599_v35  ;;  %10387 = vmatpush2.bf16.msra.mxu0 %v13470_v40  ;;  %v13462_v48 = vcombine.low %v1246_v36, %v1250_v37 }
 0x141   : > { %v1378_v39 = vld [vmem:[%s14751_s28 + $0x1f20] sm:$0xff] }
 0x142   : > { %v13591_v43 = vcombine.high %v1374_v38, %v1378_v39  ;;  %v1238_v44 = vld [vmem:[%s14751_s28 + $0x1ac0] sm:$0xff]  ;;  %10388 = vmatprep.subr.bf16.mxu0 %v13463_v42  ;;  %v13590_v49 = vcombine.low %v1374_v38, %v1378_v39 }
 0x143   : > { %v1242_v45 = vld [vmem:[%s14751_s28 + $0x1ae0] sm:$0xff]  ;;  %10430 = vmatpush2.bf16.msra.mxu1 %v13598_v41 }
 0x144   : > { %v1366_v46 = vld [vmem:[%s14751_s28 + $0x1ec0] sm:$0xff]  ;;  %v13455_v50 = vcombine.high %v1238_v44, %v1242_v45  ;;  %10431 = vmatprep.subr.bf16.mxu1 %v13591_v43  ;;  %10389 = vmatpush2.bf16.msra.mxu0 %v13462_v48  ;;  %v13454_v56 = vcombine.low %v1238_v44, %v1242_v45 }
 0x145   : > { %v1370_v47 = vld [vmem:[%s14751_s28 + $0x1ee0] sm:$0xff] }
 0x146   : > { %v13583_v51 = vcombine.high %v1366_v46, %v1370_v47  ;;  %v1230_v52 = vld [vmem:[%s14751_s28 + $0x1a80] sm:$0xff]  ;;  %10390 = vmatprep.subr.bf16.mxu0 %v13455_v50  ;;  %v13582_v57 = vcombine.low %v1366_v46, %v1370_v47 }
 0x147   : > { %v1234_v53 = vld [vmem:[%s14751_s28 + $0x1aa0] sm:$0xff]  ;;  %10432 = vmatpush2.bf16.msra.mxu1 %v13590_v49 }
 0x148   : > { %v1358_v54 = vld [vmem:[%s14751_s28 + $0x1e80] sm:$0xff]  ;;  %v13447_v58 = vcombine.high %v1230_v52, %v1234_v53  ;;  %10433 = vmatprep.subr.bf16.mxu1 %v13583_v51  ;;  %10391 = vmatpush2.bf16.msra.mxu0 %v13454_v56  ;;  %v13446_v0 = vcombine.low %v1230_v52, %v1234_v53 }
 0x149   : > { %v1362_v55 = vld [vmem:[%s14751_s28 + $0x1ea0] sm:$0xff] }
 0x14a   : > { %v13575_v59 = vcombine.high %v1358_v54, %v1362_v55  ;;  %v1222_v60 = vld [vmem:[%s14751_s28 + $0x1a40] sm:$0xff]  ;;  %10392 = vmatprep.subr.bf16.mxu0 %v13447_v58  ;;  %v13574_v1 = vcombine.low %v1358_v54, %v1362_v55 }
 0x14b   : > { %v1226_v61 = vld [vmem:[%s14751_s28 + $0x1a60] sm:$0xff]  ;;  %10434 = vmatpush2.bf16.msra.mxu1 %v13582_v57 }
 0x14c   : > { %v1350_v62 = vld [vmem:[%s14751_s28 + $0x1e40] sm:$0xff]  ;;  %v13439_v2 = vcombine.high %v1222_v60, %v1226_v61  ;;  %10435 = vmatprep.subr.bf16.mxu1 %v13575_v59  ;;  %10393 = vmatpush2.bf16.msra.mxu0 %v13446_v0  ;;  %v13438_v8 = vcombine.low %v1222_v60, %v1226_v61 }
 0x14d   : > { %v1354_v63 = vld [vmem:[%s14751_s28 + $0x1e60] sm:$0xff] }
 0x14e   : > { %v13567_v3 = vcombine.high %v1350_v62, %v1354_v63  ;;  %v1214_v4 = vld [vmem:[%s14751_s28 + $0x1a00] sm:$0xff]  ;;  %10394 = vmatprep.subr.bf16.mxu0 %v13439_v2  ;;  %v13566_v9 = vcombine.low %v1350_v62, %v1354_v63 }
 0x14f   : > { %v1218_v5 = vld [vmem:[%s14751_s28 + $0x1a20] sm:$0xff]  ;;  %10436 = vmatpush2.bf16.msra.mxu1 %v13574_v1 }
 0x150   : > { %v1342_v6 = vld [vmem:[%s14751_s28 + $0x1e00] sm:$0xff]  ;;  %v13431_v10 = vcombine.high %v1214_v4, %v1218_v5  ;;  %10437 = vmatprep.subr.bf16.mxu1 %v13567_v3  ;;  %10395 = vmatpush2.bf16.msra.mxu0 %v13438_v8  ;;  %v13430_v16 = vcombine.low %v1214_v4, %v1218_v5 }
 0x151   : > { %v1346_v7 = vld [vmem:[%s14751_s28 + $0x1e20] sm:$0xff] }
 0x152   : > { %v13559_v11 = vcombine.high %v1342_v6, %v1346_v7  ;;  %v1462_v12 = vld [vmem:[%s14751_s28 + $0x21c0] sm:$0xff]  ;;  %10396 = vmatprep.subr.bf16.mxu0 %v13431_v10  ;;  %v13558_v17 = vcombine.low %v1342_v6, %v1346_v7 }
 0x153   : > { %v1466_v13 = vld [vmem:[%s14751_s28 + $0x21e0] sm:$0xff]  ;;  %10438 = vmatpush2.bf16.msra.mxu1 %v13566_v9 }
 0x154   : > { %v1590_v14 = vld [vmem:[%s14751_s28 + $0x25c0] sm:$0xff]  ;;  %v13679_v18 = vcombine.high %v1462_v12, %v1466_v13  ;;  %10439 = vmatprep.subr.bf16.mxu1 %v13559_v11  ;;  %10397 = vmatpush2.bf16.msra.mxu0 %v13430_v16  ;;  %v13678_v26 = vcombine.low %v1462_v12, %v1466_v13 }
 0x155   : > { %v1594_v15 = vld [vmem:[%s14751_s28 + $0x25e0] sm:$0xff] }
 0x156   : > { %v13807_v19 = vcombine.high %v1590_v14, %v1594_v15  ;;  %v1454_v20 = vld [vmem:[%s14751_s28 + $0x2180] sm:$0xff]  ;;  %10452 = vmatprep.subr.bf16.mxu0 %v13679_v18  ;;  %v13806_v27 = vcombine.low %v1590_v14, %v1594_v15 }
 0x157   : > { %v1458_v21 = vld [vmem:[%s14751_s28 + $0x21a0] sm:$0xff]  ;;  %10440 = vmatpush2.bf16.msra.mxu1 %v13558_v17  ;;  %10399 = vmatmul.mubr.bf16.vlgmr.msra.gmra.mxu0 %v14317_v22 }
 0x158   : > { %v1582_v23 = vld [vmem:[%s14751_s28 + $0x2580] sm:$0xff]  ;;  %v13671_v28 = vcombine.high %v1454_v20, %v1458_v21  ;;  %10495 = vmatprep.subr.bf16.mxu1 %v13807_v19  ;;  %10453 = vmatpush1.bf16.msra.mxu0 %v13678_v26  ;;  %v13670_v36 = vcombine.low %v1454_v20, %v1458_v21 }
 0x159   : > { %v1586_v24 = vld [vmem:[%s14751_s28 + $0x25a0] sm:$0xff] }
 0x15a   : > { %v13799_v29 = vcombine.high %v1582_v23, %v1586_v24  ;;  %v1446_v30 = vld [vmem:[%s14751_s28 + $0x2140] sm:$0xff]  ;;  %10442 = vmatmul.mubr.bf16.vlgmr.msra.gmra.mxu1 %v14318_v25  ;;  %10454 = vmatprep.subr.bf16.mxu0 %v13671_v28  ;;  %v13798_v37 = vcombine.low %v1582_v23, %v1586_v24 }
 0x15b   : > { %v1450_v31 = vld [vmem:[%s14751_s28 + $0x2160] sm:$0xff]  ;;  %10496 = vmatpush1.bf16.msra.mxu1 %v13806_v27 }
 0x15c   : > { %v14319_v32 = vld [vmem:[#allocation2 + $0x44] ss:$100 sps:$4 sm:$0xff]   ;;  %v14321_v35 = vld [vmem:[#allocation2 + $0x4c] ss:$100 sps:$4 sm:$0xff]   ;;  %v13663_v38 = vcombine.high %v1446_v30, %v1450_v31  ;;  %10497 = vmatprep.subr.bf16.mxu1 %v13799_v29  ;;  %10455 = vmatpush1.bf16.msra.mxu0 %v13670_v36  ;;  %v13662_v44 = vcombine.low %v1446_v30, %v1450_v31 }
 0x15d   : > { %v1574_v33 = vld [vmem:[%s14751_s28 + $0x2540] sm:$0xff]  ;;  %10484 = vmatprep.mubr.bf16.mxu0 %v14319_v32  ;;  %10527 = vmatprep.mubr.bf16.mxu1 %v14321_v35 }
 0x15e   : > { %v1578_v34 = vld [vmem:[%s14751_s28 + $0x2560] sm:$0xff]  ;;  %10456 = vmatprep.subr.bf16.mxu0 %v13663_v38 }
 0x15f   : > { %v13791_v39 = vcombine.high %v1574_v33, %v1578_v34  ;;  %v1438_v40 = vld [vmem:[%s14751_s28 + $0x2100] sm:$0xff]  ;;  %10498 = vmatpush1.bf16.msra.mxu1 %v13798_v37  ;;  %v13790_v45 = vcombine.low %v1574_v33, %v1578_v34 }
 0x160   : > { %v1442_v41 = vld [vmem:[%s14751_s28 + $0x2120] sm:$0xff]  ;;  %10457 = vmatpush1.bf16.msra.mxu0 %v13662_v44 }
 0x161   : > { %v1566_v42 = vld [vmem:[%s14751_s28 + $0x2500] sm:$0xff]  ;;  %v13655_v46 = vcombine.high %v1438_v40, %v1442_v41  ;;  %10499 = vmatprep.subr.bf16.mxu1 %v13791_v39  ;;  %v13654_v52 = vcombine.low %v1438_v40, %v1442_v41 }
 0x162   : > { %v1570_v43 = vld [vmem:[%s14751_s28 + $0x2520] sm:$0xff] }
 0x163   : > { %v13783_v47 = vcombine.high %v1566_v42, %v1570_v43  ;;  %v1430_v48 = vld [vmem:[%s14751_s28 + $0x20c0] sm:$0xff]  ;;  %10500 = vmatpush1.bf16.msra.mxu1 %v13790_v45  ;;  %10458 = vmatprep.subr.bf16.mxu0 %v13655_v46  ;;  %v13782_v53 = vcombine.low %v1566_v42, %v1570_v43 }
 0x164   : > { %v1434_v49 = vld [vmem:[%s14751_s28 + $0x20e0] sm:$0xff]  ;;  %10459 = vmatpush1.bf16.msra.mxu0 %v13654_v52 }
 0x165   : > { %v1558_v50 = vld [vmem:[%s14751_s28 + $0x24c0] sm:$0xff]  ;;  %v13647_v54 = vcombine.high %v1430_v48, %v1434_v49  ;;  %10501 = vmatprep.subr.bf16.mxu1 %v13783_v47  ;;  %v13646_v60 = vcombine.low %v1430_v48, %v1434_v49 }
 0x166   : > { %v1562_v51 = vld [vmem:[%s14751_s28 + $0x24e0] sm:$0xff] }
 0x167   : > { %v13775_v55 = vcombine.high %v1558_v50, %v1562_v51  ;;  %v1422_v56 = vld [vmem:[%s14751_s28 + $0x2080] sm:$0xff]  ;;  %10502 = vmatpush1.bf16.msra.mxu1 %v13782_v53  ;;  %10460 = vmatprep.subr.bf16.mxu0 %v13647_v54  ;;  %v13774_v61 = vcombine.low %v1558_v50, %v1562_v51 }
 0x168   : > { %v1426_v57 = vld [vmem:[%s14751_s28 + $0x20a0] sm:$0xff]  ;;  %10461 = vmatpush1.bf16.msra.mxu0 %v13646_v60 }
 0x169   : > { %v1550_v58 = vld [vmem:[%s14751_s28 + $0x2480] sm:$0xff]  ;;  %v13639_v62 = vcombine.high %v1422_v56, %v1426_v57  ;;  %10503 = vmatprep.subr.bf16.mxu1 %v13775_v55  ;;  %v13638_v4 = vcombine.low %v1422_v56, %v1426_v57 }
 0x16a   : > { %v1554_v59 = vld [vmem:[%s14751_s28 + $0x24a0] sm:$0xff] }
 0x16b   : > { %v13767_v63 = vcombine.high %v1550_v58, %v1554_v59  ;;  %v1414_v0 = vld [vmem:[%s14751_s28 + $0x2040] sm:$0xff]  ;;  %10504 = vmatpush1.bf16.msra.mxu1 %v13774_v61  ;;  %10462 = vmatprep.subr.bf16.mxu0 %v13639_v62  ;;  %v13766_v5 = vcombine.low %v1550_v58, %v1554_v59 }
 0x16c   : > { %v1418_v1 = vld [vmem:[%s14751_s28 + $0x2060] sm:$0xff]  ;;  %10463 = vmatpush1.bf16.msra.mxu0 %v13638_v4 }
 0x16d   : > { %v1542_v2 = vld [vmem:[%s14751_s28 + $0x2440] sm:$0xff]  ;;  %v13631_v6 = vcombine.high %v1414_v0, %v1418_v1  ;;  %10505 = vmatprep.subr.bf16.mxu1 %v13767_v63  ;;  %v13630_v12 = vcombine.low %v1414_v0, %v1418_v1 }
 0x16e   : > { %v1546_v3 = vld [vmem:[%s14751_s28 + $0x2460] sm:$0xff] }
 0x16f   : > { %v13759_v7 = vcombine.high %v1542_v2, %v1546_v3  ;;  %v1406_v8 = vld [vmem:[%s14751_s28 + $0x2000] sm:$0xff]  ;;  %10506 = vmatpush1.bf16.msra.mxu1 %v13766_v5  ;;  %10464 = vmatprep.subr.bf16.mxu0 %v13631_v6  ;;  %v13758_v13 = vcombine.low %v1542_v2, %v1546_v3 }
 0x170   : > { %v1410_v9 = vld [vmem:[%s14751_s28 + $0x2020] sm:$0xff]  ;;  %10465 = vmatpush1.bf16.msra.mxu0 %v13630_v12 }
 0x171   : > { %v1534_v10 = vld [vmem:[%s14751_s28 + $0x2400] sm:$0xff]  ;;  %v13623_v14 = vcombine.high %v1406_v8, %v1410_v9  ;;  %10507 = vmatprep.subr.bf16.mxu1 %v13759_v7  ;;  %v13622_v20 = vcombine.low %v1406_v8, %v1410_v9 }
 0x172   : > { %v1538_v11 = vld [vmem:[%s14751_s28 + $0x2420] sm:$0xff] }
 0x173   : > { %v13751_v15 = vcombine.high %v1534_v10, %v1538_v11  ;;  %v1526_v16 = vld [vmem:[%s14751_s28 + $0x23c0] sm:$0xff]  ;;  %10508 = vmatpush1.bf16.msra.mxu1 %v13758_v13  ;;  %10466 = vmatprep.subr.bf16.mxu0 %v13623_v14  ;;  %v13750_v21 = vcombine.low %v1534_v10, %v1538_v11 }
 0x174   : > { %v1530_v17 = vld [vmem:[%s14751_s28 + $0x23e0] sm:$0xff]  ;;  %10467 = vmatpush1.bf16.msra.mxu0 %v13622_v20 }
 0x175   : > { %v1654_v18 = vld [vmem:[%s14751_s28 + $0x27c0] sm:$0xff]  ;;  %v13743_v22 = vcombine.high %v1526_v16, %v1530_v17  ;;  %10509 = vmatprep.subr.bf16.mxu1 %v13751_v15  ;;  %v13742_v28 = vcombine.low %v1526_v16, %v1530_v17 }
 0x176   : > { %v1658_v19 = vld [vmem:[%s14751_s28 + $0x27e0] sm:$0xff] }
 0x177   : > { %v13871_v23 = vcombine.high %v1654_v18, %v1658_v19  ;;  %v1518_v24 = vld [vmem:[%s14751_s28 + $0x2380] sm:$0xff]  ;;  %10510 = vmatpush1.bf16.msra.mxu1 %v13750_v21  ;;  %10468 = vmatprep.subr.bf16.mxu0 %v13743_v22  ;;  %v13870_v29 = vcombine.low %v1654_v18, %v1658_v19 }
 0x178   : > { %v1522_v25 = vld [vmem:[%s14751_s28 + $0x23a0] sm:$0xff]  ;;  %10469 = vmatpush2.bf16.msra.mxu0 %v13742_v28 }
 0x179   : > { %v1646_v26 = vld [vmem:[%s14751_s28 + $0x2780] sm:$0xff]  ;;  %v13735_v30 = vcombine.high %v1518_v24, %v1522_v25  ;;  %10511 = vmatprep.subr.bf16.mxu1 %v13871_v23  ;;  %v13734_v36 = vcombine.low %v1518_v24, %v1522_v25 }
 0x17a   : > { %v1650_v27 = vld [vmem:[%s14751_s28 + $0x27a0] sm:$0xff] }
 0x17b   : > { %v13863_v31 = vcombine.high %v1646_v26, %v1650_v27  ;;  %v1510_v32 = vld [vmem:[%s14751_s28 + $0x2340] sm:$0xff]  ;;  %10512 = vmatpush2.bf16.msra.mxu1 %v13870_v29  ;;  %10470 = vmatprep.subr.bf16.mxu0 %v13735_v30  ;;  %v13862_v37 = vcombine.low %v1646_v26, %v1650_v27  ;;  %v14323_v26 = vld [vmem:[#allocation2 + $0x40] ss:$100 sps:$4 sm:$0xff]  }
 0x17c   : > { %v1514_v33 = vld [vmem:[%s14751_s28 + $0x2360] sm:$0xff]  ;;  %10471 = vmatpush2.bf16.msra.mxu0 %v13734_v36  ;;  %v14325_v36 = vld [vmem:[#allocation2 + $0x54] ss:$100 sps:$4 sm:$0xff]  }
 0x17d   : > { %v1638_v34 = vld [vmem:[%s14751_s28 + $0x2740] sm:$0xff]  ;;  %v13727_v38 = vcombine.high %v1510_v32, %v1514_v33  ;;  %10513 = vmatprep.subr.bf16.mxu1 %v13863_v31  ;;  %v13726_v44 = vcombine.low %v1510_v32, %v1514_v33 }
 0x17e   : > { %v1642_v35 = vld [vmem:[%s14751_s28 + $0x2760] sm:$0xff] }
 0x17f   : > { %v13855_v39 = vcombine.high %v1638_v34, %v1642_v35  ;;  %v1502_v40 = vld [vmem:[%s14751_s28 + $0x2300] sm:$0xff]  ;;  %10514 = vmatpush2.bf16.msra.mxu1 %v13862_v37  ;;  %10472 = vmatprep.subr.bf16.mxu0 %v13727_v38  ;;  %v13854_v45 = vcombine.low %v1638_v34, %v1642_v35 }
 0x180   : > { %v1506_v41 = vld [vmem:[%s14751_s28 + $0x2320] sm:$0xff]  ;;  %10473 = vmatpush2.bf16.msra.mxu0 %v13726_v44 }
 0x181   : > { %v1630_v42 = vld [vmem:[%s14751_s28 + $0x2700] sm:$0xff]  ;;  %v13719_v46 = vcombine.high %v1502_v40, %v1506_v41  ;;  %10515 = vmatprep.subr.bf16.mxu1 %v13855_v39  ;;  %v13718_v52 = vcombine.low %v1502_v40, %v1506_v41  ;;  %v14327_v39 = vld [vmem:[#allocation2 + $0x5c] ss:$100 sps:$4 sm:$0xff]  }
 0x182   : > { %v1634_v43 = vld [vmem:[%s14751_s28 + $0x2720] sm:$0xff] }
 0x183   : > { %v13847_v47 = vcombine.high %v1630_v42, %v1634_v43  ;;  %v1494_v48 = vld [vmem:[%s14751_s28 + $0x22c0] sm:$0xff]  ;;  %10516 = vmatpush2.bf16.msra.mxu1 %v13854_v45  ;;  %10474 = vmatprep.subr.bf16.mxu0 %v13719_v46  ;;  %v13846_v53 = vcombine.low %v1630_v42, %v1634_v43 }
 0x184   : > { %v1498_v49 = vld [vmem:[%s14751_s28 + $0x22e0] sm:$0xff]  ;;  %10475 = vmatpush2.bf16.msra.mxu0 %v13718_v52 }
 0x185   : > { %v1622_v50 = vld [vmem:[%s14751_s28 + $0x26c0] sm:$0xff]  ;;  %v13711_v54 = vcombine.high %v1494_v48, %v1498_v49  ;;  %10517 = vmatprep.subr.bf16.mxu1 %v13847_v47  ;;  %v13710_v60 = vcombine.low %v1494_v48, %v1498_v49 }
 0x186   : > { %v1626_v51 = vld [vmem:[%s14751_s28 + $0x26e0] sm:$0xff] }
 0x187   : > { %v13839_v55 = vcombine.high %v1622_v50, %v1626_v51  ;;  %v1486_v56 = vld [vmem:[%s14751_s28 + $0x2280] sm:$0xff]  ;;  %10518 = vmatpush2.bf16.msra.mxu1 %v13846_v53  ;;  %10476 = vmatprep.subr.bf16.mxu0 %v13711_v54  ;;  %v13838_v61 = vcombine.low %v1622_v50, %v1626_v51 }
 0x188   : > { %v1490_v57 = vld [vmem:[%s14751_s28 + $0x22a0] sm:$0xff]  ;;  %10477 = vmatpush2.bf16.msra.mxu0 %v13710_v60 }
 0x189   : > { %v1614_v58 = vld [vmem:[%s14751_s28 + $0x2680] sm:$0xff]  ;;  %v13703_v62 = vcombine.high %v1486_v56, %v1490_v57  ;;  %10519 = vmatprep.subr.bf16.mxu1 %v13839_v55  ;;  %v13702_v4 = vcombine.low %v1486_v56, %v1490_v57 }
 0x18a   : > { %v1618_v59 = vld [vmem:[%s14751_s28 + $0x26a0] sm:$0xff] }
 0x18b   : > { %v13831_v63 = vcombine.high %v1614_v58, %v1618_v59  ;;  %v1478_v0 = vld [vmem:[%s14751_s28 + $0x2240] sm:$0xff]  ;;  %10520 = vmatpush2.bf16.msra.mxu1 %v13838_v61  ;;  %10478 = vmatprep.subr.bf16.mxu0 %v13703_v62  ;;  %v13830_v5 = vcombine.low %v1614_v58, %v1618_v59 }
 0x18c   : > { %v1482_v1 = vld [vmem:[%s14751_s28 + $0x2260] sm:$0xff]  ;;  %10479 = vmatpush2.bf16.msra.mxu0 %v13702_v4 }
 0x18d   : > { %v1606_v2 = vld [vmem:[%s14751_s28 + $0x2640] sm:$0xff]  ;;  %v13695_v6 = vcombine.high %v1478_v0, %v1482_v1  ;;  %10521 = vmatprep.subr.bf16.mxu1 %v13831_v63  ;;  %v13694_v12 = vcombine.low %v1478_v0, %v1482_v1 }
 0x18e   : > { %v1610_v3 = vld [vmem:[%s14751_s28 + $0x2660] sm:$0xff] }
 0x18f   : > { %v13823_v7 = vcombine.high %v1606_v2, %v1610_v3  ;;  %v1470_v8 = vld [vmem:[%s14751_s28 + $0x2200] sm:$0xff]  ;;  %10522 = vmatpush2.bf16.msra.mxu1 %v13830_v5  ;;  %10480 = vmatprep.subr.bf16.mxu0 %v13695_v6  ;;  %v13822_v13 = vcombine.low %v1606_v2, %v1610_v3 }
 0x190   : > { %v1474_v9 = vld [vmem:[%s14751_s28 + $0x2220] sm:$0xff]  ;;  %10481 = vmatpush2.bf16.msra.mxu0 %v13694_v12 }
 0x191   : > { %v1598_v10 = vld [vmem:[%s14751_s28 + $0x2600] sm:$0xff]  ;;  %v13687_v14 = vcombine.high %v1470_v8, %v1474_v9  ;;  %10523 = vmatprep.subr.bf16.mxu1 %v13823_v7  ;;  %v13686_v20 = vcombine.low %v1470_v8, %v1474_v9 }
 0x192   : > { %v1602_v11 = vld [vmem:[%s14751_s28 + $0x2620] sm:$0xff] }
 0x193   : > { %v13815_v15 = vcombine.high %v1598_v10, %v1602_v11  ;;  %v1718_v16 = vld [vmem:[%s14751_s28 + $0x29c0] sm:$0xff]  ;;  %10524 = vmatpush2.bf16.msra.mxu1 %v13822_v13  ;;  %10482 = vmatprep.subr.bf16.mxu0 %v13687_v14  ;;  %v13814_v21 = vcombine.low %v1598_v10, %v1602_v11 }
 0x194   : > { %v1722_v17 = vld [vmem:[%s14751_s28 + $0x29e0] sm:$0xff]  ;;  %10483 = vmatpush2.bf16.msra.mxu0 %v13686_v20 }
 0x195   : > { %v1846_v18 = vld [vmem:[%s14751_s28 + $0x2dc0] sm:$0xff]  ;;  %v13935_v22 = vcombine.high %v1718_v16, %v1722_v17  ;;  %10525 = vmatprep.subr.bf16.mxu1 %v13815_v15  ;;  %v13934_v30 = vcombine.low %v1718_v16, %v1722_v17 }
 0x196   : > { %v1850_v19 = vld [vmem:[%s14751_s28 + $0x2de0] sm:$0xff] }
 0x197   : > { %v14063_v23 = vcombine.high %v1846_v18, %v1850_v19  ;;  %v1710_v24 = vld [vmem:[%s14751_s28 + $0x2980] sm:$0xff]  ;;  %10526 = vmatpush2.bf16.msra.mxu1 %v13814_v21  ;;  %10538 = vmatprep.subr.bf16.mxu0 %v13935_v22  ;;  %v14062_v31 = vcombine.low %v1846_v18, %v1850_v19 }
 0x198   : > { %v1714_v25 = vld [vmem:[%s14751_s28 + $0x29a0] sm:$0xff]  ;;  %10485 = vmatmul.mubr.bf16.vlgmr.msra.gmra.mxu0 %v14323_v26 }
 0x199   : > { %v1838_v27 = vld [vmem:[%s14751_s28 + $0x2d80] sm:$0xff]  ;;  %v13927_v32 = vcombine.high %v1710_v24, %v1714_v25  ;;  %10581 = vmatprep.subr.bf16.mxu1 %v14063_v23  ;;  %10539 = vmatpush1.bf16.msra.mxu0 %v13934_v30  ;;  %v13926_v40 = vcombine.low %v1710_v24, %v1714_v25 }
 0x19a   : > { %v1842_v28 = vld [vmem:[%s14751_s28 + $0x2da0] sm:$0xff]  ;;  %10570 = vmatprep.mubr.bf16.mxu0 %v14325_v36 }
 0x19b   : > { %v14324_v29 = vld [vmem:[#allocation2 + $0x48] ss:$100 sps:$4 sm:$0xff]   ;;  %v14055_v33 = vcombine.high %v1838_v27, %v1842_v28  ;;  %10540 = vmatprep.subr.bf16.mxu0 %v13927_v32  ;;  %v14054_v41 = vcombine.low %v1838_v27, %v1842_v28 }
 0x19c   : > { %v1702_v34 = vld [vmem:[%s14751_s28 + $0x2940] sm:$0xff]  ;;  %10528 = vmatmul.mubr.bf16.vlgmr.msra.gmra.mxu1 %v14324_v29 }
 0x19d   : > { %v1706_v35 = vld [vmem:[%s14751_s28 + $0x2960] sm:$0xff]  ;;  %10582 = vmatpush1.bf16.msra.mxu1 %v14062_v31  ;;  %10613 = vmatprep.mubr.bf16.mxu1 %v14327_v39 }
 0x19e   : > { %v1830_v37 = vld [vmem:[%s14751_s28 + $0x2d40] sm:$0xff]  ;;  %v13919_v42 = vcombine.high %v1702_v34, %v1706_v35  ;;  %10583 = vmatprep.subr.bf16.mxu1 %v14055_v33  ;;  %10541 = vmatpush1.bf16.msra.mxu0 %v13926_v40  ;;  %v13918_v48 = vcombine.low %v1702_v34, %v1706_v35 }
 0x19f   : > { %v1834_v38 = vld [vmem:[%s14751_s28 + $0x2d60] sm:$0xff] }
 0x1a0   : > { %v14047_v43 = vcombine.high %v1830_v37, %v1834_v38  ;;  %v1694_v44 = vld [vmem:[%s14751_s28 + $0x2900] sm:$0xff]  ;;  %10542 = vmatprep.subr.bf16.mxu0 %v13919_v42  ;;  %v14046_v49 = vcombine.low %v1830_v37, %v1834_v38 }
 0x1a1   : > { %v1698_v45 = vld [vmem:[%s14751_s28 + $0x2920] sm:$0xff]  ;;  %10584 = vmatpush1.bf16.msra.mxu1 %v14054_v41 }
 0x1a2   : > { %v1822_v46 = vld [vmem:[%s14751_s28 + $0x2d00] sm:$0xff]  ;;  %v13911_v50 = vcombine.high %v1694_v44, %v1698_v45  ;;  %10585 = vmatprep.subr.bf16.mxu1 %v14047_v43  ;;  %10543 = vmatpush1.bf16.msra.mxu0 %v13918_v48  ;;  %v13910_v56 = vcombine.low %v1694_v44, %v1698_v45 }
 0x1a3   : > { %v1826_v47 = vld [vmem:[%s14751_s28 + $0x2d20] sm:$0xff] }
 0x1a4   : > { %v14039_v51 = vcombine.high %v1822_v46, %v1826_v47  ;;  %v1686_v52 = vld [vmem:[%s14751_s28 + $0x28c0] sm:$0xff]  ;;  %10544 = vmatprep.subr.bf16.mxu0 %v13911_v50  ;;  %v14038_v57 = vcombine.low %v1822_v46, %v1826_v47 }
 0x1a5   : > { %v1690_v53 = vld [vmem:[%s14751_s28 + $0x28e0] sm:$0xff]  ;;  %10586 = vmatpush1.bf16.msra.mxu1 %v14046_v49 }
 0x1a6   : > { %v1814_v54 = vld [vmem:[%s14751_s28 + $0x2cc0] sm:$0xff]  ;;  %v13903_v58 = vcombine.high %v1686_v52, %v1690_v53  ;;  %10587 = vmatprep.subr.bf16.mxu1 %v14039_v51  ;;  %10545 = vmatpush1.bf16.msra.mxu0 %v13910_v56  ;;  %v13902_v0 = vcombine.low %v1686_v52, %v1690_v53 }
 0x1a7   : > { %v1818_v55 = vld [vmem:[%s14751_s28 + $0x2ce0] sm:$0xff] }
 0x1a8   : > { %v14031_v59 = vcombine.high %v1814_v54, %v1818_v55  ;;  %v1678_v60 = vld [vmem:[%s14751_s28 + $0x2880] sm:$0xff]  ;;  %10546 = vmatprep.subr.bf16.mxu0 %v13903_v58  ;;  %v14030_v1 = vcombine.low %v1814_v54, %v1818_v55 }
 0x1a9   : > { %v1682_v61 = vld [vmem:[%s14751_s28 + $0x28a0] sm:$0xff]  ;;  %10588 = vmatpush1.bf16.msra.mxu1 %v14038_v57 }
 0x1aa   : > { %v1806_v62 = vld [vmem:[%s14751_s28 + $0x2c80] sm:$0xff]  ;;  %v13895_v2 = vcombine.high %v1678_v60, %v1682_v61  ;;  %10589 = vmatprep.subr.bf16.mxu1 %v14031_v59  ;;  %10547 = vmatpush1.bf16.msra.mxu0 %v13902_v0  ;;  %v13894_v8 = vcombine.low %v1678_v60, %v1682_v61 }
 0x1ab   : > { %v1810_v63 = vld [vmem:[%s14751_s28 + $0x2ca0] sm:$0xff] }
 0x1ac   : > { %v14023_v3 = vcombine.high %v1806_v62, %v1810_v63  ;;  %v1670_v4 = vld [vmem:[%s14751_s28 + $0x2840] sm:$0xff]  ;;  %10548 = vmatprep.subr.bf16.mxu0 %v13895_v2  ;;  %v14022_v9 = vcombine.low %v1806_v62, %v1810_v63 }
 0x1ad   : > { %v1674_v5 = vld [vmem:[%s14751_s28 + $0x2860] sm:$0xff]  ;;  %10590 = vmatpush1.bf16.msra.mxu1 %v14030_v1 }
 0x1ae   : > { %v1798_v6 = vld [vmem:[%s14751_s28 + $0x2c40] sm:$0xff]  ;;  %v13887_v10 = vcombine.high %v1670_v4, %v1674_v5  ;;  %10591 = vmatprep.subr.bf16.mxu1 %v14023_v3  ;;  %10549 = vmatpush1.bf16.msra.mxu0 %v13894_v8  ;;  %v13886_v16 = vcombine.low %v1670_v4, %v1674_v5 }
 0x1af   : > { %v1802_v7 = vld [vmem:[%s14751_s28 + $0x2c60] sm:$0xff] }
 0x1b0   : > { %v14015_v11 = vcombine.high %v1798_v6, %v1802_v7  ;;  %v1662_v12 = vld [vmem:[%s14751_s28 + $0x2800] sm:$0xff]  ;;  %10550 = vmatprep.subr.bf16.mxu0 %v13887_v10  ;;  %v14014_v17 = vcombine.low %v1798_v6, %v1802_v7 }
 0x1b1   : > { %v1666_v13 = vld [vmem:[%s14751_s28 + $0x2820] sm:$0xff]  ;;  %10592 = vmatpush1.bf16.msra.mxu1 %v14022_v9 }
 0x1b2   : > { %v1790_v14 = vld [vmem:[%s14751_s28 + $0x2c00] sm:$0xff]  ;;  %v13879_v18 = vcombine.high %v1662_v12, %v1666_v13  ;;  %10593 = vmatprep.subr.bf16.mxu1 %v14015_v11  ;;  %10551 = vmatpush1.bf16.msra.mxu0 %v13886_v16  ;;  %v13878_v24 = vcombine.low %v1662_v12, %v1666_v13 }
 0x1b3   : > { %v1794_v15 = vld [vmem:[%s14751_s28 + $0x2c20] sm:$0xff] }
 0x1b4   : > { %v14007_v19 = vcombine.high %v1790_v14, %v1794_v15  ;;  %v1782_v20 = vld [vmem:[%s14751_s28 + $0x2bc0] sm:$0xff]  ;;  %10552 = vmatprep.subr.bf16.mxu0 %v13879_v18  ;;  %v14006_v25 = vcombine.low %v1790_v14, %v1794_v15 }
 0x1b5   : > { %v1786_v21 = vld [vmem:[%s14751_s28 + $0x2be0] sm:$0xff]  ;;  %10594 = vmatpush1.bf16.msra.mxu1 %v14014_v17 }
 0x1b6   : > { %v1910_v22 = vld [vmem:[%s14751_s28 + $0x2fc0] sm:$0xff]  ;;  %v13999_v26 = vcombine.high %v1782_v20, %v1786_v21  ;;  %10595 = vmatprep.subr.bf16.mxu1 %v14007_v19  ;;  %10553 = vmatpush1.bf16.msra.mxu0 %v13878_v24  ;;  %v13998_v32 = vcombine.low %v1782_v20, %v1786_v21 }
 0x1b7   : > { %v1914_v23 = vld [vmem:[%s14751_s28 + $0x2fe0] sm:$0xff] }
 0x1b8   : > { %v14127_v27 = vcombine.high %v1910_v22, %v1914_v23  ;;  %v1774_v28 = vld [vmem:[%s14751_s28 + $0x2b80] sm:$0xff]  ;;  %10554 = vmatprep.subr.bf16.mxu0 %v13999_v26  ;;  %v14126_v33 = vcombine.low %v1910_v22, %v1914_v23  ;;  %v439_v22 = vld [vmem:[%s14751_s28 + $0x1c8] sm:$0xff] }
 0x1b9   : > { %v1778_v29 = vld [vmem:[%s14751_s28 + $0x2ba0] sm:$0xff]  ;;  %10596 = vmatpush1.bf16.msra.mxu1 %v14006_v25  ;;  %v443_v23 = vld [vmem:[%s14751_s28 + $0x1e8] sm:$0xff] }
 0x1ba   : > { %v1902_v30 = vld [vmem:[%s14751_s28 + $0x2f80] sm:$0xff]  ;;  %v13991_v34 = vcombine.high %v1774_v28, %v1778_v29  ;;  %10597 = vmatprep.subr.bf16.mxu1 %v14127_v27  ;;  %10555 = vmatpush2.bf16.msra.mxu0 %v13998_v32  ;;  %v13990_v40 = vcombine.low %v1774_v28, %v1778_v29  ;;  %v12657_v27 = vcombine.high %v439_v22, %v443_v23  ;;  %v435_v32 = vld [vmem:[%s14751_s28 + $0x1a8] sm:$0xff] }
 0x1bb   : > { %v1906_v31 = vld [vmem:[%s14751_s28 + $0x2fa0] sm:$0xff] }
 0x1bc   : > { %v14119_v35 = vcombine.high %v1902_v30, %v1906_v31  ;;  %v1766_v36 = vld [vmem:[%s14751_s28 + $0x2b40] sm:$0xff]  ;;  %10556 = vmatprep.subr.bf16.mxu0 %v13991_v34  ;;  %v14118_v41 = vcombine.low %v1902_v30, %v1906_v31  ;;  %v14329_v30 = vld [vmem:[#allocation2 + $0x50] ss:$100 sps:$4 sm:$0xff]  }
 0x1bd   : > { %v1770_v37 = vld [vmem:[%s14751_s28 + $0x2b60] sm:$0xff]  ;;  %10598 = vmatpush2.bf16.msra.mxu1 %v14126_v33  ;;  %v431_v31 = vld [vmem:[%s14751_s28 + $0x188] sm:$0xff]  ;;  %v14330_v33 = vld [vmem:[#allocation2 + $0x58] ss:$100 sps:$4 sm:$0xff]  }
 0x1be   : > { %v1894_v38 = vld [vmem:[%s14751_s28 + $0x2f40] sm:$0xff]  ;;  %v13983_v42 = vcombine.high %v1766_v36, %v1770_v37  ;;  %10599 = vmatprep.subr.bf16.mxu1 %v14119_v35  ;;  %10557 = vmatpush2.bf16.msra.mxu0 %v13990_v40  ;;  %v13982_v48 = vcombine.low %v1766_v36, %v1770_v37  ;;  %v12656_v35 = vcombine.low %v439_v22, %v443_v23  ;;  %v423_v40 = vld [vmem:[%s14751_s28 + $0x148] sm:$0xff] }
 0x1bf   : > { %v1898_v39 = vld [vmem:[%s14751_s28 + $0x2f60] sm:$0xff]  ;;  %v12649_v37 = vcombine.high %v431_v31, %v435_v32 }
 0x1c0   : > { %v14111_v43 = vcombine.high %v1894_v38, %v1898_v39  ;;  %v1758_v44 = vld [vmem:[%s14751_s28 + $0x2b00] sm:$0xff]  ;;  %10558 = vmatprep.subr.bf16.mxu0 %v13983_v42  ;;  %v14110_v49 = vcombine.low %v1894_v38, %v1898_v39 }
 0x1c1   : > { %v1762_v45 = vld [vmem:[%s14751_s28 + $0x2b20] sm:$0xff]  ;;  %10600 = vmatpush2.bf16.msra.mxu1 %v14118_v41  ;;  %v427_v41 = vld [vmem:[%s14751_s28 + $0x168] sm:$0xff] }
 0x1c2   : > { %v1886_v46 = vld [vmem:[%s14751_s28 + $0x2f00] sm:$0xff]  ;;  %v13975_v50 = vcombine.high %v1758_v44, %v1762_v45  ;;  %10601 = vmatprep.subr.bf16.mxu1 %v14111_v43  ;;  %10559 = vmatpush2.bf16.msra.mxu0 %v13982_v48  ;;  %v13974_v56 = vcombine.low %v1758_v44, %v1762_v45  ;;  %v12648_v43 = vcombine.low %v431_v31, %v435_v32  ;;  %v14586_v48 = vmov 0   ;;  %v559_v32 = vld [vmem:[%s14751_s28 + $0x588] sm:$0xff] }
 0x1c3   : > { %v1890_v47 = vld [vmem:[%s14751_s28 + $0x2f20] sm:$0xff]  ;;  %v12641_v45 = vcombine.high %v423_v40, %v427_v41 }
 0x1c4   : > { %v14103_v51 = vcombine.high %v1886_v46, %v1890_v47  ;;  %v1750_v52 = vld [vmem:[%s14751_s28 + $0x2ac0] sm:$0xff]  ;;  %10560 = vmatprep.subr.bf16.mxu0 %v13975_v50  ;;  %v14102_v57 = vcombine.low %v1886_v46, %v1890_v47  ;;  %v419_v50 = vld [vmem:[%s14751_s28 + $0x128] sm:$0xff] }
 0x1c5   : > { %v1754_v53 = vld [vmem:[%s14751_s28 + $0x2ae0] sm:$0xff]  ;;  %10602 = vmatpush2.bf16.msra.mxu1 %v14110_v49  ;;  %v415_v49 = vld [vmem:[%s14751_s28 + $0x108] sm:$0xff] }
 0x1c6   : > { %v1878_v54 = vld [vmem:[%s14751_s28 + $0x2ec0] sm:$0xff]  ;;  %v13967_v58 = vcombine.high %v1750_v52, %v1754_v53  ;;  %10603 = vmatprep.subr.bf16.mxu1 %v14103_v51  ;;  %10561 = vmatpush2.bf16.msra.mxu0 %v13974_v56  ;;  %v13966_v0 = vcombine.low %v1750_v52, %v1754_v53  ;;  %v12640_v53 = vcombine.low %v423_v40, %v427_v41  ;;  %v551_v41 = vld [vmem:[%s14751_s28 + $0x548] sm:$0xff] }
 0x1c7   : > { %v1882_v55 = vld [vmem:[%s14751_s28 + $0x2ee0] sm:$0xff] }
 0x1c8   : > { %v14095_v59 = vcombine.high %v1878_v54, %v1882_v55  ;;  %v1742_v60 = vld [vmem:[%s14751_s28 + $0x2a80] sm:$0xff]  ;;  %10562 = vmatprep.subr.bf16.mxu0 %v13967_v58  ;;  %v14094_v1 = vcombine.low %v1878_v54, %v1882_v55  ;;  %v12633_v55 = vcombine.high %v415_v49, %v419_v50  ;;  %v407_v58 = vld [vmem:[%s14751_s28 + $0xc8] sm:$0xff] }
 0x1c9   : > { %v1746_v61 = vld [vmem:[%s14751_s28 + $0x2aa0] sm:$0xff]  ;;  %10604 = vmatpush2.bf16.msra.mxu1 %v14102_v57 }
 0x1ca   : > { %v1870_v62 = vld [vmem:[%s14751_s28 + $0x2e80] sm:$0xff]  ;;  %v13959_v2 = vcombine.high %v1742_v60, %v1746_v61  ;;  %10605 = vmatprep.subr.bf16.mxu1 %v14095_v59  ;;  %10563 = vmatpush2.bf16.msra.mxu0 %v13966_v0  ;;  %v13958_v8 = vcombine.low %v1742_v60, %v1746_v61  ;;  %v411_v59 = vld [vmem:[%s14751_s28 + $0xe8] sm:$0xff]  ;;  %v12632_v61 = vcombine.low %v415_v49, %v419_v50 }
 0x1cb   : > { %v1874_v63 = vld [vmem:[%s14751_s28 + $0x2ea0] sm:$0xff] }
 0x1cc   : > { %v14087_v3 = vcombine.high %v1870_v62, %v1874_v63  ;;  %v1734_v4 = vld [vmem:[%s14751_s28 + $0x2a40] sm:$0xff]  ;;  %10564 = vmatprep.subr.bf16.mxu0 %v13959_v2  ;;  %v14086_v9 = vcombine.low %v1870_v62, %v1874_v63  ;;  %v12625_v63 = vcombine.high %v407_v58, %v411_v59  ;;  %v399_v2 = vld [vmem:[%s14751_s28 + $0x88] sm:$0xff] }
 0x1cd   : > { %v1738_v5 = vld [vmem:[%s14751_s28 + $0x2a60] sm:$0xff]  ;;  %10606 = vmatpush2.bf16.msra.mxu1 %v14094_v1 }
 0x1ce   : > { %v1862_v6 = vld [vmem:[%s14751_s28 + $0x2e40] sm:$0xff]  ;;  %v13951_v10 = vcombine.high %v1734_v4, %v1738_v5  ;;  %10607 = vmatprep.subr.bf16.mxu1 %v14087_v3  ;;  %10565 = vmatpush2.bf16.msra.mxu0 %v13958_v8  ;;  %v13950_v16 = vcombine.low %v1734_v4, %v1738_v5  ;;  %v403_v3 = vld [vmem:[%s14751_s28 + $0xa8] sm:$0xff]  ;;  %v12624_v5 = vcombine.low %v407_v58, %v411_v59 }
 0x1cf   : > { %v1866_v7 = vld [vmem:[%s14751_s28 + $0x2e60] sm:$0xff]  ;;  %v535_v59 = vld [vmem:[%s14751_s28 + $0x4c8] sm:$0xff] }
 0x1d0   : > { %v14079_v11 = vcombine.high %v1862_v6, %v1866_v7  ;;  %v1726_v12 = vld [vmem:[%s14751_s28 + $0x2a00] sm:$0xff]  ;;  %10566 = vmatprep.subr.bf16.mxu0 %v13951_v10  ;;  %v14078_v17 = vcombine.low %v1862_v6, %v1866_v7  ;;  %v12617_v7 = vcombine.high %v399_v2, %v403_v3  ;;  %v391_v10 = vld [vmem:[%s14751_s28 + $0x48] sm:$0xff] }
 0x1d1   : > { %v1730_v13 = vld [vmem:[%s14751_s28 + $0x2a20] sm:$0xff]  ;;  %10608 = vmatpush2.bf16.msra.mxu1 %v14086_v9 }
 0x1d2   : > { %v1854_v14 = vld [vmem:[%s14751_s28 + $0x2e00] sm:$0xff]  ;;  %v13943_v18 = vcombine.high %v1726_v12, %v1730_v13  ;;  %10609 = vmatprep.subr.bf16.mxu1 %v14079_v11  ;;  %10567 = vmatpush2.bf16.msra.mxu0 %v13950_v16  ;;  %v13942_v24 = vcombine.low %v1726_v12, %v1730_v13  ;;  %v395_v11 = vld [vmem:[%s14751_s28 + $0x68] sm:$0xff]  ;;  %v12616_v13 = vcombine.low %v399_v2, %v403_v3 }
 0x1d3   : > { %v1858_v15 = vld [vmem:[%s14751_s28 + $0x2e20] sm:$0xff]  ;;  %v527_v3 = vld [vmem:[%s14751_s28 + $0x488] sm:$0xff] }
 0x1d4   : > { %v14071_v19 = vcombine.high %v1854_v14, %v1858_v15  ;;  %v1974_v20 = vld [vmem:[%s14751_s28 + $0x31c0] sm:$0xff]  ;;  %10568 = vmatprep.subr.bf16.mxu0 %v13943_v18  ;;  %v14070_v25 = vcombine.low %v1854_v14, %v1858_v15  ;;  %v12609_v15 = vcombine.high %v391_v10, %v395_v11  ;;  %v383_v18 = vld [vmem:[%s14751_s28 + $0x8] sm:$0xff] }
 0x1d5   : > { %v1978_v21 = vld [vmem:[%s14751_s28 + $0x31e0] sm:$0xff]  ;;  %10610 = vmatpush2.bf16.msra.mxu1 %v14078_v17 }
 0x1d6   : > { %v14191_v26 = vcombine.high %v1974_v20, %v1978_v21  ;;  %10611 = vmatprep.subr.bf16.mxu1 %v14071_v19  ;;  %v1966_v28 = vld [vmem:[%s14751_s28 + $0x3180] sm:$0xff]  ;;  %10569 = vmatpush2.bf16.msra.mxu0 %v13942_v24  ;;  %v14190_v34 = vcombine.low %v1974_v20, %v1978_v21  ;;  %v387_v19 = vld [vmem:[%s14751_s28 + $0x28] sm:$0xff]  ;;  %v12608_v21 = vcombine.low %v391_v10, %v395_v11 }
 0x1d7   : > { %v1970_v29 = vld [vmem:[%s14751_s28 + $0x31a0] sm:$0xff]  ;;  %v12601_v23 = vcombine.high %v383_v18, %v387_v19  ;;  %v567_v24 = vld [vmem:[%s14751_s28 + $0x5c8] sm:$0xff] }
 0x1d8   : > { %10624 = vmatprep.subr.bf16.mxu0 %v14191_v26  ;;  %v14183_v36 = vcombine.high %v1966_v28, %v1970_v29  ;;  %v1958_v38 = vld [vmem:[%s14751_s28 + $0x3140] sm:$0xff]  ;;  %v14182_v42 = vcombine.low %v1966_v28, %v1970_v29  ;;  %v503_v26 = vld [vmem:[%s14751_s28 + $0x3c8] sm:$0xff]  ;;  %v12600_v29 = vcombine.low %v383_v18, %v387_v19 }
 0x1d9   : > { %10612 = vmatpush2.bf16.msra.mxu1 %v14070_v25  ;;  %v1962_v39 = vld [vmem:[%s14751_s28 + $0x3160] sm:$0xff]  ;;  %10571 = vmatmul.mubr.bf16.vlgmr.msra.gmra.mxu0 %v14329_v30  ;;  %v571_v25 = vld [vmem:[%s14751_s28 + $0x5e8] sm:$0xff] }
 0x1da   : > { %10667 = vmatprep.subr.bf16.mxu1 %v12657_v27  ;;  %10625 = vmatpush1.bf16.msra.mxu0 %v14190_v34  ;;  %v14175_v44 = vcombine.high %v1958_v38, %v1962_v39  ;;  %v1950_v46 = vld [vmem:[%s14751_s28 + $0x3100] sm:$0xff]  ;;  %v14174_v52 = vcombine.low %v1958_v38, %v1962_v39  ;;  %v507_v27 = vld [vmem:[%s14751_s28 + $0x3e8] sm:$0xff]  ;;  %v12785_v30 = vcombine.high %v567_v24, %v571_v25  ;;  %v14331_v34 = vld [vmem:[#allocation2 + $0x60] ss:$100 sps:$4 sm:$0xff]  }
 0x1db   : > { %10626 = vmatprep.subr.bf16.mxu0 %v14183_v36  ;;  %v1954_v47 = vld [vmem:[%s14751_s28 + $0x3120] sm:$0xff]  ;;  %10656 = vmatprep.mubr.bf16.mxu0 %v14586_v48  ;;  %v12721_v31 = vcombine.high %v503_v26, %v507_v27  ;;  %v499_v36 = vld [vmem:[%s14751_s28 + $0x3a8] sm:$0xff]  ;;  %v12720_v38 = vcombine.low %v503_v26, %v507_v27 }
 0x1dc   : > { %10614 = vmatmul.mubr.bf16.vlgmr.msra.gmra.mxu1 %v14330_v33  ;;  %v14332_v51 = vld [vmem:[#allocation2 + $0x4] ss:$100 sps:$4 sm:$0xff]   ;;  %v14167_v54 = vcombine.high %v1950_v46, %v1954_v47  ;;  %v14166_v60 = vcombine.low %v1950_v46, %v1954_v47  ;;  %v563_v33 = vld [vmem:[%s14751_s28 + $0x5a8] sm:$0xff] }
 0x1dd   : > { %10668 = vmatpush1.bf16.msra.mxu1 %v12656_v35  ;;  %10699 = vmatprep.mubr.bf16.mxu1 %v14332_v51  ;;  %v1942_v56 = vld [vmem:[%s14751_s28 + $0x30c0] sm:$0xff]  ;;  %v495_v35 = vld [vmem:[%s14751_s28 + $0x388] sm:$0xff]  ;;  %v12777_v39 = vcombine.high %v559_v32, %v563_v33 }
 0x1de   : > { %10669 = vmatprep.subr.bf16.mxu1 %v12649_v37  ;;  %10627 = vmatpush1.bf16.msra.mxu0 %v14182_v42  ;;  %v1946_v57 = vld [vmem:[%s14751_s28 + $0x30e0] sm:$0xff]  ;;  %v12784_v37 = vcombine.low %v567_v24, %v571_v25  ;;  %v12713_v40 = vcombine.high %v495_v35, %v499_v36  ;;  %v555_v42 = vld [vmem:[%s14751_s28 + $0x568] sm:$0xff]  ;;  %v12712_v47 = vcombine.low %v495_v35, %v499_v36 }
 0x1df   : > { %10628 = vmatprep.subr.bf16.mxu0 %v14175_v44  ;;  %v14159_v62 = vcombine.high %v1942_v56, %v1946_v57  ;;  %v1934_v0 = vld [vmem:[%s14751_s28 + $0x3080] sm:$0xff]  ;;  %v14158_v4 = vcombine.low %v1942_v56, %v1946_v57  ;;  %v491_v44 = vld [vmem:[%s14751_s28 + $0x368] sm:$0xff]  ;;  %v12769_v49 = vcombine.high %v551_v41, %v555_v42 }
 0x1e0   : > { %v1938_v1 = vld [vmem:[%s14751_s28 + $0x30a0] sm:$0xff]  ;;  %v543_v51 = vld [vmem:[%s14751_s28 + $0x508] sm:$0xff] }
 0x1e1   : > { %10670 = vmatpush1.bf16.msra.mxu1 %v12648_v43  ;;  %v14151_v6 = vcombine.high %v1934_v0, %v1938_v1  ;;  %v1926_v8 = vld [vmem:[%s14751_s28 + $0x3040] sm:$0xff]  ;;  %v14150_v12 = vcombine.low %v1934_v0, %v1938_v1  ;;  %v487_v43 = vld [vmem:[%s14751_s28 + $0x348] sm:$0xff] }
 0x1e2   : > { %10671 = vmatprep.subr.bf16.mxu1 %v12641_v45  ;;  %10629 = vmatpush1.bf16.msra.mxu0 %v14174_v52  ;;  %v1930_v9 = vld [vmem:[%s14751_s28 + $0x3060] sm:$0xff]  ;;  %v12776_v45 = vcombine.low %v559_v32, %v563_v33  ;;  %v12705_v50 = vcombine.high %v487_v43, %v491_v44  ;;  %v547_v52 = vld [vmem:[%s14751_s28 + $0x528] sm:$0xff]  ;;  %v12704_v56 = vcombine.low %v487_v43, %v491_v44 }
 0x1e3   : > { %10630 = vmatprep.subr.bf16.mxu0 %v14167_v54  ;;  %v14143_v14 = vcombine.high %v1926_v8, %v1930_v9  ;;  %v1918_v16 = vld [vmem:[%s14751_s28 + $0x3000] sm:$0xff]  ;;  %v14142_v20 = vcombine.low %v1926_v8, %v1930_v9  ;;  %v483_v54 = vld [vmem:[%s14751_s28 + $0x328] sm:$0xff]  ;;  %v12761_v57 = vcombine.high %v543_v51, %v547_v52 }
 0x1e4   : > { %v1922_v17 = vld [vmem:[%s14751_s28 + $0x3020] sm:$0xff]  ;;  %v519_v11 = vld [vmem:[%s14751_s28 + $0x448] sm:$0xff] }
 0x1e5   : > { %10672 = vmatpush1.bf16.msra.mxu1 %v12640_v53  ;;  %v14135_v22 = vcombine.high %v1918_v16, %v1922_v17  ;;  %v14134_v28 = vcombine.low %v1918_v16, %v1922_v17  ;;  %v14333_v46 = vld [vmem:[#allocation2 + $0xc] ss:$100 sps:$4 sm:$0xff]  }
 0x1e6   : > { %10673 = vmatprep.subr.bf16.mxu1 %v12633_v55  ;;  %10631 = vmatpush1.bf16.msra.mxu0 %v14166_v60  ;;  %v479_v53 = vld [vmem:[%s14751_s28 + $0x308] sm:$0xff]  ;;  %v12768_v55 = vcombine.low %v551_v41, %v555_v42 }
 0x1e7   : > { %10632 = vmatprep.subr.bf16.mxu0 %v14159_v62  ;;  %v12697_v58 = vcombine.high %v479_v53, %v483_v54  ;;  %v539_v60 = vld [vmem:[%s14751_s28 + $0x4e8] sm:$0xff]  ;;  %v12696_v0 = vcombine.low %v479_v53, %v483_v54 }
 0x1e8   : > { %v475_v62 = vld [vmem:[%s14751_s28 + $0x2e8] sm:$0xff]  ;;  %v12753_v1 = vcombine.high %v535_v59, %v539_v60 }
 0x1e9   : > { %10674 = vmatpush1.bf16.msra.mxu1 %v12632_v61  ;;  %v471_v61 = vld [vmem:[%s14751_s28 + $0x2c8] sm:$0xff] }
 0x1ea   : > { %10675 = vmatprep.subr.bf16.mxu1 %v12625_v63  ;;  %10633 = vmatpush1.bf16.msra.mxu0 %v14158_v4  ;;  %v12760_v63 = vcombine.low %v543_v51, %v547_v52  ;;  %v12689_v2 = vcombine.high %v471_v61, %v475_v62  ;;  %v531_v4 = vld [vmem:[%s14751_s28 + $0x4a8] sm:$0xff]  ;;  %v12688_v8 = vcombine.low %v471_v61, %v475_v62 }
 0x1eb   : > { %10634 = vmatprep.subr.bf16.mxu0 %v14151_v6  ;;  %v467_v6 = vld [vmem:[%s14751_s28 + $0x2a8] sm:$0xff]  ;;  %v12745_v9 = vcombine.high %v527_v3, %v531_v4 }
 0x1ec   : > { %v511_v19 = vld [vmem:[%s14751_s28 + $0x408] sm:$0xff] }
 0x1ed   : > { %10676 = vmatpush1.bf16.msra.mxu1 %v12624_v5  ;;  %v463_v5 = vld [vmem:[%s14751_s28 + $0x288] sm:$0xff] }
 0x1ee   : > { %10677 = vmatprep.subr.bf16.mxu1 %v12617_v7  ;;  %10635 = vmatpush1.bf16.msra.mxu0 %v14150_v12  ;;  %v12752_v7 = vcombine.low %v535_v59, %v539_v60  ;;  %v12681_v10 = vcombine.high %v463_v5, %v467_v6  ;;  %v523_v12 = vld [vmem:[%s14751_s28 + $0x468] sm:$0xff]  ;;  %v12680_v16 = vcombine.low %v463_v5, %v467_v6 }
 0x1ef   : > { %10636 = vmatprep.subr.bf16.mxu0 %v14143_v14  ;;  %v459_v14 = vld [vmem:[%s14751_s28 + $0x268] sm:$0xff]  ;;  %v12737_v17 = vcombine.high %v519_v11, %v523_v12 }
 0x1f0   : > { %v631_v27 = vld [vmem:[%s14751_s28 + $0x7c8] sm:$0xff] }
 0x1f1   : > { %10678 = vmatpush1.bf16.msra.mxu1 %v12616_v13  ;;  %v455_v13 = vld [vmem:[%s14751_s28 + $0x248] sm:$0xff] }
 0x1f2   : > { %10679 = vmatprep.subr.bf16.mxu1 %v12609_v15  ;;  %10637 = vmatpush1.bf16.msra.mxu0 %v14142_v20  ;;  %v12744_v15 = vcombine.low %v527_v3, %v531_v4  ;;  %v12673_v18 = vcombine.high %v455_v13, %v459_v14  ;;  %v515_v20 = vld [vmem:[%s14751_s28 + $0x428] sm:$0xff]  ;;  %v12672_v24 = vcombine.low %v455_v13, %v459_v14 }
 0x1f3   : > { %10638 = vmatprep.subr.bf16.mxu0 %v14135_v22  ;;  %v451_v22 = vld [vmem:[%s14751_s28 + $0x228] sm:$0xff]  ;;  %v12729_v25 = vcombine.high %v511_v19, %v515_v20 }
 0x1f4   : > { %v623_v35 = vld [vmem:[%s14751_s28 + $0x788] sm:$0xff] }
 0x1f5   : > { %10680 = vmatpush1.bf16.msra.mxu1 %v12608_v21  ;;  %v447_v21 = vld [vmem:[%s14751_s28 + $0x208] sm:$0xff] }
 0x1f6   : > { %10681 = vmatprep.subr.bf16.mxu1 %v12601_v23  ;;  %10639 = vmatpush1.bf16.msra.mxu0 %v14134_v28  ;;  %v12736_v23 = vcombine.low %v519_v11, %v523_v12  ;;  %v12665_v26 = vcombine.high %v447_v21, %v451_v22  ;;  %v635_v28 = vld [vmem:[%s14751_s28 + $0x7e8] sm:$0xff]  ;;  %v12664_v32 = vcombine.low %v447_v21, %v451_v22 }
 0x1f7   : > { %10710 = vmatprep.subr.bf16.mxu0 %v12785_v30  ;;  %v699_v30 = vld [vmem:[%s14751_s28 + $0x9e8] sm:$0xff]  ;;  %v12849_v33 = vcombine.high %v631_v27, %v635_v28 }
 0x1f8   : > { %v627_v36 = vld [vmem:[%s14751_s28 + $0x7a8] sm:$0xff] }
 0x1f9   : > { %10682 = vmatpush1.bf16.msra.mxu1 %v12600_v29  ;;  %10657 = vmatmul.mubr.bf16.vlgmr.msra.gmra.mxu0 %v14331_v34  ;;  %v695_v29 = vld [vmem:[%s14751_s28 + $0x9c8] sm:$0xff]  ;;  %v12841_v41 = vcombine.high %v623_v35, %v627_v36 }
 0x1fa   : > { %10683 = vmatprep.subr.bf16.mxu1 %v12721_v31  ;;  %10711 = vmatpush1.bf16.msra.mxu0 %v12784_v37  ;;  %v12728_v31 = vcombine.low %v511_v19, %v515_v20  ;;  %v12913_v34 = vcombine.high %v695_v29, %v699_v30  ;;  %v687_v37 = vld [vmem:[%s14751_s28 + $0x988] sm:$0xff] }
 0x1fb   : > { %10742 = vmatprep.mubr.bf16.mxu0 %v14333_v46  ;;  %10712 = vmatprep.subr.bf16.mxu0 %v12777_v39  ;;  %v12848_v39 = vcombine.low %v631_v27, %v635_v28  ;;  %v615_v43 = vld [vmem:[%s14751_s28 + $0x748] sm:$0xff] }
 0x1fc   : > { %v619_v44 = vld [vmem:[%s14751_s28 + $0x768] sm:$0xff] }
 0x1fd   : > { %10684 = vmatpush2.bf16.msra.mxu1 %v12720_v38  ;;  %v691_v38 = vld [vmem:[%s14751_s28 + $0x9a8] sm:$0xff]  ;;  %v12833_v51 = vcombine.high %v615_v43, %v619_v44 }
 0x1fe   : > { %10685 = vmatprep.subr.bf16.mxu1 %v12713_v40  ;;  %10713 = vmatpush1.bf16.msra.mxu0 %v12776_v45  ;;  %v12912_v40 = vcombine.low %v695_v29, %v699_v30  ;;  %v12905_v42 = vcombine.high %v687_v37, %v691_v38  ;;  %v679_v45 = vld [vmem:[%s14751_s28 + $0x948] sm:$0xff] }
 0x1ff   : > { %10714 = vmatprep.subr.bf16.mxu0 %v12769_v49  ;;  %v683_v46 = vld [vmem:[%s14751_s28 + $0x968] sm:$0xff]  ;;  %v12840_v49 = vcombine.low %v623_v35, %v627_v36 }
 0x200   : > { %v12897_v52 = vcombine.high %v679_v45, %v683_v46  ;;  %v607_v53 = vld [vmem:[%s14751_s28 + $0x708] sm:$0xff]  ;;  %v12896_v59 = vcombine.low %v679_v45, %v683_v46 }
 0x201   : > { %10686 = vmatpush2.bf16.msra.mxu1 %v12712_v47  ;;  %v14334_v47 = vld [vmem:[#allocation2] ss:$100 sps:$4 sm:$0xff]   ;;  %v611_v54 = vld [vmem:[%s14751_s28 + $0x728] sm:$0xff] }
 0x202   : > { %10687 = vmatprep.subr.bf16.mxu1 %v12705_v50  ;;  %10715 = vmatpush1.bf16.msra.mxu0 %v12768_v55  ;;  %v12904_v50 = vcombine.low %v687_v37, %v691_v38  ;;  %v14335_v55 = vld [vmem:[#allocation2 + $0x14] ss:$100 sps:$4 sm:$0xff]   ;;  %v12825_v60 = vcombine.high %v607_v53, %v611_v54 }
 0x203   : > { %10716 = vmatprep.subr.bf16.mxu0 %v12761_v57  ;;  %v675_v57 = vld [vmem:[%s14751_s28 + $0x928] sm:$0xff] }
 0x204   : > { %v599_v62 = vld [vmem:[%s14751_s28 + $0x6c8] sm:$0xff] }
 0x205   : > { %10688 = vmatpush2.bf16.msra.mxu1 %v12704_v56  ;;  %v671_v56 = vld [vmem:[%s14751_s28 + $0x908] sm:$0xff] }
 0x206   : > { %10689 = vmatprep.subr.bf16.mxu1 %v12697_v58  ;;  %10717 = vmatpush1.bf16.msra.mxu0 %v12760_v63  ;;  %v12832_v58 = vcombine.low %v615_v43, %v619_v44  ;;  %v12889_v61 = vcombine.high %v671_v56, %v675_v57  ;;  %v603_v63 = vld [vmem:[%s14751_s28 + $0x6e8] sm:$0xff]  ;;  %v12888_v3 = vcombine.low %v671_v56, %v675_v57 }
 0x207   : > { %10718 = vmatprep.subr.bf16.mxu0 %v12753_v1  ;;  %v667_v1 = vld [vmem:[%s14751_s28 + $0x8e8] sm:$0xff]  ;;  %v12817_v4 = vcombine.high %v599_v62, %v603_v63 }
 0x208   : > { %v591_v6 = vld [vmem:[%s14751_s28 + $0x688] sm:$0xff] }
 0x209   : > { %10690 = vmatpush2.bf16.msra.mxu1 %v12696_v0  ;;  %v663_v0 = vld [vmem:[%s14751_s28 + $0x8c8] sm:$0xff] }
 0x20a   : > { %10691 = vmatprep.subr.bf16.mxu1 %v12689_v2  ;;  %10719 = vmatpush1.bf16.msra.mxu0 %v12752_v7  ;;  %v12824_v2 = vcombine.low %v607_v53, %v611_v54  ;;  %v12881_v5 = vcombine.high %v663_v0, %v667_v1  ;;  %v595_v7 = vld [vmem:[%s14751_s28 + $0x6a8] sm:$0xff]  ;;  %v12880_v11 = vcombine.low %v663_v0, %v667_v1  ;;  %v14337_v53 = vld [vmem:[#allocation2 + $0x1c] ss:$100 sps:$4 sm:$0xff]  }
 0x20b   : > { %10720 = vmatprep.subr.bf16.mxu0 %v12745_v9  ;;  %v659_v9 = vld [vmem:[%s14751_s28 + $0x8a8] sm:$0xff]  ;;  %v12809_v12 = vcombine.high %v591_v6, %v595_v7 }
 0x20c   : > { %v583_v14 = vld [vmem:[%s14751_s28 + $0x648] sm:$0xff] }
 0x20d   : > { %10692 = vmatpush2.bf16.msra.mxu1 %v12688_v8  ;;  %v655_v8 = vld [vmem:[%s14751_s28 + $0x888] sm:$0xff] }
 0x20e   : > { %10693 = vmatprep.subr.bf16.mxu1 %v12681_v10  ;;  %10721 = vmatpush1.bf16.msra.mxu0 %v12744_v15  ;;  %v12816_v10 = vcombine.low %v599_v62, %v603_v63  ;;  %v12873_v13 = vcombine.high %v655_v8, %v659_v9  ;;  %v587_v15 = vld [vmem:[%s14751_s28 + $0x668] sm:$0xff]  ;;  %v12872_v19 = vcombine.low %v655_v8, %v659_v9 }
 0x20f   : > { %10722 = vmatprep.subr.bf16.mxu0 %v12737_v17  ;;  %v651_v17 = vld [vmem:[%s14751_s28 + $0x868] sm:$0xff]  ;;  %v12801_v20 = vcombine.high %v583_v14, %v587_v15 }
 0x210   : > { %v575_v22 = vld [vmem:[%s14751_s28 + $0x608] sm:$0xff] }
 0x211   : > { %10694 = vmatpush2.bf16.msra.mxu1 %v12680_v16  ;;  %v647_v16 = vld [vmem:[%s14751_s28 + $0x848] sm:$0xff] }
 0x212   : > { %10695 = vmatprep.subr.bf16.mxu1 %v12673_v18  ;;  %10723 = vmatpush1.bf16.msra.mxu0 %v12736_v23  ;;  %v12808_v18 = vcombine.low %v591_v6, %v595_v7  ;;  %v12865_v21 = vcombine.high %v647_v16, %v651_v17  ;;  %v579_v23 = vld [vmem:[%s14751_s28 + $0x628] sm:$0xff]  ;;  %v12864_v27 = vcombine.low %v647_v16, %v651_v17 }
 0x213   : > { %10724 = vmatprep.subr.bf16.mxu0 %v12729_v25  ;;  %v643_v25 = vld [vmem:[%s14751_s28 + $0x828] sm:$0xff]  ;;  %v12793_v28 = vcombine.high %v575_v22, %v579_v23 }
 0x214   : > { %v823_v30 = vld [vmem:[%s14751_s28 + $0xdc8] sm:$0xff] }
 0x215   : > { %10696 = vmatpush2.bf16.msra.mxu1 %v12672_v24  ;;  %v639_v24 = vld [vmem:[%s14751_s28 + $0x808] sm:$0xff] }
 0x216   : > { %10697 = vmatprep.subr.bf16.mxu1 %v12665_v26  ;;  %10725 = vmatpush1.bf16.msra.mxu0 %v12728_v31  ;;  %v12800_v26 = vcombine.low %v583_v14, %v587_v15  ;;  %v12857_v29 = vcombine.high %v639_v24, %v643_v25  ;;  %v827_v31 = vld [vmem:[%s14751_s28 + $0xde8] sm:$0xff]  ;;  %v12856_v35 = vcombine.low %v639_v24, %v643_v25 }
 0x217   : > { %10726 = vmatprep.subr.bf16.mxu0 %v12849_v33  ;;  %v763_v33 = vld [vmem:[%s14751_s28 + $0xbe8] sm:$0xff]  ;;  %v13041_v36 = vcombine.high %v823_v30, %v827_v31 }
 0x218   : > { %v815_v38 = vld [vmem:[%s14751_s28 + $0xd88] sm:$0xff] }
 0x219   : > { %10698 = vmatpush2.bf16.msra.mxu1 %v12664_v32  ;;  %v759_v32 = vld [vmem:[%s14751_s28 + $0xbc8] sm:$0xff] }
 0x21a   : > { %10753 = vmatprep.subr.bf16.mxu1 %v12913_v34  ;;  %10727 = vmatpush2.bf16.msra.mxu0 %v12848_v39  ;;  %v12792_v34 = vcombine.low %v575_v22, %v579_v23  ;;  %v12977_v37 = vcombine.high %v759_v32, %v763_v33  ;;  %v819_v39 = vld [vmem:[%s14751_s28 + $0xda8] sm:$0xff]  ;;  %v12976_v43 = vcombine.low %v759_v32, %v763_v33 }
 0x21b   : > { %10728 = vmatprep.subr.bf16.mxu0 %v12841_v41  ;;  %v755_v41 = vld [vmem:[%s14751_s28 + $0xba8] sm:$0xff]  ;;  %v13033_v44 = vcombine.high %v815_v38, %v819_v39 }
 0x21c   : > { %10700 = vmatmul.mubr.bf16.vlgmr.msra.gmra.mxu1 %v14334_v47  ;;  %v807_v46 = vld [vmem:[%s14751_s28 + $0xd48] sm:$0xff] }
 0x21d   : > { %10754 = vmatpush1.bf16.msra.mxu1 %v12912_v40  ;;  %10785 = vmatprep.mubr.bf16.mxu1 %v14335_v55  ;;  %v751_v40 = vld [vmem:[%s14751_s28 + $0xb88] sm:$0xff] }
 0x21e   : > { %10755 = vmatprep.subr.bf16.mxu1 %v12905_v42  ;;  %10729 = vmatpush2.bf16.msra.mxu0 %v12840_v49  ;;  %v13040_v42 = vcombine.low %v823_v30, %v827_v31  ;;  %v12969_v45 = vcombine.high %v751_v40, %v755_v41  ;;  %v811_v47 = vld [vmem:[%s14751_s28 + $0xd68] sm:$0xff]  ;;  %v14336_v49 = vld [vmem:[#allocation2 + $0x8] ss:$100 sps:$4 sm:$0xff]   ;;  %v12968_v54 = vcombine.low %v751_v40, %v755_v41 }
 0x21f   : > { %10730 = vmatprep.subr.bf16.mxu0 %v12833_v51  ;;  %v747_v51 = vld [vmem:[%s14751_s28 + $0xb68] sm:$0xff]  ;;  %v13025_v55 = vcombine.high %v807_v46, %v811_v47 }
 0x220   : > { %v799_v57 = vld [vmem:[%s14751_s28 + $0xd08] sm:$0xff] }
 0x221   : > { %10756 = vmatpush1.bf16.msra.mxu1 %v12904_v50  ;;  %v743_v50 = vld [vmem:[%s14751_s28 + $0xb48] sm:$0xff] }
 0x222   : > { %10757 = vmatprep.subr.bf16.mxu1 %v12897_v52  ;;  %10731 = vmatpush2.bf16.msra.mxu0 %v12832_v58  ;;  %v13032_v52 = vcombine.low %v815_v38, %v819_v39  ;;  %v12961_v56 = vcombine.high %v743_v50, %v747_v51  ;;  %v803_v58 = vld [vmem:[%s14751_s28 + $0xd28] sm:$0xff]  ;;  %v12960_v62 = vcombine.low %v743_v50, %v747_v51 }
 0x223   : > { %10732 = vmatprep.subr.bf16.mxu0 %v12825_v60  ;;  %v739_v60 = vld [vmem:[%s14751_s28 + $0xb28] sm:$0xff]  ;;  %v13017_v63 = vcombine.high %v799_v57, %v803_v58 }
 0x224   : > { %v791_v1 = vld [vmem:[%s14751_s28 + $0xcc8] sm:$0xff] }
 0x225   : > { %10758 = vmatpush1.bf16.msra.mxu1 %v12896_v59  ;;  %v735_v59 = vld [vmem:[%s14751_s28 + $0xb08] sm:$0xff] }
 0x226   : > { %10759 = vmatprep.subr.bf16.mxu1 %v12889_v61  ;;  %10733 = vmatpush2.bf16.msra.mxu0 %v12824_v2  ;;  %v13024_v61 = vcombine.low %v807_v46, %v811_v47  ;;  %v12953_v0 = vcombine.high %v735_v59, %v739_v60  ;;  %v795_v2 = vld [vmem:[%s14751_s28 + $0xce8] sm:$0xff]  ;;  %v12952_v6 = vcombine.low %v735_v59, %v739_v60 }
 0x227   : > { %10734 = vmatprep.subr.bf16.mxu0 %v12817_v4  ;;  %v731_v4 = vld [vmem:[%s14751_s28 + $0xae8] sm:$0xff]  ;;  %v13009_v7 = vcombine.high %v791_v1, %v795_v2 }
 0x228   : > { %v783_v9 = vld [vmem:[%s14751_s28 + $0xc88] sm:$0xff] }
 0x229   : > { %10760 = vmatpush1.bf16.msra.mxu1 %v12888_v3  ;;  %v727_v3 = vld [vmem:[%s14751_s28 + $0xac8] sm:$0xff] }
 0x22a   : > { %10761 = vmatprep.subr.bf16.mxu1 %v12881_v5  ;;  %10735 = vmatpush2.bf16.msra.mxu0 %v12816_v10  ;;  %v13016_v5 = vcombine.low %v799_v57, %v803_v58  ;;  %v12945_v8 = vcombine.high %v727_v3, %v731_v4  ;;  %v787_v10 = vld [vmem:[%s14751_s28 + $0xca8] sm:$0xff]  ;;  %v12944_v14 = vcombine.low %v727_v3, %v731_v4 }
 0x22b   : > { %10736 = vmatprep.subr.bf16.mxu0 %v12809_v12  ;;  %v723_v12 = vld [vmem:[%s14751_s28 + $0xaa8] sm:$0xff]  ;;  %v13001_v15 = vcombine.high %v783_v9, %v787_v10 }
 0x22c   : > { %v775_v17 = vld [vmem:[%s14751_s28 + $0xc48] sm:$0xff] }
 0x22d   : > { %10762 = vmatpush1.bf16.msra.mxu1 %v12880_v11  ;;  %v719_v11 = vld [vmem:[%s14751_s28 + $0xa88] sm:$0xff] }
 0x22e   : > { %10763 = vmatprep.subr.bf16.mxu1 %v12873_v13  ;;  %10737 = vmatpush2.bf16.msra.mxu0 %v12808_v18  ;;  %v13008_v13 = vcombine.low %v791_v1, %v795_v2  ;;  %v12937_v16 = vcombine.high %v719_v11, %v723_v12  ;;  %v779_v18 = vld [vmem:[%s14751_s28 + $0xc68] sm:$0xff]  ;;  %v12936_v22 = vcombine.low %v719_v11, %v723_v12 }
 0x22f   : > { %10738 = vmatprep.subr.bf16.mxu0 %v12801_v20  ;;  %v715_v20 = vld [vmem:[%s14751_s28 + $0xa68] sm:$0xff]  ;;  %v12993_v23 = vcombine.high %v775_v17, %v779_v18 }
 0x230   : > { %v767_v25 = vld [vmem:[%s14751_s28 + $0xc08] sm:$0xff] }
 0x231   : > { %10764 = vmatpush1.bf16.msra.mxu1 %v12872_v19  ;;  %v711_v19 = vld [vmem:[%s14751_s28 + $0xa48] sm:$0xff] }
 0x232   : > { %10765 = vmatprep.subr.bf16.mxu1 %v12865_v21  ;;  %10739 = vmatpush2.bf16.msra.mxu0 %v12800_v26  ;;  %v13000_v21 = vcombine.low %v783_v9, %v787_v10  ;;  %v12929_v24 = vcombine.high %v711_v19, %v715_v20  ;;  %v771_v26 = vld [vmem:[%s14751_s28 + $0xc28] sm:$0xff]  ;;  %v12928_v30 = vcombine.low %v711_v19, %v715_v20 }
 0x233   : > { %10740 = vmatprep.subr.bf16.mxu0 %v12793_v28  ;;  %v707_v28 = vld [vmem:[%s14751_s28 + $0xa28] sm:$0xff]  ;;  %v12985_v31 = vcombine.high %v767_v25, %v771_v26 }
 0x234   : > { %v887_v33 = vld [vmem:[%s14751_s28 + $0xfc8] sm:$0xff] }
 0x235   : > { %10766 = vmatpush1.bf16.msra.mxu1 %v12864_v27  ;;  %v703_v27 = vld [vmem:[%s14751_s28 + $0xa08] sm:$0xff] }
 0x236   : > { %10767 = vmatprep.subr.bf16.mxu1 %v12857_v29  ;;  %10741 = vmatpush2.bf16.msra.mxu0 %v12792_v34  ;;  %v12992_v29 = vcombine.low %v775_v17, %v779_v18  ;;  %v12921_v32 = vcombine.high %v703_v27, %v707_v28  ;;  %v891_v34 = vld [vmem:[%s14751_s28 + $0xfe8] sm:$0xff]  ;;  %v12920_v38 = vcombine.low %v703_v27, %v707_v28  ;;  %v15302_v27 = vpop.f32.mrf.mxu1 }
 0x237   : > { %10796 = vmatprep.subr.bf16.mxu0 %v13041_v36  ;;  %v955_v36 = vld [vmem:[%s14751_s28 + $0x11e8] sm:$0xff]  ;;  %v13105_v39 = vcombine.high %v887_v33, %v891_v34 }
 0x238   : > { %v879_v41 = vld [vmem:[%s14751_s28 + $0xf88] sm:$0xff] }
 0x239   : > { %10768 = vmatpush1.bf16.msra.mxu1 %v12856_v35  ;;  %10743 = vmatmul.mubr.bf16.vlgmr.msra.gmra.mxu0 %v14336_v49  ;;  %v951_v35 = vld [vmem:[%s14751_s28 + $0x11c8] sm:$0xff] }
 0x23a   : > { %10769 = vmatprep.subr.bf16.mxu1 %v12977_v37  ;;  %10797 = vmatpush1.bf16.msra.mxu0 %v13040_v42  ;;  %v12984_v37 = vcombine.low %v767_v25, %v771_v26  ;;  %v13169_v40 = vcombine.high %v951_v35, %v955_v36  ;;  %v883_v42 = vld [vmem:[%s14751_s28 + $0xfa8] sm:$0xff]  ;;  %v13168_v46 = vcombine.low %v951_v35, %v955_v36 }
 0x23b   : > { %10828 = vmatprep.mubr.bf16.mxu0 %v14337_v53  ;;  %10798 = vmatprep.subr.bf16.mxu0 %v13033_v44  ;;  %v947_v44 = vld [vmem:[%s14751_s28 + $0x11a8] sm:$0xff]  ;;  %v13097_v47 = vcombine.high %v879_v41, %v883_v42 }
 0x23c   : > { %v871_v50 = vld [vmem:[%s14751_s28 + $0xf48] sm:$0xff] }
 0x23d   : > { %10770 = vmatpush2.bf16.msra.mxu1 %v12976_v43  ;;  %v943_v43 = vld [vmem:[%s14751_s28 + $0x1188] sm:$0xff] }
 0x23e   : > { %10771 = vmatprep.subr.bf16.mxu1 %v12969_v45  ;;  %10799 = vmatpush1.bf16.msra.mxu0 %v13032_v52  ;;  %v13104_v45 = vcombine.low %v887_v33, %v891_v34  ;;  %v13161_v49 = vcombine.high %v943_v43, %v947_v44  ;;  %v875_v51 = vld [vmem:[%s14751_s28 + $0xf68] sm:$0xff] }
 0x23f   : > { %10800 = vmatprep.subr.bf16.mxu0 %v13025_v55  ;;  %v935_v52 = vld [vmem:[%s14751_s28 + $0x1148] sm:$0xff]  ;;  %v13096_v55 = vcombine.low %v879_v41, %v883_v42  ;;  %v13089_v57 = vcombine.high %v871_v50, %v875_v51 }
 0x240   : > { %v939_v53 = vld [vmem:[%s14751_s28 + $0x1168] sm:$0xff] }
 0x241   : > { %10772 = vmatpush2.bf16.msra.mxu1 %v12968_v54  ;;  %v14338_v54 = vld [vmem:[#allocation2 + $0x10] ss:$100 sps:$4 sm:$0xff]   ;;  %v13153_v58 = vcombine.high %v935_v52, %v939_v53  ;;  %v13152_v1 = vcombine.low %v935_v52, %v939_v53 }
 0x242   : > { %10773 = vmatprep.subr.bf16.mxu1 %v12961_v56  ;;  %10801 = vmatpush1.bf16.msra.mxu0 %v13024_v61  ;;  %v13160_v56 = vcombine.low %v943_v43, %v947_v44  ;;  %v863_v59 = vld [vmem:[%s14751_s28 + $0xf08] sm:$0xff]  ;;  %v14339_v61 = vld [vmem:[#allocation2 + $0x24] ss:$100 sps:$4 sm:$0xff]  }
 0x243   : > { %10802 = vmatprep.subr.bf16.mxu0 %v13017_v63  ;;  %v867_v60 = vld [vmem:[%s14751_s28 + $0xf28] sm:$0xff] }
 0x244   : > { %v931_v63 = vld [vmem:[%s14751_s28 + $0x1128] sm:$0xff]  ;;  %v13081_v2 = vcombine.high %v863_v59, %v867_v60 }
 0x245   : > { %10774 = vmatpush2.bf16.msra.mxu1 %v12960_v62  ;;  %v927_v62 = vld [vmem:[%s14751_s28 + $0x1108] sm:$0xff] }
 0x246   : > { %10775 = vmatprep.subr.bf16.mxu1 %v12953_v0  ;;  %10803 = vmatpush1.bf16.msra.mxu0 %v13016_v5  ;;  %v13088_v0 = vcombine.low %v871_v50, %v875_v51  ;;  %v13145_v3 = vcombine.high %v927_v62, %v931_v63  ;;  %v855_v4 = vld [vmem:[%s14751_s28 + $0xec8] sm:$0xff]  ;;  %v13144_v9 = vcombine.low %v927_v62, %v931_v63 }
 0x247   : > { %10804 = vmatprep.subr.bf16.mxu0 %v13009_v7  ;;  %v859_v5 = vld [vmem:[%s14751_s28 + $0xee8] sm:$0xff] }
 0x248   : > { %v923_v7 = vld [vmem:[%s14751_s28 + $0x10e8] sm:$0xff]  ;;  %v13073_v10 = vcombine.high %v855_v4, %v859_v5  ;;  %v13072_v17 = vcombine.low %v855_v4, %v859_v5 }
 0x249   : > { %10776 = vmatpush2.bf16.msra.mxu1 %v12952_v6  ;;  %v919_v6 = vld [vmem:[%s14751_s28 + $0x10c8] sm:$0xff] }
 0x24a   : > { %10777 = vmatprep.subr.bf16.mxu1 %v12945_v8  ;;  %10805 = vmatpush1.bf16.msra.mxu0 %v13008_v13  ;;  %v13080_v8 = vcombine.low %v863_v59, %v867_v60  ;;  %v13137_v11 = vcombine.high %v919_v6, %v923_v7  ;;  %v847_v12 = vld [vmem:[%s14751_s28 + $0xe88] sm:$0xff]  ;;  %v13136_v18 = vcombine.low %v919_v6, %v923_v7 }
 0x24b   : > { %10806 = vmatprep.subr.bf16.mxu0 %v13001_v15  ;;  %v851_v13 = vld [vmem:[%s14751_s28 + $0xea8] sm:$0xff] }
 0x24c   : > { %v911_v15 = vld [vmem:[%s14751_s28 + $0x1088] sm:$0xff]  ;;  %v13065_v19 = vcombine.high %v847_v12, %v851_v13  ;;  %v13064_v26 = vcombine.low %v847_v12, %v851_v13 }
 0x24d   : > { %10778 = vmatpush2.bf16.msra.mxu1 %v12944_v14  ;;  %v15292_v14 = vpop.f32.mrf.mxu0  ;;  %v907_v25 = vld [vmem:[%s14751_s28 + $0x1068] sm:$0xff] }
 0x24e   : > { %10779 = vmatprep.subr.bf16.mxu1 %v12937_v16  ;;  %10807 = vmatpush1.bf16.msra.mxu0 %v13000_v21  ;;  %v915_v16 = vld [vmem:[%s14751_s28 + $0x10a8] sm:$0xff] }
 0x24f   : > { %10808 = vmatprep.subr.bf16.mxu0 %v12993_v23  ;;  %v13129_v20 = vcombine.high %v911_v15, %v915_v16  ;;  %v839_v21 = vld [vmem:[%s14751_s28 + $0xe48] sm:$0xff]  ;;  %v15298_v23 = vpop.f32.mrf.mxu0  ;;  %v13128_v28 = vcombine.low %v911_v15, %v915_v16 }
 0x250   : > { %v895_v34 = vld [vmem:[%s14751_s28 + $0x1008] sm:$0xff] }
 0x251   : > { %10780 = vmatpush2.bf16.msra.mxu1 %v12936_v22  ;;  %v843_v22 = vld [vmem:[%s14751_s28 + $0xe68] sm:$0xff]  ;;  %v15306_v33 = vpop.f32.mrf.mxu0 }
 0x252   : > { %10781 = vmatprep.subr.bf16.mxu1 %v12929_v24  ;;  %10809 = vmatpush1.bf16.msra.mxu0 %v12992_v29  ;;  %v903_v24 = vld [vmem:[%s14751_s28 + $0x1048] sm:$0xff]  ;;  %v13057_v29 = vcombine.high %v839_v21, %v843_v22  ;;  %v13056_v36 = vcombine.low %v839_v21, %v843_v22 }
 0x253   : > { %10810 = vmatprep.subr.bf16.mxu0 %v12985_v31  ;;  %v831_v31 = vld [vmem:[%s14751_s28 + $0xe08] sm:$0xff]  ;;  %v15314_v43 = vpop.f32.mrf.mxu0 }
 0x254   : > { %v899_v35 = vld [vmem:[%s14751_s28 + $0x1028] sm:$0xff] }
 0x255   : > { %10782 = vmatpush2.bf16.msra.mxu1 %v12928_v30  ;;  %v13121_v30 = vcombine.high %v903_v24, %v907_v25  ;;  %v1079_v41 = vld [vmem:[%s14751_s28 + $0x15c8] sm:$0xff]  ;;  %v13112_v50 = vcombine.low %v895_v34, %v899_v35 }
 0x256   : > { %10783 = vmatprep.subr.bf16.mxu1 %v12921_v32  ;;  %10811 = vmatpush1.bf16.msra.mxu0 %v12984_v37  ;;  %v835_v32 = vld [vmem:[%s14751_s28 + $0xe28] sm:$0xff]  ;;  %v15310_v37 = vpop.f32.mrf.mxu1 }
 0x257   : > { %10812 = vmatprep.subr.bf16.mxu0 %v13105_v39  ;;  %v13049_v39 = vcombine.high %v831_v31, %v835_v32  ;;  %v1083_v42 = vld [vmem:[%s14751_s28 + $0x15e8] sm:$0xff] }
 0x258   : > { %v1015_v44 = vld [vmem:[%s14751_s28 + $0x13c8] sm:$0xff]  ;;  %v13297_v51 = vcombine.high %v1079_v41, %v1083_v42 }
 0x259   : > { %10784 = vmatpush2.bf16.msra.mxu1 %v12920_v38  ;;  %v13120_v38 = vcombine.low %v903_v24, %v907_v25  ;;  %v1071_v53 = vld [vmem:[%s14751_s28 + $0x1588] sm:$0xff] }
 0x25a   : > { %10839 = vmatprep.subr.bf16.mxu1 %v13169_v40  ;;  %10813 = vmatpush2.bf16.msra.mxu0 %v13104_v45  ;;  %v13113_v40 = vcombine.high %v895_v34, %v899_v35  ;;  %v1019_v45 = vld [vmem:[%s14751_s28 + $0x13e8] sm:$0xff] }
 0x25b   : > { %10814 = vmatprep.subr.bf16.mxu0 %v13097_v47  ;;  %v15318_v47 = vpop.f32.mrf.mxu1  ;;  %v13233_v52 = vcombine.high %v1015_v44, %v1019_v45  ;;  %v13232_v60 = vcombine.low %v1015_v44, %v1019_v45  ;;  %v1063_v63 = vld [vmem:[%s14751_s28 + $0x1548] sm:$0xff] }
 0x25c   : > { %10786 = vmatmul.mubr.bf16.vlgmr.msra.gmra.mxu1 %v14338_v54  ;;  %v1075_v54 = vld [vmem:[%s14751_s28 + $0x15a8] sm:$0xff] }
 0x25d   : > { %10840 = vmatpush1.bf16.msra.mxu1 %v13168_v46  ;;  %10871 = vmatprep.mubr.bf16.mxu1 %v14339_v61  ;;  %v13048_v46 = vcombine.low %v831_v31, %v835_v32  ;;  %v13289_v61 = vcombine.high %v1071_v53, %v1075_v54  ;;  %v1003_v4 = vld [vmem:[%s14751_s28 + $0x1368] sm:$0xff]  ;;  %v13288_v5 = vcombine.low %v1071_v53, %v1075_v54 }
 0x25e   : > { %10841 = vmatprep.subr.bf16.mxu1 %v13161_v49  ;;  %10815 = vmatpush2.bf16.msra.mxu0 %v13096_v55  ;;  %v15320_v49 = vpop.f32.mrf.mxu0  ;;  %v1007_v55 = vld [vmem:[%s14751_s28 + $0x1388] sm:$0xff] }
 0x25f   : > { %10816 = vmatprep.subr.bf16.mxu0 %v13089_v57  ;;  %v13296_v57 = vcombine.low %v1079_v41, %v1083_v42  ;;  %v14341_v6 = vld [vmem:[#allocation2 + $0x2c] ss:$100 sps:$4 sm:$0xff]  }
 0x260   : > { %v15328_v59 = vpop.f32.mrf.mxu0  ;;  %v1059_v12 = vld [vmem:[%s14751_s28 + $0x1528] sm:$0xff] }
 0x261   : > { %10842 = vmatpush1.bf16.msra.mxu1 %v13160_v56  ;;  %v1011_v56 = vld [vmem:[%s14751_s28 + $0x13a8] sm:$0xff] }
 0x262   : > { %10843 = vmatprep.subr.bf16.mxu1 %v13153_v58  ;;  %10817 = vmatpush2.bf16.msra.mxu0 %v13088_v0  ;;  %v15326_v58 = vpop.f32.mrf.mxu1  ;;  %v13225_v62 = vcombine.high %v1007_v55, %v1011_v56  ;;  %v1067_v0 = vld [vmem:[%s14751_s28 + $0x1568] sm:$0xff]  ;;  %v15336_v7 = vpop.f32.mrf.mxu0 }
 0x263   : > { %10818 = vmatprep.subr.bf16.mxu0 %v13081_v2  ;;  %v14340_v2 = vld [vmem:[#allocation2 + $0x18] ss:$100 sps:$4 sm:$0xff]   ;;  %v991_v15 = vld [vmem:[%s14751_s28 + $0x1308] sm:$0xff] }
 0x264   : > { %v995_v16 = vld [vmem:[%s14751_s28 + $0x1328] sm:$0xff] }
 0x265   : > { %10844 = vmatpush1.bf16.msra.mxu1 %v13152_v1  ;;  %v15332_v1 = vpop.f32.mrf.mxu1  ;;  %v13209_v21 = vcombine.high %v991_v15, %v995_v16  ;;  %v1047_v22 = vld [vmem:[%s14751_s28 + $0x14c8] sm:$0xff]  ;;  %v13208_v31 = vcombine.low %v991_v15, %v995_v16 }
 0x266   : > { %10845 = vmatprep.subr.bf16.mxu1 %v13145_v3  ;;  %10819 = vmatpush2.bf16.msra.mxu0 %v13080_v8  ;;  %v999_v3 = vld [vmem:[%s14751_s28 + $0x1348] sm:$0xff]  ;;  %v13224_v8 = vcombine.low %v1007_v55, %v1011_v56 }
 0x267   : > { %10820 = vmatprep.subr.bf16.mxu0 %v13073_v10  ;;  %v13217_v10 = vcombine.high %v999_v3, %v1003_v4  ;;  %v15340_v13 = vpop.f32.mrf.mxu1  ;;  %v1051_v24 = vld [vmem:[%s14751_s28 + $0x14e8] sm:$0xff] }
 0x268   : > { %v13265_v32 = vcombine.high %v1047_v22, %v1051_v24  ;;  %v1039_v35 = vld [vmem:[%s14751_s28 + $0x1488] sm:$0xff]  ;;  %v13264_v42 = vcombine.low %v1047_v22, %v1051_v24 }
 0x269   : > { %10846 = vmatpush1.bf16.msra.mxu1 %v13144_v9  ;;  %v13281_v9 = vcombine.high %v1063_v63, %v1067_v0  ;;  %v15348_v25 = vpop.f32.mrf.mxu1  ;;  %v979_v41 = vld [vmem:[%s14751_s28 + $0x12a8] sm:$0xff] }
 0x26a   : > { %10847 = vmatprep.subr.bf16.mxu1 %v13137_v11  ;;  %10821 = vmatpush2.bf16.msra.mxu0 %v13072_v17  ;;  %v1055_v11 = vld [vmem:[%s14751_s28 + $0x1508] sm:$0xff]  ;;  %v13280_v17 = vcombine.low %v1063_v63, %v1067_v0 }
 0x26b   : > { %10822 = vmatprep.subr.bf16.mxu0 %v13065_v19  ;;  %v13216_v19 = vcombine.low %v999_v3, %v1003_v4  ;;  %v967_v54 = vld [vmem:[%s14751_s28 + $0x1248] sm:$0xff] }
 0x26c   : > { %v971_v55 = vld [vmem:[%s14751_s28 + $0x1268] sm:$0xff] }
 0x26d   : > { %10848 = vmatpush1.bf16.msra.mxu1 %v13136_v18  ;;  %v15344_v18 = vpop.f32.mrf.mxu0  ;;  %v1023_v63 = vld [vmem:[%s14751_s28 + $0x1408] sm:$0xff] }
 0x26e   : > { %10849 = vmatprep.subr.bf16.mxu1 %v13129_v20  ;;  %10823 = vmatpush2.bf16.msra.mxu0 %v13064_v26  ;;  %v13273_v20 = vcombine.high %v1055_v11, %v1059_v12  ;;  %v1027_v0 = vld [vmem:[%s14751_s28 + $0x1428] sm:$0xff] }
 0x26f   : > { %10824 = vmatprep.subr.bf16.mxu0 %v13057_v29  ;;  %v15350_v26 = vpop.f32.mrf.mxu0  ;;  %v987_v29 = vld [vmem:[%s14751_s28 + $0x12e8] sm:$0xff] }
 0x270   : > { %v959_v3 = vld [vmem:[%s14751_s28 + $0x1208] sm:$0xff] }
 0x271   : > { %10850 = vmatpush1.bf16.msra.mxu1 %v13128_v28  ;;  %v983_v28 = vld [vmem:[%s14751_s28 + $0x12c8] sm:$0xff] }
 0x272   : > { %10851 = vmatprep.subr.bf16.mxu1 %v13121_v30  ;;  %10825 = vmatpush2.bf16.msra.mxu0 %v13056_v36  ;;  %v13272_v30 = vcombine.low %v1055_v11, %v1059_v12  ;;  %v13201_v34 = vcombine.high %v983_v28, %v987_v29  ;;  %v1043_v36 = vld [vmem:[%s14751_s28 + $0x14a8] sm:$0xff]  ;;  %v13200_v45 = vcombine.low %v983_v28, %v987_v29 }
 0x273   : > { %10826 = vmatprep.subr.bf16.mxu0 %v13049_v39  ;;  %v15358_v39 = vpop.f32.mrf.mxu0  ;;  %v13256_v56 = vcombine.low %v1039_v35, %v1043_v36  ;;  %v963_v4 = vld [vmem:[%s14751_s28 + $0x1228] sm:$0xff] }
 0x274   : > { %v13177_v11 = vcombine.high %v959_v3, %v963_v4  ;;  %v1143_v12 = vld [vmem:[%s14751_s28 + $0x17c8] sm:$0xff]  ;;  %v13176_v22 = vcombine.low %v959_v3, %v963_v4 }
 0x275   : > { %10852 = vmatpush1.bf16.msra.mxu1 %v13120_v38  ;;  %v15356_v38 = vpop.f32.mrf.mxu1  ;;  %v15366_v53 = vpop.f32.mrf.mxu0  ;;  %v1147_v15 = vld [vmem:[%s14751_s28 + $0x17e8] sm:$0xff] }
 0x276   : > { %10853 = vmatprep.subr.bf16.mxu1 %v13113_v40  ;;  %10827 = vmatpush2.bf16.msra.mxu0 %v13048_v46  ;;  %v975_v40 = vld [vmem:[%s14751_s28 + $0x1288] sm:$0xff]  ;;  %v13257_v46 = vcombine.high %v1039_v35, %v1043_v36  ;;  %v13361_v24 = vcombine.high %v1143_v12, %v1147_v15  ;;  %v13360_v35 = vcombine.low %v1143_v12, %v1147_v15 }
 0x277   : > { %10882 = vmatprep.subr.bf16.mxu0 %v13297_v51  ;;  %v15362_v44 = vpop.f32.mrf.mxu1  ;;  %v1031_v51 = vld [vmem:[%s14751_s28 + $0x1448] sm:$0xff]  ;;  %v10190_v12 = vadd.f32 %v15318_v47, %v15306_v33 }
 0x278   : > { %v1207_v16 = vld [vmem:[%s14751_s28 + $0x19c8] sm:$0xff] }
 0x279   : > { %10854 = vmatpush1.bf16.msra.mxu1 %v13112_v50  ;;  %10829 = vmatmul.mubr.bf16.vlgmr.msra.gmra.mxu0 %v14340_v2  ;;  %v13193_v50 = vcombine.high %v975_v40, %v979_v41  ;;  %v15374_v2 = vpop.f32.mrf.mxu0  ;;  %v1135_v29 = vld [vmem:[%s14751_s28 + $0x1788] sm:$0xff] }
 0x27a   : > { %10855 = vmatprep.subr.bf16.mxu1 %v13233_v52  ;;  %10883 = vmatpush1.bf16.msra.mxu0 %v13296_v57  ;;  %v1035_v52 = vld [vmem:[%s14751_s28 + $0x1468] sm:$0xff]  ;;  %v15370_v57 = vpop.f32.mrf.mxu1 }
 0x27b   : > { %10914 = vmatprep.mubr.bf16.mxu0 %v14341_v6  ;;  %10884 = vmatprep.subr.bf16.mxu0 %v13289_v61  ;;  %v13249_v61 = vcombine.high %v1031_v51, %v1035_v52  ;;  %v14343_v4 = vld [vmem:[#allocation2 + $0x34] ss:$100 sps:$4 sm:$0xff]  }
 0x27c   : > { %v15378_v6 = vpop.f32.mrf.mxu1  ;;  %v1111_v33 = vld [vmem:[%s14751_s28 + $0x16c8] sm:$0xff] }
 0x27d   : > { %10856 = vmatpush2.bf16.msra.mxu1 %v13232_v60  ;;  %v13192_v60 = vcombine.low %v975_v40, %v979_v41  ;;  %v1115_v47 = vld [vmem:[%s14751_s28 + $0x16e8] sm:$0xff] }
 0x27e   : > { %10857 = vmatprep.subr.bf16.mxu1 %v13225_v62  ;;  %10885 = vmatpush1.bf16.msra.mxu0 %v13288_v5  ;;  %v13185_v62 = vcombine.high %v967_v54, %v971_v55  ;;  %v13248_v5 = vcombine.low %v1031_v51, %v1035_v52  ;;  %v1191_v51 = vld [vmem:[%s14751_s28 + $0x1948] sm:$0xff] }
 0x27f   : > { %10886 = vmatprep.subr.bf16.mxu0 %v13281_v9  ;;  %v13184_v9 = vcombine.low %v967_v54, %v971_v55  ;;  %v1195_v52 = vld [vmem:[%s14751_s28 + $0x1968] sm:$0xff]  ;;  %v10186_v54 = vadd.f32 %v15302_v27, %v15292_v14  ;;  %v14342_v55 = vld [vmem:[#allocation2 + $0x20] ss:$100 sps:$4 sm:$0xff]  }
 0x280   : > { %v13409_v3 = vcombine.high %v1191_v51, %v1195_v52  ;;  %v1119_v14 = vld [vmem:[%s14751_s28 + $0x1708] sm:$0xff] }
 0x281   : > { %10858 = vmatpush2.bf16.msra.mxu1 %v13224_v8  ;;  %v15380_v8 = vpop.f32.mrf.mxu0  ;;  %v1123_v27 = vld [vmem:[%s14751_s28 + $0x1728] sm:$0xff] }
 0x282   : > { %10859 = vmatprep.subr.bf16.mxu1 %v13217_v10  ;;  %10887 = vmatpush1.bf16.msra.mxu0 %v13280_v17  ;;  %v13241_v10 = vcombine.high %v1023_v63, %v1027_v0  ;;  %v1211_v17 = vld [vmem:[%s14751_s28 + $0x19e8] sm:$0xff]  ;;  %v13337_v15 = vcombine.high %v1119_v14, %v1123_v27 }
 0x283   : > { %10888 = vmatprep.subr.bf16.mxu0 %v13273_v20  ;;  %v15386_v20 = vpop.f32.mrf.mxu1  ;;  %v13425_v28 = vcombine.high %v1207_v16, %v1211_v17  ;;  %v13424_v40 = vcombine.low %v1207_v16, %v1211_v17  ;;  %v10192_v16 = vadd.f32 %v15326_v58, %v15314_v43 }
 0x285   : > { %10860 = vmatpush2.bf16.msra.mxu1 %v13216_v19  ;;  %v13240_v19 = vcombine.low %v1023_v63, %v1027_v0  ;;  %v10188_v63 = vadd.f32 %v15310_v37, %v15298_v23  ;;  %v10229_v0 = vadd.f32 %v15320_v49, %v10186_v54  ;;  %v13408_v49 = vcombine.low %v1191_v51, %v1195_v52 }
 0x286   : > { %10861 = vmatprep.subr.bf16.mxu1 %v13209_v21  ;;  %10889 = vmatpush1.bf16.msra.mxu0 %v13272_v30  ;;  %v15388_v21 = vpop.f32.mrf.mxu0  ;;  %v1139_v30 = vld [vmem:[%s14751_s28 + $0x17a8] sm:$0xff]  ;;  %v10235_v43 = vadd.f32 %v15344_v18, %v10192_v16 }
 0x287   : > { %10890 = vmatprep.subr.bf16.mxu0 %v13265_v32  ;;  %v1199_v32 = vld [vmem:[%s14751_s28 + $0x1988] sm:$0xff]  ;;  %v13353_v41 = vcombine.high %v1135_v29, %v1139_v30  ;;  %v10231_v23 = vadd.f32 %v15328_v59, %v10188_v63  ;;  %v10272_v17 = vadd.f32 %v15332_v1, %v10229_v0  ;;  %v13336_v1 = vcombine.low %v1119_v14, %v1123_v27 }
 0x288   : > { %v15396_v36 = vpop.f32.mrf.mxu0  ;;  %v1107_v18 = vld [vmem:[%s14751_s28 + $0x16a8] sm:$0xff] }
 0x289   : > { %10862 = vmatpush2.bf16.msra.mxu1 %v13208_v31  ;;  %v15392_v31 = vpop.f32.mrf.mxu1  ;;  %v10315_v58 = vadd.f32 %v15350_v26, %v10272_v17  ;;  %v1167_v26 = vld [vmem:[%s14751_s28 + $0x1888] sm:$0xff] }
 0x28a   : > { %10863 = vmatprep.subr.bf16.mxu1 %v13201_v34  ;;  %10891 = vmatpush1.bf16.msra.mxu0 %v13264_v42  ;;  %v1203_v34 = vld [vmem:[%s14751_s28 + $0x19a8] sm:$0xff] }
 0x28b   : > { %10892 = vmatprep.subr.bf16.mxu0 %v13257_v46  ;;  %v13417_v42 = vcombine.high %v1199_v32, %v1203_v34  ;;  %v1131_v46 = vld [vmem:[%s14751_s28 + $0x1768] sm:$0xff]  ;;  %v10358_v51 = vadd.f32 %v15362_v44, %v10315_v58 }
 0x28c   : > { %v1159_v0 = vld [vmem:[%s14751_s28 + $0x1848] sm:$0xff] }
 0x28d   : > { %10864 = vmatpush2.bf16.msra.mxu1 %v13200_v45  ;;  %v1127_v45 = vld [vmem:[%s14751_s28 + $0x1748] sm:$0xff] }
 0x28e   : > { %10865 = vmatprep.subr.bf16.mxu1 %v13193_v50  ;;  %10893 = vmatpush1.bf16.msra.mxu0 %v13256_v56  ;;  %v15400_v50 = vpop.f32.mrf.mxu1  ;;  %v13352_v56 = vcombine.low %v1135_v29, %v1139_v30  ;;  %v13344_v37 = vcombine.low %v1127_v45, %v1131_v46  ;;  %v1179_v29 = vld [vmem:[%s14751_s28 + $0x18e8] sm:$0xff]  ;;  %v10274_v30 = vadd.f32 %v15340_v13, %v10231_v23 }
 0x28f   : > { %10894 = vmatprep.subr.bf16.mxu0 %v13249_v61  ;;  %v13416_v61 = vcombine.low %v1199_v32, %v1203_v34  ;;  %v13329_v34 = vcombine.high %v1111_v33, %v1115_v47  ;;  %v1155_v16 = vld [vmem:[%s14751_s28 + $0x1828] sm:$0xff] }
 0x290   : > { %v1271_v58 = vld [vmem:[%s14751_s28 + $0x1bc8] sm:$0xff] }
 0x291   : > { %10866 = vmatpush2.bf16.msra.mxu1 %v13192_v60  ;;  %v15406_v60 = vpop.f32.mrf.mxu0 }
 0x292   : > { %10867 = vmatprep.subr.bf16.mxu1 %v13185_v62  ;;  %10895 = vmatpush1.bf16.msra.mxu0 %v13248_v5  ;;  %v13345_v62 = vcombine.high %v1127_v45, %v1131_v46  ;;  %v15413_v5 = vpop.f32.mrf.mxu1  ;;  %v1171_v45 = vld [vmem:[%s14751_s28 + $0x18a8] sm:$0xff]  ;;  %v10278_v46 = vadd.f32 %v15356_v38, %v10235_v43  ;;  %v10401_v38 = vadd.f32 %v15380_v8, %v10358_v51 }
 0x293   : > { %10896 = vmatprep.subr.bf16.mxu0 %v13241_v10  ;;  %v1183_v10 = vld [vmem:[%s14751_s28 + $0x1908] sm:$0xff]  ;;  %v13385_v44 = vcombine.high %v1167_v26, %v1171_v45  ;;  %v13384_v8 = vcombine.low %v1167_v26, %v1171_v45 }
 0x294   : > { %v15428_v59 = vpop.f32.mrf.mxu1  ;;  %v1327_v45 = vld [vmem:[%s14751_s28 + $0x1d88] sm:$0xff] }
 0x295   : > { %10868 = vmatpush2.bf16.msra.mxu1 %v13184_v9  ;;  %v15415_v9 = vpop.f32.mrf.mxu0 }
 0x296   : > { %10869 = vmatprep.subr.bf16.mxu1 %v13177_v11  ;;  %10897 = vmatpush1.bf16.msra.mxu0 %v13240_v19  ;;  %v1187_v11 = vld [vmem:[%s14751_s28 + $0x1928] sm:$0xff]  ;;  %v10233_v19 = vadd.f32 %v15336_v7, %v10190_v12  ;;  %v15437_v7 = vpop.f32.mrf.mxu1 }
 0x297   : > { %10898 = vmatprep.subr.bf16.mxu0 %v13361_v24  ;;  %v15430_v24 = vpop.f32.mrf.mxu0  ;;  %v13400_v32 = vcombine.low %v1183_v10, %v1187_v11 }
 0x299   : > { %10870 = vmatpush2.bf16.msra.mxu1 %v13176_v22  ;;  %v13401_v22 = vcombine.high %v1183_v10, %v1187_v11  ;;  %v276_v11 = vlaneseq }
 0x29a   : > { %10925 = vmatprep.subr.bf16.mxu1 %v13425_v28  ;;  %10899 = vmatpush2.bf16.msra.mxu0 %v13360_v35  ;;  %v1175_v28 = vld [vmem:[%s14751_s28 + $0x18c8] sm:$0xff]  ;;  %v10276_v35 = vadd.f32 %v15348_v25, %v10233_v19  ;;  %v13328_v25 = vcombine.low %v1111_v33, %v1115_v47 }
 0x29b   : > { %10900 = vmatprep.subr.bf16.mxu0 %v13353_v41  ;;  %v13393_v13 = vcombine.high %v1175_v28, %v1179_v29  ;;  %v1103_v41 = vld [vmem:[%s14751_s28 + $0x1688] sm:$0xff]  ;;  %v13392_v54 = vcombine.low %v1175_v28, %v1179_v29  ;;  %v15472_v28 = vshrl.u32 %v276_v11, 7 }
 0x29c   : > { %10872 = vmatmul.mubr.bf16.vlgmr.msra.gmra.mxu1 %v14342_v55  ;;  %v10319_v52 = vadd.f32 %v15366_v53, %v10276_v35  ;;  %v13321_v55 = vcombine.high %v1103_v41, %v1107_v18  ;;  %v1099_v53 = vld [vmem:[%s14751_s28 + $0x1668] sm:$0xff] }
 0x29d   : > { %10926 = vmatpush1.bf16.msra.mxu1 %v13424_v40  ;;  %10957 = vmatprep.mubr.bf16.mxu1 %v14343_v4  ;;  %v10317_v40 = vadd.f32 %v15358_v39, %v10274_v30  ;;  %v15450_v39 = vpop.f32.mrf.mxu1  ;;  %v1335_v29 = vld [vmem:[%s14751_s28 + $0x1dc8] sm:$0xff] }
 0x29e   : > { %10927 = vmatprep.subr.bf16.mxu1 %v13417_v42  ;;  %10901 = vmatpush2.bf16.msra.mxu0 %v13352_v56  ;;  %v15443_v42 = vpop.f32.mrf.mxu0  ;;  %v10362_v14 = vadd.f32 %v15378_v6, %v10319_v52  ;;  %v10444_v6 = vadd.f32 %v15392_v31, %v10401_v38  ;;  %v1339_v30 = vld [vmem:[%s14751_s28 + $0x1de8] sm:$0xff]  ;;  %v282_v52 = vsub.s32 1, %v15472_v28 }
 0x29f   : > { %10902 = vmatprep.subr.bf16.mxu0 %v13345_v62  ;;  %v10360_v56 = vadd.f32 %v15370_v57, %v10317_v40  ;;  %v1095_v62 = vld [vmem:[%s14751_s28 + $0x1648] sm:$0xff]  ;;  %v13320_v57 = vcombine.low %v1103_v41, %v1107_v18  ;;  %v13553_v41 = vcombine.high %v1335_v29, %v1339_v30 }
 0x2a0   : > { %v10492_v63 = vpop.f32.mrf.mxu0  ;;  %v13313_v10 = vcombine.high %v1095_v62, %v1099_v53  ;;  %v10405_v23 = vadd.f32 %v15396_v36, %v10362_v14  ;;  %v1319_v14 = vld [vmem:[%s14751_s28 + $0x1d48] sm:$0xff] }
 0x2a1   : > { %10928 = vmatpush1.bf16.msra.mxu1 %v13416_v61  ;;  %v10321_v61 = vadd.f32 %v15374_v2, %v10278_v46  ;;  %v10403_v27 = vadd.f32 %v15388_v21, %v10360_v56  ;;  %v10533_v2 = vpop.f32.mrf.mxu1  ;;  %v1331_v46 = vld [vmem:[%s14751_s28 + $0x1da8] sm:$0xff]  ;;  %v13552_v56 = vcombine.low %v1335_v29, %v1339_v30 }
 0x2a2   : > { %10929 = vmatprep.subr.bf16.mxu1 %v13409_v3  ;;  %10903 = vmatpush2.bf16.msra.mxu0 %v13344_v37  ;;  %v1163_v3 = vld [vmem:[%s14751_s28 + $0x1868] sm:$0xff]  ;;  %v10572_v4 = vpop.f32.mrf.mxu0 }
 0x2a3   : > { %10904 = vmatprep.subr.bf16.mxu0 %v13337_v15  ;;  %v10364_v12 = vadd.f32 %v15386_v20, %v10321_v61  ;;  %v13377_v21 = vcombine.high %v1159_v0, %v1163_v3  ;;  %v1087_v37 = vld [vmem:[%s14751_s28 + $0x1608] sm:$0xff]  ;;  %v10446_v17 = vadd.f32 %v15400_v50, %v10403_v27  ;;  %v13312_v20 = vcombine.low %v1095_v62, %v1099_v53  ;;  %v10535_v31 = vpop.f32.mrf.mxu1 }
 0x2a4   : > { %v1151_v15 = vld [vmem:[%s14751_s28 + $0x1808] sm:$0xff]  ;;  %v10574_v36 = vpop.f32.mrf.mxu0  ;;  %v13376_v33 = vcombine.low %v1159_v0, %v1163_v3  ;;  %v10448_v50 = vadd.f32 %v15413_v5, %v10405_v23  ;;  %v13545_v62 = vcombine.high %v1327_v45, %v1331_v46 }
 0x2a5   : > { %10930 = vmatpush1.bf16.msra.mxu1 %v13408_v49  ;;  %v1091_v49 = vld [vmem:[%s14751_s28 + $0x1628] sm:$0xff]  ;;  %v10407_v19 = vadd.f32 %v15406_v60, %v10364_v12  ;;  %v10489_v60 = vadd.f32 %v15430_v24, %v10446_v17  ;;  %v10615_v43 = vpop.f32.mrf.mxu1  ;;  %v13368_v24 = vcombine.low %v1151_v15, %v1155_v16 }
 0x2a6   : > { %10931 = vmatprep.subr.bf16.mxu1 %v13401_v22  ;;  %10905 = vmatpush2.bf16.msra.mxu0 %v13336_v1  ;;  %v10487_v22 = vadd.f32 %v15415_v9, %v10444_v6  ;;  %v13305_v47 = vcombine.high %v1087_v37, %v1091_v49  ;;  %v13369_v9 = vcombine.high %v1151_v15, %v1155_v16  ;;  %v1275_v1 = vld [vmem:[%s14751_s28 + $0x1be8] sm:$0xff]  ;;  %v10576_v40 = vpop.f32.mrf.mxu0 }
 0x2a7   : > { %10906 = vmatprep.subr.bf16.mxu0 %v13329_v34  ;;  %v10491_v35 = vadd.f32 %v15443_v42, %v10448_v50  ;;  %v13304_v5 = vcombine.low %v1087_v37, %v1091_v49  ;;  %v10532_v18 = vadd.f32 %v15450_v39, %v10489_v60  ;;  %v13489_v42 = vcombine.high %v1271_v58, %v1275_v1  ;;  %v10617_v51 = vpop.f32.mrf.mxu1  ;;  %v1323_v27 = vld [vmem:[%s14751_s28 + $0x1d68] sm:$0xff]  ;;  %v14345_v37 = vld [vmem:[#allocation2 + $0x3c] ss:$100 sps:$4 sm:$0xff]  }
 0x2a8   : > { %v10530_v34 = vadd.f32 %v15437_v7, %v10487_v22  ;;  %v274_v7 = vld [vmem:[%s15487_s20] sm:$0xff]  ;;  %v10578_v61 = vpop.f32.mrf.mxu0  ;;  %v13537_v16 = vcombine.high %v1319_v14, %v1323_v27  ;;  %v13536_v50 = vcombine.low %v1319_v14, %v1323_v27 }
 0x2a9   : > { %10932 = vmatpush1.bf16.msra.mxu1 %v13400_v32  ;;  %v10450_v32 = vadd.f32 %v15428_v59, %v10407_v19  ;;  %v10575_v39 = vadd.f32 %v10574_v36, %v10532_v18  ;;  %v1255_v11 = vld [vmem:[%s14751_s28 + $0x1b48] sm:$0xff] }
 0x2aa   : > { %10933 = vmatprep.subr.bf16.mxu1 %v13393_v13  ;;  %10907 = vmatpush2.bf16.msra.mxu0 %v13328_v25  ;;  %v278_v13 = vsub.s32 0, %v15472_v28  ;;  %v10573_v26 = vadd.f32 %v10572_v4, %v10530_v34  ;;  %v1263_v25 = vld [vmem:[%s14751_s28 + $0x1b88] sm:$0xff]  ;;  %v14344_v4 = vld [vmem:[#allocation2 + $0x28] ss:$100 sps:$4 sm:$0xff]  }
 0x2ab   : > { %10908 = vmatprep.subr.bf16.mxu0 %v13321_v55  ;;  %v10493_v59 = vadd.f32 %v10492_v63, %v10450_v32  ;;  %v10534_v55 = vadd.f32 %v10533_v2, %v10491_v35  ;;  %v1259_v12 = vld [vmem:[%s14751_s28 + $0x1b68] sm:$0xff]  ;;  %v10618_v6 = vadd.f32 %v10617_v51, %v10575_v39 }
 0x2ac   : > { %v279_v38 = vrot.slane %v274_v7, %v278_v13  ;;  %v10616_v63 = vadd.f32 %v10615_v43, %v10573_v26  ;;  %v1315_v36 = vld [vmem:[%s14751_s28 + $0x1d28] sm:$0xff]  ;;  %v13472_v32 = vcombine.low %v1255_v11, %v1259_v12 }
 0x2ad   : > { %10934 = vmatpush1.bf16.msra.mxu1 %v13392_v54  ;;  %v1267_v54 = vld [vmem:[%s14751_s28 + $0x1ba8] sm:$0xff]  ;;  %v10536_v53 = vadd.f32 %v10535_v31, %v10493_v59  ;;  %v10577_v0 = vadd.f32 %v10576_v40, %v10534_v55 }
 0x2ae   : > { %10935 = vmatprep.subr.bf16.mxu1 %v13385_v44  ;;  %10909 = vmatpush2.bf16.msra.mxu0 %v13320_v57  ;;  %v13488_v44 = vcombine.low %v1271_v58, %v1275_v1  ;;  %v13481_v3 = vcombine.high %v1263_v25, %v1267_v54  ;;  %v10619_v57 = vpop.f32.mrf.mxu1  ;;  %v13480_v15 = vcombine.low %v1263_v25, %v1267_v54  ;;  %v1311_v31 = vld [vmem:[%s14751_s28 + $0x1d08] sm:$0xff] }
 0x2af   : > { %10910 = vmatprep.subr.bf16.mxu0 %v13313_v10  ;;  %v13544_v10 = vcombine.low %v1327_v45, %v1331_v46  ;;  %v10579_v23 = vadd.f32 %v10578_v61, %v10536_v53  ;;  %v10620_v17 = vadd.f32 %v10619_v57, %v10577_v0  ;;  %v1247_v60 = vld [vmem:[%s14751_s28 + $0x1b08] sm:$0xff]  ;;  %v13529_v34 = vcombine.high %v1311_v31, %v1315_v36 }
 0x2b0   : > { %v1303_v13 = vld [vmem:[%s14751_s28 + $0x1cc8] sm:$0xff] }
 0x2b1   : > { %10936 = vmatpush1.bf16.msra.mxu1 %v13384_v8  ;;  %v283_v8 = vrot.slane %v274_v7, %v282_v52  ;;  %v1239_v18 = vld [vmem:[%s14751_s28 + $0x1ac8] sm:$0xff] }
 0x2b2   : > { %10937 = vmatprep.subr.bf16.mxu1 %v13377_v21  ;;  %10911 = vmatpush2.bf16.msra.mxu0 %v13312_v20  ;;  %v13473_v20 = vcombine.high %v1255_v11, %v1259_v12  ;;  %v1243_v59 = vld [vmem:[%s14751_s28 + $0x1ae8] sm:$0xff] }
 0x2b3   : > { %10912 = vmatprep.subr.bf16.mxu0 %v13305_v47  ;;  %v13457_v52 = vcombine.high %v1239_v18, %v1243_v59  ;;  %v1295_v25 = vld [vmem:[%s14751_s28 + $0x1c88] sm:$0xff]  ;;  %v13456_v61 = vcombine.low %v1239_v18, %v1243_v59 }
 0x2b4   : > { %v1299_v54 = vld [vmem:[%s14751_s28 + $0x1ca8] sm:$0xff] }
 0x2b5   : > { %10938 = vmatpush1.bf16.msra.mxu1 %v13376_v33  ;;  %v10621_v33 = vpop.f32.mrf.mxu1  ;;  %v1231_v55 = vld [vmem:[%s14751_s28 + $0x1a88] sm:$0xff] }
 0x2b6   : > { %10939 = vmatprep.subr.bf16.mxu1 %v13369_v9  ;;  %10913 = vmatpush2.bf16.msra.mxu0 %v13304_v5  ;;  %v1251_v9 = vld [vmem:[%s14751_s28 + $0x1b28] sm:$0xff]  ;;  %v10622_v29 = vadd.f32 %v10621_v33, %v10579_v23 }
 0x2b7   : > { %10968 = vmatprep.subr.bf16.mxu0 %v13553_v41  ;;  %v1307_v41 = vld [vmem:[%s14751_s28 + $0x1ce8] sm:$0xff]  ;;  %v13464_v45 = vcombine.low %v1247_v60, %v1251_v9 }
 0x2b8   : > { %v13521_v46 = vcombine.high %v1303_v13, %v1307_v41  ;;  %v1235_v39 = vld [vmem:[%s14751_s28 + $0x1aa8] sm:$0xff] }
 0x2b9   : > { %10940 = vmatpush1.bf16.msra.mxu1 %v13368_v24  ;;  %v10658_v2 = vpop.f32.mrf.mxu0  ;;  %10915 = vmatmul.mubr.bf16.vlgmr.msra.gmra.mxu0 %v14344_v4  ;;  %v13465_v24 = vcombine.high %v1247_v60, %v1251_v9  ;;  %v1291_v53 = vld [vmem:[%s14751_s28 + $0x1c68] sm:$0xff]  ;;  %v13448_v14 = vcombine.low %v1231_v55, %v1235_v39 }
 0x2ba   : > { %10941 = vmatprep.subr.bf16.mxu1 %v13489_v42  ;;  %v10659_v21 = vadd.f32 %v10658_v2, %v10616_v63  ;;  %10969 = vmatpush1.bf16.msra.mxu0 %v13552_v56  ;;  %v13528_v42 = vcombine.low %v1311_v31, %v1315_v36  ;;  %v13520_v56 = vcombine.low %v1303_v13, %v1307_v41  ;;  %v1223_v63 = vld [vmem:[%s14751_s28 + $0x1a48] sm:$0xff]  ;;  %v14347_v13 = vld [vmem:[#allocation2 + $0x44] ss:$100 sps:$4 sm:$0xff]  }
 0x2bb   : > { %11000 = vmatprep.mubr.bf16.mxu0 %v14345_v37  ;;  %v10660_v49 = vpop.f32.mrf.mxu0  ;;  %10970 = vmatprep.subr.bf16.mxu0 %v13545_v62  ;;  %v1287_v62 = vld [vmem:[%s14751_s28 + $0x1c48] sm:$0xff] }
 0x2bc   : > { %v12344_v19 = vadd.f32 %v10659_v21, %v279_v38  ;;  %v10661_v22 = vadd.f32 %v10660_v49, %v10618_v6  ;;  %v1227_v0 = vld [vmem:[%s14751_s28 + $0x1a68] sm:$0xff]  ;;  %v13505_v27 = vcombine.high %v1287_v62, %v1291_v53  ;;  %v13504_v11 = vcombine.low %v1287_v62, %v1291_v53 }
 0x2bd   : > { %10942 = vmatpush2.bf16.msra.mxu1 %v13488_v44  ;;  %v10662_v47 = vpop.f32.mrf.mxu0  ;;  %v13449_v44 = vcombine.high %v1231_v55, %v1235_v39  ;;  %v13441_v57 = vcombine.high %v1223_v63, %v1227_v0  ;;  %v1279_v2 = vld [vmem:[%s14751_s28 + $0x1c08] sm:$0xff]  ;;  %v13440_v12 = vcombine.low %v1223_v63, %v1227_v0 }
 0x2be   : > { %10943 = vmatprep.subr.bf16.mxu1 %v13481_v3  ;;  %v12395_v30 = vmax.f32 %v12344_v19, 0.0  ;;  %v12345_v43 = vadd.f32 %v10661_v22, %v283_v8  ;;  %v10663_v58 = vadd.f32 %v10662_v47, %v10620_v17  ;;  %10971 = vmatpush1.bf16.msra.mxu0 %v13544_v10  ;;  %v13512_v3 = vcombine.low %v1295_v25, %v1299_v54  ;;  %v1283_v4 = vld [vmem:[%s14751_s28 + $0x1c28] sm:$0xff] }
 0x2bf   : > { %v10664_v1 = vpop.f32.mrf.mxu0  ;;  %10972 = vmatprep.subr.bf16.mxu0 %v13537_v16  ;;  %v1219_v10 = vld [vmem:[%s14751_s28 + $0x1a28] sm:$0xff]  ;;  %v13497_v6 = vcombine.high %v1279_v2, %v1283_v4  ;;  %v13496_v16 = vcombine.low %v1279_v2, %v1283_v4 }
 0x2c0   : > { %12411 = vst [vmem:[%s15506_s27] sm:$0xff] %v12395_v30  ;;  %v12396_v35 = vmax.f32 %v12345_v43, 0.0  ;;  %v12352_v5 = vadd.f32 %v10663_v58, %v279_v38  ;;  %v10665_v40 = vadd.f32 %v10664_v1, %v10622_v29  ;;  %v13513_v38 = vcombine.high %v1295_v25, %v1299_v54  ;;  %v1399_v21 = vld [vmem:[%s14751_s28 + $0x1fc8] sm:$0xff] }
 0x2c1   : > { %10944 = vmatpush2.bf16.msra.mxu1 %v13480_v15  ;;  %v1403_v37 = vld [vmem:[%s14751_s28 + $0x1fe8] sm:$0xff] }
 0x2c2   : > { %10945 = vmatprep.subr.bf16.mxu1 %v13473_v20  ;;  %12412 = vst [vmem:[%s15506_s27 + $0x8] sm:$0xff] %v12396_v35  ;;  %v12403_v26 = vmax.f32 %v12352_v5, 0.0  ;;  %v12353_v7 = vadd.f32 %v10665_v40, %v283_v8  ;;  %10973 = vmatpush1.bf16.msra.mxu0 %v13536_v50  ;;  %v1215_v8 = vld [vmem:[%s14751_s28 + $0x1a08] sm:$0xff]  ;;  %v13617_v19 = vcombine.high %v1399_v21, %v1403_v37 }
 0x2c3   : > { %10974 = vmatprep.subr.bf16.mxu0 %v13529_v34  ;;  %v13433_v23 = vcombine.high %v1215_v8, %v1219_v10  ;;  %v1463_v49 = vld [vmem:[%s14751_s28 + $0x21c8] sm:$0xff]  ;;  %v13432_v17 = vcombine.low %v1215_v8, %v1219_v10  ;;  %v13616_v47 = vcombine.low %v1399_v21, %v1403_v37 }
 0x2c4   : > { %12419 = vst [vmem:[%s15506_s27 + $0x40] sm:$0xff] %v12403_v26  ;;  %v12404_v51 = vmax.f32 %v12353_v7, 0.0  ;;  %v1467_v15 = vld [vmem:[%s14751_s28 + $0x21e8] sm:$0xff] }
 0x2c5   : > { %10946 = vmatpush2.bf16.msra.mxu1 %v13472_v32  ;;  %v13681_v22 = vcombine.high %v1463_v49, %v1467_v15  ;;  %v1391_v20 = vld [vmem:[%s14751_s28 + $0x1f88] sm:$0xff]  ;;  %v13680_v50 = vcombine.low %v1463_v49, %v1467_v15 }
 0x2c6   : > { %10947 = vmatprep.subr.bf16.mxu1 %v13465_v24  ;;  %12420 = vst [vmem:[%s15506_s27 + $0x48] sm:$0xff] %v12404_v51  ;;  %10975 = vmatpush1.bf16.msra.mxu0 %v13528_v42  ;;  %v1395_v31 = vld [vmem:[%s14751_s28 + $0x1fa8] sm:$0xff] }
 0x2c7   : > { %10976 = vmatprep.subr.bf16.mxu0 %v13521_v46  ;;  %v1455_v36 = vld [vmem:[%s14751_s28 + $0x2188] sm:$0xff]  ;;  %v13609_v60 = vcombine.high %v1391_v20, %v1395_v31  ;;  %v13608_v32 = vcombine.low %v1391_v20, %v1395_v31 }
 0x2c8   : > { %v1459_v33 = vld [vmem:[%s14751_s28 + $0x21a8] sm:$0xff] }
 0x2c9   : > { %10948 = vmatpush2.bf16.msra.mxu1 %v13464_v45  ;;  %v13673_v9 = vcombine.high %v1455_v36, %v1459_v33  ;;  %v1383_v29 = vld [vmem:[%s14751_s28 + $0x1f48] sm:$0xff]  ;;  %v13672_v34 = vcombine.low %v1455_v36, %v1459_v33 }
 0x2ca   : > { %10949 = vmatprep.subr.bf16.mxu1 %v13457_v52  ;;  %10977 = vmatpush1.bf16.msra.mxu0 %v13520_v56  ;;  %v1387_v30 = vld [vmem:[%s14751_s28 + $0x1f68] sm:$0xff] }
 0x2cb   : > { %10978 = vmatprep.subr.bf16.mxu0 %v13513_v38  ;;  %v1447_v43 = vld [vmem:[%s14751_s28 + $0x2148] sm:$0xff]  ;;  %v13601_v35 = vcombine.high %v1383_v29, %v1387_v30  ;;  %v13600_v59 = vcombine.low %v1383_v29, %v1387_v30 }
 0x2cc   : > { %v1451_v58 = vld [vmem:[%s14751_s28 + $0x2168] sm:$0xff] }
 0x2cd   : > { %10950 = vmatpush2.bf16.msra.mxu1 %v13456_v61  ;;  %v14346_v1 = vld [vmem:[#allocation2 + $0x30] ss:$100 sps:$4 sm:$0xff]   ;;  %v13665_v5 = vcombine.high %v1447_v43, %v1451_v58  ;;  %v13664_v26 = vcombine.low %v1447_v43, %v1451_v58 }
 0x2ce   : > { %10951 = vmatprep.subr.bf16.mxu1 %v13449_v44  ;;  %10979 = vmatpush1.bf16.msra.mxu0 %v13512_v3  ;;  %v1375_v40 = vld [vmem:[%s14751_s28 + $0x1f08] sm:$0xff] }
 0x2cf   : > { %10980 = vmatprep.subr.bf16.mxu0 %v13505_v27  ;;  %v1379_v24 = vld [vmem:[%s14751_s28 + $0x1f28] sm:$0xff] }
 0x2d0   : > { %v1439_v41 = vld [vmem:[%s14751_s28 + $0x2108] sm:$0xff]  ;;  %v13593_v7 = vcombine.high %v1375_v40, %v1379_v24  ;;  %v13592_v25 = vcombine.low %v1375_v40, %v1379_v24 }
 0x2d1   : > { %10952 = vmatpush2.bf16.msra.mxu1 %v13448_v14  ;;  %v1443_v18 = vld [vmem:[%s14751_s28 + $0x2128] sm:$0xff] }
 0x2d2   : > { %10953 = vmatprep.subr.bf16.mxu1 %v13441_v57  ;;  %10981 = vmatpush1.bf16.msra.mxu0 %v13504_v11  ;;  %v13657_v42 = vcombine.high %v1439_v41, %v1443_v18  ;;  %v1367_v45 = vld [vmem:[%s14751_s28 + $0x1ec8] sm:$0xff]  ;;  %v13656_v54 = vcombine.low %v1439_v41, %v1443_v18 }
 0x2d3   : > { %10982 = vmatprep.subr.bf16.mxu0 %v13497_v6  ;;  %v1371_v46 = vld [vmem:[%s14751_s28 + $0x1ee8] sm:$0xff] }
 0x2d4   : > { %v1431_v51 = vld [vmem:[%s14751_s28 + $0x20c8] sm:$0xff]  ;;  %v13585_v55 = vcombine.high %v1367_v45, %v1371_v46  ;;  %v13584_v62 = vcombine.low %v1367_v45, %v1371_v46 }
 0x2d5   : > { %10954 = vmatpush2.bf16.msra.mxu1 %v13440_v12  ;;  %v1435_v52 = vld [vmem:[%s14751_s28 + $0x20e8] sm:$0xff] }
 0x2d6   : > { %10955 = vmatprep.subr.bf16.mxu1 %v13433_v23  ;;  %10983 = vmatpush1.bf16.msra.mxu0 %v13496_v16  ;;  %v13649_v39 = vcombine.high %v1431_v51, %v1435_v52  ;;  %v1359_v56 = vld [vmem:[%s14751_s28 + $0x1e88] sm:$0xff]  ;;  %v13648_v53 = vcombine.low %v1431_v51, %v1435_v52 }
 0x2d7   : > { %10984 = vmatprep.subr.bf16.mxu0 %v13617_v19  ;;  %v1363_v61 = vld [vmem:[%s14751_s28 + $0x1ea8] sm:$0xff] }
 0x2d8   : > { %v1423_v38 = vld [vmem:[%s14751_s28 + $0x2088] sm:$0xff]  ;;  %v13577_v63 = vcombine.high %v1359_v56, %v1363_v61  ;;  %v13576_v2 = vcombine.low %v1359_v56, %v1363_v61 }
 0x2d9   : > { %10956 = vmatpush2.bf16.msra.mxu1 %v13432_v17  ;;  %v1427_v44 = vld [vmem:[%s14751_s28 + $0x20a8] sm:$0xff] }
 0x2da   : > { %11011 = vmatprep.subr.bf16.mxu1 %v13681_v22  ;;  %10985 = vmatpush2.bf16.msra.mxu0 %v13616_v47  ;;  %v13641_v0 = vcombine.high %v1423_v38, %v1427_v44  ;;  %v1351_v3 = vld [vmem:[%s14751_s28 + $0x1e48] sm:$0xff]  ;;  %v13640_v4 = vcombine.low %v1423_v38, %v1427_v44 }
 0x2db   : > { %10986 = vmatprep.subr.bf16.mxu0 %v13609_v60  ;;  %v1355_v14 = vld [vmem:[%s14751_s28 + $0x1e68] sm:$0xff] }
 0x2dc   : > { %10958 = vmatmul.mubr.bf16.vlgmr.msra.gmra.mxu1 %v14346_v1  ;;  %v1415_v27 = vld [vmem:[%s14751_s28 + $0x2048] sm:$0xff]  ;;  %v13569_v8 = vcombine.high %v1351_v3, %v1355_v14  ;;  %v13568_v21 = vcombine.low %v1351_v3, %v1355_v14 }
 0x2dd   : > { %11012 = vmatpush1.bf16.msra.mxu1 %v13680_v50  ;;  %11043 = vmatprep.mubr.bf16.mxu1 %v14347_v13  ;;  %v1419_v57 = vld [vmem:[%s14751_s28 + $0x2068] sm:$0xff] }
 0x2de   : > { %11013 = vmatprep.subr.bf16.mxu1 %v13673_v9  ;;  %10987 = vmatpush2.bf16.msra.mxu0 %v13608_v32  ;;  %v13633_v10 = vcombine.high %v1415_v27, %v1419_v57  ;;  %v1343_v11 = vld [vmem:[%s14751_s28 + $0x1e08] sm:$0xff]  ;;  %v13632_v37 = vcombine.low %v1415_v27, %v1419_v57 }
 0x2df   : > { %10988 = vmatprep.subr.bf16.mxu0 %v13601_v35  ;;  %v1347_v12 = vld [vmem:[%s14751_s28 + $0x1e28] sm:$0xff] }
 0x2e0   : > { %v1407_v6 = vld [vmem:[%s14751_s28 + $0x2008] sm:$0xff]  ;;  %v13561_v49 = vcombine.high %v1343_v11, %v1347_v12  ;;  %v13560_v20 = vcombine.low %v1343_v11, %v1347_v12 }
 0x2e1   : > { %11014 = vmatpush1.bf16.msra.mxu1 %v13672_v34  ;;  %v1411_v23 = vld [vmem:[%s14751_s28 + $0x2028] sm:$0xff]  ;;  %v14348_v34 = vld [vmem:[#allocation2 + $0x38] ss:$100 sps:$4 sm:$0xff]  }
 0x2e2   : > { %11015 = vmatprep.subr.bf16.mxu1 %v13665_v5  ;;  %10989 = vmatpush2.bf16.msra.mxu0 %v13600_v59  ;;  %v13625_v15 = vcombine.high %v1407_v6, %v1411_v23  ;;  %v1591_v16 = vld [vmem:[%s14751_s28 + $0x25c8] sm:$0xff]  ;;  %v13624_v31 = vcombine.low %v1407_v6, %v1411_v23 }
 0x2e3   : > { %10990 = vmatprep.subr.bf16.mxu0 %v13593_v7  ;;  %v1595_v17 = vld [vmem:[%s14751_s28 + $0x25e8] sm:$0xff] }
 0x2e4   : > { %v1527_v19 = vld [vmem:[%s14751_s28 + $0x23c8] sm:$0xff]  ;;  %v13809_v36 = vcombine.high %v1591_v16, %v1595_v17  ;;  %v13808_v29 = vcombine.low %v1591_v16, %v1595_v17 }
 0x2e5   : > { %11016 = vmatpush1.bf16.msra.mxu1 %v13664_v26  ;;  %v1531_v22 = vld [vmem:[%s14751_s28 + $0x23e8] sm:$0xff] }
 0x2e6   : > { %11017 = vmatprep.subr.bf16.mxu1 %v13657_v42  ;;  %10991 = vmatpush2.bf16.msra.mxu0 %v13592_v25  ;;  %v13745_v33 = vcombine.high %v1527_v19, %v1531_v22  ;;  %v1583_v47 = vld [vmem:[%s14751_s28 + $0x2588] sm:$0xff]  ;;  %v13744_v30 = vcombine.low %v1527_v19, %v1531_v22 }
 0x2e7   : > { %10992 = vmatprep.subr.bf16.mxu0 %v13585_v55  ;;  %v1587_v50 = vld [vmem:[%s14751_s28 + $0x25a8] sm:$0xff] }
 0x2e8   : > { %v1519_v60 = vld [vmem:[%s14751_s28 + $0x2388] sm:$0xff]  ;;  %v13801_v43 = vcombine.high %v1583_v47, %v1587_v50  ;;  %v13800_v40 = vcombine.low %v1583_v47, %v1587_v50 }
 0x2e9   : > { %11018 = vmatpush1.bf16.msra.mxu1 %v13656_v54  ;;  %v1523_v9 = vld [vmem:[%s14751_s28 + $0x23a8] sm:$0xff] }
 0x2ea   : > { %11019 = vmatprep.subr.bf16.mxu1 %v13649_v39  ;;  %10993 = vmatpush2.bf16.msra.mxu0 %v13584_v62  ;;  %v13737_v58 = vcombine.high %v1519_v60, %v1523_v9  ;;  %v1575_v1 = vld [vmem:[%s14751_s28 + $0x2548] sm:$0xff]  ;;  %v13736_v13 = vcombine.low %v1519_v60, %v1523_v9 }
 0x2eb   : > { %10994 = vmatprep.subr.bf16.mxu0 %v13577_v63  ;;  %v1579_v32 = vld [vmem:[%s14751_s28 + $0x2568] sm:$0xff] }
 0x2ec   : > { %v1511_v35 = vld [vmem:[%s14751_s28 + $0x2348] sm:$0xff]  ;;  %v13793_v41 = vcombine.high %v1575_v1, %v1579_v32  ;;  %v13792_v45 = vcombine.low %v1575_v1, %v1579_v32 }
 0x2ed   : > { %11020 = vmatpush1.bf16.msra.mxu1 %v13648_v53  ;;  %v1515_v5 = vld [vmem:[%s14751_s28 + $0x2368] sm:$0xff] }
 0x2ee   : > { %11021 = vmatprep.subr.bf16.mxu1 %v13641_v0  ;;  %10995 = vmatpush2.bf16.msra.mxu0 %v13576_v2  ;;  %v14349_v24 = vld [vmem:[#allocation2 + $0x4c] ss:$100 sps:$4 sm:$0xff]   ;;  %v13729_v18 = vcombine.high %v1511_v35, %v1515_v5  ;;  %v13728_v46 = vcombine.low %v1511_v35, %v1515_v5 }
 0x2ef   : > { %10996 = vmatprep.subr.bf16.mxu0 %v13569_v8  ;;  %v1567_v59 = vld [vmem:[%s14751_s28 + $0x2508] sm:$0xff] }
 0x2f0   : > { %v1571_v26 = vld [vmem:[%s14751_s28 + $0x2528] sm:$0xff] }
 0x2f1   : > { %11022 = vmatpush1.bf16.msra.mxu1 %v13640_v4  ;;  %v1503_v7 = vld [vmem:[%s14751_s28 + $0x2308] sm:$0xff]  ;;  %v13785_v51 = vcombine.high %v1567_v59, %v1571_v26  ;;  %v13784_v56 = vcombine.low %v1567_v59, %v1571_v26 }
 0x2f2   : > { %11023 = vmatprep.subr.bf16.mxu1 %v13633_v10  ;;  %10997 = vmatpush2.bf16.msra.mxu0 %v13568_v21  ;;  %v1507_v42 = vld [vmem:[%s14751_s28 + $0x2328] sm:$0xff] }
 0x2f3   : > { %10998 = vmatprep.subr.bf16.mxu0 %v13561_v49  ;;  %v13721_v52 = vcombine.high %v1503_v7, %v1507_v42  ;;  %v1559_v25 = vld [vmem:[%s14751_s28 + $0x24c8] sm:$0xff]  ;;  %v13720_v61 = vcombine.low %v1503_v7, %v1507_v42 }
 0x2f4   : > { %v1563_v54 = vld [vmem:[%s14751_s28 + $0x24e8] sm:$0xff] }
 0x2f5   : > { %11024 = vmatpush1.bf16.msra.mxu1 %v13632_v37  ;;  %v1495_v55 = vld [vmem:[%s14751_s28 + $0x22c8] sm:$0xff]  ;;  %v13777_v38 = vcombine.high %v1559_v25, %v1563_v54  ;;  %v13776_v3 = vcombine.low %v1559_v25, %v1563_v54 }
 0x2f6   : > { %11025 = vmatprep.subr.bf16.mxu1 %v13625_v15  ;;  %10999 = vmatpush2.bf16.msra.mxu0 %v13560_v20  ;;  %v1499_v39 = vld [vmem:[%s14751_s28 + $0x22e8] sm:$0xff] }
 0x2f7   : > { %11054 = vmatprep.subr.bf16.mxu0 %v13809_v36  ;;  %v13713_v44 = vcombine.high %v1495_v55, %v1499_v39  ;;  %v1551_v62 = vld [vmem:[%s14751_s28 + $0x2488] sm:$0xff]  ;;  %v13712_v14 = vcombine.low %v1495_v55, %v1499_v39 }
 0x2f8   : > { %v1555_v53 = vld [vmem:[%s14751_s28 + $0x24a8] sm:$0xff] }
 0x2f9   : > { %11026 = vmatpush1.bf16.msra.mxu1 %v13624_v31  ;;  %11001 = vmatmul.mubr.bf16.vlgmr.msra.gmra.mxu0 %v14348_v34  ;;  %v1487_v63 = vld [vmem:[%s14751_s28 + $0x2288] sm:$0xff]  ;;  %v13769_v27 = vcombine.high %v1551_v62, %v1555_v53  ;;  %v13768_v11 = vcombine.low %v1551_v62, %v1555_v53 }
 0x2fa   : > { %11027 = vmatprep.subr.bf16.mxu1 %v13745_v33  ;;  %11055 = vmatpush1.bf16.msra.mxu0 %v13808_v29  ;;  %v1491_v0 = vld [vmem:[%s14751_s28 + $0x22a8] sm:$0xff] }
 0x2fb   : > { %11086 = vmatprep.mubr.bf16.mxu0 %v14349_v24  ;;  %11056 = vmatprep.subr.bf16.mxu0 %v13801_v43  ;;  %v13705_v57 = vcombine.high %v1487_v63, %v1491_v0  ;;  %v1543_v2 = vld [vmem:[%s14751_s28 + $0x2448] sm:$0xff]  ;;  %v13704_v12 = vcombine.low %v1487_v63, %v1491_v0 }
 0x2fc   : > { %v1547_v4 = vld [vmem:[%s14751_s28 + $0x2468] sm:$0xff] }
 0x2fd   : > { %11028 = vmatpush2.bf16.msra.mxu1 %v13744_v30  ;;  %v1479_v8 = vld [vmem:[%s14751_s28 + $0x2248] sm:$0xff]  ;;  %v13761_v6 = vcombine.high %v1543_v2, %v1547_v4  ;;  %v13760_v16 = vcombine.low %v1543_v2, %v1547_v4 }
 0x2fe   : > { %11029 = vmatprep.subr.bf16.mxu1 %v13737_v58  ;;  %11057 = vmatpush1.bf16.msra.mxu0 %v13800_v40  ;;  %v1483_v10 = vld [vmem:[%s14751_s28 + $0x2268] sm:$0xff] }
 0x2ff   : > { %11058 = vmatprep.subr.bf16.mxu0 %v13793_v41  ;;  %v13697_v23 = vcombine.high %v1479_v8, %v1483_v10  ;;  %v1535_v21 = vld [vmem:[%s14751_s28 + $0x2408] sm:$0xff]  ;;  %v13696_v17 = vcombine.low %v1479_v8, %v1483_v10  ;;  %v14350_v41 = vld [vmem:[#allocation2 + $0x40] ss:$100 sps:$4 sm:$0xff]  }
 0x300   : > { %v1539_v37 = vld [vmem:[%s14751_s28 + $0x2428] sm:$0xff] }
 0x301   : > { %11030 = vmatpush2.bf16.msra.mxu1 %v13736_v13  ;;  %v1471_v49 = vld [vmem:[%s14751_s28 + $0x2208] sm:$0xff]  ;;  %v13753_v19 = vcombine.high %v1535_v21, %v1539_v37  ;;  %v13752_v47 = vcombine.low %v1535_v21, %v1539_v37 }
 0x302   : > { %11031 = vmatprep.subr.bf16.mxu1 %v13729_v18  ;;  %11059 = vmatpush1.bf16.msra.mxu0 %v13792_v45  ;;  %v1475_v15 = vld [vmem:[%s14751_s28 + $0x2228] sm:$0xff] }
 0x303   : > { %11060 = vmatprep.subr.bf16.mxu0 %v13785_v51  ;;  %v13689_v22 = vcombine.high %v1471_v49, %v1475_v15  ;;  %v1655_v20 = vld [vmem:[%s14751_s28 + $0x27c8] sm:$0xff]  ;;  %v13688_v50 = vcombine.low %v1471_v49, %v1475_v15 }
 0x304   : > { %v1659_v31 = vld [vmem:[%s14751_s28 + $0x27e8] sm:$0xff] }
 0x305   : > { %11032 = vmatpush2.bf16.msra.mxu1 %v13728_v46  ;;  %v1719_v36 = vld [vmem:[%s14751_s28 + $0x29c8] sm:$0xff]  ;;  %v13873_v60 = vcombine.high %v1655_v20, %v1659_v31  ;;  %v13872_v1 = vcombine.low %v1655_v20, %v1659_v31 }
 0x306   : > { %11033 = vmatprep.subr.bf16.mxu1 %v13721_v52  ;;  %11061 = vmatpush1.bf16.msra.mxu0 %v13784_v56  ;;  %v1723_v33 = vld [vmem:[%s14751_s28 + $0x29e8] sm:$0xff] }
 0x307   : > { %11062 = vmatprep.subr.bf16.mxu0 %v13777_v38  ;;  %v13937_v9 = vcombine.high %v1719_v36, %v1723_v33  ;;  %v1647_v29 = vld [vmem:[%s14751_s28 + $0x2788] sm:$0xff]  ;;  %v13936_v32 = vcombine.low %v1719_v36, %v1723_v33 }
 0x308   : > { %v1651_v30 = vld [vmem:[%s14751_s28 + $0x27a8] sm:$0xff] }
 0x309   : > { %11034 = vmatpush2.bf16.msra.mxu1 %v13720_v61  ;;  %v1711_v43 = vld [vmem:[%s14751_s28 + $0x2988] sm:$0xff]  ;;  %v13865_v34 = vcombine.high %v1647_v29, %v1651_v30  ;;  %v13864_v18 = vcombine.low %v1647_v29, %v1651_v30 }
 0x30a   : > { %11035 = vmatprep.subr.bf16.mxu1 %v13713_v44  ;;  %11063 = vmatpush1.bf16.msra.mxu0 %v13776_v3  ;;  %v1715_v58 = vld [vmem:[%s14751_s28 + $0x29a8] sm:$0xff] }
 0x30b   : > { %11064 = vmatprep.subr.bf16.mxu0 %v13769_v27  ;;  %v13929_v35 = vcombine.high %v1711_v43, %v1715_v58  ;;  %v1639_v5 = vld [vmem:[%s14751_s28 + $0x2748] sm:$0xff]  ;;  %v13928_v59 = vcombine.low %v1711_v43, %v1715_v58 }
 0x30c   : > { %v1643_v40 = vld [vmem:[%s14751_s28 + $0x2768] sm:$0xff] }
 0x30d   : > { %11036 = vmatpush2.bf16.msra.mxu1 %v13712_v14  ;;  %v1703_v24 = vld [vmem:[%s14751_s28 + $0x2948] sm:$0xff]  ;;  %v13857_v26 = vcombine.high %v1639_v5, %v1643_v40  ;;  %v13856_v25 = vcombine.low %v1639_v5, %v1643_v40 }
 0x30e   : > { %11037 = vmatprep.subr.bf16.mxu1 %v13705_v57  ;;  %11065 = vmatpush1.bf16.msra.mxu0 %v13768_v11  ;;  %v1707_v13 = vld [vmem:[%s14751_s28 + $0x2968] sm:$0xff] }
 0x30f   : > { %11066 = vmatprep.subr.bf16.mxu0 %v13761_v6  ;;  %v13921_v7 = vcombine.high %v1703_v24, %v1707_v13  ;;  %v1631_v42 = vld [vmem:[%s14751_s28 + $0x2708] sm:$0xff]  ;;  %v13920_v54 = vcombine.low %v1703_v24, %v1707_v13 }
 0x310   : > { %v1635_v45 = vld [vmem:[%s14751_s28 + $0x2728] sm:$0xff] }
 0x311   : > { %11038 = vmatpush2.bf16.msra.mxu1 %v13704_v12  ;;  %v14351_v46 = vld [vmem:[#allocation2 + $0x54] ss:$100 sps:$4 sm:$0xff]   ;;  %v13849_v55 = vcombine.high %v1631_v42, %v1635_v45  ;;  %v13848_v62 = vcombine.low %v1631_v42, %v1635_v45  ;;  %v14353_v45 = vld [vmem:[#allocation2 + $0x5c] ss:$100 sps:$4 sm:$0xff]  }
 0x312   : > { %11039 = vmatprep.subr.bf16.mxu1 %v13697_v23  ;;  %11067 = vmatpush1.bf16.msra.mxu0 %v13760_v16  ;;  %v1695_v51 = vld [vmem:[%s14751_s28 + $0x2908] sm:$0xff] }
 0x313   : > { %11068 = vmatprep.subr.bf16.mxu0 %v13753_v19  ;;  %v1699_v52 = vld [vmem:[%s14751_s28 + $0x2928] sm:$0xff] }
 0x314   : > { %v13913_v39 = vcombine.high %v1695_v51, %v1699_v52  ;;  %v1623_v56 = vld [vmem:[%s14751_s28 + $0x26c8] sm:$0xff]  ;;  %v13912_v53 = vcombine.low %v1695_v51, %v1699_v52 }
 0x315   : > { %11040 = vmatpush2.bf16.msra.mxu1 %v13696_v17  ;;  %v1627_v61 = vld [vmem:[%s14751_s28 + $0x26e8] sm:$0xff] }
 0x316   : > { %11041 = vmatprep.subr.bf16.mxu1 %v13689_v22  ;;  %11069 = vmatpush1.bf16.msra.mxu0 %v13752_v47  ;;  %v1687_v38 = vld [vmem:[%s14751_s28 + $0x28c8] sm:$0xff]  ;;  %v13841_v63 = vcombine.high %v1623_v56, %v1627_v61  ;;  %v13840_v2 = vcombine.low %v1623_v56, %v1627_v61 }
 0x317   : > { %11070 = vmatprep.subr.bf16.mxu0 %v13873_v60  ;;  %v1691_v44 = vld [vmem:[%s14751_s28 + $0x28e8] sm:$0xff] }
 0x318   : > { %v13905_v0 = vcombine.high %v1687_v38, %v1691_v44  ;;  %v1615_v3 = vld [vmem:[%s14751_s28 + $0x2688] sm:$0xff]  ;;  %v13904_v4 = vcombine.low %v1687_v38, %v1691_v44 }
 0x319   : > { %11042 = vmatpush2.bf16.msra.mxu1 %v13688_v50  ;;  %v1619_v14 = vld [vmem:[%s14751_s28 + $0x26a8] sm:$0xff] }
 0x31a   : > { %11097 = vmatprep.subr.bf16.mxu1 %v13937_v9  ;;  %11071 = vmatpush2.bf16.msra.mxu0 %v13872_v1  ;;  %v1679_v27 = vld [vmem:[%s14751_s28 + $0x2888] sm:$0xff]  ;;  %v13833_v8 = vcombine.high %v1615_v3, %v1619_v14  ;;  %v13832_v21 = vcombine.low %v1615_v3, %v1619_v14 }
 0x31b   : > { %11072 = vmatprep.subr.bf16.mxu0 %v13865_v34  ;;  %v1683_v57 = vld [vmem:[%s14751_s28 + $0x28a8] sm:$0xff] }
 0x31c   : > { %11044 = vmatmul.mubr.bf16.vlgmr.msra.gmra.mxu1 %v14350_v41  ;;  %v13897_v10 = vcombine.high %v1679_v27, %v1683_v57  ;;  %v1607_v11 = vld [vmem:[%s14751_s28 + $0x2648] sm:$0xff]  ;;  %v13896_v37 = vcombine.low %v1679_v27, %v1683_v57 }
 0x31d   : > { %11098 = vmatpush1.bf16.msra.mxu1 %v13936_v32  ;;  %11129 = vmatprep.mubr.bf16.mxu1 %v14351_v46  ;;  %v1611_v12 = vld [vmem:[%s14751_s28 + $0x2668] sm:$0xff] }
 0x31e   : > { %11099 = vmatprep.subr.bf16.mxu1 %v13929_v35  ;;  %11073 = vmatpush2.bf16.msra.mxu0 %v13864_v18  ;;  %v1671_v6 = vld [vmem:[%s14751_s28 + $0x2848] sm:$0xff]  ;;  %v13825_v49 = vcombine.high %v1607_v11, %v1611_v12  ;;  %v13824_v20 = vcombine.low %v1607_v11, %v1611_v12 }
 0x31f   : > { %11074 = vmatprep.subr.bf16.mxu0 %v13857_v26  ;;  %v1675_v23 = vld [vmem:[%s14751_s28 + $0x2868] sm:$0xff] }
 0x320   : > { %v13889_v15 = vcombine.high %v1671_v6, %v1675_v23  ;;  %v1599_v16 = vld [vmem:[%s14751_s28 + $0x2608] sm:$0xff]  ;;  %v13888_v31 = vcombine.low %v1671_v6, %v1675_v23 }
 0x321   : > { %11100 = vmatpush1.bf16.msra.mxu1 %v13928_v59  ;;  %v1603_v17 = vld [vmem:[%s14751_s28 + $0x2628] sm:$0xff]  ;;  %v14352_v59 = vld [vmem:[#allocation2 + $0x48] ss:$100 sps:$4 sm:$0xff]  }
 0x322   : > { %11101 = vmatprep.subr.bf16.mxu1 %v13921_v7  ;;  %11075 = vmatpush2.bf16.msra.mxu0 %v13856_v25  ;;  %v1663_v19 = vld [vmem:[%s14751_s28 + $0x2808] sm:$0xff]  ;;  %v13817_v36 = vcombine.high %v1599_v16, %v1603_v17  ;;  %v13816_v29 = vcombine.low %v1599_v16, %v1603_v17 }
 0x323   : > { %11076 = vmatprep.subr.bf16.mxu0 %v13849_v55  ;;  %v1667_v22 = vld [vmem:[%s14751_s28 + $0x2828] sm:$0xff] }
 0x324   : > { %v13881_v33 = vcombine.high %v1663_v19, %v1667_v22  ;;  %v1847_v47 = vld [vmem:[%s14751_s28 + $0x2dc8] sm:$0xff]  ;;  %v13880_v30 = vcombine.low %v1663_v19, %v1667_v22 }
 0x325   : > { %11102 = vmatpush1.bf16.msra.mxu1 %v13920_v54  ;;  %v1851_v50 = vld [vmem:[%s14751_s28 + $0x2de8] sm:$0xff] }
 0x326   : > { %11103 = vmatprep.subr.bf16.mxu1 %v13913_v39  ;;  %11077 = vmatpush2.bf16.msra.mxu0 %v13848_v62  ;;  %v1783_v60 = vld [vmem:[%s14751_s28 + $0x2bc8] sm:$0xff]  ;;  %v14065_v43 = vcombine.high %v1847_v47, %v1851_v50  ;;  %v14064_v5 = vcombine.low %v1847_v47, %v1851_v50 }
 0x327   : > { %11078 = vmatprep.subr.bf16.mxu0 %v13841_v63  ;;  %v1787_v9 = vld [vmem:[%s14751_s28 + $0x2be8] sm:$0xff] }
 0x328   : > { %v14001_v58 = vcombine.high %v1783_v60, %v1787_v9  ;;  %v1839_v1 = vld [vmem:[%s14751_s28 + $0x2d88] sm:$0xff]  ;;  %v14000_v40 = vcombine.low %v1783_v60, %v1787_v9 }
 0x329   : > { %11104 = vmatpush1.bf16.msra.mxu1 %v13912_v53  ;;  %v1843_v32 = vld [vmem:[%s14751_s28 + $0x2da8] sm:$0xff] }
 0x32a   : > { %11105 = vmatprep.subr.bf16.mxu1 %v13905_v0  ;;  %11079 = vmatpush2.bf16.msra.mxu0 %v13840_v2  ;;  %v1775_v34 = vld [vmem:[%s14751_s28 + $0x2b88] sm:$0xff]  ;;  %v14057_v24 = vcombine.high %v1839_v1, %v1843_v32  ;;  %v14056_v42 = vcombine.low %v1839_v1, %v1843_v32 }
 0x32b   : > { %11080 = vmatprep.subr.bf16.mxu0 %v13833_v8  ;;  %v1779_v35 = vld [vmem:[%s14751_s28 + $0x2ba8] sm:$0xff] }
 0x32c   : > { %v13993_v13 = vcombine.high %v1775_v34, %v1779_v35  ;;  %v1831_v41 = vld [vmem:[%s14751_s28 + $0x2d48] sm:$0xff]  ;;  %v13992_v46 = vcombine.low %v1775_v34, %v1779_v35 }
 0x32d   : > { %11106 = vmatpush1.bf16.msra.mxu1 %v13904_v4  ;;  %v1835_v18 = vld [vmem:[%s14751_s28 + $0x2d68] sm:$0xff] }
 0x32e   : > { %11107 = vmatprep.subr.bf16.mxu1 %v13897_v10  ;;  %11081 = vmatpush2.bf16.msra.mxu0 %v13832_v21  ;;  %v1767_v26 = vld [vmem:[%s14751_s28 + $0x2b48] sm:$0xff]  ;;  %v14049_v51 = vcombine.high %v1831_v41, %v1835_v18  ;;  %v14048_v56 = vcombine.low %v1831_v41, %v1835_v18 }
 0x32f   : > { %11082 = vmatprep.subr.bf16.mxu0 %v13825_v49  ;;  %v1771_v7 = vld [vmem:[%s14751_s28 + $0x2b68] sm:$0xff] }
 0x330   : > { %v13985_v52 = vcombine.high %v1767_v26, %v1771_v7  ;;  %v1823_v25 = vld [vmem:[%s14751_s28 + $0x2d08] sm:$0xff]  ;;  %v13984_v61 = vcombine.low %v1767_v26, %v1771_v7 }
 0x331   : > { %11108 = vmatpush1.bf16.msra.mxu1 %v13896_v37  ;;  %v1827_v54 = vld [vmem:[%s14751_s28 + $0x2d28] sm:$0xff] }
 0x332   : > { %11109 = vmatprep.subr.bf16.mxu1 %v13889_v15  ;;  %11083 = vmatpush2.bf16.msra.mxu0 %v13824_v20  ;;  %v1759_v55 = vld [vmem:[%s14751_s28 + $0x2b08] sm:$0xff]  ;;  %v14041_v38 = vcombine.high %v1823_v25, %v1827_v54  ;;  %v14040_v3 = vcombine.low %v1823_v25, %v1827_v54 }
 0x333   : > { %11084 = vmatprep.subr.bf16.mxu0 %v13817_v36  ;;  %v1763_v39 = vld [vmem:[%s14751_s28 + $0x2b28] sm:$0xff] }
 0x334   : > { %v13977_v44 = vcombine.high %v1759_v55, %v1763_v39  ;;  %v1815_v62 = vld [vmem:[%s14751_s28 + $0x2cc8] sm:$0xff]  ;;  %v13976_v14 = vcombine.low %v1759_v55, %v1763_v39 }
 0x335   : > { %11110 = vmatpush1.bf16.msra.mxu1 %v13888_v31  ;;  %v1819_v53 = vld [vmem:[%s14751_s28 + $0x2ce8] sm:$0xff] }
 0x336   : > { %11111 = vmatprep.subr.bf16.mxu1 %v13881_v33  ;;  %11085 = vmatpush2.bf16.msra.mxu0 %v13816_v29  ;;  %v1751_v63 = vld [vmem:[%s14751_s28 + $0x2ac8] sm:$0xff]  ;;  %v14033_v27 = vcombine.high %v1815_v62, %v1819_v53  ;;  %v14032_v11 = vcombine.low %v1815_v62, %v1819_v53 }
 0x337   : > { %11140 = vmatprep.subr.bf16.mxu0 %v14065_v43  ;;  %v1755_v0 = vld [vmem:[%s14751_s28 + $0x2ae8] sm:$0xff] }
 0x338   : > { %v13969_v57 = vcombine.high %v1751_v63, %v1755_v0  ;;  %v1807_v2 = vld [vmem:[%s14751_s28 + $0x2c88] sm:$0xff]  ;;  %v13968_v12 = vcombine.low %v1751_v63, %v1755_v0 }
 0x339   : > { %11112 = vmatpush1.bf16.msra.mxu1 %v13880_v30  ;;  %11087 = vmatmul.mubr.bf16.vlgmr.msra.gmra.mxu0 %v14352_v59  ;;  %v1811_v4 = vld [vmem:[%s14751_s28 + $0x2ca8] sm:$0xff] }
 0x33a   : > { %11113 = vmatprep.subr.bf16.mxu1 %v14001_v58  ;;  %11141 = vmatpush1.bf16.msra.mxu0 %v14064_v5  ;;  %v1743_v8 = vld [vmem:[%s14751_s28 + $0x2a88] sm:$0xff]  ;;  %v14025_v6 = vcombine.high %v1807_v2, %v1811_v4  ;;  %v14024_v16 = vcombine.low %v1807_v2, %v1811_v4 }
 0x33b   : > { %11172 = vmatprep.mubr.bf16.mxu0 %v14353_v45  ;;  %11142 = vmatprep.subr.bf16.mxu0 %v14057_v24  ;;  %v1747_v10 = vld [vmem:[%s14751_s28 + $0x2aa8] sm:$0xff] }
 0x33c   : > { %v13961_v23 = vcombine.high %v1743_v8, %v1747_v10  ;;  %v1799_v21 = vld [vmem:[%s14751_s28 + $0x2c48] sm:$0xff]  ;;  %v13960_v17 = vcombine.low %v1743_v8, %v1747_v10 }
 0x33d   : > { %11114 = vmatpush2.bf16.msra.mxu1 %v14000_v40  ;;  %v1803_v37 = vld [vmem:[%s14751_s28 + $0x2c68] sm:$0xff] }
 0x33e   : > { %11115 = vmatprep.subr.bf16.mxu1 %v13993_v13  ;;  %11143 = vmatpush1.bf16.msra.mxu0 %v14056_v42  ;;  %v1735_v49 = vld [vmem:[%s14751_s28 + $0x2a48] sm:$0xff]  ;;  %v14017_v19 = vcombine.high %v1799_v21, %v1803_v37  ;;  %v14016_v47 = vcombine.low %v1799_v21, %v1803_v37 }
 0x33f   : > { %11144 = vmatprep.subr.bf16.mxu0 %v14049_v51  ;;  %v1739_v15 = vld [vmem:[%s14751_s28 + $0x2a68] sm:$0xff] }
 0x340   : > { %v13953_v22 = vcombine.high %v1735_v49, %v1739_v15  ;;  %v1791_v20 = vld [vmem:[%s14751_s28 + $0x2c08] sm:$0xff]  ;;  %v13952_v50 = vcombine.low %v1735_v49, %v1739_v15 }
 0x341   : > { %11116 = vmatpush2.bf16.msra.mxu1 %v13992_v46  ;;  %v1795_v31 = vld [vmem:[%s14751_s28 + $0x2c28] sm:$0xff] }
 0x342   : > { %11117 = vmatprep.subr.bf16.mxu1 %v13985_v52  ;;  %11145 = vmatpush1.bf16.msra.mxu0 %v14048_v56  ;;  %v1727_v36 = vld [vmem:[%s14751_s28 + $0x2a08] sm:$0xff]  ;;  %v14009_v60 = vcombine.high %v1791_v20, %v1795_v31  ;;  %v14008_v1 = vcombine.low %v1791_v20, %v1795_v31 }
 0x343   : > { %11146 = vmatprep.subr.bf16.mxu0 %v14041_v38  ;;  %v1731_v33 = vld [vmem:[%s14751_s28 + $0x2a28] sm:$0xff] }
 0x344   : > { %v13945_v9 = vcombine.high %v1727_v36, %v1731_v33  ;;  %v1911_v29 = vld [vmem:[%s14751_s28 + $0x2fc8] sm:$0xff]  ;;  %v13944_v32 = vcombine.low %v1727_v36, %v1731_v33 }
 0x345   : > { %11118 = vmatpush2.bf16.msra.mxu1 %v13984_v61  ;;  %v1915_v30 = vld [vmem:[%s14751_s28 + $0x2fe8] sm:$0xff] }
 0x346   : > { %11119 = vmatprep.subr.bf16.mxu1 %v13977_v44  ;;  %11147 = vmatpush1.bf16.msra.mxu0 %v14040_v3  ;;  %v1975_v43 = vld [vmem:[%s14751_s28 + $0x31c8] sm:$0xff]  ;;  %v14129_v34 = vcombine.high %v1911_v29, %v1915_v30  ;;  %v14128_v41 = vcombine.low %v1911_v29, %v1915_v30 }
 0x347   : > { %11148 = vmatprep.subr.bf16.mxu0 %v14033_v27  ;;  %v1979_v58 = vld [vmem:[%s14751_s28 + $0x31e8] sm:$0xff] }
 0x348   : > { %v14193_v35 = vcombine.high %v1975_v43, %v1979_v58  ;;  %v1903_v5 = vld [vmem:[%s14751_s28 + $0x2f88] sm:$0xff]  ;;  %v14192_v18 = vcombine.low %v1975_v43, %v1979_v58  ;;  %v440_v58 = vld [vmem:[%s14751_s28 + $0x1d0] sm:$0xff] }
 0x349   : > { %11120 = vmatpush2.bf16.msra.mxu1 %v13976_v14  ;;  %v1907_v40 = vld [vmem:[%s14751_s28 + $0x2fa8] sm:$0xff] }
 0x34a   : > { %11121 = vmatprep.subr.bf16.mxu1 %v13969_v57  ;;  %11149 = vmatpush1.bf16.msra.mxu0 %v14032_v11  ;;  %v1967_v24 = vld [vmem:[%s14751_s28 + $0x3188] sm:$0xff]  ;;  %v14121_v59 = vcombine.high %v1903_v5, %v1907_v40  ;;  %v14120_v52 = vcombine.low %v1903_v5, %v1907_v40 }
 0x34b   : > { %11150 = vmatprep.subr.bf16.mxu0 %v14025_v6  ;;  %v1971_v13 = vld [vmem:[%s14751_s28 + $0x31a8] sm:$0xff] }
 0x34c   : > { %v14185_v26 = vcombine.high %v1967_v24, %v1971_v13  ;;  %v1895_v7 = vld [vmem:[%s14751_s28 + $0x2f48] sm:$0xff]  ;;  %v14184_v25 = vcombine.low %v1967_v24, %v1971_v13  ;;  %v432_v13 = vld [vmem:[%s14751_s28 + $0x190] sm:$0xff] }
 0x34d   : > { %11122 = vmatpush2.bf16.msra.mxu1 %v13968_v12  ;;  %v1899_v42 = vld [vmem:[%s14751_s28 + $0x2f68] sm:$0xff] }
 0x34e   : > { %11123 = vmatprep.subr.bf16.mxu1 %v13961_v23  ;;  %11151 = vmatpush1.bf16.msra.mxu0 %v14024_v16  ;;  %v1959_v45 = vld [vmem:[%s14751_s28 + $0x3148] sm:$0xff]  ;;  %v14113_v54 = vcombine.high %v1895_v7, %v1899_v42  ;;  %v14112_v44 = vcombine.low %v1895_v7, %v1899_v42 }
 0x34f   : > { %11152 = vmatprep.subr.bf16.mxu0 %v14017_v19  ;;  %v1963_v46 = vld [vmem:[%s14751_s28 + $0x3168] sm:$0xff] }
 0x350   : > { %v14354_v51 = vld [vmem:[#allocation2 + $0x50] ss:$100 sps:$4 sm:$0xff]   ;;  %v14177_v55 = vcombine.high %v1959_v45, %v1963_v46  ;;  %v14176_v62 = vcombine.low %v1959_v45, %v1963_v46  ;;  %v424_v46 = vld [vmem:[%s14751_s28 + $0x150] sm:$0xff] }
 0x351   : > { %11124 = vmatpush2.bf16.msra.mxu1 %v13960_v17  ;;  %v1887_v39 = vld [vmem:[%s14751_s28 + $0x2f08] sm:$0xff] }
 0x352   : > { %11125 = vmatprep.subr.bf16.mxu1 %v13953_v22  ;;  %11153 = vmatpush1.bf16.msra.mxu0 %v14016_v47  ;;  %v1891_v56 = vld [vmem:[%s14751_s28 + $0x2f28] sm:$0xff] }
 0x353   : > { %11154 = vmatprep.subr.bf16.mxu0 %v14009_v60  ;;  %v1951_v61 = vld [vmem:[%s14751_s28 + $0x3108] sm:$0xff]  ;;  %v14105_v53 = vcombine.high %v1887_v39, %v1891_v56  ;;  %v14104_v57 = vcombine.low %v1887_v39, %v1891_v56 }
 0x354   : > { %v1955_v38 = vld [vmem:[%s14751_s28 + $0x3128] sm:$0xff] }
 0x355   : > { %11126 = vmatpush2.bf16.msra.mxu1 %v13952_v50  ;;  %v14169_v63 = vcombine.high %v1951_v61, %v1955_v38  ;;  %v1879_v0 = vld [vmem:[%s14751_s28 + $0x2ec8] sm:$0xff]  ;;  %v14168_v2 = vcombine.low %v1951_v61, %v1955_v38 }
 0x356   : > { %11127 = vmatprep.subr.bf16.mxu1 %v13945_v9  ;;  %11155 = vmatpush1.bf16.msra.mxu0 %v14008_v1  ;;  %v1883_v3 = vld [vmem:[%s14751_s28 + $0x2ee8] sm:$0xff]  ;;  %v444_v1 = vld [vmem:[%s14751_s28 + $0x1f0] sm:$0xff] }
 0x357   : > { %11156 = vmatprep.subr.bf16.mxu0 %v14129_v34  ;;  %v1943_v14 = vld [vmem:[%s14751_s28 + $0x30c8] sm:$0xff]  ;;  %v14097_v4 = vcombine.high %v1879_v0, %v1883_v3  ;;  %v14096_v23 = vcombine.low %v1879_v0, %v1883_v3  ;;  %v572_v34 = vld [vmem:[%s14751_s28 + $0x5f0] sm:$0xff]  ;;  %v12659_v40 = vcombine.high %v440_v58, %v444_v1 }
 0x358   : > { %v1947_v27 = vld [vmem:[%s14751_s28 + $0x30e8] sm:$0xff]  ;;  %v548_v0 = vld [vmem:[%s14751_s28 + $0x530] sm:$0xff] }
 0x359   : > { %11128 = vmatpush2.bf16.msra.mxu1 %v13944_v32  ;;  %v14161_v8 = vcombine.high %v1943_v14, %v1947_v27  ;;  %v1871_v10 = vld [vmem:[%s14751_s28 + $0x2e88] sm:$0xff]  ;;  %v14160_v21 = vcombine.low %v1943_v14, %v1947_v27  ;;  %v568_v32 = vld [vmem:[%s14751_s28 + $0x5d0] sm:$0xff] }
 0x35a   : > { %11183 = vmatprep.subr.bf16.mxu1 %v14193_v35  ;;  %11157 = vmatpush2.bf16.msra.mxu0 %v14128_v41  ;;  %v1875_v11 = vld [vmem:[%s14751_s28 + $0x2ea8] sm:$0xff]  ;;  %v12787_v24 = vcombine.high %v568_v32, %v572_v34  ;;  %v436_v41 = vld [vmem:[%s14751_s28 + $0x1b0] sm:$0xff]  ;;  %v12786_v7 = vcombine.low %v568_v32, %v572_v34 }
 0x35b   : > { %11158 = vmatprep.subr.bf16.mxu0 %v14121_v59  ;;  %v1935_v12 = vld [vmem:[%s14751_s28 + $0x3088] sm:$0xff]  ;;  %v14089_v37 = vcombine.high %v1871_v10, %v1875_v11  ;;  %v14088_v22 = vcombine.low %v1871_v10, %v1875_v11  ;;  %v564_v59 = vld [vmem:[%s14751_s28 + $0x5b0] sm:$0xff]  ;;  %v12651_v42 = vcombine.high %v432_v13, %v436_v41  ;;  %v12650_v39 = vcombine.low %v432_v13, %v436_v41 }
 0x35c   : > { %11130 = vmatmul.mubr.bf16.vlgmr.msra.gmra.mxu1 %v14354_v51  ;;  %v1939_v6 = vld [vmem:[%s14751_s28 + $0x30a8] sm:$0xff]  ;;  %v428_v51 = vld [vmem:[%s14751_s28 + $0x170] sm:$0xff] }
 0x35d   : > { %11184 = vmatpush1.bf16.msra.mxu1 %v14192_v18  ;;  %11215 = vmatprep.mubr.bf16.mxu1 %v14586_v48  ;;  %v14153_v49 = vcombine.high %v1935_v12, %v1939_v6  ;;  %v1863_v15 = vld [vmem:[%s14751_s28 + $0x2e48] sm:$0xff]  ;;  %v14152_v20 = vcombine.low %v1935_v12, %v1939_v6  ;;  %v560_v18 = vld [vmem:[%s14751_s28 + $0x590] sm:$0xff]  ;;  %v12643_v61 = vcombine.high %v424_v46, %v428_v51 }
 0x35e   : > { %11185 = vmatprep.subr.bf16.mxu1 %v14185_v26  ;;  %11159 = vmatpush2.bf16.msra.mxu0 %v14120_v52  ;;  %v1867_v16 = vld [vmem:[%s14751_s28 + $0x2e68] sm:$0xff]  ;;  %v12658_v26 = vcombine.low %v440_v58, %v444_v1  ;;  %v12779_v45 = vcombine.high %v560_v18, %v564_v59  ;;  %v14355_v52 = vld [vmem:[#allocation2 + $0x58] ss:$100 sps:$4 sm:$0xff]   ;;  %v12778_v56 = vcombine.low %v560_v18, %v564_v59 }
 0x35f   : > { %11160 = vmatprep.subr.bf16.mxu0 %v14113_v54  ;;  %v1927_v17 = vld [vmem:[%s14751_s28 + $0x3048] sm:$0xff]  ;;  %v14081_v31 = vcombine.high %v1863_v15, %v1867_v16  ;;  %v14080_v9 = vcombine.low %v1863_v15, %v1867_v16  ;;  %v556_v54 = vld [vmem:[%s14751_s28 + $0x570] sm:$0xff]  ;;  %v12642_v14 = vcombine.low %v424_v46, %v428_v51 }
 0x360   : > { %v1931_v19 = vld [vmem:[%s14751_s28 + $0x3068] sm:$0xff]  ;;  %v536_v10 = vld [vmem:[%s14751_s28 + $0x4d0] sm:$0xff] }
 0x361   : > { %11186 = vmatpush1.bf16.msra.mxu1 %v14184_v25  ;;  %v14145_v36 = vcombine.high %v1927_v17, %v1931_v19  ;;  %v1855_v33 = vld [vmem:[%s14751_s28 + $0x2e08] sm:$0xff]  ;;  %v14144_v29 = vcombine.low %v1927_v17, %v1931_v19  ;;  %v552_v25 = vld [vmem:[%s14751_s28 + $0x550] sm:$0xff] }
 0x362   : > { %11187 = vmatprep.subr.bf16.mxu1 %v14177_v55  ;;  %11161 = vmatpush2.bf16.msra.mxu0 %v14112_v44  ;;  %v1859_v47 = vld [vmem:[%s14751_s28 + $0x2e28] sm:$0xff]  ;;  %v14356_v55 = vld [vmem:[#allocation2 + $0x60] ss:$100 sps:$4 sm:$0xff]   ;;  %v12771_v38 = vcombine.high %v552_v25, %v556_v54  ;;  %v416_v44 = vld [vmem:[%s14751_s28 + $0x110] sm:$0xff]  ;;  %v12770_v27 = vcombine.low %v552_v25, %v556_v54 }
 0x363   : > { %11162 = vmatprep.subr.bf16.mxu0 %v14105_v53  ;;  %v1919_v50 = vld [vmem:[%s14751_s28 + $0x3008] sm:$0xff]  ;;  %v14073_v30 = vcombine.high %v1855_v33, %v1859_v47  ;;  %v14072_v35 = vcombine.low %v1855_v33, %v1859_v47  ;;  %v14357_v53 = vld [vmem:[#allocation2 + $0x4] ss:$100 sps:$4 sm:$0xff]   ;;  %v540_v11 = vld [vmem:[%s14751_s28 + $0x4f0] sm:$0xff] }
 0x364   : > { %v1923_v60 = vld [vmem:[%s14751_s28 + $0x3028] sm:$0xff]  ;;  %v528_v15 = vld [vmem:[%s14751_s28 + $0x490] sm:$0xff]  ;;  %v12754_v19 = vcombine.low %v536_v10, %v540_v11 }
 0x365   : > { %11188 = vmatpush1.bf16.msra.mxu1 %v14176_v62  ;;  %v14137_v43 = vcombine.high %v1919_v50, %v1923_v60  ;;  %v14136_v5 = vcombine.low %v1919_v50, %v1923_v60  ;;  %v420_v62 = vld [vmem:[%s14751_s28 + $0x130] sm:$0xff]  ;;  %v14358_v3 = vld [vmem:[#allocation2 + $0xc] ss:$100 sps:$4 sm:$0xff]  }
 0x366   : > { %11189 = vmatprep.subr.bf16.mxu1 %v14169_v63  ;;  %11163 = vmatpush2.bf16.msra.mxu0 %v14104_v57  ;;  %v544_v63 = vld [vmem:[%s14751_s28 + $0x510] sm:$0xff]  ;;  %v12635_v57 = vcombine.high %v416_v44, %v420_v62  ;;  %v12634_v12 = vcombine.low %v416_v44, %v420_v62 }
 0x367   : > { %11164 = vmatprep.subr.bf16.mxu0 %v14097_v4  ;;  %v408_v4 = vld [vmem:[%s14751_s28 + $0xd0] sm:$0xff]  ;;  %v12762_v6 = vcombine.low %v544_v63, %v548_v0 }
 0x368   : > { %v532_v16 = vld [vmem:[%s14751_s28 + $0x4b0] sm:$0xff] }
 0x369   : > { %11190 = vmatpush1.bf16.msra.mxu1 %v14168_v2  ;;  %v12763_v2 = vcombine.high %v544_v63, %v548_v0  ;;  %v520_v33 = vld [vmem:[%s14751_s28 + $0x450] sm:$0xff]  ;;  %v12746_v60 = vcombine.low %v528_v15, %v532_v16 }
 0x36a   : > { %11191 = vmatprep.subr.bf16.mxu1 %v14161_v8  ;;  %11165 = vmatpush2.bf16.msra.mxu0 %v14096_v23  ;;  %v412_v8 = vld [vmem:[%s14751_s28 + $0xf0] sm:$0xff] }
 0x36b   : > { %11166 = vmatprep.subr.bf16.mxu0 %v14089_v37  ;;  %v12627_v23 = vcombine.high %v408_v4, %v412_v8  ;;  %v400_v37 = vld [vmem:[%s14751_s28 + $0x90] sm:$0xff]  ;;  %v12626_v17 = vcombine.low %v408_v4, %v412_v8 }
 0x36c   : > { %v524_v47 = vld [vmem:[%s14751_s28 + $0x470] sm:$0xff] }
 0x36d   : > { %11192 = vmatpush1.bf16.msra.mxu1 %v14160_v21  ;;  %v12755_v21 = vcombine.high %v536_v10, %v540_v11  ;;  %v512_v58 = vld [vmem:[%s14751_s28 + $0x410] sm:$0xff]  ;;  %v12738_v34 = vcombine.low %v520_v33, %v524_v47 }
 0x36e   : > { %11193 = vmatprep.subr.bf16.mxu1 %v14153_v49  ;;  %11167 = vmatpush2.bf16.msra.mxu0 %v14088_v22  ;;  %v404_v49 = vld [vmem:[%s14751_s28 + $0xb0] sm:$0xff] }
 0x36f   : > { %11168 = vmatprep.subr.bf16.mxu0 %v14081_v31  ;;  %v12619_v22 = vcombine.high %v400_v37, %v404_v49  ;;  %v392_v31 = vld [vmem:[%s14751_s28 + $0x50] sm:$0xff]  ;;  %v12618_v50 = vcombine.low %v400_v37, %v404_v49 }
 0x370   : > { %v516_v1 = vld [vmem:[%s14751_s28 + $0x430] sm:$0xff] }
 0x371   : > { %11194 = vmatpush1.bf16.msra.mxu1 %v14152_v20  ;;  %v12747_v20 = vcombine.high %v528_v15, %v532_v16  ;;  %v632_v13 = vld [vmem:[%s14751_s28 + $0x7d0] sm:$0xff]  ;;  %v12730_v59 = vcombine.low %v512_v58, %v516_v1 }
 0x372   : > { %11195 = vmatprep.subr.bf16.mxu1 %v14145_v36  ;;  %11169 = vmatpush2.bf16.msra.mxu0 %v14080_v9  ;;  %v396_v36 = vld [vmem:[%s14751_s28 + $0x70] sm:$0xff] }
 0x373   : > { %11170 = vmatprep.subr.bf16.mxu0 %v14073_v30  ;;  %v12611_v9 = vcombine.high %v392_v31, %v396_v36  ;;  %v384_v30 = vld [vmem:[%s14751_s28 + $0x10] sm:$0xff]  ;;  %v12610_v32 = vcombine.low %v392_v31, %v396_v36 }
 0x374   : > { %v636_v41 = vld [vmem:[%s14751_s28 + $0x7f0] sm:$0xff] }
 0x375   : > { %11196 = vmatpush1.bf16.msra.mxu1 %v14144_v29  ;;  %v12739_v29 = vcombine.high %v520_v33, %v524_v47  ;;  %v624_v46 = vld [vmem:[%s14751_s28 + $0x790] sm:$0xff]  ;;  %v12850_v25 = vcombine.low %v632_v13, %v636_v41 }
 0x376   : > { %11197 = vmatprep.subr.bf16.mxu1 %v14137_v43  ;;  %11171 = vmatpush2.bf16.msra.mxu0 %v14072_v35  ;;  %v388_v43 = vld [vmem:[%s14751_s28 + $0x30] sm:$0xff] }
 0x377   : > { %11226 = vmatprep.subr.bf16.mxu0 %v12659_v40  ;;  %v12603_v35 = vcombine.high %v384_v30, %v388_v43  ;;  %v504_v40 = vld [vmem:[%s14751_s28 + $0x3d0] sm:$0xff]  ;;  %v12602_v18 = vcombine.low %v384_v30, %v388_v43 }
 0x378   : > { %v628_v51 = vld [vmem:[%s14751_s28 + $0x7b0] sm:$0xff] }
 0x379   : > { %11198 = vmatpush1.bf16.msra.mxu1 %v14136_v5  ;;  %11173 = vmatmul.mubr.bf16.vlgmr.msra.gmra.mxu0 %v14355_v52  ;;  %v12731_v5 = vcombine.high %v512_v58, %v516_v1  ;;  %v12842_v62 = vcombine.low %v624_v46, %v628_v51  ;;  %v480_v0 = vld [vmem:[%s14751_s28 + $0x310] sm:$0xff] }
 0x37a   : > { %11269 = vmatprep.subr.bf16.mxu1 %v12787_v24  ;;  %11227 = vmatpush1.bf16.msra.mxu0 %v12658_v26  ;;  %v508_v24 = vld [vmem:[%s14751_s28 + $0x3f0] sm:$0xff] }
 0x37b   : > { %11228 = vmatprep.subr.bf16.mxu0 %v12651_v42  ;;  %11258 = vmatprep.mubr.bf16.mxu0 %v14357_v53  ;;  %v12723_v26 = vcombine.high %v504_v40, %v508_v24  ;;  %v496_v42 = vld [vmem:[%s14751_s28 + $0x390] sm:$0xff]  ;;  %v12722_v52 = vcombine.low %v504_v40, %v508_v24 }
 0x37c   : > { %11216 = vmatmul.mubr.bf16.vlgmr.msra.gmra.mxu1 %v14356_v55  ;;  %v12843_v55 = vcombine.high %v624_v46, %v628_v51  ;;  %v472_v10 = vld [vmem:[%s14751_s28 + $0x2d0] sm:$0xff] }
 0x37d   : > { %11270 = vmatpush1.bf16.msra.mxu1 %v12786_v7  ;;  %11301 = vmatprep.mubr.bf16.mxu1 %v14358_v3  ;;  %v12851_v7 = vcombine.high %v632_v13, %v636_v41  ;;  %v484_v3 = vld [vmem:[%s14751_s28 + $0x330] sm:$0xff] }
 0x37e   : > { %11271 = vmatprep.subr.bf16.mxu1 %v12779_v45  ;;  %11229 = vmatpush1.bf16.msra.mxu0 %v12650_v39  ;;  %v500_v45 = vld [vmem:[%s14751_s28 + $0x3b0] sm:$0xff]  ;;  %v12699_v4 = vcombine.high %v480_v0, %v484_v3 }
 0x37f   : > { %11230 = vmatprep.subr.bf16.mxu0 %v12643_v61  ;;  %v12715_v54 = vcombine.high %v496_v42, %v500_v45  ;;  %v488_v39 = vld [vmem:[%s14751_s28 + $0x350] sm:$0xff]  ;;  %v12714_v44 = vcombine.low %v496_v42, %v500_v45 }
 0x380   : > { %v616_v61 = vld [vmem:[%s14751_s28 + $0x750] sm:$0xff] }
 0x381   : > { %11272 = vmatpush1.bf16.msra.mxu1 %v12778_v56  ;;  %v492_v56 = vld [vmem:[%s14751_s28 + $0x370] sm:$0xff] }
 0x382   : > { %11273 = vmatprep.subr.bf16.mxu1 %v12771_v38  ;;  %11231 = vmatpush1.bf16.msra.mxu0 %v12642_v14  ;;  %v620_v38 = vld [vmem:[%s14751_s28 + $0x770] sm:$0xff]  ;;  %v12707_v53 = vcombine.high %v488_v39, %v492_v56 }
 0x383   : > { %11232 = vmatprep.subr.bf16.mxu0 %v12635_v57  ;;  %v12835_v63 = vcombine.high %v616_v61, %v620_v38  ;;  %v608_v14 = vld [vmem:[%s14751_s28 + $0x710] sm:$0xff]  ;;  %v12706_v57 = vcombine.low %v488_v39, %v492_v56 }
 0x384   : > { %v476_v11 = vld [vmem:[%s14751_s28 + $0x2f0] sm:$0xff] }
 0x385   : > { %11274 = vmatpush1.bf16.msra.mxu1 %v12770_v27  ;;  %v612_v27 = vld [vmem:[%s14751_s28 + $0x730] sm:$0xff]  ;;  %v12691_v37 = vcombine.high %v472_v10, %v476_v11 }
 0x386   : > { %11275 = vmatprep.subr.bf16.mxu1 %v12763_v2  ;;  %11233 = vmatpush1.bf16.msra.mxu0 %v12634_v12  ;;  %v12834_v2 = vcombine.low %v616_v61, %v620_v38  ;;  %v12827_v8 = vcombine.high %v608_v14, %v612_v27  ;;  %v600_v12 = vld [vmem:[%s14751_s28 + $0x6d0] sm:$0xff] }
 0x387   : > { %11234 = vmatprep.subr.bf16.mxu0 %v12627_v23  ;;  %v12698_v23 = vcombine.low %v480_v0, %v484_v3  ;;  %v464_v15 = vld [vmem:[%s14751_s28 + $0x290] sm:$0xff] }
 0x388   : > { %v468_v16 = vld [vmem:[%s14751_s28 + $0x2b0] sm:$0xff] }
 0x389   : > { %11276 = vmatpush1.bf16.msra.mxu1 %v12762_v6  ;;  %v604_v6 = vld [vmem:[%s14751_s28 + $0x6f0] sm:$0xff]  ;;  %v12683_v31 = vcombine.high %v464_v15, %v468_v16 }
 0x38a   : > { %11277 = vmatprep.subr.bf16.mxu1 %v12755_v21  ;;  %11235 = vmatpush1.bf16.msra.mxu0 %v12626_v17  ;;  %v12826_v21 = vcombine.low %v608_v14, %v612_v27  ;;  %v12819_v49 = vcombine.high %v600_v12, %v604_v6  ;;  %v592_v17 = vld [vmem:[%s14751_s28 + $0x690] sm:$0xff] }
 0x38b   : > { %11236 = vmatprep.subr.bf16.mxu0 %v12619_v22  ;;  %v12690_v22 = vcombine.low %v472_v10, %v476_v11  ;;  %v456_v33 = vld [vmem:[%s14751_s28 + $0x250] sm:$0xff] }
 0x38c   : > { %v460_v47 = vld [vmem:[%s14751_s28 + $0x270] sm:$0xff] }
 0x38d   : > { %11278 = vmatpush1.bf16.msra.mxu1 %v12754_v19  ;;  %v596_v19 = vld [vmem:[%s14751_s28 + $0x6b0] sm:$0xff]  ;;  %v12675_v30 = vcombine.high %v456_v33, %v460_v47 }
 0x38e   : > { %11279 = vmatprep.subr.bf16.mxu1 %v12747_v20  ;;  %11237 = vmatpush1.bf16.msra.mxu0 %v12618_v50  ;;  %v12818_v20 = vcombine.low %v600_v12, %v604_v6  ;;  %v12811_v36 = vcombine.high %v592_v17, %v596_v19  ;;  %v584_v50 = vld [vmem:[%s14751_s28 + $0x650] sm:$0xff] }
 0x38f   : > { %11238 = vmatprep.subr.bf16.mxu0 %v12611_v9  ;;  %v12682_v9 = vcombine.low %v464_v15, %v468_v16  ;;  %v448_v58 = vld [vmem:[%s14751_s28 + $0x210] sm:$0xff] }
 0x390   : > { %v452_v1 = vld [vmem:[%s14751_s28 + $0x230] sm:$0xff] }
 0x391   : > { %11280 = vmatpush1.bf16.msra.mxu1 %v12746_v60  ;;  %v588_v60 = vld [vmem:[%s14751_s28 + $0x670] sm:$0xff]  ;;  %v12667_v40 = vcombine.high %v448_v58, %v452_v1 }
 0x392   : > { %11281 = vmatprep.subr.bf16.mxu1 %v12739_v29  ;;  %11239 = vmatpush1.bf16.msra.mxu0 %v12610_v32  ;;  %v12810_v29 = vcombine.low %v592_v17, %v596_v19  ;;  %v12803_v43 = vcombine.high %v584_v50, %v588_v60  ;;  %v576_v32 = vld [vmem:[%s14751_s28 + $0x610] sm:$0xff] }
 0x393   : > { %11240 = vmatprep.subr.bf16.mxu0 %v12603_v35  ;;  %v12674_v35 = vcombine.low %v456_v33, %v460_v47  ;;  %v696_v13 = vld [vmem:[%s14751_s28 + $0x9d0] sm:$0xff] }
 0x394   : > { %v700_v41 = vld [vmem:[%s14751_s28 + $0x9f0] sm:$0xff] }
 0x395   : > { %11282 = vmatpush1.bf16.msra.mxu1 %v12738_v34  ;;  %v580_v34 = vld [vmem:[%s14751_s28 + $0x630] sm:$0xff]  ;;  %v12915_v42 = vcombine.high %v696_v13, %v700_v41 }
 0x396   : > { %11283 = vmatprep.subr.bf16.mxu1 %v12731_v5  ;;  %11241 = vmatpush1.bf16.msra.mxu0 %v12602_v18  ;;  %v12802_v5 = vcombine.low %v584_v50, %v588_v60  ;;  %v12795_v24 = vcombine.high %v576_v32, %v580_v34  ;;  %v824_v18 = vld [vmem:[%s14751_s28 + $0xdd0] sm:$0xff] }
 0x397   : > { %11242 = vmatprep.subr.bf16.mxu0 %v12723_v26  ;;  %v12666_v26 = vcombine.low %v448_v58, %v452_v1  ;;  %v688_v46 = vld [vmem:[%s14751_s28 + $0x990] sm:$0xff] }
 0x398   : > { %v692_v51 = vld [vmem:[%s14751_s28 + $0x9b0] sm:$0xff] }
 0x399   : > { %11284 = vmatpush1.bf16.msra.mxu1 %v12730_v59  ;;  %v828_v59 = vld [vmem:[%s14751_s28 + $0xdf0] sm:$0xff]  ;;  %v12907_v39 = vcombine.high %v688_v46, %v692_v51  ;;  %v12906_v0 = vcombine.low %v688_v46, %v692_v51 }
 0x39a   : > { %11285 = vmatprep.subr.bf16.mxu1 %v12851_v7  ;;  %11243 = vmatpush2.bf16.msra.mxu0 %v12722_v52  ;;  %v12794_v7 = vcombine.low %v576_v32, %v580_v34  ;;  %v13043_v45 = vcombine.high %v824_v18, %v828_v59  ;;  %v816_v52 = vld [vmem:[%s14751_s28 + $0xd90] sm:$0xff] }
 0x39b   : > { %11244 = vmatprep.subr.bf16.mxu0 %v12715_v54  ;;  %v12914_v54 = vcombine.low %v696_v13, %v700_v41  ;;  %v680_v61 = vld [vmem:[%s14751_s28 + $0x950] sm:$0xff] }
 0x39c   : > { %v684_v38 = vld [vmem:[%s14751_s28 + $0x970] sm:$0xff] }
 0x39d   : > { %11286 = vmatpush2.bf16.msra.mxu1 %v12850_v25  ;;  %v820_v25 = vld [vmem:[%s14751_s28 + $0xdb0] sm:$0xff]  ;;  %v12899_v14 = vcombine.high %v680_v61, %v684_v38  ;;  %v12898_v12 = vcombine.low %v680_v61, %v684_v38 }
 0x39e   : > { %11287 = vmatprep.subr.bf16.mxu1 %v12843_v55  ;;  %11245 = vmatpush2.bf16.msra.mxu0 %v12714_v44  ;;  %v13042_v55 = vcombine.low %v824_v18, %v828_v59  ;;  %v13035_v56 = vcombine.high %v816_v52, %v820_v25  ;;  %v14359_v44 = vld [vmem:[#allocation2] ss:$100 sps:$4 sm:$0xff]   ;;  %v13034_v3 = vcombine.low %v816_v52, %v820_v25  ;;  %v804_v10 = vld [vmem:[%s14751_s28 + $0xd30] sm:$0xff] }
 0x39f   : > { %11246 = vmatprep.subr.bf16.mxu0 %v12707_v53  ;;  %v812_v53 = vld [vmem:[%s14751_s28 + $0xd70] sm:$0xff] }
 0x3a0   : > { %v14362_v11 = vld [vmem:[#allocation2 + $0x1c] ss:$100 sps:$4 sm:$0xff]  }
 0x3a1   : > { %11288 = vmatpush2.bf16.msra.mxu1 %v12842_v62  ;;  %v808_v62 = vld [vmem:[%s14751_s28 + $0xd50] sm:$0xff] }
 0x3a2   : > { %11289 = vmatprep.subr.bf16.mxu1 %v12835_v63  ;;  %11247 = vmatpush2.bf16.msra.mxu0 %v12706_v57  ;;  %v14360_v63 = vld [vmem:[#allocation2 + $0x8] ss:$100 sps:$4 sm:$0xff]   ;;  %v13027_v27 = vcombine.high %v808_v62, %v812_v53  ;;  %v672_v57 = vld [vmem:[%s14751_s28 + $0x910] sm:$0xff]  ;;  %v13026_v6 = vcombine.low %v808_v62, %v812_v53 }
 0x3a3   : > { %11248 = vmatprep.subr.bf16.mxu0 %v12699_v4  ;;  %v14361_v4 = vld [vmem:[#allocation2 + $0x14] ss:$100 sps:$4 sm:$0xff]  }
 0x3a4   : > { %v792_v15 = vld [vmem:[%s14751_s28 + $0xcd0] sm:$0xff] }
 0x3a5   : > { %11290 = vmatpush2.bf16.msra.mxu1 %v12834_v2  ;;  %v676_v2 = vld [vmem:[%s14751_s28 + $0x930] sm:$0xff] }
 0x3a6   : > { %11291 = vmatprep.subr.bf16.mxu1 %v12827_v8  ;;  %11249 = vmatpush2.bf16.msra.mxu0 %v12698_v23  ;;  %v800_v8 = vld [vmem:[%s14751_s28 + $0xd10] sm:$0xff]  ;;  %v12891_v23 = vcombine.high %v672_v57, %v676_v2  ;;  %v12890_v17 = vcombine.low %v672_v57, %v676_v2 }
 0x3a7   : > { %11250 = vmatprep.subr.bf16.mxu0 %v12691_v37  ;;  %v664_v37 = vld [vmem:[%s14751_s28 + $0x8d0] sm:$0xff]  ;;  %v13018_v19 = vcombine.low %v800_v8, %v804_v10 }
 0x3a8   : > { %v796_v16 = vld [vmem:[%s14751_s28 + $0xcf0] sm:$0xff] }
 0x3a9   : > { %11292 = vmatpush2.bf16.msra.mxu1 %v12826_v21  ;;  %v13019_v21 = vcombine.high %v800_v8, %v804_v10  ;;  %v784_v33 = vld [vmem:[%s14751_s28 + $0xc90] sm:$0xff]  ;;  %v13010_v60 = vcombine.low %v792_v15, %v796_v16 }
 0x3aa   : > { %11293 = vmatprep.subr.bf16.mxu1 %v12819_v49  ;;  %11251 = vmatpush2.bf16.msra.mxu0 %v12690_v22  ;;  %v668_v49 = vld [vmem:[%s14751_s28 + $0x8f0] sm:$0xff] }
 0x3ab   : > { %11252 = vmatprep.subr.bf16.mxu0 %v12683_v31  ;;  %v12883_v22 = vcombine.high %v664_v37, %v668_v49  ;;  %v656_v31 = vld [vmem:[%s14751_s28 + $0x890] sm:$0xff]  ;;  %v12882_v50 = vcombine.low %v664_v37, %v668_v49 }
 0x3ac   : > { %v788_v47 = vld [vmem:[%s14751_s28 + $0xcb0] sm:$0xff] }
 0x3ad   : > { %11294 = vmatpush2.bf16.msra.mxu1 %v12818_v20  ;;  %v13011_v20 = vcombine.high %v792_v15, %v796_v16  ;;  %v776_v58 = vld [vmem:[%s14751_s28 + $0xc50] sm:$0xff]  ;;  %v13002_v34 = vcombine.low %v784_v33, %v788_v47 }
 0x3ae   : > { %11295 = vmatprep.subr.bf16.mxu1 %v12811_v36  ;;  %11253 = vmatpush2.bf16.msra.mxu0 %v12682_v9  ;;  %v660_v36 = vld [vmem:[%s14751_s28 + $0x8b0] sm:$0xff] }
 0x3af   : > { %11254 = vmatprep.subr.bf16.mxu0 %v12675_v30  ;;  %v12875_v9 = vcombine.high %v656_v31, %v660_v36  ;;  %v648_v30 = vld [vmem:[%s14751_s28 + $0x850] sm:$0xff]  ;;  %v12874_v32 = vcombine.low %v656_v31, %v660_v36 }
 0x3b0   : > { %v780_v1 = vld [vmem:[%s14751_s28 + $0xc70] sm:$0xff] }
 0x3b1   : > { %11296 = vmatpush2.bf16.msra.mxu1 %v12810_v29  ;;  %v13003_v29 = vcombine.high %v784_v33, %v788_v47  ;;  %v768_v13 = vld [vmem:[%s14751_s28 + $0xc10] sm:$0xff]  ;;  %v12994_v59 = vcombine.low %v776_v58, %v780_v1 }
 0x3b2   : > { %11297 = vmatprep.subr.bf16.mxu1 %v12803_v43  ;;  %11255 = vmatpush2.bf16.msra.mxu0 %v12674_v35  ;;  %v652_v43 = vld [vmem:[%s14751_s28 + $0x870] sm:$0xff] }
 0x3b3   : > { %11256 = vmatprep.subr.bf16.mxu0 %v12667_v40  ;;  %v12867_v35 = vcombine.high %v648_v30, %v652_v43  ;;  %v640_v40 = vld [vmem:[%s14751_s28 + $0x810] sm:$0xff]  ;;  %v12866_v18 = vcombine.low %v648_v30, %v652_v43 }
 0x3b4   : > { %v772_v41 = vld [vmem:[%s14751_s28 + $0xc30] sm:$0xff] }
 0x3b5   : > { %11298 = vmatpush2.bf16.msra.mxu1 %v12802_v5  ;;  %v12995_v5 = vcombine.high %v776_v58, %v780_v1  ;;  %v888_v46 = vld [vmem:[%s14751_s28 + $0xfd0] sm:$0xff]  ;;  %v12986_v25 = vcombine.low %v768_v13, %v772_v41 }
 0x3b6   : > { %11299 = vmatprep.subr.bf16.mxu1 %v12795_v24  ;;  %11257 = vmatpush2.bf16.msra.mxu0 %v12666_v26  ;;  %v644_v24 = vld [vmem:[%s14751_s28 + $0x830] sm:$0xff] }
 0x3b7   : > { %11312 = vmatprep.subr.bf16.mxu0 %v12915_v42  ;;  %v12859_v26 = vcombine.high %v640_v40, %v644_v24  ;;  %v760_v42 = vld [vmem:[%s14751_s28 + $0xbd0] sm:$0xff]  ;;  %v12858_v52 = vcombine.low %v640_v40, %v644_v24 }
 0x3b8   : > { %v892_v51 = vld [vmem:[%s14751_s28 + $0xff0] sm:$0xff] }
 0x3b9   : > { %11300 = vmatpush2.bf16.msra.mxu1 %v12794_v7  ;;  %11259 = vmatmul.mubr.bf16.vlgmr.msra.gmra.mxu0 %v14359_v44  ;;  %v12987_v7 = vcombine.high %v768_v13, %v772_v41  ;;  %v880_v61 = vld [vmem:[%s14751_s28 + $0xf90] sm:$0xff]  ;;  %v13106_v62 = vcombine.low %v888_v46, %v892_v51 }
 0x3ba   : > { %11355 = vmatprep.subr.bf16.mxu1 %v13043_v45  ;;  %11313 = vmatpush1.bf16.msra.mxu0 %v12914_v54  ;;  %v764_v45 = vld [vmem:[%s14751_s28 + $0xbf0] sm:$0xff] }
 0x3bb   : > { %11314 = vmatprep.subr.bf16.mxu0 %v12907_v39  ;;  %11344 = vmatprep.mubr.bf16.mxu0 %v14361_v4  ;;  %v12979_v54 = vcombine.high %v760_v42, %v764_v45  ;;  %v752_v39 = vld [vmem:[%s14751_s28 + $0xb90] sm:$0xff]  ;;  %v12978_v44 = vcombine.low %v760_v42, %v764_v45 }
 0x3bc   : > { %11302 = vmatmul.mubr.bf16.vlgmr.msra.gmra.mxu1 %v14360_v63  ;;  %v884_v38 = vld [vmem:[%s14751_s28 + $0xfb0] sm:$0xff] }
 0x3bd   : > { %11356 = vmatpush1.bf16.msra.mxu1 %v13042_v55  ;;  %11387 = vmatprep.mubr.bf16.mxu1 %v14362_v11  ;;  %v13107_v55 = vcombine.high %v888_v46, %v892_v51  ;;  %v13099_v63 = vcombine.high %v880_v61, %v884_v38  ;;  %v13098_v2 = vcombine.low %v880_v61, %v884_v38  ;;  %v736_v10 = vld [vmem:[%s14751_s28 + $0xb10] sm:$0xff]  ;;  %v15829_v38 = vpop.f32.mrf.mxu0 }
 0x3be   : > { %11357 = vmatprep.subr.bf16.mxu1 %v13035_v56  ;;  %11315 = vmatpush1.bf16.msra.mxu0 %v12906_v0  ;;  %v756_v56 = vld [vmem:[%s14751_s28 + $0xbb0] sm:$0xff] }
 0x3bf   : > { %11316 = vmatprep.subr.bf16.mxu0 %v12899_v14  ;;  %v12971_v53 = vcombine.high %v752_v39, %v756_v56  ;;  %v744_v0 = vld [vmem:[%s14751_s28 + $0xb50] sm:$0xff]  ;;  %v12970_v57 = vcombine.low %v752_v39, %v756_v56 }
 0x3c0   : > { %v872_v14 = vld [vmem:[%s14751_s28 + $0xf50] sm:$0xff] }
 0x3c1   : > { %11358 = vmatpush1.bf16.msra.mxu1 %v13034_v3  ;;  %v748_v3 = vld [vmem:[%s14751_s28 + $0xb70] sm:$0xff] }
 0x3c2   : > { %11359 = vmatprep.subr.bf16.mxu1 %v13027_v27  ;;  %11317 = vmatpush1.bf16.msra.mxu0 %v12898_v12  ;;  %v876_v27 = vld [vmem:[%s14751_s28 + $0xf70] sm:$0xff]  ;;  %v12963_v4 = vcombine.high %v744_v0, %v748_v3 }
 0x3c3   : > { %11318 = vmatprep.subr.bf16.mxu0 %v12891_v23  ;;  %v13091_v8 = vcombine.high %v872_v14, %v876_v27  ;;  %v740_v11 = vld [vmem:[%s14751_s28 + $0xb30] sm:$0xff]  ;;  %v12962_v23 = vcombine.low %v744_v0, %v748_v3 }
 0x3c4   : > { %v864_v12 = vld [vmem:[%s14751_s28 + $0xf10] sm:$0xff]  ;;  %v12955_v37 = vcombine.high %v736_v10, %v740_v11 }
 0x3c5   : > { %11360 = vmatpush1.bf16.msra.mxu1 %v13026_v6  ;;  %v868_v6 = vld [vmem:[%s14751_s28 + $0xf30] sm:$0xff] }
 0x3c6   : > { %11361 = vmatprep.subr.bf16.mxu1 %v13019_v21  ;;  %11319 = vmatpush1.bf16.msra.mxu0 %v12890_v17  ;;  %v13090_v21 = vcombine.low %v872_v14, %v876_v27  ;;  %v13083_v49 = vcombine.high %v864_v12, %v868_v6  ;;  %v728_v15 = vld [vmem:[%s14751_s28 + $0xad0] sm:$0xff] }
 0x3c7   : > { %11320 = vmatprep.subr.bf16.mxu0 %v12883_v22  ;;  %v732_v16 = vld [vmem:[%s14751_s28 + $0xaf0] sm:$0xff]  ;;  %v12954_v22 = vcombine.low %v736_v10, %v740_v11 }
 0x3c8   : > { %v856_v17 = vld [vmem:[%s14751_s28 + $0xed0] sm:$0xff]  ;;  %v12947_v31 = vcombine.high %v728_v15, %v732_v16 }
 0x3c9   : > { %11362 = vmatpush1.bf16.msra.mxu1 %v13018_v19  ;;  %v860_v19 = vld [vmem:[%s14751_s28 + $0xef0] sm:$0xff] }
 0x3ca   : > { %11363 = vmatprep.subr.bf16.mxu1 %v13011_v20  ;;  %11321 = vmatpush1.bf16.msra.mxu0 %v12882_v50  ;;  %v13082_v20 = vcombine.low %v864_v12, %v868_v6  ;;  %v13075_v36 = vcombine.high %v856_v17, %v860_v19  ;;  %v720_v33 = vld [vmem:[%s14751_s28 + $0xa90] sm:$0xff]  ;;  %v13074_v30 = vcombine.low %v856_v17, %v860_v19 }
 0x3cb   : > { %11322 = vmatprep.subr.bf16.mxu0 %v12875_v9  ;;  %v724_v47 = vld [vmem:[%s14751_s28 + $0xab0] sm:$0xff]  ;;  %v15809_v9 = vpop.f32.mrf.mxu1 }
 0x3cc   : > { %v848_v50 = vld [vmem:[%s14751_s28 + $0xe90] sm:$0xff]  ;;  %v12939_v43 = vcombine.high %v720_v33, %v724_v47  ;;  %v12938_v40 = vcombine.low %v720_v33, %v724_v47  ;;  %v14365_v33 = vld [vmem:[#allocation2 + $0x24] ss:$100 sps:$4 sm:$0xff]  }
 0x3cd   : > { %11364 = vmatpush1.bf16.msra.mxu1 %v13010_v60  ;;  %v852_v60 = vld [vmem:[%s14751_s28 + $0xeb0] sm:$0xff] }
 0x3ce   : > { %11365 = vmatprep.subr.bf16.mxu1 %v13003_v29  ;;  %11323 = vmatpush1.bf16.msra.mxu0 %v12874_v32  ;;  %v12946_v29 = vcombine.low %v728_v15, %v732_v16  ;;  %v13067_v58 = vcombine.high %v848_v50, %v852_v60  ;;  %v712_v1 = vld [vmem:[%s14751_s28 + $0xa50] sm:$0xff]  ;;  %v13066_v24 = vcombine.low %v848_v50, %v852_v60  ;;  %v14366_v60 = vld [vmem:[#allocation2 + $0x2c] ss:$100 sps:$4 sm:$0xff]  }
 0x3cf   : > { %11324 = vmatprep.subr.bf16.mxu0 %v12867_v35  ;;  %v716_v32 = vld [vmem:[%s14751_s28 + $0xa70] sm:$0xff] }
 0x3d0   : > { %v844_v35 = vld [vmem:[%s14751_s28 + $0xe70] sm:$0xff]  ;;  %v12931_v13 = vcombine.high %v712_v1, %v716_v32  ;;  %v12930_v45 = vcombine.low %v712_v1, %v716_v32 }
 0x3d1   : > { %11366 = vmatpush1.bf16.msra.mxu1 %v13002_v34  ;;  %v840_v34 = vld [vmem:[%s14751_s28 + $0xe50] sm:$0xff] }
 0x3d2   : > { %11367 = vmatprep.subr.bf16.mxu1 %v12995_v5  ;;  %11325 = vmatpush1.bf16.msra.mxu0 %v12866_v18  ;;  %v15815_v5 = vpop.f32.mrf.mxu1  ;;  %v13059_v41 = vcombine.high %v840_v34, %v844_v35  ;;  %v704_v18 = vld [vmem:[%s14751_s28 + $0xa10] sm:$0xff]  ;;  %v13058_v46 = vcombine.low %v840_v34, %v844_v35 }
 0x3d3   : > { %11326 = vmatprep.subr.bf16.mxu0 %v12859_v26  ;;  %v832_v26 = vld [vmem:[%s14751_s28 + $0xe10] sm:$0xff] }
 0x3d4   : > { %v15821_v42 = vpop.f32.mrf.mxu1  ;;  %v1084_v39 = vld [vmem:[%s14751_s28 + $0x15f0] sm:$0xff] }
 0x3d5   : > { %11368 = vmatpush1.bf16.msra.mxu1 %v12994_v59  ;;  %v708_v59 = vld [vmem:[%s14751_s28 + $0xa30] sm:$0xff] }
 0x3d6   : > { %11369 = vmatprep.subr.bf16.mxu1 %v12987_v7  ;;  %11327 = vmatpush1.bf16.msra.mxu0 %v12858_v52  ;;  %v836_v7 = vld [vmem:[%s14751_s28 + $0xe30] sm:$0xff]  ;;  %v12923_v51 = vcombine.high %v704_v18, %v708_v59  ;;  %v15827_v56 = vpop.f32.mrf.mxu1  ;;  %v12922_v61 = vcombine.low %v704_v18, %v708_v59 }
 0x3d7   : > { %11328 = vmatprep.subr.bf16.mxu0 %v12979_v54  ;;  %v13051_v52 = vcombine.high %v832_v26, %v836_v7  ;;  %v956_v54 = vld [vmem:[%s14751_s28 + $0x11f0] sm:$0xff] }
 0x3d8   : > { %v944_v0 = vld [vmem:[%s14751_s28 + $0x1190] sm:$0xff] }
 0x3d9   : > { %11370 = vmatpush1.bf16.msra.mxu1 %v12986_v25  ;;  %v952_v25 = vld [vmem:[%s14751_s28 + $0x11d0] sm:$0xff] }
 0x3da   : > { %11371 = vmatprep.subr.bf16.mxu1 %v13107_v55  ;;  %11329 = vmatpush2.bf16.msra.mxu0 %v12978_v44  ;;  %v1080_v55 = vld [vmem:[%s14751_s28 + $0x15d0] sm:$0xff]  ;;  %v13050_v44 = vcombine.low %v832_v26, %v836_v7 }
 0x3db   : > { %11330 = vmatprep.subr.bf16.mxu0 %v12971_v53  ;;  %v15831_v53 = vpop.f32.mrf.mxu1  ;;  %v948_v3 = vld [vmem:[%s14751_s28 + $0x11b0] sm:$0xff] }
 0x3dc   : > { %v1072_v14 = vld [vmem:[%s14751_s28 + $0x1590] sm:$0xff]  ;;  %v13162_v15 = vcombine.low %v944_v0, %v948_v3 }
 0x3dd   : > { %11372 = vmatpush2.bf16.msra.mxu1 %v13106_v62  ;;  %v13171_v62 = vcombine.high %v952_v25, %v956_v54  ;;  %v1076_v27 = vld [vmem:[%s14751_s28 + $0x15b0] sm:$0xff]  ;;  %v15839_v10 = vpop.f32.mrf.mxu1 }
 0x3de   : > { %11373 = vmatprep.subr.bf16.mxu1 %v13099_v63  ;;  %11331 = vmatpush2.bf16.msra.mxu0 %v12970_v57  ;;  %v13299_v63 = vcombine.high %v1080_v55, %v1084_v39  ;;  %v13170_v57 = vcombine.low %v952_v25, %v956_v54  ;;  %v13291_v11 = vcombine.high %v1072_v14, %v1076_v27  ;;  %v936_v12 = vld [vmem:[%s14751_s28 + $0x1150] sm:$0xff] }
 0x3df   : > { %11332 = vmatprep.subr.bf16.mxu0 %v12963_v4  ;;  %v13298_v4 = vcombine.low %v1080_v55, %v1084_v39  ;;  %v940_v6 = vld [vmem:[%s14751_s28 + $0x1170] sm:$0xff]  ;;  %v13290_v17 = vcombine.low %v1072_v14, %v1076_v27 }
 0x3e0   : > { %v13155_v19 = vcombine.high %v936_v12, %v940_v6  ;;  %v1056_v47 = vld [vmem:[%s14751_s28 + $0x1510] sm:$0xff] }
 0x3e1   : > { %11374 = vmatpush2.bf16.msra.mxu1 %v13098_v2  ;;  %v15837_v2 = vpop.f32.mrf.mxu0  ;;  %v1060_v50 = vld [vmem:[%s14751_s28 + $0x1530] sm:$0xff] }
 0x3e2   : > { %11375 = vmatprep.subr.bf16.mxu1 %v13091_v8  ;;  %11333 = vmatpush2.bf16.msra.mxu0 %v12962_v23  ;;  %v13163_v8 = vcombine.high %v944_v0, %v948_v3  ;;  %v14363_v23 = vld [vmem:[#allocation2 + $0x10] ss:$100 sps:$4 sm:$0xff]   ;;  %v13275_v32 = vcombine.high %v1056_v47, %v1060_v50  ;;  %v920_v34 = vld [vmem:[%s14751_s28 + $0x10d0] sm:$0xff]  ;;  %v13274_v59 = vcombine.low %v1056_v47, %v1060_v50 }
 0x3e3   : > { %11334 = vmatprep.subr.bf16.mxu0 %v12955_v37  ;;  %v1068_v37 = vld [vmem:[%s14751_s28 + $0x1570] sm:$0xff]  ;;  %v15845_v16 = vpop.f32.mrf.mxu0 }
 0x3e4   : > { %v924_v35 = vld [vmem:[%s14751_s28 + $0x10f0] sm:$0xff] }
 0x3e5   : > { %11376 = vmatpush2.bf16.msra.mxu1 %v13090_v21  ;;  %v1064_v21 = vld [vmem:[%s14751_s28 + $0x1550] sm:$0xff]  ;;  %v13139_v26 = vcombine.high %v920_v34, %v924_v35  ;;  %v13138_v55 = vcombine.low %v920_v34, %v924_v35 }
 0x3e6   : > { %11377 = vmatprep.subr.bf16.mxu1 %v13083_v49  ;;  %11335 = vmatpush2.bf16.msra.mxu0 %v12954_v22  ;;  %v14364_v49 = vld [vmem:[#allocation2 + $0x18] ss:$100 sps:$4 sm:$0xff]   ;;  %v15847_v22 = vpop.f32.mrf.mxu1 }
 0x3e7   : > { %11336 = vmatprep.subr.bf16.mxu0 %v12947_v31  ;;  %v928_v31 = vld [vmem:[%s14751_s28 + $0x1110] sm:$0xff] }
 0x3e8   : > { %v15855_v1 = vpop.f32.mrf.mxu1  ;;  %v1044_v25 = vld [vmem:[%s14751_s28 + $0x14b0] sm:$0xff] }
 0x3e9   : > { %11378 = vmatpush2.bf16.msra.mxu1 %v13082_v20  ;;  %v13283_v20 = vcombine.high %v1064_v21, %v1068_v37  ;;  %v1032_v3 = vld [vmem:[%s14751_s28 + $0x1450] sm:$0xff] }
 0x3ea   : > { %11379 = vmatprep.subr.bf16.mxu1 %v13075_v36  ;;  %11337 = vmatpush2.bf16.msra.mxu0 %v12946_v29  ;;  %v932_v36 = vld [vmem:[%s14751_s28 + $0x1130] sm:$0xff]  ;;  %v13154_v29 = vcombine.low %v936_v12, %v940_v6 }
 0x3eb   : > { %11338 = vmatprep.subr.bf16.mxu0 %v12939_v43  ;;  %v13282_v43 = vcombine.low %v1064_v21, %v1068_v37  ;;  %v13146_v18 = vcombine.low %v928_v31, %v932_v36  ;;  %v1036_v14 = vld [vmem:[%s14751_s28 + $0x1470] sm:$0xff] }
 0x3ec   : > { %v896_v12 = vld [vmem:[%s14751_s28 + $0x1010] sm:$0xff] }
 0x3ed   : > { %11380 = vmatpush2.bf16.msra.mxu1 %v13074_v30  ;;  %v15853_v30 = vpop.f32.mrf.mxu0  ;;  %v900_v6 = vld [vmem:[%s14751_s28 + $0x1030] sm:$0xff] }
 0x3ee   : > { %11381 = vmatprep.subr.bf16.mxu1 %v13067_v58  ;;  %11339 = vmatpush2.bf16.msra.mxu0 %v12938_v40  ;;  %v13147_v58 = vcombine.high %v928_v31, %v932_v36  ;;  %v1024_v21 = vld [vmem:[%s14751_s28 + $0x1410] sm:$0xff] }
 0x3ef   : > { %11340 = vmatprep.subr.bf16.mxu0 %v12931_v13  ;;  %v15859_v40 = vpop.f32.mrf.mxu0  ;;  %v1052_v13 = vld [vmem:[%s14751_s28 + $0x14f0] sm:$0xff] }
 0x3f0   : > { %v1028_v37 = vld [vmem:[%s14751_s28 + $0x1430] sm:$0xff] }
 0x3f1   : > { %11382 = vmatpush2.bf16.msra.mxu1 %v13066_v24  ;;  %v1048_v24 = vld [vmem:[%s14751_s28 + $0x14d0] sm:$0xff]  ;;  %v13243_v36 = vcombine.high %v1024_v21, %v1028_v37 }
 0x3f2   : > { %11383 = vmatprep.subr.bf16.mxu1 %v13059_v41  ;;  %11341 = vmatpush2.bf16.msra.mxu0 %v12930_v45  ;;  %v15863_v41 = vpop.f32.mrf.mxu1  ;;  %v13267_v7 = vcombine.high %v1048_v24, %v1052_v13  ;;  %v912_v45 = vld [vmem:[%s14751_s28 + $0x1090] sm:$0xff]  ;;  %v13266_v39 = vcombine.low %v1048_v24, %v1052_v13 }
 0x3f3   : > { %11342 = vmatprep.subr.bf16.mxu0 %v12923_v51  ;;  %v15867_v51 = vpop.f32.mrf.mxu0  ;;  %v1020_v47 = vld [vmem:[%s14751_s28 + $0x13f0] sm:$0xff] }
 0x3f4   : > { %v15871_v54 = vpop.f32.mrf.mxu1  ;;  %v1144_v50 = vld [vmem:[%s14751_s28 + $0x17d0] sm:$0xff] }
 0x3f5   : > { %11384 = vmatpush2.bf16.msra.mxu1 %v13058_v46  ;;  %v916_v46 = vld [vmem:[%s14751_s28 + $0x10b0] sm:$0xff]  ;;  %v15875_v0 = vpop.f32.mrf.mxu0 }
 0x3f6   : > { %11385 = vmatprep.subr.bf16.mxu1 %v13051_v52  ;;  %11343 = vmatpush2.bf16.msra.mxu0 %v12922_v61  ;;  %v1040_v52 = vld [vmem:[%s14751_s28 + $0x1490] sm:$0xff]  ;;  %v13131_v61 = vcombine.high %v912_v45, %v916_v46  ;;  %v15879_v27 = vpop.f32.mrf.mxu1 }
 0x3f7   : > { %11398 = vmatprep.subr.bf16.mxu0 %v13171_v62  ;;  %v904_v62 = vld [vmem:[%s14751_s28 + $0x1050] sm:$0xff] }
 0x3f8   : > { %v1008_v24 = vld [vmem:[%s14751_s28 + $0x1390] sm:$0xff] }
 0x3f9   : > { %11386 = vmatpush2.bf16.msra.mxu1 %v13050_v44  ;;  %11345 = vmatmul.mubr.bf16.vlgmr.msra.gmra.mxu0 %v14363_v23  ;;  %v13259_v44 = vcombine.high %v1040_v52, %v1044_v25  ;;  %v15883_v23 = vpop.f32.mrf.mxu0  ;;  %v1012_v13 = vld [vmem:[%s14751_s28 + $0x13b0] sm:$0xff] }
 0x3fa   : > { %11441 = vmatprep.subr.bf16.mxu1 %v13299_v63  ;;  %11399 = vmatpush1.bf16.msra.mxu0 %v13170_v57  ;;  %v908_v63 = vld [vmem:[%s14751_s28 + $0x1070] sm:$0xff]  ;;  %v13130_v57 = vcombine.low %v912_v45, %v916_v46  ;;  %v13227_v46 = vcombine.high %v1008_v24, %v1012_v13 }
 0x3fb   : > { %11400 = vmatprep.subr.bf16.mxu0 %v13163_v8  ;;  %11430 = vmatprep.mubr.bf16.mxu0 %v14365_v33  ;;  %v13123_v8 = vcombine.high %v904_v62, %v908_v63  ;;  %v1016_v33 = vld [vmem:[%s14751_s28 + $0x13d0] sm:$0xff] }
 0x3fc   : > { %11388 = vmatmul.mubr.bf16.vlgmr.msra.gmra.mxu1 %v14364_v49  ;;  %v15887_v49 = vpop.f32.mrf.mxu1 }
 0x3fd   : > { %11442 = vmatpush1.bf16.msra.mxu1 %v13298_v4  ;;  %11473 = vmatprep.mubr.bf16.mxu1 %v14366_v60  ;;  %v13258_v4 = vcombine.low %v1040_v52, %v1044_v25  ;;  %v1148_v60 = vld [vmem:[%s14751_s28 + $0x17f0] sm:$0xff] }
 0x3fe   : > { %11443 = vmatprep.subr.bf16.mxu1 %v13291_v11  ;;  %11401 = vmatpush1.bf16.msra.mxu0 %v13162_v15  ;;  %v13251_v11 = vcombine.high %v1032_v3, %v1036_v14  ;;  %v13122_v15 = vcombine.low %v904_v62, %v908_v63  ;;  %v15891_v31 = vpop.f32.mrf.mxu1  ;;  %v13363_v35 = vcombine.high %v1144_v50, %v1148_v60 }
 0x3ff   : > { %11402 = vmatprep.subr.bf16.mxu0 %v13155_v19  ;;  %v13250_v19 = vcombine.low %v1032_v3, %v1036_v14  ;;  %v13362_v45 = vcombine.low %v1144_v50, %v1148_v60  ;;  %v13226_v62 = vcombine.low %v1008_v24, %v1012_v13  ;;  %v1112_v60 = vld [vmem:[%s14751_s28 + $0x16d0] sm:$0xff] }
 0x400   : > { %v15899_v34 = vpop.f32.mrf.mxu1 }
 0x401   : > { %11444 = vmatpush1.bf16.msra.mxu1 %v13290_v17  ;;  %v15889_v17 = vpop.f32.mrf.mxu0 }
 0x402   : > { %11445 = vmatprep.subr.bf16.mxu1 %v13283_v20  ;;  %11403 = vmatpush1.bf16.msra.mxu0 %v13154_v29  ;;  %v13115_v20 = vcombine.high %v896_v12, %v900_v6  ;;  %v13114_v29 = vcombine.low %v896_v12, %v900_v6  ;;  %v15907_v52 = vpop.f32.mrf.mxu1  ;;  %v1120_v6 = vld [vmem:[%s14751_s28 + $0x1710] sm:$0xff] }
 0x403   : > { %11404 = vmatprep.subr.bf16.mxu0 %v13147_v58  ;;  %v13242_v58 = vcombine.low %v1024_v21, %v1028_v37  ;;  %v1124_v21 = vld [vmem:[%s14751_s28 + $0x1730] sm:$0xff] }
 0x405   : > { %11446 = vmatpush1.bf16.msra.mxu1 %v13282_v43  ;;  %v15897_v43 = vpop.f32.mrf.mxu0 }
 0x406   : > { %11447 = vmatprep.subr.bf16.mxu1 %v13275_v32  ;;  %11405 = vmatpush1.bf16.msra.mxu0 %v13146_v18  ;;  %v13235_v32 = vcombine.high %v1016_v33, %v1020_v47  ;;  %v1136_v18 = vld [vmem:[%s14751_s28 + $0x1790] sm:$0xff] }
 0x407   : > { %11406 = vmatprep.subr.bf16.mxu0 %v13139_v26  ;;  %v13234_v26 = vcombine.low %v1016_v33, %v1020_v47  ;;  %v984_v33 = vld [vmem:[%s14751_s28 + $0x12d0] sm:$0xff] }
 0x408   : > { %v988_v47 = vld [vmem:[%s14751_s28 + $0x12f0] sm:$0xff] }
 0x409   : > { %11448 = vmatpush1.bf16.msra.mxu1 %v13274_v59  ;;  %v1140_v59 = vld [vmem:[%s14751_s28 + $0x17b0] sm:$0xff]  ;;  %v13203_v24 = vcombine.high %v984_v33, %v988_v47 }
 0x40a   : > { %11449 = vmatprep.subr.bf16.mxu1 %v13267_v7  ;;  %11407 = vmatpush1.bf16.msra.mxu0 %v13138_v55  ;;  %v15905_v7 = vpop.f32.mrf.mxu0  ;;  %v13355_v25 = vcombine.high %v1136_v18, %v1140_v59  ;;  %v1000_v55 = vld [vmem:[%s14751_s28 + $0x1350] sm:$0xff]  ;;  %v13354_v3 = vcombine.low %v1136_v18, %v1140_v59 }
 0x40b   : > { %11408 = vmatprep.subr.bf16.mxu0 %v13131_v61  ;;  %v1128_v61 = vld [vmem:[%s14751_s28 + $0x1750] sm:$0xff] }
 0x40c   : > { %v15913_v63 = vpop.f32.mrf.mxu0  ;;  %v976_v18 = vld [vmem:[%s14751_s28 + $0x1290] sm:$0xff] }
 0x40d   : > { %11450 = vmatpush1.bf16.msra.mxu1 %v13266_v39  ;;  %v1004_v39 = vld [vmem:[%s14751_s28 + $0x1370] sm:$0xff] }
 0x40e   : > { %11451 = vmatprep.subr.bf16.mxu1 %v13259_v44  ;;  %11409 = vmatpush1.bf16.msra.mxu0 %v13130_v57  ;;  %v1132_v44 = vld [vmem:[%s14751_s28 + $0x1770] sm:$0xff]  ;;  %v13219_v14 = vcombine.high %v1000_v55, %v1004_v39  ;;  %v15915_v57 = vpop.f32.mrf.mxu1  ;;  %v15919_v12 = vpop.f32.mrf.mxu0 }
 0x40f   : > { %11410 = vmatprep.subr.bf16.mxu0 %v13123_v8  ;;  %v992_v8 = vld [vmem:[%s14751_s28 + $0x1310] sm:$0xff] }
 0x410   : > { %v15923_v37 = vpop.f32.mrf.mxu1  ;;  %v15927_v50 = vpop.f32.mrf.mxu0  ;;  %v980_v59 = vld [vmem:[%s14751_s28 + $0x12b0] sm:$0xff] }
 0x411   : > { %11452 = vmatpush1.bf16.msra.mxu1 %v13258_v4  ;;  %v13347_v4 = vcombine.high %v1128_v61, %v1132_v44 }
 0x412   : > { %11453 = vmatprep.subr.bf16.mxu1 %v13251_v11  ;;  %11411 = vmatpush1.bf16.msra.mxu0 %v13122_v15  ;;  %v996_v11 = vld [vmem:[%s14751_s28 + $0x1330] sm:$0xff]  ;;  %v13218_v15 = vcombine.low %v1000_v55, %v1004_v39  ;;  %v13202_v39 = vcombine.low %v984_v33, %v988_v47 }
 0x413   : > { %11412 = vmatprep.subr.bf16.mxu0 %v13115_v20  ;;  %v13211_v20 = vcombine.high %v992_v8, %v996_v11  ;;  %v960_v47 = vld [vmem:[%s14751_s28 + $0x1210] sm:$0xff] }
 0x415   : > { %11454 = vmatpush1.bf16.msra.mxu1 %v13250_v19  ;;  %v13346_v19 = vcombine.low %v1128_v61, %v1132_v44  ;;  %v13195_v44 = vcombine.high %v976_v18, %v980_v59 }
 0x416   : > { %11455 = vmatprep.subr.bf16.mxu1 %v13243_v36  ;;  %11413 = vmatpush1.bf16.msra.mxu0 %v13114_v29  ;;  %v13339_v36 = vcombine.high %v1120_v6, %v1124_v21  ;;  %v1116_v29 = vld [vmem:[%s14751_s28 + $0x16f0] sm:$0xff] }
 0x417   : > { %11414 = vmatprep.subr.bf16.mxu0 %v13235_v32  ;;  %v13210_v32 = vcombine.low %v992_v8, %v996_v11  ;;  %v13331_v13 = vcombine.high %v1112_v60, %v1116_v29  ;;  %v13330_v61 = vcombine.low %v1112_v60, %v1116_v29  ;;  %v972_v8 = vld [vmem:[%s14751_s28 + $0x1270] sm:$0xff] }
 0x418   : > { %v964_v60 = vld [vmem:[%s14751_s28 + $0x1230] sm:$0xff] }
 0x419   : > { %11456 = vmatpush1.bf16.msra.mxu1 %v13242_v58  ;;  %v15931_v58 = vpop.f32.mrf.mxu1  ;;  %v1092_v29 = vld [vmem:[%s14751_s28 + $0x1630] sm:$0xff] }
 0x41a   : > { %11457 = vmatprep.subr.bf16.mxu1 %v13363_v35  ;;  %11415 = vmatpush2.bf16.msra.mxu0 %v13234_v26  ;;  %v13338_v35 = vcombine.low %v1120_v6, %v1124_v21  ;;  %v15935_v26 = vpop.f32.mrf.mxu0  ;;  %v10749_v6 = vadd.f32 %v15845_v16, %v15821_v42 }
 0x41b   : > { %11416 = vmatprep.subr.bf16.mxu0 %v13227_v46  ;;  %v1108_v46 = vld [vmem:[%s14751_s28 + $0x16b0] sm:$0xff]  ;;  %v15941_v55 = vpop.f32.mrf.mxu1 }
 0x41c   : > { %v15948_v11 = vpop.f32.mrf.mxu0 }
 0x41d   : > { %11458 = vmatpush2.bf16.msra.mxu1 %v13362_v45  ;;  %v1104_v45 = vld [vmem:[%s14751_s28 + $0x1690] sm:$0xff] }
 0x41e   : > { %11459 = vmatprep.subr.bf16.mxu1 %v13355_v25  ;;  %11417 = vmatpush2.bf16.msra.mxu0 %v13226_v62  ;;  %v10745_v25 = vadd.f32 %v15829_v38, %v15809_v9  ;;  %v10747_v62 = vadd.f32 %v15837_v2, %v15815_v5  ;;  %v1096_v9 = vld [vmem:[%s14751_s28 + $0x1650] sm:$0xff]  ;;  %v13194_v5 = vcombine.low %v976_v18, %v980_v59  ;;  %v15960_v2 = vpop.f32.mrf.mxu0 }
 0x41f   : > { %11418 = vmatprep.subr.bf16.mxu0 %v13219_v14  ;;  %v13323_v14 = vcombine.high %v1104_v45, %v1108_v46  ;;  %v1100_v38 = vld [vmem:[%s14751_s28 + $0x1670] sm:$0xff]  ;;  %v13322_v42 = vcombine.low %v1104_v45, %v1108_v46 }
 0x420   : > { %v10790_v21 = vadd.f32 %v15839_v10, %v10747_v62  ;;  %v10792_v10 = vadd.f32 %v15847_v22, %v10749_v6  ;;  %v13315_v33 = vcombine.high %v1096_v9, %v1100_v38  ;;  %v15982_v45 = vld [vmem:[%s14751_s28 + $0x19d0] sm:$0xff] }
 0x421   : > { %11460 = vmatpush2.bf16.msra.mxu1 %v13354_v3  ;;  %v10788_v3 = vadd.f32 %v15831_v53, %v10745_v25  ;;  %v10751_v53 = vadd.f32 %v15853_v30, %v15827_v56  ;;  %v1088_v30 = vld [vmem:[%s14751_s28 + $0x1610] sm:$0xff] }
 0x422   : > { %11461 = vmatprep.subr.bf16.mxu1 %v13347_v4  ;;  %11419 = vmatpush2.bf16.msra.mxu0 %v13218_v15  ;;  %v968_v4 = vld [vmem:[%s14751_s28 + $0x1250] sm:$0xff] }
 0x423   : > { %11420 = vmatprep.subr.bf16.mxu0 %v13211_v20  ;;  %v10831_v15 = vadd.f32 %v15859_v40, %v10788_v3  ;;  %v13187_v16 = vcombine.high %v968_v4, %v972_v8  ;;  %v10833_v40 = vadd.f32 %v15867_v51, %v10790_v21  ;;  %v10794_v56 = vadd.f32 %v15855_v1, %v10751_v53  ;;  %v15985_v46 = vld [vmem:[%s14751_s28 + $0x19f0] sm:$0xff] }
 0x424   : > { %v13314_v1 = vcombine.low %v1096_v9, %v1100_v38  ;;  %v15989_v25 = vld [vmem:[%s14751_s28 + $0x1dd0] sm:$0xff]  ;;  %v286_v3 = vsub.s32 2, %v15472_v28  ;;  %v13426_v6 = vcombine.low %v15982_v45, %v15985_v46 }
 0x425   : > { %11462 = vmatpush2.bf16.msra.mxu1 %v13346_v19  ;;  %v15956_v19 = vpop.f32.mrf.mxu1  ;;  %v10874_v20 = vadd.f32 %v15863_v41, %v10831_v15  ;;  %v13186_v41 = vcombine.low %v968_v4, %v972_v8  ;;  %v10837_v51 = vadd.f32 %v15883_v23, %v10794_v56  ;;  %v16007_v8 = vld [vmem:[%s14751_s28 + $0x1990] sm:$0xff] }
 0x426   : > { %11463 = vmatprep.subr.bf16.mxu1 %v13339_v36  ;;  %11421 = vmatpush2.bf16.msra.mxu0 %v13210_v32  ;;  %v10835_v32 = vadd.f32 %v15875_v0, %v10792_v10  ;;  %v16010_v9 = vld [vmem:[%s14751_s28 + $0x19b0] sm:$0xff] }
 0x427   : > { %11422 = vmatprep.subr.bf16.mxu0 %v13203_v24  ;;  %v15965_v36 = vpop.f32.mrf.mxu1  ;;  %v10917_v22 = vadd.f32 %v15889_v17, %v10874_v20  ;;  %v11090_v24 = vpop.f32.mrf.mxu0  ;;  %v13307_v17 = vcombine.high %v1088_v30, %v1092_v29  ;;  %v10880_v23 = vadd.f32 %v15887_v49, %v10837_v51  ;;  %v13306_v49 = vcombine.low %v1088_v30, %v1092_v29  ;;  %v16047_v56 = vld [vmem:[%s14751_s28 + $0x1d70] sm:$0xff] }
 0x428   : > { %v10878_v18 = vadd.f32 %v15879_v27, %v10835_v32  ;;  %v14368_v32 = vld [vmem:[#allocation2 + $0x20] ss:$100 sps:$4 sm:$0xff]  }
 0x429   : > { %11464 = vmatpush2.bf16.msra.mxu1 %v13338_v35  ;;  %v10876_v35 = vadd.f32 %v15871_v54, %v10833_v40  ;;  %v10960_v54 = vadd.f32 %v15891_v31, %v10917_v22  ;;  %v15979_v59 = vpop.f32.mrf.mxu1  ;;  %v11092_v62 = vpop.f32.mrf.mxu0 }
 0x42a   : > { %11465 = vmatprep.subr.bf16.mxu1 %v13331_v13  ;;  %11423 = vmatpush2.bf16.msra.mxu0 %v13202_v39  ;;  %v13179_v13 = vcombine.high %v960_v47, %v964_v60  ;;  %v15992_v39 = vld [vmem:[%s14751_s28 + $0x1df0] sm:$0xff]  ;;  %v10921_v27 = vadd.f32 %v15905_v7, %v10878_v18  ;;  %v13427_v7 = vcombine.high %v15982_v45, %v15985_v46 }
 0x42b   : > { %11424 = vmatprep.subr.bf16.mxu0 %v13195_v44  ;;  %v10919_v0 = vadd.f32 %v15897_v43, %v10876_v35  ;;  %v11003_v31 = vadd.f32 %v15919_v12, %v10960_v54  ;;  %v10923_v44 = vadd.f32 %v15913_v63, %v10880_v23  ;;  %v11135_v4 = vpop.f32.mrf.mxu1  ;;  %v13555_v63 = vcombine.high %v15989_v25, %v15992_v39  ;;  %v1184_v54 = vld [vmem:[%s14751_s28 + $0x1910] sm:$0xff] }
 0x42c   : > { %v1188_v23 = vld [vmem:[%s14751_s28 + $0x1930] sm:$0xff] }
 0x42d   : > { %11466 = vmatpush2.bf16.msra.mxu1 %v13330_v61  ;;  %v10962_v43 = vadd.f32 %v15899_v34, %v10919_v0  ;;  %v13178_v61 = vcombine.low %v960_v47, %v964_v60  ;;  %v10964_v34 = vadd.f32 %v15907_v52, %v10921_v27  ;;  %v10966_v38 = vadd.f32 %v15915_v57, %v10923_v44  ;;  %v16041_v47 = vld [vmem:[%s14751_s28 + $0x1970] sm:$0xff] }
 0x42e   : > { %11467 = vmatprep.subr.bf16.mxu1 %v13323_v14  ;;  %11425 = vmatpush2.bf16.msra.mxu0 %v13194_v5  ;;  %v11046_v14 = vadd.f32 %v15923_v37, %v11003_v31  ;;  %v290_v52 = vsub.s32 3, %v15472_v28  ;;  %v16020_v37 = vld [vmem:[%s14751_s28 + $0x1db0] sm:$0xff]  ;;  %v13554_v57 = vcombine.low %v15989_v25, %v15992_v39 }
 0x42f   : > { %11426 = vmatprep.subr.bf16.mxu0 %v13187_v16  ;;  %v11005_v12 = vadd.f32 %v15927_v50, %v10962_v43  ;;  %v16017_v50 = vld [vmem:[%s14751_s28 + $0x1d90] sm:$0xff]  ;;  %v11007_v21 = vadd.f32 %v15935_v26, %v10964_v34  ;;  %v11009_v53 = vadd.f32 %v15948_v11, %v10966_v38  ;;  %v14367_v16 = vld [vmem:[%s15487_s20] sm:$0xff] }
 0x430   : > { %v11089_v5 = vadd.f32 %v15960_v2, %v11046_v14  ;;  %v16029_v10 = vrot.slane %v14367_v16, %v286_v3  ;;  %v16034_v26 = vld [vmem:[%s14751_s28 + $0x1950] sm:$0xff]  ;;  %v13547_v11 = vcombine.high %v16017_v50, %v16020_v37  ;;  %v13546_v35 = vcombine.low %v16017_v50, %v16020_v37 }
 0x431   : > { %11468 = vmatpush2.bf16.msra.mxu1 %v13322_v42  ;;  %v11048_v15 = vadd.f32 %v15931_v58, %v11005_v12  ;;  %v11094_v42 = vpop.f32.mrf.mxu0  ;;  %v13419_v58 = vcombine.high %v16007_v8, %v16010_v9  ;;  %v11050_v2 = vadd.f32 %v15941_v55, %v11007_v21  ;;  %v16044_v60 = vld [vmem:[%s14751_s28 + $0x1d50] sm:$0xff]  ;;  %v11052_v30 = vadd.f32 %v15956_v19, %v11009_v53 }
 0x432   : > { %11469 = vmatprep.subr.bf16.mxu1 %v13315_v33  ;;  %11427 = vmatpush2.bf16.msra.mxu0 %v13186_v41  ;;  %v11132_v20 = vadd.f32 %v15965_v36, %v11089_v5  ;;  %v11137_v33 = vpop.f32.mrf.mxu1  ;;  %v16050_v55 = vrot.slane %v14367_v16, %v290_v52  ;;  %v13418_v36 = vcombine.low %v16007_v8, %v16010_v9  ;;  %v1312_v25 = vld [vmem:[%s14751_s28 + $0x1d10] sm:$0xff] }
 0x433   : > { %11428 = vmatprep.subr.bf16.mxu0 %v13179_v13  ;;  %v11091_v40 = vadd.f32 %v11090_v24, %v11048_v15  ;;  %v11093_v22 = vadd.f32 %v11092_v62, %v11050_v2  ;;  %v11095_v19 = vadd.f32 %v11094_v42, %v11052_v30  ;;  %v13411_v18 = vcombine.high %v16034_v26, %v16041_v47  ;;  %v1316_v39 = vld [vmem:[%s14751_s28 + $0x1d30] sm:$0xff] }
 0x434   : > { %v13539_v0 = vcombine.high %v16044_v60, %v16047_v56  ;;  %v14370_v27 = vld [vmem:[#allocation2 + $0x34] ss:$100 sps:$4 sm:$0xff]   ;;  %v13410_v31 = vcombine.low %v16034_v26, %v16041_v47  ;;  %v13538_v12 = vcombine.low %v16044_v60, %v16047_v56  ;;  %v13403_v14 = vcombine.high %v1184_v54, %v1188_v23 }
 0x435   : > { %11470 = vmatpush2.bf16.msra.mxu1 %v13314_v1  ;;  %v11134_v41 = vadd.f32 %v15979_v59, %v11091_v40  ;;  %v14369_v1 = vld [vmem:[#allocation2 + $0x28] ss:$100 sps:$4 sm:$0xff]   ;;  %v11136_v59 = vadd.f32 %v11135_v4, %v11093_v22  ;;  %v11138_v44 = vadd.f32 %v11137_v33, %v11095_v19  ;;  %v13531_v4 = vcombine.high %v1312_v25, %v1316_v39  ;;  %v1180_v52 = vld [vmem:[%s14751_s28 + $0x18f0] sm:$0xff] }
 0x436   : > { %11471 = vmatprep.subr.bf16.mxu1 %v13307_v17  ;;  %11429 = vmatpush2.bf16.msra.mxu0 %v13178_v61  ;;  %v14371_v61 = vld [vmem:[#allocation2 + $0x3c] ss:$100 sps:$4 sm:$0xff]   ;;  %v13402_v53 = vcombine.low %v1184_v54, %v1188_v23  ;;  %v13530_v42 = vcombine.low %v1312_v25, %v1316_v39 }
 0x437   : > { %11484 = vmatprep.subr.bf16.mxu0 %v13427_v7  ;;  %v1304_v37 = vld [vmem:[%s14751_s28 + $0x1cd0] sm:$0xff] }
 0x438   : > { %v1308_v21 = vld [vmem:[%s14751_s28 + $0x1cf0] sm:$0xff] }
 0x439   : > { %11472 = vmatpush2.bf16.msra.mxu1 %v13306_v49  ;;  %v11174_v29 = vpop.f32.mrf.mxu0  ;;  %11431 = vmatmul.mubr.bf16.vlgmr.msra.gmra.mxu0 %v14368_v32  ;;  %v13523_v2 = vcombine.high %v1304_v37, %v1308_v21  ;;  %v1168_v40 = vld [vmem:[%s14751_s28 + $0x1890] sm:$0xff]  ;;  %v13522_v60 = vcombine.low %v1304_v37, %v1308_v21 }
 0x43a   : > { %11527 = vmatprep.subr.bf16.mxu1 %v13555_v63  ;;  %v11175_v51 = vadd.f32 %v11174_v29, %v11132_v20  ;;  %11485 = vmatpush1.bf16.msra.mxu0 %v13426_v6  ;;  %v1176_v6 = vld [vmem:[%s14751_s28 + $0x18d0] sm:$0xff] }
 0x43b   : > { %v11176_v13 = vpop.f32.mrf.mxu0  ;;  %11486 = vmatprep.subr.bf16.mxu0 %v13419_v58  ;;  %11516 = vmatprep.mubr.bf16.mxu0 %v14370_v27  ;;  %v13395_v16 = vcombine.high %v1176_v6, %v1180_v52  ;;  %v1296_v20 = vld [vmem:[%s14751_s28 + $0x1c90] sm:$0xff]  ;;  %v13394_v47 = vcombine.low %v1176_v6, %v1180_v52 }
 0x43c   : > { %v11217_v24 = vpop.f32.mrf.mxu1  ;;  %11474 = vmatmul.mubr.bf16.vlgmr.msra.gmra.mxu1 %v14369_v1  ;;  %v11177_v45 = vadd.f32 %v11176_v13, %v11134_v41  ;;  %v1300_v33 = vld [vmem:[%s14751_s28 + $0x1cb0] sm:$0xff] }
 0x43d   : > { %11528 = vmatpush1.bf16.msra.mxu1 %v13554_v57  ;;  %v11218_v17 = vadd.f32 %v11217_v24, %v11175_v51  ;;  %v11178_v43 = vpop.f32.mrf.mxu0  ;;  %11559 = vmatprep.mubr.bf16.mxu1 %v14371_v61  ;;  %v13515_v30 = vcombine.high %v1296_v20, %v1300_v33  ;;  %v1160_v29 = vld [vmem:[%s14751_s28 + $0x1850] sm:$0xff]  ;;  %v13514_v22 = vcombine.low %v1296_v20, %v1300_v33 }
 0x43e   : > { %v11219_v46 = vpop.f32.mrf.mxu1  ;;  %11529 = vmatprep.subr.bf16.mxu1 %v13547_v11  ;;  %v11179_v3 = vadd.f32 %v11178_v43, %v11136_v59  ;;  %11487 = vmatpush1.bf16.msra.mxu0 %v13418_v36  ;;  %v1164_v32 = vld [vmem:[%s14751_s28 + $0x1870] sm:$0xff] }
 0x43f   : > { %v12346_v62 = vadd.f32 %v11218_v17, %v16029_v10  ;;  %v11220_v49 = vadd.f32 %v11219_v46, %v11177_v45  ;;  %v11180_v34 = vpop.f32.mrf.mxu0  ;;  %11488 = vmatprep.subr.bf16.mxu0 %v13411_v18  ;;  %v1292_v36 = vld [vmem:[%s14751_s28 + $0x1c70] sm:$0xff]  ;;  %v13379_v41 = vcombine.high %v1160_v29, %v1164_v32  ;;  %v13378_v18 = vcombine.low %v1160_v29, %v1164_v32 }
 0x440   : > { %v11221_v7 = vpop.f32.mrf.mxu1  ;;  %v11181_v38 = vadd.f32 %v11180_v34, %v11138_v44  ;;  %v1152_v24 = vld [vmem:[%s14751_s28 + $0x1810] sm:$0xff] }
 0x441   : > { %11530 = vmatpush1.bf16.msra.mxu1 %v13546_v35  ;;  %v12397_v63 = vmax.f32 %v12346_v62, 0.0  ;;  %v12347_v8 = vadd.f32 %v11220_v49, %v16050_v55  ;;  %v11222_v9 = vadd.f32 %v11221_v7, %v11179_v3  ;;  %v1156_v1 = vld [vmem:[%s14751_s28 + $0x1830] sm:$0xff] }
 0x442   : > { %11531 = vmatprep.subr.bf16.mxu1 %v13539_v0  ;;  %v11223_v50 = vpop.f32.mrf.mxu1  ;;  %11489 = vmatpush1.bf16.msra.mxu0 %v13410_v31  ;;  %v1280_v19 = vld [vmem:[%s14751_s28 + $0x1c10] sm:$0xff]  ;;  %v13371_v54 = vcombine.high %v1152_v24, %v1156_v1  ;;  %v13370_v25 = vcombine.low %v1152_v24, %v1156_v1 }
 0x443   : > { %12413 = vst [vmem:[%s15506_s27 + $0x10] sm:$0xff] %v12397_v63  ;;  %v12398_v15 = vmax.f32 %v12347_v8, 0.0  ;;  %v12354_v5 = vadd.f32 %v11222_v9, %v16029_v10  ;;  %v11224_v57 = vadd.f32 %v11223_v50, %v11181_v38  ;;  %11490 = vmatprep.subr.bf16.mxu0 %v13403_v14  ;;  %v1172_v10 = vld [vmem:[%s14751_s28 + $0x18b0] sm:$0xff] }
 0x444   : > { %v13387_v56 = vcombine.high %v1168_v40, %v1172_v10  ;;  %v13386_v35 = vcombine.low %v1168_v40, %v1172_v10  ;;  %v1284_v13 = vld [vmem:[%s14751_s28 + $0x1c30] sm:$0xff] }
 0x445   : > { %11532 = vmatpush1.bf16.msra.mxu1 %v13538_v12  ;;  %12414 = vst [vmem:[%s15506_s27 + $0x18] sm:$0xff] %v12398_v15  ;;  %v12405_v58 = vmax.f32 %v12354_v5, 0.0  ;;  %v12355_v26 = vadd.f32 %v11224_v57, %v16050_v55  ;;  %v1288_v55 = vld [vmem:[%s14751_s28 + $0x1c50] sm:$0xff]  ;;  %v13499_v59 = vcombine.high %v1280_v19, %v1284_v13  ;;  %v13498_v39 = vcombine.low %v1280_v19, %v1284_v13 }
 0x446   : > { %11533 = vmatprep.subr.bf16.mxu1 %v13531_v4  ;;  %11491 = vmatpush1.bf16.msra.mxu0 %v13402_v53  ;;  %v13507_v51 = vcombine.high %v1288_v55, %v1292_v36  ;;  %v13506_v0 = vcombine.low %v1288_v55, %v1292_v36  ;;  %v1272_v17 = vld [vmem:[%s14751_s28 + $0x1bd0] sm:$0xff] }
 0x447   : > { %12421 = vst [vmem:[%s15506_s27 + $0x50] sm:$0xff] %v12405_v58  ;;  %v12406_v11 = vmax.f32 %v12355_v26, 0.0  ;;  %11492 = vmatprep.subr.bf16.mxu0 %v13395_v16  ;;  %v1276_v45 = vld [vmem:[%s14751_s28 + $0x1bf0] sm:$0xff] }
 0x448   : > { %v1400_v46 = vld [vmem:[%s14751_s28 + $0x1fd0] sm:$0xff]  ;;  %v13491_v27 = vcombine.high %v1272_v17, %v1276_v45  ;;  %v13490_v49 = vcombine.low %v1272_v17, %v1276_v45 }
 0x449   : > { %11534 = vmatpush1.bf16.msra.mxu1 %v13530_v42  ;;  %12422 = vst [vmem:[%s15506_s27 + $0x58] sm:$0xff] %v12406_v11  ;;  %v1404_v23 = vld [vmem:[%s14751_s28 + $0x1ff0] sm:$0xff] }
 0x44a   : > { %11535 = vmatprep.subr.bf16.mxu1 %v13523_v2  ;;  %11493 = vmatpush1.bf16.msra.mxu0 %v13394_v47  ;;  %v13619_v43 = vcombine.high %v1400_v46, %v1404_v23  ;;  %v1264_v31 = vld [vmem:[%s14751_s28 + $0x1b90] sm:$0xff]  ;;  %v13618_v3 = vcombine.low %v1400_v46, %v1404_v23 }
 0x44b   : > { %11494 = vmatprep.subr.bf16.mxu0 %v13387_v56  ;;  %v1268_v61 = vld [vmem:[%s14751_s28 + $0x1bb0] sm:$0xff] }
 0x44c   : > { %v1392_v44 = vld [vmem:[%s14751_s28 + $0x1f90] sm:$0xff]  ;;  %v13483_v7 = vcombine.high %v1264_v31, %v1268_v61  ;;  %v13482_v8 = vcombine.low %v1264_v31, %v1268_v61 }
 0x44d   : > { %11536 = vmatpush1.bf16.msra.mxu1 %v13522_v60  ;;  %v1396_v62 = vld [vmem:[%s14751_s28 + $0x1fb0] sm:$0xff] }
 0x44e   : > { %11537 = vmatprep.subr.bf16.mxu1 %v13515_v30  ;;  %11495 = vmatpush1.bf16.msra.mxu0 %v13386_v35  ;;  %v13611_v34 = vcombine.high %v1392_v44, %v1396_v62  ;;  %v1256_v12 = vld [vmem:[%s14751_s28 + $0x1b50] sm:$0xff]  ;;  %v13610_v9 = vcombine.low %v1392_v44, %v1396_v62 }
 0x44f   : > { %11496 = vmatprep.subr.bf16.mxu0 %v13379_v41  ;;  %v1260_v14 = vld [vmem:[%s14751_s28 + $0x1b70] sm:$0xff] }
 0x450   : > { %v1384_v4 = vld [vmem:[%s14751_s28 + $0x1f50] sm:$0xff]  ;;  %v13475_v38 = vcombine.high %v1256_v12, %v1260_v14  ;;  %v13474_v15 = vcombine.low %v1256_v12, %v1260_v14 }
 0x451   : > { %11538 = vmatpush1.bf16.msra.mxu1 %v13514_v22  ;;  %v1388_v63 = vld [vmem:[%s14751_s28 + $0x1f70] sm:$0xff] }
 0x452   : > { %11539 = vmatprep.subr.bf16.mxu1 %v13507_v51  ;;  %11497 = vmatpush1.bf16.msra.mxu0 %v13378_v18  ;;  %v13603_v6 = vcombine.high %v1384_v4, %v1388_v63  ;;  %v1248_v52 = vld [vmem:[%s14751_s28 + $0x1b10] sm:$0xff]  ;;  %v13602_v5 = vcombine.low %v1384_v4, %v1388_v63 }
 0x453   : > { %11498 = vmatprep.subr.bf16.mxu0 %v13371_v54  ;;  %v1252_v50 = vld [vmem:[%s14751_s28 + $0x1b30] sm:$0xff] }
 0x454   : > { %v1376_v37 = vld [vmem:[%s14751_s28 + $0x1f10] sm:$0xff]  ;;  %v13467_v57 = vcombine.high %v1248_v52, %v1252_v50  ;;  %v13466_v2 = vcombine.low %v1248_v52, %v1252_v50 }
 0x455   : > { %11540 = vmatpush1.bf16.msra.mxu1 %v13506_v0  ;;  %v1380_v21 = vld [vmem:[%s14751_s28 + $0x1f30] sm:$0xff] }
 0x456   : > { %11541 = vmatprep.subr.bf16.mxu1 %v13499_v59  ;;  %11499 = vmatpush1.bf16.msra.mxu0 %v13370_v25  ;;  %v13595_v53 = vcombine.high %v1376_v37, %v1380_v21  ;;  %v1240_v42 = vld [vmem:[%s14751_s28 + $0x1ad0] sm:$0xff]  ;;  %v13594_v40 = vcombine.low %v1376_v37, %v1380_v21 }
 0x457   : > { %11500 = vmatprep.subr.bf16.mxu0 %v13491_v27  ;;  %v1244_v16 = vld [vmem:[%s14751_s28 + $0x1af0] sm:$0xff] }
 0x458   : > { %v1368_v58 = vld [vmem:[%s14751_s28 + $0x1ed0] sm:$0xff]  ;;  %v13459_v10 = vcombine.high %v1240_v42, %v1244_v16  ;;  %v13458_v56 = vcombine.low %v1240_v42, %v1244_v16  ;;  %v14375_v16 = vld [vmem:[#allocation2 + $0x4c] ss:$100 sps:$4 sm:$0xff]  }
 0x459   : > { %11542 = vmatpush1.bf16.msra.mxu1 %v13498_v39  ;;  %v1372_v26 = vld [vmem:[%s14751_s28 + $0x1ef0] sm:$0xff] }
 0x45a   : > { %11543 = vmatprep.subr.bf16.mxu1 %v13619_v43  ;;  %11501 = vmatpush2.bf16.msra.mxu0 %v13490_v49  ;;  %v13587_v20 = vcombine.high %v1368_v58, %v1372_v26  ;;  %v1232_v33 = vld [vmem:[%s14751_s28 + $0x1a90] sm:$0xff]  ;;  %v13586_v30 = vcombine.low %v1368_v58, %v1372_v26 }
 0x45b   : > { %11502 = vmatprep.subr.bf16.mxu0 %v13483_v7  ;;  %v1236_v11 = vld [vmem:[%s14751_s28 + $0x1ab0] sm:$0xff] }
 0x45c   : > { %v1360_v47 = vld [vmem:[%s14751_s28 + $0x1e90] sm:$0xff]  ;;  %v13451_v29 = vcombine.high %v1232_v33, %v1236_v11  ;;  %v13450_v41 = vcombine.low %v1232_v33, %v1236_v11 }
 0x45d   : > { %11544 = vmatpush2.bf16.msra.mxu1 %v13618_v3  ;;  %v1364_v60 = vld [vmem:[%s14751_s28 + $0x1eb0] sm:$0xff] }
 0x45e   : > { %11545 = vmatprep.subr.bf16.mxu1 %v13611_v34  ;;  %11503 = vmatpush2.bf16.msra.mxu0 %v13482_v8  ;;  %v13579_v32 = vcombine.high %v1360_v47, %v1364_v60  ;;  %v1224_v55 = vld [vmem:[%s14751_s28 + $0x1a50] sm:$0xff]  ;;  %v13578_v51 = vcombine.low %v1360_v47, %v1364_v60  ;;  %v14372_v8 = vld [vmem:[#allocation2 + $0x30] ss:$100 sps:$4 sm:$0xff]  }
 0x45f   : > { %11504 = vmatprep.subr.bf16.mxu0 %v13475_v38  ;;  %v1228_v36 = vld [vmem:[%s14751_s28 + $0x1a70] sm:$0xff] }
 0x460   : > { %v1352_v35 = vld [vmem:[%s14751_s28 + $0x1e50] sm:$0xff]  ;;  %v13443_v24 = vcombine.high %v1224_v55, %v1228_v36  ;;  %v13442_v54 = vcombine.low %v1224_v55, %v1228_v36 }
 0x461   : > { %11546 = vmatpush2.bf16.msra.mxu1 %v13610_v9  ;;  %v1356_v22 = vld [vmem:[%s14751_s28 + $0x1e70] sm:$0xff] }
 0x462   : > { %11547 = vmatprep.subr.bf16.mxu1 %v13603_v6  ;;  %11505 = vmatpush2.bf16.msra.mxu0 %v13474_v15  ;;  %v13571_v1 = vcombine.high %v1352_v35, %v1356_v22  ;;  %v1216_v19 = vld [vmem:[%s14751_s28 + $0x1a10] sm:$0xff]  ;;  %v13570_v59 = vcombine.low %v1352_v35, %v1356_v22 }
 0x463   : > { %11506 = vmatprep.subr.bf16.mxu0 %v13467_v57  ;;  %v1220_v13 = vld [vmem:[%s14751_s28 + $0x1a30] sm:$0xff]  ;;  %v14374_v57 = vld [vmem:[#allocation2 + $0x44] ss:$100 sps:$4 sm:$0xff]  }
 0x464   : > { %v1344_v18 = vld [vmem:[%s14751_s28 + $0x1e10] sm:$0xff]  ;;  %v13435_v17 = vcombine.high %v1216_v19, %v1220_v13  ;;  %v13434_v27 = vcombine.low %v1216_v19, %v1220_v13 }
 0x465   : > { %11548 = vmatpush2.bf16.msra.mxu1 %v13602_v5  ;;  %v1348_v0 = vld [vmem:[%s14751_s28 + $0x1e30] sm:$0xff] }
 0x466   : > { %11549 = vmatprep.subr.bf16.mxu1 %v13595_v53  ;;  %11507 = vmatpush2.bf16.msra.mxu0 %v13466_v2  ;;  %v13563_v45 = vcombine.high %v1344_v18, %v1348_v0  ;;  %v1464_v46 = vld [vmem:[%s14751_s28 + $0x21d0] sm:$0xff]  ;;  %v13562_v43 = vcombine.low %v1344_v18, %v1348_v0 }
 0x467   : > { %11508 = vmatprep.subr.bf16.mxu0 %v13459_v10  ;;  %v1468_v23 = vld [vmem:[%s14751_s28 + $0x21f0] sm:$0xff] }
 0x468   : > { %v1592_v25 = vld [vmem:[%s14751_s28 + $0x25d0] sm:$0xff]  ;;  %v13683_v31 = vcombine.high %v1464_v46, %v1468_v23  ;;  %v13682_v7 = vcombine.low %v1464_v46, %v1468_v23 }
 0x469   : > { %11550 = vmatpush2.bf16.msra.mxu1 %v13594_v40  ;;  %v1596_v39 = vld [vmem:[%s14751_s28 + $0x25f0] sm:$0xff] }
 0x46a   : > { %11551 = vmatprep.subr.bf16.mxu1 %v13587_v20  ;;  %11509 = vmatpush2.bf16.msra.mxu0 %v13458_v56  ;;  %v13811_v61 = vcombine.high %v1592_v25, %v1596_v39  ;;  %v1456_v44 = vld [vmem:[%s14751_s28 + $0x2190] sm:$0xff]  ;;  %v13810_v34 = vcombine.low %v1592_v25, %v1596_v39 }
 0x46b   : > { %11510 = vmatprep.subr.bf16.mxu0 %v13451_v29  ;;  %v1460_v62 = vld [vmem:[%s14751_s28 + $0x21b0] sm:$0xff] }
 0x46c   : > { %v1584_v49 = vld [vmem:[%s14751_s28 + $0x2590] sm:$0xff]  ;;  %v13675_v12 = vcombine.high %v1456_v44, %v1460_v62  ;;  %v13674_v52 = vcombine.low %v1456_v44, %v1460_v62 }
 0x46d   : > { %11552 = vmatpush2.bf16.msra.mxu1 %v13586_v30  ;;  %v1588_v3 = vld [vmem:[%s14751_s28 + $0x25b0] sm:$0xff] }
 0x46e   : > { %11553 = vmatprep.subr.bf16.mxu1 %v13579_v32  ;;  %11511 = vmatpush2.bf16.msra.mxu0 %v13450_v41  ;;  %v13803_v14 = vcombine.high %v1584_v49, %v1588_v3  ;;  %v1448_v4 = vld [vmem:[%s14751_s28 + $0x2150] sm:$0xff]  ;;  %v13802_v50 = vcombine.low %v1584_v49, %v1588_v3 }
 0x46f   : > { %11512 = vmatprep.subr.bf16.mxu0 %v13443_v24  ;;  %v1452_v63 = vld [vmem:[%s14751_s28 + $0x2170] sm:$0xff] }
 0x470   : > { %v1576_v9 = vld [vmem:[%s14751_s28 + $0x2550] sm:$0xff]  ;;  %v13667_v37 = vcombine.high %v1448_v4, %v1452_v63  ;;  %v13666_v58 = vcombine.low %v1448_v4, %v1452_v63 }
 0x471   : > { %11554 = vmatpush2.bf16.msra.mxu1 %v13578_v51  ;;  %v1580_v38 = vld [vmem:[%s14751_s28 + $0x2570] sm:$0xff] }
 0x472   : > { %11555 = vmatprep.subr.bf16.mxu1 %v13571_v1  ;;  %11513 = vmatpush2.bf16.msra.mxu0 %v13442_v54  ;;  %v14373_v6 = vld [vmem:[#allocation2 + $0x38] ss:$100 sps:$4 sm:$0xff]   ;;  %v13795_v21 = vcombine.high %v1576_v9, %v1580_v38  ;;  %v13794_v26 = vcombine.low %v1576_v9, %v1580_v38 }
 0x473   : > { %11514 = vmatprep.subr.bf16.mxu0 %v13435_v17  ;;  %v1440_v15 = vld [vmem:[%s14751_s28 + $0x2110] sm:$0xff] }
 0x474   : > { %v1444_v5 = vld [vmem:[%s14751_s28 + $0x2130] sm:$0xff] }
 0x475   : > { %11556 = vmatpush2.bf16.msra.mxu1 %v13570_v59  ;;  %v1568_v53 = vld [vmem:[%s14751_s28 + $0x2510] sm:$0xff]  ;;  %v13659_v2 = vcombine.high %v1440_v15, %v1444_v5  ;;  %v13658_v47 = vcombine.low %v1440_v15, %v1444_v5 }
 0x476   : > { %11557 = vmatprep.subr.bf16.mxu1 %v13563_v45  ;;  %11515 = vmatpush2.bf16.msra.mxu0 %v13434_v27  ;;  %v1572_v42 = vld [vmem:[%s14751_s28 + $0x2530] sm:$0xff] }
 0x477   : > { %11570 = vmatprep.subr.bf16.mxu0 %v13683_v31  ;;  %v13787_v40 = vcombine.high %v1568_v53, %v1572_v42  ;;  %v1432_v10 = vld [vmem:[%s14751_s28 + $0x20d0] sm:$0xff]  ;;  %v13786_v60 = vcombine.low %v1568_v53, %v1572_v42 }
 0x478   : > { %v1436_v20 = vld [vmem:[%s14751_s28 + $0x20f0] sm:$0xff] }
 0x479   : > { %11558 = vmatpush2.bf16.msra.mxu1 %v13562_v43  ;;  %11517 = vmatmul.mubr.bf16.vlgmr.msra.gmra.mxu0 %v14372_v8  ;;  %v1560_v33 = vld [vmem:[%s14751_s28 + $0x24d0] sm:$0xff]  ;;  %v13651_v56 = vcombine.high %v1432_v10, %v1436_v20  ;;  %v13650_v35 = vcombine.low %v1432_v10, %v1436_v20 }
 0x47a   : > { %11613 = vmatprep.subr.bf16.mxu1 %v13811_v61  ;;  %11571 = vmatpush1.bf16.msra.mxu0 %v13682_v7  ;;  %v1564_v11 = vld [vmem:[%s14751_s28 + $0x24f0] sm:$0xff] }
 0x47b   : > { %11572 = vmatprep.subr.bf16.mxu0 %v13675_v12  ;;  %11602 = vmatprep.mubr.bf16.mxu0 %v14374_v57  ;;  %v13779_v30 = vcombine.high %v1560_v33, %v1564_v11  ;;  %v1424_v29 = vld [vmem:[%s14751_s28 + $0x2090] sm:$0xff]  ;;  %v13778_v22 = vcombine.low %v1560_v33, %v1564_v11 }
 0x47c   : > { %11560 = vmatmul.mubr.bf16.vlgmr.msra.gmra.mxu1 %v14373_v6  ;;  %v1428_v32 = vld [vmem:[%s14751_s28 + $0x20b0] sm:$0xff] }
 0x47d   : > { %11614 = vmatpush1.bf16.msra.mxu1 %v13810_v34  ;;  %11645 = vmatprep.mubr.bf16.mxu1 %v14375_v16  ;;  %v1552_v55 = vld [vmem:[%s14751_s28 + $0x2490] sm:$0xff]  ;;  %v13643_v41 = vcombine.high %v1424_v29, %v1428_v32  ;;  %v13642_v18 = vcombine.low %v1424_v29, %v1428_v32 }
 0x47e   : > { %11615 = vmatprep.subr.bf16.mxu1 %v13803_v14  ;;  %11573 = vmatpush1.bf16.msra.mxu0 %v13674_v52  ;;  %v1556_v36 = vld [vmem:[%s14751_s28 + $0x24b0] sm:$0xff] }
 0x47f   : > { %11574 = vmatprep.subr.bf16.mxu0 %v13667_v37  ;;  %v13771_v51 = vcombine.high %v1552_v55, %v1556_v36  ;;  %v1416_v24 = vld [vmem:[%s14751_s28 + $0x2050] sm:$0xff]  ;;  %v13770_v0 = vcombine.low %v1552_v55, %v1556_v36 }
 0x480   : > { %v1420_v1 = vld [vmem:[%s14751_s28 + $0x2070] sm:$0xff] }
 0x481   : > { %11616 = vmatpush1.bf16.msra.mxu1 %v13802_v50  ;;  %v1544_v19 = vld [vmem:[%s14751_s28 + $0x2450] sm:$0xff]  ;;  %v13635_v54 = vcombine.high %v1416_v24, %v1420_v1  ;;  %v13634_v25 = vcombine.low %v1416_v24, %v1420_v1 }
 0x482   : > { %11617 = vmatprep.subr.bf16.mxu1 %v13795_v21  ;;  %11575 = vmatpush1.bf16.msra.mxu0 %v13666_v58  ;;  %v1548_v13 = vld [vmem:[%s14751_s28 + $0x2470] sm:$0xff] }
 0x483   : > { %11576 = vmatprep.subr.bf16.mxu0 %v13659_v2  ;;  %v13763_v59 = vcombine.high %v1544_v19, %v1548_v13  ;;  %v1408_v17 = vld [vmem:[%s14751_s28 + $0x2010] sm:$0xff]  ;;  %v13762_v39 = vcombine.low %v1544_v19, %v1548_v13 }
 0x484   : > { %v1412_v45 = vld [vmem:[%s14751_s28 + $0x2030] sm:$0xff] }
 0x485   : > { %11618 = vmatpush1.bf16.msra.mxu1 %v13794_v26  ;;  %v1536_v46 = vld [vmem:[%s14751_s28 + $0x2410] sm:$0xff]  ;;  %v13627_v27 = vcombine.high %v1408_v17, %v1412_v45  ;;  %v13626_v49 = vcombine.low %v1408_v17, %v1412_v45 }
 0x486   : > { %11619 = vmatprep.subr.bf16.mxu1 %v13787_v40  ;;  %11577 = vmatpush1.bf16.msra.mxu0 %v13658_v47  ;;  %v1540_v23 = vld [vmem:[%s14751_s28 + $0x2430] sm:$0xff] }
 0x487   : > { %11578 = vmatprep.subr.bf16.mxu0 %v13651_v56  ;;  %v13755_v43 = vcombine.high %v1536_v46, %v1540_v23  ;;  %v1528_v31 = vld [vmem:[%s14751_s28 + $0x23d0] sm:$0xff]  ;;  %v13754_v3 = vcombine.low %v1536_v46, %v1540_v23 }
 0x488   : > { %v1532_v61 = vld [vmem:[%s14751_s28 + $0x23f0] sm:$0xff] }
 0x489   : > { %11620 = vmatpush1.bf16.msra.mxu1 %v13786_v60  ;;  %v1656_v44 = vld [vmem:[%s14751_s28 + $0x27d0] sm:$0xff]  ;;  %v13747_v7 = vcombine.high %v1528_v31, %v1532_v61  ;;  %v13746_v8 = vcombine.low %v1528_v31, %v1532_v61 }
 0x48a   : > { %11621 = vmatprep.subr.bf16.mxu1 %v13779_v30  ;;  %11579 = vmatpush1.bf16.msra.mxu0 %v13650_v35  ;;  %v1660_v62 = vld [vmem:[%s14751_s28 + $0x27f0] sm:$0xff] }
 0x48b   : > { %11580 = vmatprep.subr.bf16.mxu0 %v13643_v41  ;;  %v13875_v34 = vcombine.high %v1656_v44, %v1660_v62  ;;  %v1520_v12 = vld [vmem:[%s14751_s28 + $0x2390] sm:$0xff]  ;;  %v13874_v9 = vcombine.low %v1656_v44, %v1660_v62 }
 0x48c   : > { %v1524_v14 = vld [vmem:[%s14751_s28 + $0x23b0] sm:$0xff] }
 0x48d   : > { %11622 = vmatpush1.bf16.msra.mxu1 %v13778_v22  ;;  %v1648_v4 = vld [vmem:[%s14751_s28 + $0x2790] sm:$0xff]  ;;  %v13739_v38 = vcombine.high %v1520_v12, %v1524_v14  ;;  %v13738_v15 = vcombine.low %v1520_v12, %v1524_v14 }
 0x48e   : > { %11623 = vmatprep.subr.bf16.mxu1 %v13771_v51  ;;  %11581 = vmatpush1.bf16.msra.mxu0 %v13642_v18  ;;  %v1652_v63 = vld [vmem:[%s14751_s28 + $0x27b0] sm:$0xff] }
 0x48f   : > { %11582 = vmatprep.subr.bf16.mxu0 %v13635_v54  ;;  %v13867_v6 = vcombine.high %v1648_v4, %v1652_v63  ;;  %v1512_v52 = vld [vmem:[%s14751_s28 + $0x2350] sm:$0xff]  ;;  %v13866_v5 = vcombine.low %v1648_v4, %v1652_v63 }
 0x490   : > { %v1516_v50 = vld [vmem:[%s14751_s28 + $0x2370] sm:$0xff] }
 0x491   : > { %11624 = vmatpush1.bf16.msra.mxu1 %v13770_v0  ;;  %v1640_v37 = vld [vmem:[%s14751_s28 + $0x2750] sm:$0xff]  ;;  %v13731_v57 = vcombine.high %v1512_v52, %v1516_v50  ;;  %v13730_v2 = vcombine.low %v1512_v52, %v1516_v50 }
 0x492   : > { %11625 = vmatprep.subr.bf16.mxu1 %v13763_v59  ;;  %11583 = vmatpush1.bf16.msra.mxu0 %v13634_v25  ;;  %v1644_v21 = vld [vmem:[%s14751_s28 + $0x2770] sm:$0xff] }
 0x493   : > { %11584 = vmatprep.subr.bf16.mxu0 %v13627_v27  ;;  %v13859_v53 = vcombine.high %v1640_v37, %v1644_v21  ;;  %v1504_v42 = vld [vmem:[%s14751_s28 + $0x2310] sm:$0xff]  ;;  %v13858_v40 = vcombine.low %v1640_v37, %v1644_v21 }
 0x494   : > { %v1508_v16 = vld [vmem:[%s14751_s28 + $0x2330] sm:$0xff] }
 0x495   : > { %11626 = vmatpush1.bf16.msra.mxu1 %v13762_v39  ;;  %v1632_v58 = vld [vmem:[%s14751_s28 + $0x2710] sm:$0xff]  ;;  %v13723_v10 = vcombine.high %v1504_v42, %v1508_v16  ;;  %v13722_v56 = vcombine.low %v1504_v42, %v1508_v16 }
 0x496   : > { %11627 = vmatprep.subr.bf16.mxu1 %v13755_v43  ;;  %11585 = vmatpush1.bf16.msra.mxu0 %v13626_v49  ;;  %v1636_v26 = vld [vmem:[%s14751_s28 + $0x2730] sm:$0xff] }
 0x497   : > { %11586 = vmatprep.subr.bf16.mxu0 %v13747_v7  ;;  %v13851_v20 = vcombine.high %v1632_v58, %v1636_v26  ;;  %v1496_v33 = vld [vmem:[%s14751_s28 + $0x22d0] sm:$0xff]  ;;  %v13850_v30 = vcombine.low %v1632_v58, %v1636_v26 }
 0x498   : > { %v1500_v11 = vld [vmem:[%s14751_s28 + $0x22f0] sm:$0xff] }
 0x499   : > { %11628 = vmatpush1.bf16.msra.mxu1 %v13754_v3  ;;  %v1624_v47 = vld [vmem:[%s14751_s28 + $0x26d0] sm:$0xff]  ;;  %v13715_v29 = vcombine.high %v1496_v33, %v1500_v11  ;;  %v13714_v41 = vcombine.low %v1496_v33, %v1500_v11 }
 0x49a   : > { %11629 = vmatprep.subr.bf16.mxu1 %v13875_v34  ;;  %11587 = vmatpush2.bf16.msra.mxu0 %v13746_v8  ;;  %v1628_v60 = vld [vmem:[%s14751_s28 + $0x26f0] sm:$0xff] }
 0x49b   : > { %11588 = vmatprep.subr.bf16.mxu0 %v13739_v38  ;;  %v13843_v32 = vcombine.high %v1624_v47, %v1628_v60  ;;  %v1488_v55 = vld [vmem:[%s14751_s28 + $0x2290] sm:$0xff]  ;;  %v13842_v51 = vcombine.low %v1624_v47, %v1628_v60 }
 0x49c   : > { %v1492_v36 = vld [vmem:[%s14751_s28 + $0x22b0] sm:$0xff] }
 0x49d   : > { %11630 = vmatpush2.bf16.msra.mxu1 %v13874_v9  ;;  %v1616_v35 = vld [vmem:[%s14751_s28 + $0x2690] sm:$0xff]  ;;  %v13707_v24 = vcombine.high %v1488_v55, %v1492_v36  ;;  %v13706_v54 = vcombine.low %v1488_v55, %v1492_v36 }
 0x49e   : > { %11631 = vmatprep.subr.bf16.mxu1 %v13867_v6  ;;  %11589 = vmatpush2.bf16.msra.mxu0 %v13738_v15  ;;  %v1620_v22 = vld [vmem:[%s14751_s28 + $0x26b0] sm:$0xff]  ;;  %v14376_v15 = vld [vmem:[#allocation2 + $0x40] ss:$100 sps:$4 sm:$0xff]  }
 0x49f   : > { %11590 = vmatprep.subr.bf16.mxu0 %v13731_v57  ;;  %v13835_v1 = vcombine.high %v1616_v35, %v1620_v22  ;;  %v1480_v19 = vld [vmem:[%s14751_s28 + $0x2250] sm:$0xff]  ;;  %v13834_v59 = vcombine.low %v1616_v35, %v1620_v22 }
 0x4a0   : > { %v1484_v13 = vld [vmem:[%s14751_s28 + $0x2270] sm:$0xff] }
 0x4a1   : > { %11632 = vmatpush2.bf16.msra.mxu1 %v13866_v5  ;;  %v1608_v18 = vld [vmem:[%s14751_s28 + $0x2650] sm:$0xff]  ;;  %v13699_v17 = vcombine.high %v1480_v19, %v1484_v13  ;;  %v13698_v27 = vcombine.low %v1480_v19, %v1484_v13 }
 0x4a2   : > { %11633 = vmatprep.subr.bf16.mxu1 %v13859_v53  ;;  %11591 = vmatpush2.bf16.msra.mxu0 %v13730_v2  ;;  %v1612_v0 = vld [vmem:[%s14751_s28 + $0x2670] sm:$0xff]  ;;  %v14377_v53 = vld [vmem:[#allocation2 + $0x48] ss:$100 sps:$4 sm:$0xff]  }
 0x4a3   : > { %11592 = vmatprep.subr.bf16.mxu0 %v13723_v10  ;;  %v13827_v45 = vcombine.high %v1608_v18, %v1612_v0  ;;  %v1472_v46 = vld [vmem:[%s14751_s28 + $0x2210] sm:$0xff]  ;;  %v13826_v43 = vcombine.low %v1608_v18, %v1612_v0 }
 0x4a4   : > { %v1476_v23 = vld [vmem:[%s14751_s28 + $0x2230] sm:$0xff] }
 0x4a5   : > { %11634 = vmatpush2.bf16.msra.mxu1 %v13858_v40  ;;  %v1600_v25 = vld [vmem:[%s14751_s28 + $0x2610] sm:$0xff]  ;;  %v13691_v31 = vcombine.high %v1472_v46, %v1476_v23  ;;  %v13690_v7 = vcombine.low %v1472_v46, %v1476_v23 }
 0x4a6   : > { %11635 = vmatprep.subr.bf16.mxu1 %v13851_v20  ;;  %11593 = vmatpush2.bf16.msra.mxu0 %v13722_v56  ;;  %v1604_v39 = vld [vmem:[%s14751_s28 + $0x2630] sm:$0xff] }
 0x4a7   : > { %11594 = vmatprep.subr.bf16.mxu0 %v13715_v29  ;;  %v13819_v61 = vcombine.high %v1600_v25, %v1604_v39  ;;  %v1720_v44 = vld [vmem:[%s14751_s28 + $0x29d0] sm:$0xff]  ;;  %v13818_v34 = vcombine.low %v1600_v25, %v1604_v39 }
 0x4a8   : > { %v1724_v62 = vld [vmem:[%s14751_s28 + $0x29f0] sm:$0xff] }
 0x4a9   : > { %11636 = vmatpush2.bf16.msra.mxu1 %v13850_v30  ;;  %v1848_v49 = vld [vmem:[%s14751_s28 + $0x2dd0] sm:$0xff]  ;;  %v13939_v12 = vcombine.high %v1720_v44, %v1724_v62  ;;  %v13938_v38 = vcombine.low %v1720_v44, %v1724_v62 }
 0x4aa   : > { %11637 = vmatprep.subr.bf16.mxu1 %v13843_v32  ;;  %11595 = vmatpush2.bf16.msra.mxu0 %v13714_v41  ;;  %v1852_v3 = vld [vmem:[%s14751_s28 + $0x2df0] sm:$0xff] }
 0x4ab   : > { %11596 = vmatprep.subr.bf16.mxu0 %v13707_v24  ;;  %v14067_v14 = vcombine.high %v1848_v49, %v1852_v3  ;;  %v1712_v4 = vld [vmem:[%s14751_s28 + $0x2990] sm:$0xff]  ;;  %v14066_v6 = vcombine.low %v1848_v49, %v1852_v3 }
 0x4ac   : > { %v1716_v63 = vld [vmem:[%s14751_s28 + $0x29b0] sm:$0xff] }
 0x4ad   : > { %11638 = vmatpush2.bf16.msra.mxu1 %v13842_v51  ;;  %v1840_v8 = vld [vmem:[%s14751_s28 + $0x2d90] sm:$0xff]  ;;  %v13931_v52 = vcombine.high %v1712_v4, %v1716_v63  ;;  %v13930_v42 = vcombine.low %v1712_v4, %v1716_v63 }
 0x4ae   : > { %11639 = vmatprep.subr.bf16.mxu1 %v13835_v1  ;;  %11597 = vmatpush2.bf16.msra.mxu0 %v13706_v54  ;;  %v1844_v9 = vld [vmem:[%s14751_s28 + $0x2db0] sm:$0xff] }
 0x4af   : > { %11598 = vmatprep.subr.bf16.mxu0 %v13699_v17  ;;  %v14059_v50 = vcombine.high %v1840_v8, %v1844_v9  ;;  %v1704_v37 = vld [vmem:[%s14751_s28 + $0x2950] sm:$0xff]  ;;  %v14058_v16 = vcombine.low %v1840_v8, %v1844_v9 }
 0x4b0   : > { %v1708_v21 = vld [vmem:[%s14751_s28 + $0x2970] sm:$0xff] }
 0x4b1   : > { %11640 = vmatpush2.bf16.msra.mxu1 %v13834_v59  ;;  %v1832_v5 = vld [vmem:[%s14751_s28 + $0x2d50] sm:$0xff]  ;;  %v13923_v58 = vcombine.high %v1704_v37, %v1708_v21  ;;  %v13922_v47 = vcombine.low %v1704_v37, %v1708_v21 }
 0x4b2   : > { %11641 = vmatprep.subr.bf16.mxu1 %v13827_v45  ;;  %11599 = vmatpush2.bf16.msra.mxu0 %v13698_v27  ;;  %v1836_v57 = vld [vmem:[%s14751_s28 + $0x2d70] sm:$0xff] }
 0x4b3   : > { %11600 = vmatprep.subr.bf16.mxu0 %v13691_v31  ;;  %v14051_v26 = vcombine.high %v1832_v5, %v1836_v57  ;;  %v1696_v2 = vld [vmem:[%s14751_s28 + $0x2910] sm:$0xff]  ;;  %v14050_v60 = vcombine.low %v1832_v5, %v1836_v57 }
 0x4b4   : > { %v1700_v40 = vld [vmem:[%s14751_s28 + $0x2930] sm:$0xff] }
 0x4b5   : > { %11642 = vmatpush2.bf16.msra.mxu1 %v13826_v43  ;;  %v14378_v10 = vld [vmem:[#allocation2 + $0x54] ss:$100 sps:$4 sm:$0xff]   ;;  %v14379_v11 = vld [vmem:[#allocation2 + $0x5c] ss:$100 sps:$4 sm:$0xff]   ;;  %v13915_v56 = vcombine.high %v1696_v2, %v1700_v40  ;;  %v13914_v35 = vcombine.low %v1696_v2, %v1700_v40 }
 0x4b6   : > { %11643 = vmatprep.subr.bf16.mxu1 %v13819_v61  ;;  %11601 = vmatpush2.bf16.msra.mxu0 %v13690_v7  ;;  %v1824_v20 = vld [vmem:[%s14751_s28 + $0x2d10] sm:$0xff] }
 0x4b7   : > { %11656 = vmatprep.subr.bf16.mxu0 %v13939_v12  ;;  %v1828_v33 = vld [vmem:[%s14751_s28 + $0x2d30] sm:$0xff] }
 0x4b8   : > { %v14043_v30 = vcombine.high %v1824_v20, %v1828_v33  ;;  %v1688_v29 = vld [vmem:[%s14751_s28 + $0x28d0] sm:$0xff]  ;;  %v14042_v22 = vcombine.low %v1824_v20, %v1828_v33 }
 0x4b9   : > { %11644 = vmatpush2.bf16.msra.mxu1 %v13818_v34  ;;  %11603 = vmatmul.mubr.bf16.vlgmr.msra.gmra.mxu0 %v14376_v15  ;;  %v1692_v32 = vld [vmem:[%s14751_s28 + $0x28f0] sm:$0xff] }
 0x4ba   : > { %11699 = vmatprep.subr.bf16.mxu1 %v14067_v14  ;;  %11657 = vmatpush1.bf16.msra.mxu0 %v13938_v38  ;;  %v1816_v55 = vld [vmem:[%s14751_s28 + $0x2cd0] sm:$0xff]  ;;  %v13907_v41 = vcombine.high %v1688_v29, %v1692_v32  ;;  %v13906_v18 = vcombine.low %v1688_v29, %v1692_v32 }
 0x4bb   : > { %11658 = vmatprep.subr.bf16.mxu0 %v13931_v52  ;;  %11688 = vmatprep.mubr.bf16.mxu0 %v14378_v10  ;;  %v1820_v36 = vld [vmem:[%s14751_s28 + $0x2cf0] sm:$0xff] }
 0x4bc   : > { %11646 = vmatmul.mubr.bf16.vlgmr.msra.gmra.mxu1 %v14377_v53  ;;  %v14035_v51 = vcombine.high %v1816_v55, %v1820_v36  ;;  %v1680_v24 = vld [vmem:[%s14751_s28 + $0x2890] sm:$0xff]  ;;  %v14034_v0 = vcombine.low %v1816_v55, %v1820_v36 }
 0x4bd   : > { %11700 = vmatpush1.bf16.msra.mxu1 %v14066_v6  ;;  %11731 = vmatprep.mubr.bf16.mxu1 %v14379_v11  ;;  %v1684_v1 = vld [vmem:[%s14751_s28 + $0x28b0] sm:$0xff] }
 0x4be   : > { %11701 = vmatprep.subr.bf16.mxu1 %v14059_v50  ;;  %11659 = vmatpush1.bf16.msra.mxu0 %v13930_v42  ;;  %v1808_v19 = vld [vmem:[%s14751_s28 + $0x2c90] sm:$0xff]  ;;  %v13899_v54 = vcombine.high %v1680_v24, %v1684_v1  ;;  %v13898_v25 = vcombine.low %v1680_v24, %v1684_v1 }
 0x4bf   : > { %11660 = vmatprep.subr.bf16.mxu0 %v13923_v58  ;;  %v1812_v13 = vld [vmem:[%s14751_s28 + $0x2cb0] sm:$0xff] }
 0x4c0   : > { %v14027_v59 = vcombine.high %v1808_v19, %v1812_v13  ;;  %v1672_v17 = vld [vmem:[%s14751_s28 + $0x2850] sm:$0xff]  ;;  %v14026_v39 = vcombine.low %v1808_v19, %v1812_v13 }
 0x4c1   : > { %11702 = vmatpush1.bf16.msra.mxu1 %v14058_v16  ;;  %v1676_v45 = vld [vmem:[%s14751_s28 + $0x2870] sm:$0xff] }
 0x4c2   : > { %11703 = vmatprep.subr.bf16.mxu1 %v14051_v26  ;;  %11661 = vmatpush1.bf16.msra.mxu0 %v13922_v47  ;;  %v1800_v46 = vld [vmem:[%s14751_s28 + $0x2c50] sm:$0xff]  ;;  %v13891_v27 = vcombine.high %v1672_v17, %v1676_v45  ;;  %v13890_v49 = vcombine.low %v1672_v17, %v1676_v45 }
 0x4c3   : > { %11662 = vmatprep.subr.bf16.mxu0 %v13915_v56  ;;  %v1804_v23 = vld [vmem:[%s14751_s28 + $0x2c70] sm:$0xff] }
 0x4c4   : > { %v14019_v43 = vcombine.high %v1800_v46, %v1804_v23  ;;  %v1664_v31 = vld [vmem:[%s14751_s28 + $0x2810] sm:$0xff]  ;;  %v14018_v3 = vcombine.low %v1800_v46, %v1804_v23 }
 0x4c5   : > { %11704 = vmatpush1.bf16.msra.mxu1 %v14050_v60  ;;  %v1668_v61 = vld [vmem:[%s14751_s28 + $0x2830] sm:$0xff] }
 0x4c6   : > { %11705 = vmatprep.subr.bf16.mxu1 %v14043_v30  ;;  %11663 = vmatpush1.bf16.msra.mxu0 %v13914_v35  ;;  %v1792_v44 = vld [vmem:[%s14751_s28 + $0x2c10] sm:$0xff]  ;;  %v13883_v7 = vcombine.high %v1664_v31, %v1668_v61  ;;  %v13882_v8 = vcombine.low %v1664_v31, %v1668_v61 }
 0x4c7   : > { %11664 = vmatprep.subr.bf16.mxu0 %v13907_v41  ;;  %v1796_v62 = vld [vmem:[%s14751_s28 + $0x2c30] sm:$0xff] }
 0x4c8   : > { %v14011_v34 = vcombine.high %v1792_v44, %v1796_v62  ;;  %v1784_v12 = vld [vmem:[%s14751_s28 + $0x2bd0] sm:$0xff]  ;;  %v14010_v9 = vcombine.low %v1792_v44, %v1796_v62 }
 0x4c9   : > { %11706 = vmatpush1.bf16.msra.mxu1 %v14042_v22  ;;  %v1788_v14 = vld [vmem:[%s14751_s28 + $0x2bf0] sm:$0xff] }
 0x4ca   : > { %11707 = vmatprep.subr.bf16.mxu1 %v14035_v51  ;;  %11665 = vmatpush1.bf16.msra.mxu0 %v13906_v18  ;;  %v1912_v4 = vld [vmem:[%s14751_s28 + $0x2fd0] sm:$0xff]  ;;  %v14003_v38 = vcombine.high %v1784_v12, %v1788_v14  ;;  %v14002_v15 = vcombine.low %v1784_v12, %v1788_v14 }
 0x4cb   : > { %11666 = vmatprep.subr.bf16.mxu0 %v13899_v54  ;;  %v1916_v63 = vld [vmem:[%s14751_s28 + $0x2ff0] sm:$0xff] }
 0x4cc   : > { %v14131_v6 = vcombine.high %v1912_v4, %v1916_v63  ;;  %v1776_v52 = vld [vmem:[%s14751_s28 + $0x2b90] sm:$0xff]  ;;  %v14130_v5 = vcombine.low %v1912_v4, %v1916_v63 }
 0x4cd   : > { %11708 = vmatpush1.bf16.msra.mxu1 %v14034_v0  ;;  %v1780_v50 = vld [vmem:[%s14751_s28 + $0x2bb0] sm:$0xff] }
 0x4ce   : > { %11709 = vmatprep.subr.bf16.mxu1 %v14027_v59  ;;  %11667 = vmatpush1.bf16.msra.mxu0 %v13898_v25  ;;  %v1904_v37 = vld [vmem:[%s14751_s28 + $0x2f90] sm:$0xff]  ;;  %v13995_v57 = vcombine.high %v1776_v52, %v1780_v50  ;;  %v13994_v2 = vcombine.low %v1776_v52, %v1780_v50 }
 0x4cf   : > { %11668 = vmatprep.subr.bf16.mxu0 %v13891_v27  ;;  %v1908_v21 = vld [vmem:[%s14751_s28 + $0x2fb0] sm:$0xff] }
 0x4d0   : > { %v14123_v53 = vcombine.high %v1904_v37, %v1908_v21  ;;  %v1768_v42 = vld [vmem:[%s14751_s28 + $0x2b50] sm:$0xff]  ;;  %v14122_v40 = vcombine.low %v1904_v37, %v1908_v21 }
 0x4d1   : > { %11710 = vmatpush1.bf16.msra.mxu1 %v14026_v39  ;;  %v1772_v16 = vld [vmem:[%s14751_s28 + $0x2b70] sm:$0xff] }
 0x4d2   : > { %11711 = vmatprep.subr.bf16.mxu1 %v14019_v43  ;;  %11669 = vmatpush1.bf16.msra.mxu0 %v13890_v49  ;;  %v1896_v58 = vld [vmem:[%s14751_s28 + $0x2f50] sm:$0xff]  ;;  %v13987_v10 = vcombine.high %v1768_v42, %v1772_v16  ;;  %v13986_v56 = vcombine.low %v1768_v42, %v1772_v16 }
 0x4d3   : > { %11670 = vmatprep.subr.bf16.mxu0 %v13883_v7  ;;  %v1900_v26 = vld [vmem:[%s14751_s28 + $0x2f70] sm:$0xff] }
 0x4d4   : > { %v14115_v20 = vcombine.high %v1896_v58, %v1900_v26  ;;  %v1760_v33 = vld [vmem:[%s14751_s28 + $0x2b10] sm:$0xff]  ;;  %v14114_v30 = vcombine.low %v1896_v58, %v1900_v26 }
 0x4d5   : > { %11712 = vmatpush1.bf16.msra.mxu1 %v14018_v3  ;;  %v1764_v11 = vld [vmem:[%s14751_s28 + $0x2b30] sm:$0xff] }
 0x4d6   : > { %11713 = vmatprep.subr.bf16.mxu1 %v14011_v34  ;;  %11671 = vmatpush1.bf16.msra.mxu0 %v13882_v8  ;;  %v1888_v47 = vld [vmem:[%s14751_s28 + $0x2f10] sm:$0xff]  ;;  %v13979_v29 = vcombine.high %v1760_v33, %v1764_v11  ;;  %v13978_v41 = vcombine.low %v1760_v33, %v1764_v11  ;;  %v441_v8 = vld [vmem:[%s14751_s28 + $0x1d8] sm:$0xff] }
 0x4d7   : > { %11672 = vmatprep.subr.bf16.mxu0 %v14003_v38  ;;  %v1892_v60 = vld [vmem:[%s14751_s28 + $0x2f30] sm:$0xff] }
 0x4d8   : > { %v14107_v32 = vcombine.high %v1888_v47, %v1892_v60  ;;  %v1752_v55 = vld [vmem:[%s14751_s28 + $0x2ad0] sm:$0xff]  ;;  %v14106_v51 = vcombine.low %v1888_v47, %v1892_v60 }
 0x4d9   : > { %11714 = vmatpush1.bf16.msra.mxu1 %v14010_v9  ;;  %v1756_v36 = vld [vmem:[%s14751_s28 + $0x2af0] sm:$0xff]  ;;  %v445_v9 = vld [vmem:[%s14751_s28 + $0x1f8] sm:$0xff] }
 0x4da   : > { %11715 = vmatprep.subr.bf16.mxu1 %v14131_v6  ;;  %11673 = vmatpush2.bf16.msra.mxu0 %v14002_v15  ;;  %v1880_v35 = vld [vmem:[%s14751_s28 + $0x2ed0] sm:$0xff]  ;;  %v13971_v24 = vcombine.high %v1752_v55, %v1756_v36  ;;  %v13970_v54 = vcombine.low %v1752_v55, %v1756_v36  ;;  %v12661_v50 = vcombine.high %v441_v8, %v445_v9  ;;  %v433_v15 = vld [vmem:[%s14751_s28 + $0x198] sm:$0xff] }
 0x4db   : > { %11674 = vmatprep.subr.bf16.mxu0 %v13995_v57  ;;  %v1884_v22 = vld [vmem:[%s14751_s28 + $0x2ef0] sm:$0xff]  ;;  %v14382_v55 = vld [vmem:[#allocation2 + $0x4] ss:$100 sps:$4 sm:$0xff]  }
 0x4dc   : > { %v14099_v1 = vcombine.high %v1880_v35, %v1884_v22  ;;  %v1744_v19 = vld [vmem:[%s14751_s28 + $0x2a90] sm:$0xff]  ;;  %v14098_v59 = vcombine.low %v1880_v35, %v1884_v22 }
 0x4dd   : > { %11716 = vmatpush2.bf16.msra.mxu1 %v14130_v5  ;;  %v1748_v13 = vld [vmem:[%s14751_s28 + $0x2ab0] sm:$0xff]  ;;  %v437_v5 = vld [vmem:[%s14751_s28 + $0x1b8] sm:$0xff] }
 0x4de   : > { %11717 = vmatprep.subr.bf16.mxu1 %v14123_v53  ;;  %11675 = vmatpush2.bf16.msra.mxu0 %v13994_v2  ;;  %v1872_v18 = vld [vmem:[%s14751_s28 + $0x2e90] sm:$0xff]  ;;  %v13963_v17 = vcombine.high %v1744_v19, %v1748_v13  ;;  %v13962_v27 = vcombine.low %v1744_v19, %v1748_v13  ;;  %v12660_v53 = vcombine.low %v441_v8, %v445_v9  ;;  %v14380_v2 = vld [vmem:[#allocation2 + $0x50] ss:$100 sps:$4 sm:$0xff]   ;;  %v413_v19 = vld [vmem:[%s14751_s28 + $0xf8] sm:$0xff] }
 0x4df   : > { %11676 = vmatprep.subr.bf16.mxu0 %v13987_v10  ;;  %v1876_v0 = vld [vmem:[%s14751_s28 + $0x2eb0] sm:$0xff]  ;;  %v12653_v16 = vcombine.high %v433_v15, %v437_v5  ;;  %v429_v10 = vld [vmem:[%s14751_s28 + $0x178] sm:$0xff]  ;;  %v12652_v11 = vcombine.low %v433_v15, %v437_v5 }
 0x4e0   : > { %v14091_v45 = vcombine.high %v1872_v18, %v1876_v0  ;;  %v1736_v46 = vld [vmem:[%s14751_s28 + $0x2a50] sm:$0xff]  ;;  %v14090_v43 = vcombine.low %v1872_v18, %v1876_v0 }
 0x4e1   : > { %11718 = vmatpush2.bf16.msra.mxu1 %v14122_v40  ;;  %v1740_v23 = vld [vmem:[%s14751_s28 + $0x2a70] sm:$0xff]  ;;  %v425_v40 = vld [vmem:[%s14751_s28 + $0x158] sm:$0xff] }
 0x4e2   : > { %11719 = vmatprep.subr.bf16.mxu1 %v14115_v20  ;;  %11677 = vmatpush2.bf16.msra.mxu0 %v13986_v56  ;;  %v1864_v25 = vld [vmem:[%s14751_s28 + $0x2e50] sm:$0xff]  ;;  %v13955_v31 = vcombine.high %v1736_v46, %v1740_v23  ;;  %v13954_v7 = vcombine.low %v1736_v46, %v1740_v23  ;;  %v12645_v60 = vcombine.high %v425_v40, %v429_v10  ;;  %v405_v46 = vld [vmem:[%s14751_s28 + $0xb8] sm:$0xff] }
 0x4e3   : > { %11678 = vmatprep.subr.bf16.mxu0 %v13979_v29  ;;  %v1868_v39 = vld [vmem:[%s14751_s28 + $0x2e70] sm:$0xff]  ;;  %v417_v29 = vld [vmem:[%s14751_s28 + $0x118] sm:$0xff]  ;;  %v12644_v35 = vcombine.low %v425_v40, %v429_v10 }
 0x4e4   : > { %v14083_v61 = vcombine.high %v1864_v25, %v1868_v39  ;;  %v1728_v44 = vld [vmem:[%s14751_s28 + $0x2a10] sm:$0xff]  ;;  %v14082_v34 = vcombine.low %v1864_v25, %v1868_v39 }
 0x4e5   : > { %11720 = vmatpush2.bf16.msra.mxu1 %v14114_v30  ;;  %v1732_v62 = vld [vmem:[%s14751_s28 + $0x2a30] sm:$0xff] }
 0x4e6   : > { %11721 = vmatprep.subr.bf16.mxu1 %v14107_v32  ;;  %11679 = vmatpush2.bf16.msra.mxu0 %v13978_v41  ;;  %v1856_v49 = vld [vmem:[%s14751_s28 + $0x2e10] sm:$0xff]  ;;  %v13947_v12 = vcombine.high %v1728_v44, %v1732_v62  ;;  %v13946_v38 = vcombine.low %v1728_v44, %v1732_v62  ;;  %v421_v32 = vld [vmem:[%s14751_s28 + $0x138] sm:$0xff] }
 0x4e7   : > { %11680 = vmatprep.subr.bf16.mxu0 %v13971_v24  ;;  %v1860_v3 = vld [vmem:[%s14751_s28 + $0x2e30] sm:$0xff]  ;;  %v12637_v41 = vcombine.high %v417_v29, %v421_v32  ;;  %v12636_v18 = vcombine.low %v417_v29, %v421_v32  ;;  %v397_v44 = vld [vmem:[%s14751_s28 + $0x78] sm:$0xff] }
 0x4e8   : > { %v14075_v14 = vcombine.high %v1856_v49, %v1860_v3  ;;  %v1976_v4 = vld [vmem:[%s14751_s28 + $0x31d0] sm:$0xff]  ;;  %v14074_v6 = vcombine.low %v1856_v49, %v1860_v3 }
 0x4e9   : > { %11722 = vmatpush2.bf16.msra.mxu1 %v14106_v51  ;;  %v1980_v63 = vld [vmem:[%s14751_s28 + $0x31f0] sm:$0xff] }
 0x4ea   : > { %11723 = vmatprep.subr.bf16.mxu1 %v14099_v1  ;;  %11681 = vmatpush2.bf16.msra.mxu0 %v13970_v54  ;;  %v14195_v52 = vcombine.high %v1976_v4, %v1980_v63  ;;  %v1968_v37 = vld [vmem:[%s14751_s28 + $0x3190] sm:$0xff]  ;;  %v14194_v57 = vcombine.low %v1976_v4, %v1980_v63  ;;  %v409_v1 = vld [vmem:[%s14751_s28 + $0xd8] sm:$0xff] }
 0x4eb   : > { %11682 = vmatprep.subr.bf16.mxu0 %v13963_v17  ;;  %v1972_v21 = vld [vmem:[%s14751_s28 + $0x31b0] sm:$0xff]  ;;  %v12629_v54 = vcombine.high %v409_v1, %v413_v19  ;;  %v12628_v25 = vcombine.low %v409_v1, %v413_v19  ;;  %v389_v4 = vld [vmem:[%s14751_s28 + $0x38] sm:$0xff] }
 0x4ec   : > { %v14187_v42 = vcombine.high %v1968_v37, %v1972_v21  ;;  %v1960_v58 = vld [vmem:[%s14751_s28 + $0x3150] sm:$0xff]  ;;  %v14186_v33 = vcombine.low %v1968_v37, %v1972_v21  ;;  %v509_v37 = vld [vmem:[%s14751_s28 + $0x3f8] sm:$0xff] }
 0x4ed   : > { %11724 = vmatpush2.bf16.msra.mxu1 %v14098_v59  ;;  %v1964_v26 = vld [vmem:[%s14751_s28 + $0x3170] sm:$0xff] }
 0x4ee   : > { %11725 = vmatprep.subr.bf16.mxu1 %v14091_v45  ;;  %11683 = vmatpush2.bf16.msra.mxu0 %v13962_v27  ;;  %v14381_v20 = vld [vmem:[#allocation2 + $0x58] ss:$100 sps:$4 sm:$0xff]   ;;  %v14179_v47 = vcombine.high %v1960_v58, %v1964_v26  ;;  %v14178_v36 = vcombine.low %v1960_v58, %v1964_v26  ;;  %v401_v45 = vld [vmem:[%s14751_s28 + $0x98] sm:$0xff] }
 0x4ef   : > { %11684 = vmatprep.subr.bf16.mxu0 %v13955_v31  ;;  %v1952_v56 = vld [vmem:[%s14751_s28 + $0x3110] sm:$0xff]  ;;  %v12621_v27 = vcombine.high %v401_v45, %v405_v46  ;;  %v12620_v49 = vcombine.low %v401_v45, %v405_v46  ;;  %v501_v58 = vld [vmem:[%s14751_s28 + $0x3b8] sm:$0xff] }
 0x4f0   : > { %v1956_v30 = vld [vmem:[%s14751_s28 + $0x3130] sm:$0xff] }
 0x4f1   : > { %11726 = vmatpush2.bf16.msra.mxu1 %v14090_v43  ;;  %v14171_v22 = vcombine.high %v1952_v56, %v1956_v30  ;;  %v1944_v51 = vld [vmem:[%s14751_s28 + $0x30d0] sm:$0xff]  ;;  %v14170_v13 = vcombine.low %v1952_v56, %v1956_v30  ;;  %v14384_v30 = vld [vmem:[#allocation2 + $0xc] ss:$100 sps:$4 sm:$0xff]  }
 0x4f2   : > { %11727 = vmatprep.subr.bf16.mxu1 %v14083_v61  ;;  %11685 = vmatpush2.bf16.msra.mxu0 %v13954_v7  ;;  %v1948_v24 = vld [vmem:[%s14751_s28 + $0x30f0] sm:$0xff]  ;;  %v393_v61 = vld [vmem:[%s14751_s28 + $0x58] sm:$0xff] }
 0x4f3   : > { %11686 = vmatprep.subr.bf16.mxu0 %v13947_v12  ;;  %v14163_v0 = vcombine.high %v1944_v51, %v1948_v24  ;;  %v1936_v59 = vld [vmem:[%s14751_s28 + $0x3090] sm:$0xff]  ;;  %v14162_v23 = vcombine.low %v1944_v51, %v1948_v24  ;;  %v12613_v7 = vcombine.high %v393_v61, %v397_v44  ;;  %v12612_v8 = vcombine.low %v393_v61, %v397_v44 }
 0x4f4   : > { %v1940_v17 = vld [vmem:[%s14751_s28 + $0x30b0] sm:$0xff] }
 0x4f5   : > { %11728 = vmatpush2.bf16.msra.mxu1 %v14082_v34  ;;  %v14155_v39 = vcombine.high %v1936_v59, %v1940_v17  ;;  %v1928_v43 = vld [vmem:[%s14751_s28 + $0x3050] sm:$0xff]  ;;  %v14154_v62 = vcombine.low %v1936_v59, %v1940_v17 }
 0x4f6   : > { %11729 = vmatprep.subr.bf16.mxu1 %v14075_v14  ;;  %11687 = vmatpush2.bf16.msra.mxu0 %v13946_v38  ;;  %v1932_v31 = vld [vmem:[%s14751_s28 + $0x3070] sm:$0xff]  ;;  %v385_v14 = vld [vmem:[%s14751_s28 + $0x18] sm:$0xff] }
 0x4f7   : > { %11742 = vmatprep.subr.bf16.mxu0 %v14195_v52  ;;  %v14147_v3 = vcombine.high %v1928_v43, %v1932_v31  ;;  %v1920_v34 = vld [vmem:[%s14751_s28 + $0x3010] sm:$0xff]  ;;  %v14146_v63 = vcombine.low %v1928_v43, %v1932_v31  ;;  %v12605_v38 = vcombine.high %v385_v14, %v389_v4  ;;  %v573_v52 = vld [vmem:[%s14751_s28 + $0x5f8] sm:$0xff]  ;;  %v12604_v15 = vcombine.low %v385_v14, %v389_v4 }
 0x4f8   : > { %v1924_v12 = vld [vmem:[%s14751_s28 + $0x3030] sm:$0xff] }
 0x4f9   : > { %11730 = vmatpush2.bf16.msra.mxu1 %v14074_v6  ;;  %11689 = vmatmul.mubr.bf16.vlgmr.msra.gmra.mxu0 %v14380_v2  ;;  %v14139_v9 = vcombine.high %v1920_v34, %v1924_v12  ;;  %v569_v6 = vld [vmem:[%s14751_s28 + $0x5d8] sm:$0xff]  ;;  %v14138_v21 = vcombine.low %v1920_v34, %v1924_v12 }
 0x4fa   : > { %11785 = vmatprep.subr.bf16.mxu1 %v12661_v50  ;;  %11743 = vmatpush1.bf16.msra.mxu0 %v14194_v57  ;;  %v505_v50 = vld [vmem:[%s14751_s28 + $0x3d8] sm:$0xff]  ;;  %v12789_v5 = vcombine.high %v569_v6, %v573_v52  ;;  %v12788_v26 = vcombine.low %v569_v6, %v573_v52 }
 0x4fb   : > { %11744 = vmatprep.subr.bf16.mxu0 %v14187_v42  ;;  %11774 = vmatprep.mubr.bf16.mxu0 %v14586_v48  ;;  %v12725_v57 = vcombine.high %v505_v50, %v509_v37  ;;  %v565_v42 = vld [vmem:[%s14751_s28 + $0x5b8] sm:$0xff]  ;;  %v12724_v2 = vcombine.low %v505_v50, %v509_v37 }
 0x4fc   : > { %11732 = vmatmul.mubr.bf16.vlgmr.msra.gmra.mxu1 %v14381_v20  ;;  %v553_v20 = vld [vmem:[%s14751_s28 + $0x558] sm:$0xff] }
 0x4fd   : > { %11786 = vmatpush1.bf16.msra.mxu1 %v12660_v53  ;;  %11817 = vmatprep.mubr.bf16.mxu1 %v14382_v55  ;;  %v561_v53 = vld [vmem:[%s14751_s28 + $0x598] sm:$0xff] }
 0x4fe   : > { %11787 = vmatprep.subr.bf16.mxu1 %v12653_v16  ;;  %11745 = vmatpush1.bf16.msra.mxu0 %v14186_v33  ;;  %v497_v16 = vld [vmem:[%s14751_s28 + $0x398] sm:$0xff]  ;;  %v12781_v40 = vcombine.high %v561_v53, %v565_v42  ;;  %v12780_v56 = vcombine.low %v561_v53, %v565_v42 }
 0x4ff   : > { %11746 = vmatprep.subr.bf16.mxu0 %v14179_v47  ;;  %v12717_v10 = vcombine.high %v497_v16, %v501_v58  ;;  %v557_v33 = vld [vmem:[%s14751_s28 + $0x578] sm:$0xff]  ;;  %v12716_v29 = vcombine.low %v497_v16, %v501_v58 }
 0x500   : > { %v489_v47 = vld [vmem:[%s14751_s28 + $0x358] sm:$0xff]  ;;  %v12773_v32 = vcombine.high %v553_v20, %v557_v33  ;;  %v12772_v51 = vcombine.low %v553_v20, %v557_v33 }
 0x501   : > { %11788 = vmatpush1.bf16.msra.mxu1 %v12652_v11  ;;  %v14383_v11 = vld [vmem:[#allocation2 + $0x60] ss:$100 sps:$4 sm:$0xff]  }
 0x502   : > { %11789 = vmatprep.subr.bf16.mxu1 %v12645_v60  ;;  %11747 = vmatpush1.bf16.msra.mxu0 %v14178_v36  ;;  %v493_v60 = vld [vmem:[%s14751_s28 + $0x378] sm:$0xff] }
 0x503   : > { %11748 = vmatprep.subr.bf16.mxu0 %v14171_v22  ;;  %v12709_v55 = vcombine.high %v489_v47, %v493_v60  ;;  %v545_v36 = vld [vmem:[%s14751_s28 + $0x518] sm:$0xff]  ;;  %v12708_v24 = vcombine.low %v489_v47, %v493_v60 }
 0x504   : > { %v481_v22 = vld [vmem:[%s14751_s28 + $0x318] sm:$0xff] }
 0x505   : > { %11790 = vmatpush1.bf16.msra.mxu1 %v12644_v35  ;;  %v549_v35 = vld [vmem:[%s14751_s28 + $0x538] sm:$0xff] }
 0x506   : > { %11791 = vmatprep.subr.bf16.mxu1 %v12637_v41  ;;  %11749 = vmatpush1.bf16.msra.mxu0 %v14170_v13  ;;  %v485_v41 = vld [vmem:[%s14751_s28 + $0x338] sm:$0xff]  ;;  %v12765_v1 = vcombine.high %v545_v36, %v549_v35  ;;  %v12764_v59 = vcombine.low %v545_v36, %v549_v35 }
 0x507   : > { %11750 = vmatprep.subr.bf16.mxu0 %v14163_v0  ;;  %v12701_v19 = vcombine.high %v481_v22, %v485_v41  ;;  %v537_v13 = vld [vmem:[%s14751_s28 + $0x4d8] sm:$0xff]  ;;  %v12700_v17 = vcombine.low %v481_v22, %v485_v41 }
 0x508   : > { %v473_v0 = vld [vmem:[%s14751_s28 + $0x2d8] sm:$0xff] }
 0x509   : > { %11792 = vmatpush1.bf16.msra.mxu1 %v12636_v18  ;;  %v541_v18 = vld [vmem:[%s14751_s28 + $0x4f8] sm:$0xff] }
 0x50a   : > { %11793 = vmatprep.subr.bf16.mxu1 %v12629_v54  ;;  %11751 = vmatpush1.bf16.msra.mxu0 %v14162_v23  ;;  %v477_v54 = vld [vmem:[%s14751_s28 + $0x2f8] sm:$0xff]  ;;  %v12757_v45 = vcombine.high %v537_v13, %v541_v18  ;;  %v12756_v43 = vcombine.low %v537_v13, %v541_v18 }
 0x50b   : > { %11752 = vmatprep.subr.bf16.mxu0 %v14155_v39  ;;  %v12693_v46 = vcombine.high %v473_v0, %v477_v54  ;;  %v529_v23 = vld [vmem:[%s14751_s28 + $0x498] sm:$0xff]  ;;  %v12692_v31 = vcombine.low %v473_v0, %v477_v54 }
 0x50c   : > { %v465_v39 = vld [vmem:[%s14751_s28 + $0x298] sm:$0xff] }
 0x50d   : > { %11794 = vmatpush1.bf16.msra.mxu1 %v12628_v25  ;;  %v533_v25 = vld [vmem:[%s14751_s28 + $0x4b8] sm:$0xff] }
 0x50e   : > { %11795 = vmatprep.subr.bf16.mxu1 %v12621_v27  ;;  %11753 = vmatpush1.bf16.msra.mxu0 %v14154_v62  ;;  %v469_v27 = vld [vmem:[%s14751_s28 + $0x2b8] sm:$0xff]  ;;  %v12749_v61 = vcombine.high %v529_v23, %v533_v25  ;;  %v12748_v34 = vcombine.low %v529_v23, %v533_v25 }
 0x50f   : > { %11754 = vmatprep.subr.bf16.mxu0 %v14147_v3  ;;  %v12685_v44 = vcombine.high %v465_v39, %v469_v27  ;;  %v521_v62 = vld [vmem:[%s14751_s28 + $0x458] sm:$0xff]  ;;  %v12684_v12 = vcombine.low %v465_v39, %v469_v27 }
 0x510   : > { %v457_v3 = vld [vmem:[%s14751_s28 + $0x258] sm:$0xff] }
 0x511   : > { %11796 = vmatpush1.bf16.msra.mxu1 %v12620_v49  ;;  %v525_v49 = vld [vmem:[%s14751_s28 + $0x478] sm:$0xff] }
 0x512   : > { %11797 = vmatprep.subr.bf16.mxu1 %v12613_v7  ;;  %11755 = vmatpush1.bf16.msra.mxu0 %v14146_v63  ;;  %v461_v7 = vld [vmem:[%s14751_s28 + $0x278] sm:$0xff]  ;;  %v12741_v14 = vcombine.high %v521_v62, %v525_v49  ;;  %v12740_v6 = vcombine.low %v521_v62, %v525_v49 }
 0x513   : > { %11756 = vmatprep.subr.bf16.mxu0 %v14139_v9  ;;  %v12677_v4 = vcombine.high %v457_v3, %v461_v7  ;;  %v513_v63 = vld [vmem:[%s14751_s28 + $0x418] sm:$0xff]  ;;  %v12676_v52 = vcombine.low %v457_v3, %v461_v7 }
 0x514   : > { %v449_v9 = vld [vmem:[%s14751_s28 + $0x218] sm:$0xff] }
 0x515   : > { %11798 = vmatpush1.bf16.msra.mxu1 %v12612_v8  ;;  %v517_v8 = vld [vmem:[%s14751_s28 + $0x438] sm:$0xff] }
 0x516   : > { %11799 = vmatprep.subr.bf16.mxu1 %v12605_v38  ;;  %11757 = vmatpush1.bf16.msra.mxu0 %v14138_v21  ;;  %v453_v38 = vld [vmem:[%s14751_s28 + $0x238] sm:$0xff]  ;;  %v12733_v50 = vcombine.high %v513_v63, %v517_v8  ;;  %v12732_v53 = vcombine.low %v513_v63, %v517_v8 }
 0x517   : > { %11828 = vmatprep.subr.bf16.mxu0 %v12789_v5  ;;  %v12669_v37 = vcombine.high %v449_v9, %v453_v38  ;;  %v633_v21 = vld [vmem:[%s14751_s28 + $0x7d8] sm:$0xff]  ;;  %v12668_v42 = vcombine.low %v449_v9, %v453_v38 }
 0x518   : > { %v697_v5 = vld [vmem:[%s14751_s28 + $0x9d8] sm:$0xff] }
 0x519   : > { %11800 = vmatpush1.bf16.msra.mxu1 %v12604_v15  ;;  %11775 = vmatmul.mubr.bf16.vlgmr.msra.gmra.mxu0 %v14383_v11  ;;  %v637_v15 = vld [vmem:[%s14751_s28 + $0x7f8] sm:$0xff] }
 0x51a   : > { %11801 = vmatprep.subr.bf16.mxu1 %v12725_v57  ;;  %11829 = vmatpush1.bf16.msra.mxu0 %v12788_v26  ;;  %v701_v57 = vld [vmem:[%s14751_s28 + $0x9f8] sm:$0xff]  ;;  %v12853_v16 = vcombine.high %v633_v21, %v637_v15  ;;  %v12852_v20 = vcombine.low %v633_v21, %v637_v15 }
 0x51b   : > { %11860 = vmatprep.mubr.bf16.mxu0 %v14384_v30  ;;  %11830 = vmatprep.subr.bf16.mxu0 %v12781_v40  ;;  %v12917_v58 = vcombine.high %v697_v5, %v701_v57  ;;  %v625_v26 = vld [vmem:[%s14751_s28 + $0x798] sm:$0xff]  ;;  %v12916_v33 = vcombine.low %v697_v5, %v701_v57 }
 0x51c   : > { %v689_v40 = vld [vmem:[%s14751_s28 + $0x998] sm:$0xff] }
 0x51d   : > { %11802 = vmatpush2.bf16.msra.mxu1 %v12724_v2  ;;  %v629_v2 = vld [vmem:[%s14751_s28 + $0x7b8] sm:$0xff] }
 0x51e   : > { %11803 = vmatprep.subr.bf16.mxu1 %v12717_v10  ;;  %11831 = vmatpush1.bf16.msra.mxu0 %v12780_v56  ;;  %v693_v10 = vld [vmem:[%s14751_s28 + $0x9b8] sm:$0xff]  ;;  %v12845_v11 = vcombine.high %v625_v26, %v629_v2 }
 0x51f   : > { %11832 = vmatprep.subr.bf16.mxu0 %v12773_v32  ;;  %v12909_v47 = vcombine.high %v689_v40, %v693_v10  ;;  %v617_v60 = vld [vmem:[%s14751_s28 + $0x758] sm:$0xff]  ;;  %v12908_v36 = vcombine.low %v689_v40, %v693_v10 }
 0x520   : > { %v621_v56 = vld [vmem:[%s14751_s28 + $0x778] sm:$0xff] }
 0x521   : > { %11804 = vmatpush2.bf16.msra.mxu1 %v12716_v29  ;;  %v681_v30 = vld [vmem:[%s14751_s28 + $0x958] sm:$0xff]  ;;  %v12837_v35 = vcombine.high %v617_v60, %v621_v56  ;;  %v12836_v13 = vcombine.low %v617_v60, %v621_v56 }
 0x522   : > { %11805 = vmatprep.subr.bf16.mxu1 %v12709_v55  ;;  %11833 = vmatpush1.bf16.msra.mxu0 %v12772_v51  ;;  %v685_v29 = vld [vmem:[%s14751_s28 + $0x978] sm:$0xff]  ;;  %v12844_v55 = vcombine.low %v625_v26, %v629_v2 }
 0x523   : > { %11834 = vmatprep.subr.bf16.mxu0 %v12765_v1  ;;  %v14385_v32 = vld [vmem:[#allocation2] ss:$100 sps:$4 sm:$0xff]   ;;  %v12901_v22 = vcombine.high %v681_v30, %v685_v29  ;;  %v12900_v18 = vcombine.low %v681_v30, %v685_v29 }
 0x524   : > { %v609_v41 = vld [vmem:[%s14751_s28 + $0x718] sm:$0xff] }
 0x525   : > { %11806 = vmatpush2.bf16.msra.mxu1 %v12708_v24  ;;  %v613_v51 = vld [vmem:[%s14751_s28 + $0x738] sm:$0xff]  ;;  %v14386_v24 = vld [vmem:[#allocation2 + $0x14] ss:$100 sps:$4 sm:$0xff]  }
 0x526   : > { %11807 = vmatprep.subr.bf16.mxu1 %v12701_v19  ;;  %11835 = vmatpush1.bf16.msra.mxu0 %v12764_v59  ;;  %v673_v1 = vld [vmem:[%s14751_s28 + $0x918] sm:$0xff]  ;;  %v12829_v0 = vcombine.high %v609_v41, %v613_v51  ;;  %v12828_v23 = vcombine.low %v609_v41, %v613_v51 }
 0x527   : > { %11836 = vmatprep.subr.bf16.mxu0 %v12757_v45  ;;  %v677_v19 = vld [vmem:[%s14751_s28 + $0x938] sm:$0xff] }
 0x528   : > { %v12893_v54 = vcombine.high %v673_v1, %v677_v19  ;;  %v601_v59 = vld [vmem:[%s14751_s28 + $0x6d8] sm:$0xff]  ;;  %v12892_v25 = vcombine.low %v673_v1, %v677_v19 }
 0x529   : > { %11808 = vmatpush2.bf16.msra.mxu1 %v12700_v17  ;;  %v605_v17 = vld [vmem:[%s14751_s28 + $0x6f8] sm:$0xff] }
 0x52a   : > { %11809 = vmatprep.subr.bf16.mxu1 %v12693_v46  ;;  %11837 = vmatpush1.bf16.msra.mxu0 %v12756_v43  ;;  %v665_v45 = vld [vmem:[%s14751_s28 + $0x8d8] sm:$0xff]  ;;  %v12821_v39 = vcombine.high %v601_v59, %v605_v17  ;;  %v12820_v62 = vcombine.low %v601_v59, %v605_v17 }
 0x52b   : > { %11838 = vmatprep.subr.bf16.mxu0 %v12749_v61  ;;  %v669_v46 = vld [vmem:[%s14751_s28 + $0x8f8] sm:$0xff] }
 0x52c   : > { %v12885_v27 = vcombine.high %v665_v45, %v669_v46  ;;  %v593_v43 = vld [vmem:[%s14751_s28 + $0x698] sm:$0xff]  ;;  %v12884_v49 = vcombine.low %v665_v45, %v669_v46 }
 0x52d   : > { %11810 = vmatpush2.bf16.msra.mxu1 %v12692_v31  ;;  %v597_v31 = vld [vmem:[%s14751_s28 + $0x6b8] sm:$0xff] }
 0x52e   : > { %11811 = vmatprep.subr.bf16.mxu1 %v12685_v44  ;;  %11839 = vmatpush1.bf16.msra.mxu0 %v12748_v34  ;;  %v657_v61 = vld [vmem:[%s14751_s28 + $0x898] sm:$0xff]  ;;  %v12813_v3 = vcombine.high %v593_v43, %v597_v31  ;;  %v12812_v63 = vcombine.low %v593_v43, %v597_v31 }
 0x52f   : > { %11840 = vmatprep.subr.bf16.mxu0 %v12741_v14  ;;  %v661_v44 = vld [vmem:[%s14751_s28 + $0x8b8] sm:$0xff] }
 0x530   : > { %v12877_v7 = vcombine.high %v657_v61, %v661_v44  ;;  %v585_v34 = vld [vmem:[%s14751_s28 + $0x658] sm:$0xff]  ;;  %v12876_v8 = vcombine.low %v657_v61, %v661_v44 }
 0x531   : > { %11812 = vmatpush2.bf16.msra.mxu1 %v12684_v12  ;;  %v589_v12 = vld [vmem:[%s14751_s28 + $0x678] sm:$0xff] }
 0x532   : > { %11813 = vmatprep.subr.bf16.mxu1 %v12677_v4  ;;  %11841 = vmatpush1.bf16.msra.mxu0 %v12740_v6  ;;  %v649_v14 = vld [vmem:[%s14751_s28 + $0x858] sm:$0xff]  ;;  %v12805_v9 = vcombine.high %v585_v34, %v589_v12  ;;  %v12804_v21 = vcombine.low %v585_v34, %v589_v12 }
 0x533   : > { %11842 = vmatprep.subr.bf16.mxu0 %v12733_v50  ;;  %v653_v4 = vld [vmem:[%s14751_s28 + $0x878] sm:$0xff] }
 0x534   : > { %v12869_v38 = vcombine.high %v649_v14, %v653_v4  ;;  %v577_v6 = vld [vmem:[%s14751_s28 + $0x618] sm:$0xff]  ;;  %v12868_v15 = vcombine.low %v649_v14, %v653_v4 }
 0x535   : > { %11814 = vmatpush2.bf16.msra.mxu1 %v12676_v52  ;;  %v581_v52 = vld [vmem:[%s14751_s28 + $0x638] sm:$0xff] }
 0x536   : > { %11815 = vmatprep.subr.bf16.mxu1 %v12669_v37  ;;  %11843 = vmatpush1.bf16.msra.mxu0 %v12732_v53  ;;  %v641_v50 = vld [vmem:[%s14751_s28 + $0x818] sm:$0xff]  ;;  %v12797_v5 = vcombine.high %v577_v6, %v581_v52  ;;  %v12796_v26 = vcombine.low %v577_v6, %v581_v52 }
 0x537   : > { %11844 = vmatprep.subr.bf16.mxu0 %v12853_v16  ;;  %v645_v37 = vld [vmem:[%s14751_s28 + $0x838] sm:$0xff] }
 0x538   : > { %v12861_v57 = vcombine.high %v641_v50, %v645_v37  ;;  %v825_v53 = vld [vmem:[%s14751_s28 + $0xdd8] sm:$0xff]  ;;  %v12860_v2 = vcombine.low %v641_v50, %v645_v37 }
 0x539   : > { %11816 = vmatpush2.bf16.msra.mxu1 %v12668_v42  ;;  %v829_v42 = vld [vmem:[%s14751_s28 + $0xdf8] sm:$0xff] }
 0x53a   : > { %11871 = vmatprep.subr.bf16.mxu1 %v12917_v58  ;;  %11845 = vmatpush2.bf16.msra.mxu0 %v12852_v20  ;;  %v761_v16 = vld [vmem:[%s14751_s28 + $0xbd8] sm:$0xff]  ;;  %v13045_v40 = vcombine.high %v825_v53, %v829_v42  ;;  %v13044_v60 = vcombine.low %v825_v53, %v829_v42 }
 0x53b   : > { %11846 = vmatprep.subr.bf16.mxu0 %v12845_v11  ;;  %v765_v58 = vld [vmem:[%s14751_s28 + $0xbf8] sm:$0xff] }
 0x53c   : > { %11818 = vmatmul.mubr.bf16.vlgmr.msra.gmra.mxu1 %v14385_v32  ;;  %v12981_v10 = vcombine.high %v761_v16, %v765_v58  ;;  %v817_v20 = vld [vmem:[%s14751_s28 + $0xd98] sm:$0xff]  ;;  %v12980_v56 = vcombine.low %v761_v16, %v765_v58 }
 0x53d   : > { %11872 = vmatpush1.bf16.msra.mxu1 %v12916_v33  ;;  %11903 = vmatprep.mubr.bf16.mxu1 %v14386_v24  ;;  %v821_v33 = vld [vmem:[%s14751_s28 + $0xdb8] sm:$0xff] }
 0x53e   : > { %11873 = vmatprep.subr.bf16.mxu1 %v12909_v47  ;;  %11847 = vmatpush2.bf16.msra.mxu0 %v12844_v55  ;;  %v753_v11 = vld [vmem:[%s14751_s28 + $0xb98] sm:$0xff]  ;;  %v13037_v30 = vcombine.high %v817_v20, %v821_v33  ;;  %v13036_v41 = vcombine.low %v817_v20, %v821_v33 }
 0x53f   : > { %11848 = vmatprep.subr.bf16.mxu0 %v12837_v35  ;;  %v757_v47 = vld [vmem:[%s14751_s28 + $0xbb8] sm:$0xff] }
 0x540   : > { %v12973_v29 = vcombine.high %v753_v11, %v757_v47  ;;  %v809_v32 = vld [vmem:[%s14751_s28 + $0xd58] sm:$0xff]  ;;  %v12972_v24 = vcombine.low %v753_v11, %v757_v47 }
 0x541   : > { %11874 = vmatpush1.bf16.msra.mxu1 %v12908_v36  ;;  %v813_v55 = vld [vmem:[%s14751_s28 + $0xd78] sm:$0xff]  ;;  %v14387_v36 = vld [vmem:[#allocation2 + $0x8] ss:$100 sps:$4 sm:$0xff]  }
 0x542   : > { %11875 = vmatprep.subr.bf16.mxu1 %v12901_v22  ;;  %11849 = vmatpush2.bf16.msra.mxu0 %v12836_v13  ;;  %v745_v35 = vld [vmem:[%s14751_s28 + $0xb58] sm:$0xff]  ;;  %v13029_v1 = vcombine.high %v809_v32, %v813_v55  ;;  %v13028_v59 = vcombine.low %v809_v32, %v813_v55 }
 0x543   : > { %11850 = vmatprep.subr.bf16.mxu0 %v12829_v0  ;;  %v749_v22 = vld [vmem:[%s14751_s28 + $0xb78] sm:$0xff] }
 0x544   : > { %v14388_v51 = vld [vmem:[#allocation2 + $0x1c] ss:$100 sps:$4 sm:$0xff]   ;;  %v12965_v19 = vcombine.high %v745_v35, %v749_v22  ;;  %v12964_v17 = vcombine.low %v745_v35, %v749_v22 }
 0x545   : > { %11876 = vmatpush1.bf16.msra.mxu1 %v12900_v18  ;;  %v801_v13 = vld [vmem:[%s14751_s28 + $0xd18] sm:$0xff] }
 0x546   : > { %11877 = vmatprep.subr.bf16.mxu1 %v12893_v54  ;;  %11851 = vmatpush2.bf16.msra.mxu0 %v12828_v23  ;;  %v805_v18 = vld [vmem:[%s14751_s28 + $0xd38] sm:$0xff] }
 0x547   : > { %11852 = vmatprep.subr.bf16.mxu0 %v12821_v39  ;;  %v737_v0 = vld [vmem:[%s14751_s28 + $0xb18] sm:$0xff]  ;;  %v13021_v45 = vcombine.high %v801_v13, %v805_v18  ;;  %v13020_v43 = vcombine.low %v801_v13, %v805_v18 }
 0x548   : > { %v741_v54 = vld [vmem:[%s14751_s28 + $0xb38] sm:$0xff] }
 0x549   : > { %11878 = vmatpush1.bf16.msra.mxu1 %v12892_v25  ;;  %v12957_v46 = vcombine.high %v737_v0, %v741_v54  ;;  %v793_v23 = vld [vmem:[%s14751_s28 + $0xcd8] sm:$0xff]  ;;  %v12956_v31 = vcombine.low %v737_v0, %v741_v54 }
 0x54a   : > { %11879 = vmatprep.subr.bf16.mxu1 %v12885_v27  ;;  %11853 = vmatpush2.bf16.msra.mxu0 %v12820_v62  ;;  %v797_v25 = vld [vmem:[%s14751_s28 + $0xcf8] sm:$0xff] }
 0x54b   : > { %11854 = vmatprep.subr.bf16.mxu0 %v12813_v3  ;;  %v729_v39 = vld [vmem:[%s14751_s28 + $0xad8] sm:$0xff]  ;;  %v13013_v61 = vcombine.high %v793_v23, %v797_v25  ;;  %v13012_v34 = vcombine.low %v793_v23, %v797_v25 }
 0x54c   : > { %v733_v27 = vld [vmem:[%s14751_s28 + $0xaf8] sm:$0xff] }
 0x54d   : > { %11880 = vmatpush1.bf16.msra.mxu1 %v12884_v49  ;;  %v12949_v44 = vcombine.high %v729_v39, %v733_v27  ;;  %v785_v62 = vld [vmem:[%s14751_s28 + $0xc98] sm:$0xff]  ;;  %v12948_v12 = vcombine.low %v729_v39, %v733_v27 }
 0x54e   : > { %11881 = vmatprep.subr.bf16.mxu1 %v12877_v7  ;;  %11855 = vmatpush2.bf16.msra.mxu0 %v12812_v63  ;;  %v789_v49 = vld [vmem:[%s14751_s28 + $0xcb8] sm:$0xff] }
 0x54f   : > { %11856 = vmatprep.subr.bf16.mxu0 %v12805_v9  ;;  %v721_v3 = vld [vmem:[%s14751_s28 + $0xa98] sm:$0xff]  ;;  %v13005_v14 = vcombine.high %v785_v62, %v789_v49  ;;  %v13004_v6 = vcombine.low %v785_v62, %v789_v49 }
 0x550   : > { %v725_v7 = vld [vmem:[%s14751_s28 + $0xab8] sm:$0xff] }
 0x551   : > { %11882 = vmatpush1.bf16.msra.mxu1 %v12876_v8  ;;  %v12941_v4 = vcombine.high %v721_v3, %v725_v7  ;;  %v777_v63 = vld [vmem:[%s14751_s28 + $0xc58] sm:$0xff]  ;;  %v12940_v52 = vcombine.low %v721_v3, %v725_v7 }
 0x552   : > { %11883 = vmatprep.subr.bf16.mxu1 %v12869_v38  ;;  %11857 = vmatpush2.bf16.msra.mxu0 %v12804_v21  ;;  %v781_v8 = vld [vmem:[%s14751_s28 + $0xc78] sm:$0xff] }
 0x553   : > { %11858 = vmatprep.subr.bf16.mxu0 %v12797_v5  ;;  %v713_v9 = vld [vmem:[%s14751_s28 + $0xa58] sm:$0xff]  ;;  %v12997_v50 = vcombine.high %v777_v63, %v781_v8  ;;  %v12996_v53 = vcombine.low %v777_v63, %v781_v8 }
 0x554   : > { %v717_v38 = vld [vmem:[%s14751_s28 + $0xa78] sm:$0xff] }
 0x555   : > { %11884 = vmatpush1.bf16.msra.mxu1 %v12868_v15  ;;  %v12933_v37 = vcombine.high %v713_v9, %v717_v38  ;;  %v769_v21 = vld [vmem:[%s14751_s28 + $0xc18] sm:$0xff]  ;;  %v12932_v42 = vcombine.low %v713_v9, %v717_v38 }
 0x556   : > { %11885 = vmatprep.subr.bf16.mxu1 %v12861_v57  ;;  %11859 = vmatpush2.bf16.msra.mxu0 %v12796_v26  ;;  %v773_v15 = vld [vmem:[%s14751_s28 + $0xc38] sm:$0xff] }
 0x557   : > { %11914 = vmatprep.subr.bf16.mxu0 %v13045_v40  ;;  %v705_v5 = vld [vmem:[%s14751_s28 + $0xa18] sm:$0xff]  ;;  %v12989_v16 = vcombine.high %v769_v21, %v773_v15  ;;  %v12988_v20 = vcombine.low %v769_v21, %v773_v15 }
 0x558   : > { %v709_v57 = vld [vmem:[%s14751_s28 + $0xa38] sm:$0xff] }
 0x559   : > { %11886 = vmatpush1.bf16.msra.mxu1 %v12860_v2  ;;  %11861 = vmatmul.mubr.bf16.vlgmr.msra.gmra.mxu0 %v14387_v36  ;;  %v12925_v58 = vcombine.high %v705_v5, %v709_v57  ;;  %v889_v26 = vld [vmem:[%s14751_s28 + $0xfd8] sm:$0xff]  ;;  %v12924_v33 = vcombine.low %v705_v5, %v709_v57  ;;  %v16414_v57 = vpop.f32.mrf.mxu1 }
 0x55a   : > { %11887 = vmatprep.subr.bf16.mxu1 %v12981_v10  ;;  %11915 = vmatpush1.bf16.msra.mxu0 %v13044_v60  ;;  %v893_v2 = vld [vmem:[%s14751_s28 + $0xff8] sm:$0xff] }
 0x55b   : > { %11946 = vmatprep.mubr.bf16.mxu0 %v14388_v51  ;;  %11916 = vmatprep.subr.bf16.mxu0 %v13037_v30  ;;  %v953_v40 = vld [vmem:[%s14751_s28 + $0x11d8] sm:$0xff]  ;;  %v13109_v11 = vcombine.high %v889_v26, %v893_v2  ;;  %v13108_v32 = vcombine.low %v889_v26, %v893_v2 }
 0x55c   : > { %v957_v10 = vld [vmem:[%s14751_s28 + $0x11f8] sm:$0xff] }
 0x55d   : > { %11888 = vmatpush2.bf16.msra.mxu1 %v12980_v56  ;;  %v13173_v47 = vcombine.high %v953_v40, %v957_v10  ;;  %v881_v60 = vld [vmem:[%s14751_s28 + $0xf98] sm:$0xff]  ;;  %v13172_v55 = vcombine.low %v953_v40, %v957_v10 }
 0x55e   : > { %11889 = vmatprep.subr.bf16.mxu1 %v12973_v29  ;;  %11917 = vmatpush1.bf16.msra.mxu0 %v13036_v41  ;;  %v885_v56 = vld [vmem:[%s14751_s28 + $0xfb8] sm:$0xff] }
 0x55f   : > { %11918 = vmatprep.subr.bf16.mxu0 %v13029_v1  ;;  %v945_v30 = vld [vmem:[%s14751_s28 + $0x1198] sm:$0xff]  ;;  %v13101_v36 = vcombine.high %v881_v60, %v885_v56  ;;  %v14389_v1 = vld [vmem:[#allocation2 + $0x10] ss:$100 sps:$4 sm:$0xff]  }
 0x560   : > { %v949_v29 = vld [vmem:[%s14751_s28 + $0x11b8] sm:$0xff] }
 0x561   : > { %11890 = vmatpush2.bf16.msra.mxu1 %v12972_v24  ;;  %v13165_v35 = vcombine.high %v945_v30, %v949_v29  ;;  %v873_v22 = vld [vmem:[%s14751_s28 + $0xf58] sm:$0xff]  ;;  %v13164_v13 = vcombine.low %v945_v30, %v949_v29 }
 0x562   : > { %11891 = vmatprep.subr.bf16.mxu1 %v12965_v19  ;;  %11919 = vmatpush1.bf16.msra.mxu0 %v13028_v59  ;;  %v877_v41 = vld [vmem:[%s14751_s28 + $0xf78] sm:$0xff]  ;;  %v13100_v19 = vcombine.low %v881_v60, %v885_v56 }
 0x563   : > { %11920 = vmatprep.subr.bf16.mxu0 %v13021_v45  ;;  %v937_v51 = vld [vmem:[%s14751_s28 + $0x1158] sm:$0xff]  ;;  %v13093_v18 = vcombine.high %v873_v22, %v877_v41  ;;  %v13092_v23 = vcombine.low %v873_v22, %v877_v41 }
 0x564   : > { %v941_v24 = vld [vmem:[%s14751_s28 + $0x1178] sm:$0xff] }
 0x565   : > { %11892 = vmatpush2.bf16.msra.mxu1 %v12964_v17  ;;  %v13157_v0 = vcombine.high %v937_v51, %v941_v24  ;;  %v865_v54 = vld [vmem:[%s14751_s28 + $0xf18] sm:$0xff]  ;;  %v13156_v25 = vcombine.low %v937_v51, %v941_v24 }
 0x566   : > { %11893 = vmatprep.subr.bf16.mxu1 %v12957_v46  ;;  %11921 = vmatpush1.bf16.msra.mxu0 %v13020_v43  ;;  %v869_v59 = vld [vmem:[%s14751_s28 + $0xf38] sm:$0xff] }
 0x567   : > { %11922 = vmatprep.subr.bf16.mxu0 %v13013_v61  ;;  %v14390_v17 = vld [vmem:[#allocation2 + $0x24] ss:$100 sps:$4 sm:$0xff]   ;;  %v13085_v39 = vcombine.high %v865_v54, %v869_v59  ;;  %v13084_v62 = vcombine.low %v865_v54, %v869_v59 }
 0x568   : > { %v929_v45 = vld [vmem:[%s14751_s28 + $0x1118] sm:$0xff] }
 0x569   : > { %11894 = vmatpush2.bf16.msra.mxu1 %v12956_v31  ;;  %v933_v46 = vld [vmem:[%s14751_s28 + $0x1138] sm:$0xff] }
 0x56a   : > { %11895 = vmatprep.subr.bf16.mxu1 %v12949_v44  ;;  %11923 = vmatpush1.bf16.msra.mxu0 %v13012_v34  ;;  %v13149_v27 = vcombine.high %v929_v45, %v933_v46  ;;  %v857_v43 = vld [vmem:[%s14751_s28 + $0xed8] sm:$0xff]  ;;  %v13148_v49 = vcombine.low %v929_v45, %v933_v46 }
 0x56b   : > { %11924 = vmatprep.subr.bf16.mxu0 %v13005_v14  ;;  %v861_v31 = vld [vmem:[%s14751_s28 + $0xef8] sm:$0xff]  ;;  %v16404_v14 = vpop.f32.mrf.mxu0 }
 0x56c   : > { %v921_v61 = vld [vmem:[%s14751_s28 + $0x10d8] sm:$0xff]  ;;  %v13077_v3 = vcombine.high %v857_v43, %v861_v31  ;;  %v13076_v8 = vcombine.low %v857_v43, %v861_v31 }
 0x56d   : > { %11896 = vmatpush2.bf16.msra.mxu1 %v12948_v12  ;;  %v925_v44 = vld [vmem:[%s14751_s28 + $0x10f8] sm:$0xff] }
 0x56e   : > { %11897 = vmatprep.subr.bf16.mxu1 %v12941_v4  ;;  %11925 = vmatpush1.bf16.msra.mxu0 %v13004_v6  ;;  %v13141_v7 = vcombine.high %v921_v61, %v925_v44  ;;  %v849_v34 = vld [vmem:[%s14751_s28 + $0xe98] sm:$0xff]  ;;  %v13140_v9 = vcombine.low %v921_v61, %v925_v44  ;;  %v14392_v44 = vld [vmem:[#allocation2 + $0x2c] ss:$100 sps:$4 sm:$0xff]  }
 0x56f   : > { %11926 = vmatprep.subr.bf16.mxu0 %v12997_v50  ;;  %v853_v12 = vld [vmem:[%s14751_s28 + $0xeb8] sm:$0xff] }
 0x570   : > { %v913_v4 = vld [vmem:[%s14751_s28 + $0x1098] sm:$0xff]  ;;  %v13069_v38 = vcombine.high %v849_v34, %v853_v12  ;;  %v13068_v5 = vcombine.low %v849_v34, %v853_v12 }
 0x571   : > { %11898 = vmatpush2.bf16.msra.mxu1 %v12940_v52  ;;  %v917_v63 = vld [vmem:[%s14751_s28 + $0x10b8] sm:$0xff] }
 0x572   : > { %11899 = vmatprep.subr.bf16.mxu1 %v12933_v37  ;;  %11927 = vmatpush1.bf16.msra.mxu0 %v12996_v53  ;;  %v13133_v6 = vcombine.high %v913_v4, %v917_v63  ;;  %v841_v52 = vld [vmem:[%s14751_s28 + $0xe58] sm:$0xff]  ;;  %v16410_v37 = vpop.f32.mrf.mxu0  ;;  %v13132_v53 = vcombine.low %v913_v4, %v917_v63 }
 0x573   : > { %11928 = vmatprep.subr.bf16.mxu0 %v12989_v16  ;;  %v845_v50 = vld [vmem:[%s14751_s28 + $0xe78] sm:$0xff] }
 0x574   : > { %v905_v21 = vld [vmem:[%s14751_s28 + $0x1058] sm:$0xff]  ;;  %v16418_v2 = vpop.f32.mrf.mxu0 }
 0x575   : > { %11900 = vmatpush2.bf16.msra.mxu1 %v12932_v42  ;;  %v909_v15 = vld [vmem:[%s14751_s28 + $0x1078] sm:$0xff]  ;;  %v13061_v42 = vcombine.high %v841_v52, %v845_v50 }
 0x576   : > { %11901 = vmatprep.subr.bf16.mxu1 %v12925_v58  ;;  %11929 = vmatpush1.bf16.msra.mxu0 %v12988_v20  ;;  %v13125_v16 = vcombine.high %v905_v21, %v909_v15  ;;  %v833_v58 = vld [vmem:[%s14751_s28 + $0xe18] sm:$0xff]  ;;  %v13060_v20 = vcombine.low %v841_v52, %v845_v50  ;;  %v16426_v29 = vpop.f32.mrf.mxu0 }
 0x577   : > { %11930 = vmatprep.subr.bf16.mxu0 %v13109_v11  ;;  %v837_v26 = vld [vmem:[%s14751_s28 + $0xe38] sm:$0xff]  ;;  %v13124_v11 = vcombine.low %v905_v21, %v909_v15 }
 0x578   : > { %v897_v40 = vld [vmem:[%s14751_s28 + $0x1018] sm:$0xff]  ;;  %v16432_v22 = vpop.f32.mrf.mxu0 }
 0x579   : > { %11902 = vmatpush2.bf16.msra.mxu1 %v12924_v33  ;;  %v901_v10 = vld [vmem:[%s14751_s28 + $0x1038] sm:$0xff]  ;;  %v16422_v33 = vpop.f32.mrf.mxu1 }
 0x57a   : > { %11957 = vmatprep.subr.bf16.mxu1 %v13173_v47  ;;  %11931 = vmatpush2.bf16.msra.mxu0 %v13108_v32  ;;  %v13053_v47 = vcombine.high %v833_v58, %v837_v26  ;;  %v13117_v60 = vcombine.high %v897_v40, %v901_v10  ;;  %v1081_v56 = vld [vmem:[%s14751_s28 + $0x15d8] sm:$0xff]  ;;  %v13116_v41 = vcombine.low %v897_v40, %v901_v10  ;;  %v16440_v59 = vpop.f32.mrf.mxu0 }
 0x57b   : > { %11932 = vmatprep.subr.bf16.mxu0 %v13101_v36  ;;  %v1085_v30 = vld [vmem:[%s14751_s28 + $0x15f8] sm:$0xff]  ;;  %v13052_v36 = vcombine.low %v833_v58, %v837_v26 }
 0x57c   : > { %11904 = vmatmul.mubr.bf16.vlgmr.msra.gmra.mxu1 %v14389_v1  ;;  %v1017_v32 = vld [vmem:[%s14751_s28 + $0x13d8] sm:$0xff]  ;;  %v13301_v51 = vcombine.high %v1081_v56, %v1085_v30 }
 0x57d   : > { %11958 = vmatpush1.bf16.msra.mxu1 %v13172_v55  ;;  %11989 = vmatprep.mubr.bf16.mxu1 %v14390_v17  ;;  %v1021_v55 = vld [vmem:[%s14751_s28 + $0x13f8] sm:$0xff] }
 0x57e   : > { %11959 = vmatprep.subr.bf16.mxu1 %v13165_v35  ;;  %11933 = vmatpush2.bf16.msra.mxu0 %v13100_v19  ;;  %v16430_v35 = vpop.f32.mrf.mxu1  ;;  %v13237_v24 = vcombine.high %v1017_v32, %v1021_v55  ;;  %v1073_v1 = vld [vmem:[%s14751_s28 + $0x1598] sm:$0xff]  ;;  %v13236_v17 = vcombine.low %v1017_v32, %v1021_v55 }
 0x57f   : > { %11934 = vmatprep.subr.bf16.mxu0 %v13093_v18  ;;  %v1077_v19 = vld [vmem:[%s14751_s28 + $0x15b8] sm:$0xff] }
 0x580   : > { %v1013_v18 = vld [vmem:[%s14751_s28 + $0x13b8] sm:$0xff]  ;;  %v16438_v54 = vpop.f32.mrf.mxu1  ;;  %v13293_v45 = vcombine.high %v1073_v1, %v1077_v19  ;;  %v13292_v61 = vcombine.low %v1073_v1, %v1077_v19 }
 0x581   : > { %11960 = vmatpush1.bf16.msra.mxu1 %v13164_v13  ;;  %v1009_v13 = vld [vmem:[%s14751_s28 + $0x1398] sm:$0xff] }
 0x582   : > { %11961 = vmatprep.subr.bf16.mxu1 %v13157_v0  ;;  %11935 = vmatpush2.bf16.msra.mxu0 %v13092_v23  ;;  %v13300_v0 = vcombine.low %v1081_v56, %v1085_v30  ;;  %v13229_v46 = vcombine.high %v1009_v13, %v1013_v18  ;;  %v1065_v23 = vld [vmem:[%s14751_s28 + $0x1558] sm:$0xff] }
 0x583   : > { %11936 = vmatprep.subr.bf16.mxu0 %v13085_v39  ;;  %v16444_v39 = vpop.f32.mrf.mxu1  ;;  %v1001_v43 = vld [vmem:[%s14751_s28 + $0x1358] sm:$0xff] }
 0x584   : > { %v1005_v31 = vld [vmem:[%s14751_s28 + $0x1378] sm:$0xff] }
 0x585   : > { %11962 = vmatpush1.bf16.msra.mxu1 %v13156_v25  ;;  %v1069_v25 = vld [vmem:[%s14751_s28 + $0x1578] sm:$0xff]  ;;  %v16452_v4 = vpop.f32.mrf.mxu1 }
 0x586   : > { %11963 = vmatprep.subr.bf16.mxu1 %v13149_v27  ;;  %11937 = vmatpush2.bf16.msra.mxu0 %v13084_v62  ;;  %v14391_v27 = vld [vmem:[#allocation2 + $0x18] ss:$100 sps:$4 sm:$0xff]   ;;  %v16448_v62 = vpop.f32.mrf.mxu0  ;;  %v1057_v34 = vld [vmem:[%s14751_s28 + $0x1518] sm:$0xff] }
 0x587   : > { %11938 = vmatprep.subr.bf16.mxu0 %v13077_v3  ;;  %v13285_v3 = vcombine.high %v1065_v23, %v1069_v25  ;;  %v1061_v12 = vld [vmem:[%s14751_s28 + $0x1538] sm:$0xff] }
 0x588   : > { %v993_v63 = vld [vmem:[%s14751_s28 + $0x1318] sm:$0xff]  ;;  %v13277_v52 = vcombine.high %v1057_v34, %v1061_v12  ;;  %v13276_v58 = vcombine.low %v1057_v34, %v1061_v12 }
 0x589   : > { %11964 = vmatpush1.bf16.msra.mxu1 %v13148_v49  ;;  %v13228_v49 = vcombine.low %v1009_v13, %v1013_v18  ;;  %v1049_v21 = vld [vmem:[%s14751_s28 + $0x14d8] sm:$0xff] }
 0x58a   : > { %11965 = vmatprep.subr.bf16.mxu1 %v13141_v7  ;;  %11939 = vmatpush2.bf16.msra.mxu0 %v13076_v8  ;;  %v13221_v7 = vcombine.high %v1001_v43, %v1005_v31  ;;  %v997_v8 = vld [vmem:[%s14751_s28 + $0x1338] sm:$0xff] }
 0x58b   : > { %11940 = vmatprep.subr.bf16.mxu0 %v13069_v38  ;;  %v16456_v38 = vpop.f32.mrf.mxu0  ;;  %v13213_v50 = vcombine.high %v993_v63, %v997_v8  ;;  %v1053_v15 = vld [vmem:[%s14751_s28 + $0x14f8] sm:$0xff]  ;;  %v13212_v26 = vcombine.low %v993_v63, %v997_v8 }
 0x58c   : > { %v13269_v40 = vcombine.high %v1049_v21, %v1053_v15  ;;  %v977_v56 = vld [vmem:[%s14751_s28 + $0x1298] sm:$0xff]  ;;  %v13268_v32 = vcombine.low %v1049_v21, %v1053_v15 }
 0x58d   : > { %11966 = vmatpush1.bf16.msra.mxu1 %v13140_v9  ;;  %v13284_v9 = vcombine.low %v1065_v23, %v1069_v25  ;;  %v981_v30 = vld [vmem:[%s14751_s28 + $0x12b8] sm:$0xff] }
 0x58e   : > { %11967 = vmatprep.subr.bf16.mxu1 %v13133_v6  ;;  %11941 = vmatpush2.bf16.msra.mxu0 %v13068_v5  ;;  %v13220_v6 = vcombine.low %v1001_v43, %v1005_v31  ;;  %v16460_v5 = vpop.f32.mrf.mxu1  ;;  %v1037_v1 = vld [vmem:[%s14751_s28 + $0x1478] sm:$0xff] }
 0x58f   : > { %11942 = vmatprep.subr.bf16.mxu0 %v13061_v42  ;;  %v985_v42 = vld [vmem:[%s14751_s28 + $0x12d8] sm:$0xff] }
 0x590   : > { %v969_v13 = vld [vmem:[%s14751_s28 + $0x1258] sm:$0xff] }
 0x591   : > { %11968 = vmatpush1.bf16.msra.mxu1 %v13132_v53  ;;  %v16462_v53 = vpop.f32.mrf.mxu0  ;;  %v973_v18 = vld [vmem:[%s14751_s28 + $0x1278] sm:$0xff] }
 0x592   : > { %11969 = vmatprep.subr.bf16.mxu1 %v13125_v16  ;;  %11943 = vmatpush2.bf16.msra.mxu0 %v13060_v20  ;;  %v989_v16 = vld [vmem:[%s14751_s28 + $0x12f8] sm:$0xff]  ;;  %v13189_v23 = vcombine.high %v969_v13, %v973_v18 }
 0x593   : > { %11944 = vmatprep.subr.bf16.mxu0 %v13053_v47  ;;  %v13205_v10 = vcombine.high %v985_v42, %v989_v16  ;;  %v1041_v20 = vld [vmem:[%s14751_s28 + $0x1498] sm:$0xff]  ;;  %v16468_v47 = vpop.f32.mrf.mxu1 }
 0x594   : > { %v1025_v25 = vld [vmem:[%s14751_s28 + $0x1418] sm:$0xff] }
 0x595   : > { %11970 = vmatpush1.bf16.msra.mxu1 %v13124_v11  ;;  %v1045_v11 = vld [vmem:[%s14751_s28 + $0x14b8] sm:$0xff]  ;;  %v16474_v55 = vpop.f32.mrf.mxu1 }
 0x596   : > { %11971 = vmatprep.subr.bf16.mxu1 %v13117_v60  ;;  %11945 = vmatpush2.bf16.msra.mxu0 %v13052_v36  ;;  %v16470_v60 = vpop.f32.mrf.mxu0  ;;  %v13204_v36 = vcombine.low %v985_v42, %v989_v16  ;;  %v961_v31 = vld [vmem:[%s14751_s28 + $0x1218] sm:$0xff] }
 0x597   : > { %12000 = vmatprep.subr.bf16.mxu0 %v13301_v51  ;;  %v13197_v51 = vcombine.high %v977_v56, %v981_v30  ;;  %v1145_v63 = vld [vmem:[%s14751_s28 + $0x17d8] sm:$0xff] }
 0x598   : > { %v16478_v19 = vpop.f32.mrf.mxu0  ;;  %v1149_v8 = vld [vmem:[%s14751_s28 + $0x17f8] sm:$0xff] }
 0x599   : > { %11972 = vmatpush1.bf16.msra.mxu1 %v13116_v41  ;;  %11947 = vmatmul.mubr.bf16.vlgmr.msra.gmra.mxu0 %v14391_v27  ;;  %v13261_v41 = vcombine.high %v1041_v20, %v1045_v11  ;;  %v1029_v27 = vld [vmem:[%s14751_s28 + $0x1438] sm:$0xff]  ;;  %v13365_v42 = vcombine.high %v1145_v63, %v1149_v8 }
 0x59a   : > { %11973 = vmatprep.subr.bf16.mxu1 %v13237_v24  ;;  %12001 = vmatpush1.bf16.msra.mxu0 %v13300_v0  ;;  %v1033_v24 = vld [vmem:[%s14751_s28 + $0x1458] sm:$0xff]  ;;  %v13260_v0 = vcombine.low %v1041_v20, %v1045_v11  ;;  %v16486_v43 = vpop.f32.mrf.mxu0  ;;  %v13245_v34 = vcombine.high %v1025_v25, %v1029_v27  ;;  %v13364_v11 = vcombine.low %v1145_v63, %v1149_v8 }
 0x59b   : > { %12032 = vmatprep.mubr.bf16.mxu0 %v14392_v44  ;;  %12002 = vmatprep.subr.bf16.mxu0 %v13293_v45  ;;  %v13196_v45 = vcombine.low %v977_v56, %v981_v30  ;;  %v13252_v44 = vcombine.low %v1033_v24, %v1037_v1  ;;  %v1205_v20 = vld [vmem:[%s14751_s28 + $0x19b8] sm:$0xff]  ;;  %v11308_v8 = vadd.f32 %v16430_v35, %v16418_v2 }
 0x59c   : > { %v1189_v63 = vld [vmem:[%s14751_s28 + $0x1938] sm:$0xff] }
 0x59d   : > { %11974 = vmatpush2.bf16.msra.mxu1 %v13236_v17  ;;  %v16482_v17 = vpop.f32.mrf.mxu1  ;;  %v1113_v2 = vld [vmem:[%s14751_s28 + $0x16d8] sm:$0xff] }
 0x59e   : > { %11975 = vmatprep.subr.bf16.mxu1 %v13229_v46  ;;  %12003 = vmatpush1.bf16.msra.mxu0 %v13292_v61  ;;  %v13253_v46 = vcombine.high %v1033_v24, %v1037_v1  ;;  %v965_v61 = vld [vmem:[%s14751_s28 + $0x1238] sm:$0xff] }
 0x59f   : > { %12004 = vmatprep.subr.bf16.mxu0 %v13285_v3  ;;  %v16492_v3 = vpop.f32.mrf.mxu0  ;;  %v13181_v12 = vcombine.high %v961_v31, %v965_v61  ;;  %v13180_v15 = vcombine.low %v961_v31, %v965_v61  ;;  %v1193_v1 = vld [vmem:[%s14751_s28 + $0x1958] sm:$0xff] }
 0x5a0   : > { %v1117_v35 = vld [vmem:[%s14751_s28 + $0x16f8] sm:$0xff] }
 0x5a1   : > { %11976 = vmatpush2.bf16.msra.mxu1 %v13228_v49  ;;  %v16490_v49 = vpop.f32.mrf.mxu1  ;;  %v16500_v21 = vpop.f32.mrf.mxu0 }
 0x5a2   : > { %11977 = vmatprep.subr.bf16.mxu1 %v13221_v7  ;;  %12005 = vmatpush1.bf16.msra.mxu0 %v13284_v9  ;;  %v13188_v7 = vcombine.low %v969_v13, %v973_v18  ;;  %v1209_v9 = vld [vmem:[%s14751_s28 + $0x19d8] sm:$0xff]  ;;  %v11304_v18 = vadd.f32 %v16414_v57, %v16404_v14 }
 0x5a3   : > { %12006 = vmatprep.subr.bf16.mxu0 %v13277_v52  ;;  %v13244_v52 = vcombine.low %v1025_v25, %v1029_v27  ;;  %v16508_v56 = vpop.f32.mrf.mxu0  ;;  %v1197_v13 = vld [vmem:[%s14751_s28 + $0x1978] sm:$0xff]  ;;  %v11306_v27 = vadd.f32 %v16422_v33, %v16410_v37 }
 0x5a4   : > { %v11347_v31 = vadd.f32 %v16432_v22, %v11304_v18  ;;  %v13413_v61 = vcombine.high %v1193_v1, %v1197_v13  ;;  %v1121_v14 = vld [vmem:[%s14751_s28 + $0x1718] sm:$0xff]  ;;  %v13412_v22 = vcombine.low %v1193_v1, %v1197_v13 }
 0x5a5   : > { %11978 = vmatpush2.bf16.msra.mxu1 %v13220_v6  ;;  %v1213_v6 = vld [vmem:[%s14751_s28 + $0x19f8] sm:$0xff]  ;;  %v11349_v37 = vadd.f32 %v16440_v59, %v11306_v27 }
 0x5a6   : > { %11979 = vmatprep.subr.bf16.mxu1 %v13213_v50  ;;  %12007 = vmatpush1.bf16.msra.mxu0 %v13276_v58  ;;  %v16498_v50 = vpop.f32.mrf.mxu1  ;;  %v13429_v16 = vcombine.high %v1209_v9, %v1213_v6  ;;  %v1137_v58 = vld [vmem:[%s14751_s28 + $0x1798] sm:$0xff]  ;;  %v13428_v30 = vcombine.low %v1209_v9, %v1213_v6  ;;  %v11310_v6 = vadd.f32 %v16438_v54, %v16426_v29 }
 0x5a7   : > { %12008 = vmatprep.subr.bf16.mxu0 %v13269_v40  ;;  %v1125_v57 = vld [vmem:[%s14751_s28 + $0x1738] sm:$0xff] }
 0x5a8   : > { %v16504_v40 = vpop.f32.mrf.mxu1  ;;  %v13341_v9 = vcombine.high %v1121_v14, %v1125_v57  ;;  %v11353_v29 = vadd.f32 %v16456_v38, %v11310_v6  ;;  %v1109_v38 = vld [vmem:[%s14751_s28 + $0x16b8] sm:$0xff] }
 0x5a9   : > { %11980 = vmatpush2.bf16.msra.mxu1 %v13212_v26  ;;  %v1141_v26 = vld [vmem:[%s14751_s28 + $0x17b8] sm:$0xff] }
 0x5aa   : > { %11981 = vmatprep.subr.bf16.mxu1 %v13205_v10  ;;  %12009 = vmatpush1.bf16.msra.mxu0 %v13268_v32  ;;  %v1201_v10 = vld [vmem:[%s14751_s28 + $0x1998] sm:$0xff]  ;;  %v13357_v32 = vcombine.high %v1137_v58, %v1141_v26  ;;  %v16512_v24 = vpop.f32.mrf.mxu1  ;;  %v11396_v1 = vadd.f32 %v16468_v47, %v11353_v29 }
 0x5ab   : > { %12010 = vmatprep.subr.bf16.mxu0 %v13261_v41  ;;  %v1129_v41 = vld [vmem:[%s14751_s28 + $0x1758] sm:$0xff] }
 0x5ac   : > { %v1097_v27 = vld [vmem:[%s14751_s28 + $0x1658] sm:$0xff] }
 0x5ad   : > { %11982 = vmatpush2.bf16.msra.mxu1 %v13204_v36  ;;  %v13421_v36 = vcombine.high %v1201_v10, %v1205_v20  ;;  %v1157_v6 = vld [vmem:[%s14751_s28 + $0x1838] sm:$0xff] }
 0x5ae   : > { %11983 = vmatprep.subr.bf16.mxu1 %v13197_v51  ;;  %12011 = vmatpush1.bf16.msra.mxu0 %v13260_v0  ;;  %v1133_v51 = vld [vmem:[%s14751_s28 + $0x1778] sm:$0xff] }
 0x5af   : > { %12012 = vmatprep.subr.bf16.mxu0 %v13253_v46  ;;  %v14393_v0 = vld [vmem:[#allocation2 + $0x20] ss:$100 sps:$4 sm:$0xff]   ;;  %v16518_v46 = vpop.f32.mrf.mxu0  ;;  %v13349_v25 = vcombine.high %v1129_v41, %v1133_v51  ;;  %v13348_v33 = vcombine.low %v1129_v41, %v1133_v51 }
 0x5b0   : > { %v1173_v51 = vld [vmem:[%s14751_s28 + $0x18b8] sm:$0xff] }
 0x5b1   : > { %11984 = vmatpush2.bf16.msra.mxu1 %v13196_v45  ;;  %v13356_v45 = vcombine.low %v1137_v58, %v1141_v26  ;;  %v1177_v58 = vld [vmem:[%s14751_s28 + $0x18d8] sm:$0xff] }
 0x5b2   : > { %11985 = vmatprep.subr.bf16.mxu1 %v13189_v23  ;;  %12013 = vmatpush1.bf16.msra.mxu0 %v13252_v44  ;;  %v13420_v23 = vcombine.low %v1201_v10, %v1205_v20  ;;  %v14394_v44 = vld [vmem:[#allocation2 + $0x34] ss:$100 sps:$4 sm:$0xff]   ;;  %v1181_v26 = vld [vmem:[%s14751_s28 + $0x18f8] sm:$0xff]  ;;  %v11392_v10 = vadd.f32 %v16452_v4, %v11349_v37 }
 0x5b3   : > { %12014 = vmatprep.subr.bf16.mxu0 %v13245_v34  ;;  %v16527_v34 = vpop.f32.mrf.mxu0  ;;  %v13397_v4 = vcombine.high %v1177_v58, %v1181_v26 }
 0x5b5   : > { %11986 = vmatpush2.bf16.msra.mxu1 %v13188_v7  ;;  %v16525_v7 = vpop.f32.mrf.mxu1 }
 0x5b6   : > { %11987 = vmatprep.subr.bf16.mxu1 %v13181_v12  ;;  %12015 = vmatpush1.bf16.msra.mxu0 %v13244_v52  ;;  %v1185_v12 = vld [vmem:[%s14751_s28 + $0x1918] sm:$0xff]  ;;  %v11390_v52 = vadd.f32 %v16444_v39, %v11347_v31  ;;  %v13340_v39 = vcombine.low %v1121_v14, %v1125_v57 }
 0x5b7   : > { %12016 = vmatprep.subr.bf16.mxu0 %v13365_v42  ;;  %v13405_v42 = vcombine.high %v1185_v12, %v1189_v63  ;;  %v16540_v59 = vpop.f32.mrf.mxu1  ;;  %v13404_v20 = vcombine.low %v1185_v12, %v1189_v63  ;;  %v1165_v14 = vld [vmem:[%s14751_s28 + $0x1878] sm:$0xff] }
 0x5b8   : > { %v11433_v54 = vadd.f32 %v16462_v53, %v11390_v52  ;;  %v1169_v53 = vld [vmem:[%s14751_s28 + $0x1898] sm:$0xff] }
 0x5b9   : > { %11988 = vmatpush2.bf16.msra.mxu1 %v13180_v15  ;;  %v11351_v15 = vadd.f32 %v16448_v62, %v11308_v8  ;;  %v16549_v62 = vpop.f32.mrf.mxu1 }
 0x5ba   : > { %12043 = vmatprep.subr.bf16.mxu1 %v13429_v16  ;;  %12017 = vmatpush2.bf16.msra.mxu0 %v13364_v11  ;;  %v16542_v16 = vpop.f32.mrf.mxu0  ;;  %v13333_v11 = vcombine.high %v1113_v2, %v1117_v35  ;;  %v11476_v13 = vadd.f32 %v16474_v55, %v11433_v54  ;;  %v13389_v55 = vcombine.high %v1169_v53, %v1173_v51  ;;  %v1277_v54 = vld [vmem:[%s14751_s28 + $0x1bf8] sm:$0xff] }
 0x5bb   : > { %12018 = vmatprep.subr.bf16.mxu0 %v13357_v32  ;;  %v11435_v32 = vadd.f32 %v16470_v60, %v11392_v10  ;;  %v16562_v60 = vpop.f32.mrf.mxu1  ;;  %v1337_v10 = vld [vmem:[%s14751_s28 + $0x1dd8] sm:$0xff] }
 0x5bc   : > { %11990 = vmatmul.mubr.bf16.vlgmr.msra.gmra.mxu1 %v14393_v0  ;;  %v16555_v41 = vpop.f32.mrf.mxu0  ;;  %v13396_v0 = vcombine.low %v1177_v58, %v1181_v26  ;;  %v11519_v47 = vadd.f32 %v16492_v3, %v11476_v13  ;;  %v13388_v3 = vcombine.low %v1169_v53, %v1173_v51  ;;  %v1329_v53 = vld [vmem:[%s14751_s28 + $0x1d98] sm:$0xff] }
 0x5bd   : > { %12044 = vmatpush1.bf16.msra.mxu1 %v13428_v30  ;;  %12075 = vmatprep.mubr.bf16.mxu1 %v14394_v44  ;;  %v11394_v30 = vadd.f32 %v16460_v5, %v11351_v15  ;;  %v13332_v5 = vcombine.low %v1113_v2, %v1117_v35  ;;  %v1265_v13 = vld [vmem:[%s14751_s28 + $0x1b98] sm:$0xff] }
 0x5be   : > { %12045 = vmatprep.subr.bf16.mxu1 %v13421_v36  ;;  %12019 = vmatpush2.bf16.msra.mxu0 %v13356_v45  ;;  %v1105_v36 = vld [vmem:[%s14751_s28 + $0x1698] sm:$0xff]  ;;  %v11610_v31 = vpop.f32.mrf.mxu0  ;;  %v11562_v37 = vadd.f32 %v16504_v40, %v11519_v47 }
 0x5bf   : > { %12020 = vmatprep.subr.bf16.mxu0 %v13349_v25  ;;  %v11437_v18 = vadd.f32 %v16478_v19, %v11394_v30  ;;  %v13325_v45 = vcombine.high %v1105_v36, %v1109_v38  ;;  %v11439_v25 = vadd.f32 %v16486_v43, %v11396_v1  ;;  %v1101_v19 = vld [vmem:[%s14751_s28 + $0x1678] sm:$0xff]  ;;  %v11651_v43 = vpop.f32.mrf.mxu1  ;;  %v298_v1 = vsub.s32 5, %v15472_v28 }
 0x5c0   : > { %v11690_v12 = vpop.f32.mrf.mxu0  ;;  %v13317_v63 = vcombine.high %v1097_v27, %v1101_v19 }
 0x5c1   : > { %12046 = vmatpush1.bf16.msra.mxu1 %v13420_v23  ;;  %v11478_v23 = vadd.f32 %v16482_v17, %v11435_v32  ;;  %v11480_v57 = vadd.f32 %v16490_v49, %v11437_v18  ;;  %v13324_v17 = vcombine.low %v1105_v36, %v1109_v38  ;;  %v11482_v8 = vadd.f32 %v16498_v50, %v11439_v25  ;;  %v11653_v40 = vpop.f32.mrf.mxu1  ;;  %v1269_v18 = vld [vmem:[%s14751_s28 + $0x1bb8] sm:$0xff] }
 0x5c2   : > { %12047 = vmatprep.subr.bf16.mxu1 %v13413_v61  ;;  %12021 = vmatpush2.bf16.msra.mxu0 %v13348_v33  ;;  %v1161_v61 = vld [vmem:[%s14751_s28 + $0x1858] sm:$0xff]  ;;  %v13316_v50 = vcombine.low %v1097_v27, %v1101_v19  ;;  %v294_v32 = vsub.s32 4, %v15472_v28 }
 0x5c3   : > { %12022 = vmatprep.subr.bf16.mxu0 %v13341_v9  ;;  %v11521_v44 = vadd.f32 %v16500_v21, %v11478_v23  ;;  %v11523_v33 = vadd.f32 %v16508_v56, %v11480_v57  ;;  %v13381_v49 = vcombine.high %v1161_v61, %v1165_v14  ;;  %v1093_v21 = vld [vmem:[%s14751_s28 + $0x1638] sm:$0xff]  ;;  %v11525_v15 = vadd.f32 %v16518_v46, %v11482_v8  ;;  %v11692_v56 = vpop.f32.mrf.mxu0  ;;  %v11733_v29 = vpop.f32.mrf.mxu1 }
 0x5c4   : > { %v1153_v9 = vld [vmem:[%s14751_s28 + $0x1818] sm:$0xff]  ;;  %v13380_v2 = vcombine.low %v1161_v61, %v1165_v14  ;;  %v13485_v61 = vcombine.high %v1265_v13, %v1269_v18 }
 0x5c5   : > { %12048 = vmatpush1.bf16.msra.mxu1 %v13412_v22  ;;  %v1089_v22 = vld [vmem:[%s14751_s28 + $0x1618] sm:$0xff]  ;;  %v11564_v52 = vadd.f32 %v16512_v24, %v11521_v44  ;;  %v11566_v58 = vadd.f32 %v16525_v7, %v11523_v33  ;;  %v13373_v24 = vcombine.high %v1153_v9, %v1157_v6  ;;  %v11694_v7 = vpop.f32.mrf.mxu0  ;;  %v11735_v51 = vpop.f32.mrf.mxu1 }
 0x5c6   : > { %12049 = vmatprep.subr.bf16.mxu1 %v13405_v42  ;;  %12023 = vmatpush2.bf16.msra.mxu0 %v13340_v39  ;;  %v11605_v42 = vadd.f32 %v16527_v34, %v11562_v37  ;;  %v13309_v35 = vcombine.high %v1089_v22, %v1093_v21  ;;  %v1341_v46 = vld [vmem:[%s14751_s28 + $0x1df8] sm:$0xff]  ;;  %v11568_v39 = vadd.f32 %v16540_v59, %v11525_v15 }
 0x5c7   : > { %12024 = vmatprep.subr.bf16.mxu0 %v13333_v11  ;;  %v11607_v26 = vadd.f32 %v16542_v16, %v11564_v52  ;;  %v1273_v34 = vld [vmem:[%s14751_s28 + $0x1bd8] sm:$0xff]  ;;  %v11609_v11 = vadd.f32 %v16555_v41, %v11566_v58  ;;  %v13308_v30 = vcombine.low %v1089_v22, %v1093_v21  ;;  %v13372_v16 = vcombine.low %v1153_v9, %v1157_v6  ;;  %v11696_v23 = vpop.f32.mrf.mxu0  ;;  %v11737_v44 = vpop.f32.mrf.mxu1 }
 0x5c8   : > { %v11611_v59 = vadd.f32 %v11610_v31, %v11568_v39  ;;  %v1333_v41 = vld [vmem:[%s14751_s28 + $0x1db8] sm:$0xff]  ;;  %v13492_v47 = vcombine.low %v1273_v34, %v1277_v54  ;;  %v13484_v9 = vcombine.low %v1265_v13, %v1269_v18 }
 0x5c9   : > { %12050 = vmatpush1.bf16.msra.mxu1 %v13404_v20  ;;  %v11648_v20 = vadd.f32 %v16549_v62, %v11605_v42  ;;  %v11650_v36 = vadd.f32 %v16562_v60, %v11607_v26  ;;  %v13493_v62 = vcombine.high %v1273_v34, %v1277_v54  ;;  %v14395_v60 = vld [vmem:[%s15487_s20] sm:$0xff]  ;;  %v1321_v14 = vld [vmem:[%s14751_s28 + $0x1d58] sm:$0xff] }
 0x5ca   : > { %12051 = vmatprep.subr.bf16.mxu1 %v13397_v4  ;;  %12025 = vmatpush2.bf16.msra.mxu0 %v13332_v5  ;;  %v13557_v4 = vcombine.high %v1337_v10, %v1341_v46  ;;  %v11652_v5 = vadd.f32 %v11651_v43, %v11609_v11  ;;  %v295_v25 = vrot.slane %v14395_v60, %v294_v32  ;;  %v1325_v57 = vld [vmem:[%s14751_s28 + $0x1d78] sm:$0xff]  ;;  %v14396_v43 = vld [vmem:[#allocation2 + $0x28] ss:$100 sps:$4 sm:$0xff]  }
 0x5cb   : > { %12026 = vmatprep.subr.bf16.mxu0 %v13325_v45  ;;  %v11691_v38 = vadd.f32 %v11690_v12, %v11648_v20  ;;  %v13556_v45 = vcombine.low %v1337_v10, %v1341_v46  ;;  %v11654_v27 = vadd.f32 %v11653_v40, %v11611_v59  ;;  %v299_v12 = vrot.slane %v14395_v60, %v298_v1  ;;  %v1261_v8 = vld [vmem:[%s14751_s28 + $0x1b78] sm:$0xff] }
 0x5cc   : > { %v11695_v31 = vadd.f32 %v11694_v7, %v11652_v5  ;;  %v14397_v22 = vld [vmem:[#allocation2 + $0x3c] ss:$100 sps:$4 sm:$0xff]   ;;  %v13541_v6 = vcombine.high %v1321_v14, %v1325_v57  ;;  %v13540_v58 = vcombine.low %v1321_v14, %v1325_v57 }
 0x5cd   : > { %12052 = vmatpush1.bf16.msra.mxu1 %v13396_v0  ;;  %v11693_v0 = vadd.f32 %v11692_v56, %v11650_v36  ;;  %v11734_v19 = vadd.f32 %v11733_v29, %v11691_v38  ;;  %v11697_v33 = vadd.f32 %v11696_v23, %v11654_v27  ;;  %v1313_v40 = vld [vmem:[%s14751_s28 + $0x1d18] sm:$0xff] }
 0x5ce   : > { %12053 = vmatprep.subr.bf16.mxu1 %v13389_v55  ;;  %12027 = vmatpush2.bf16.msra.mxu0 %v13324_v17  ;;  %v13549_v55 = vcombine.high %v1329_v53, %v1333_v41  ;;  %v11738_v52 = vadd.f32 %v11737_v44, %v11695_v31  ;;  %v1317_v56 = vld [vmem:[%s14751_s28 + $0x1d38] sm:$0xff] }
 0x5cf   : > { %12028 = vmatprep.subr.bf16.mxu0 %v13317_v63  ;;  %v1257_v63 = vld [vmem:[%s14751_s28 + $0x1b58] sm:$0xff]  ;;  %v11736_v37 = vadd.f32 %v11735_v51, %v11693_v0  ;;  %v13533_v20 = vcombine.high %v1313_v40, %v1317_v56 }
 0x5d0   : > { %v1249_v26 = vld [vmem:[%s14751_s28 + $0x1b18] sm:$0xff]  ;;  %v13476_v39 = vcombine.low %v1257_v63, %v1261_v8 }
 0x5d1   : > { %12054 = vmatpush1.bf16.msra.mxu1 %v13388_v3  ;;  %v13548_v3 = vcombine.low %v1329_v53, %v1333_v41  ;;  %v1305_v32 = vld [vmem:[%s14751_s28 + $0x1cd8] sm:$0xff]  ;;  %v13532_v53 = vcombine.low %v1313_v40, %v1317_v56 }
 0x5d2   : > { %12055 = vmatprep.subr.bf16.mxu1 %v13381_v49  ;;  %12029 = vmatpush2.bf16.msra.mxu0 %v13316_v50  ;;  %v13477_v50 = vcombine.high %v1257_v63, %v1261_v8  ;;  %v1241_v36 = vld [vmem:[%s14751_s28 + $0x1ad8] sm:$0xff] }
 0x5d3   : > { %12030 = vmatprep.subr.bf16.mxu0 %v13309_v35  ;;  %v1245_v59 = vld [vmem:[%s14751_s28 + $0x1af8] sm:$0xff] }
 0x5d4   : > { %v13461_v13 = vcombine.high %v1241_v36, %v1245_v59  ;;  %v1297_v18 = vld [vmem:[%s14751_s28 + $0x1c98] sm:$0xff]  ;;  %v13460_v60 = vcombine.low %v1241_v36, %v1245_v59 }
 0x5d5   : > { %12056 = vmatpush1.bf16.msra.mxu1 %v13380_v2  ;;  %v11739_v2 = vpop.f32.mrf.mxu1  ;;  %v1301_v5 = vld [vmem:[%s14751_s28 + $0x1cb8] sm:$0xff] }
 0x5d6   : > { %12057 = vmatprep.subr.bf16.mxu1 %v13373_v24  ;;  %12031 = vmatpush2.bf16.msra.mxu0 %v13308_v30  ;;  %v1253_v24 = vld [vmem:[%s14751_s28 + $0x1b38] sm:$0xff]  ;;  %v11740_v10 = vadd.f32 %v11739_v2, %v11697_v33 }
 0x5d7   : > { %12086 = vmatprep.subr.bf16.mxu0 %v13557_v4  ;;  %v1309_v4 = vld [vmem:[%s14751_s28 + $0x1cf8] sm:$0xff]  ;;  %v13468_v41 = vcombine.low %v1249_v26, %v1253_v24 }
 0x5d8   : > { %v13525_v51 = vcombine.high %v1305_v32, %v1309_v4  ;;  %v1233_v0 = vld [vmem:[%s14751_s28 + $0x1a98] sm:$0xff]  ;;  %v13524_v23 = vcombine.low %v1305_v32, %v1309_v4 }
 0x5d9   : > { %12058 = vmatpush1.bf16.msra.mxu1 %v13372_v16  ;;  %v11776_v17 = vpop.f32.mrf.mxu0  ;;  %12033 = vmatmul.mubr.bf16.vlgmr.msra.gmra.mxu0 %v14396_v43  ;;  %v13469_v16 = vcombine.high %v1249_v26, %v1253_v24  ;;  %v1293_v27 = vld [vmem:[%s14751_s28 + $0x1c78] sm:$0xff] }
 0x5da   : > { %12059 = vmatprep.subr.bf16.mxu1 %v13493_v62  ;;  %v11777_v49 = vadd.f32 %v11776_v17, %v11734_v19  ;;  %12087 = vmatpush1.bf16.msra.mxu0 %v13556_v45  ;;  %v1237_v45 = vld [vmem:[%s14751_s28 + $0x1ab8] sm:$0xff] }
 0x5db   : > { %12118 = vmatprep.mubr.bf16.mxu0 %v14397_v22  ;;  %v11778_v21 = vpop.f32.mrf.mxu0  ;;  %12088 = vmatprep.subr.bf16.mxu0 %v13549_v55  ;;  %v1289_v55 = vld [vmem:[%s14751_s28 + $0x1c58] sm:$0xff]  ;;  %v13452_v14 = vcombine.low %v1233_v0, %v1237_v45 }
 0x5dc   : > { %v12348_v15 = vadd.f32 %v11777_v49, %v295_v25  ;;  %v11779_v42 = vadd.f32 %v11778_v21, %v11736_v37  ;;  %v1225_v19 = vld [vmem:[%s14751_s28 + $0x1a58] sm:$0xff]  ;;  %v13509_v57 = vcombine.high %v1289_v55, %v1293_v27  ;;  %v13508_v63 = vcombine.low %v1289_v55, %v1293_v27 }
 0x5dd   : > { %12060 = vmatpush2.bf16.msra.mxu1 %v13492_v47  ;;  %v11780_v35 = vpop.f32.mrf.mxu0  ;;  %v13453_v47 = vcombine.high %v1233_v0, %v1237_v45  ;;  %v1229_v31 = vld [vmem:[%s14751_s28 + $0x1a78] sm:$0xff] }
 0x5de   : > { %12061 = vmatprep.subr.bf16.mxu1 %v13485_v61  ;;  %v12399_v46 = vmax.f32 %v12348_v15, 0.0  ;;  %v12349_v29 = vadd.f32 %v11779_v42, %v299_v12  ;;  %v11781_v34 = vadd.f32 %v11780_v35, %v11738_v52  ;;  %12089 = vmatpush1.bf16.msra.mxu0 %v13548_v3  ;;  %v13516_v61 = vcombine.low %v1297_v18, %v1301_v5  ;;  %v1281_v17 = vld [vmem:[%s14751_s28 + $0x1c18] sm:$0xff] }
 0x5df   : > { %v11782_v54 = vpop.f32.mrf.mxu0  ;;  %12090 = vmatprep.subr.bf16.mxu0 %v13541_v6  ;;  %v13445_v44 = vcombine.high %v1225_v19, %v1229_v31  ;;  %v1285_v43 = vld [vmem:[%s14751_s28 + $0x1c38] sm:$0xff]  ;;  %v13444_v8 = vcombine.low %v1225_v19, %v1229_v31 }
 0x5e0   : > { %12415 = vst [vmem:[%s15506_s27 + $0x20] sm:$0xff] %v12399_v46  ;;  %v12400_v11 = vmax.f32 %v12349_v29, 0.0  ;;  %v12356_v30 = vadd.f32 %v11781_v34, %v295_v25  ;;  %v11783_v7 = vadd.f32 %v11782_v54, %v11740_v10  ;;  %v13517_v25 = vcombine.high %v1297_v18, %v1301_v5  ;;  %v1221_v3 = vld [vmem:[%s14751_s28 + $0x1a38] sm:$0xff]  ;;  %v14398_v54 = vld [vmem:[#allocation2 + $0x30] ss:$100 sps:$4 sm:$0xff]  }
 0x5e1   : > { %12062 = vmatpush2.bf16.msra.mxu1 %v13484_v9  ;;  %v13501_v37 = vcombine.high %v1281_v17, %v1285_v43  ;;  %v1401_v49 = vld [vmem:[%s14751_s28 + $0x1fd8] sm:$0xff]  ;;  %v13500_v6 = vcombine.low %v1281_v17, %v1285_v43 }
 0x5e2   : > { %12063 = vmatprep.subr.bf16.mxu1 %v13477_v50  ;;  %12416 = vst [vmem:[%s15506_s27 + $0x28] sm:$0xff] %v12400_v11  ;;  %v12407_v38 = vmax.f32 %v12356_v30, 0.0  ;;  %v12357_v62 = vadd.f32 %v11783_v7, %v299_v12  ;;  %12091 = vmatpush1.bf16.msra.mxu0 %v13540_v58  ;;  %v1217_v12 = vld [vmem:[%s14751_s28 + $0x1a18] sm:$0xff] }
 0x5e3   : > { %12092 = vmatprep.subr.bf16.mxu0 %v13533_v20  ;;  %v13437_v33 = vcombine.high %v1217_v12, %v1221_v3  ;;  %v1405_v22 = vld [vmem:[%s14751_s28 + $0x1ff8] sm:$0xff]  ;;  %v13436_v52 = vcombine.low %v1217_v12, %v1221_v3 }
 0x5e4   : > { %12423 = vst [vmem:[%s15506_s27 + $0x60] sm:$0xff] %v12407_v38  ;;  %v12408_v1 = vmax.f32 %v12357_v62, 0.0  ;;  %v1465_v21 = vld [vmem:[%s14751_s28 + $0x21d8] sm:$0xff]  ;;  %v13621_v15 = vcombine.high %v1401_v49, %v1405_v22  ;;  %v13620_v35 = vcombine.low %v1401_v49, %v1405_v22 }
 0x5e5   : > { %12064 = vmatpush2.bf16.msra.mxu1 %v13476_v39  ;;  %v1469_v9 = vld [vmem:[%s14751_s28 + $0x21f8] sm:$0xff] }
 0x5e6   : > { %12065 = vmatprep.subr.bf16.mxu1 %v13469_v16  ;;  %12424 = vst [vmem:[%s15506_s27 + $0x68] sm:$0xff] %v12408_v1  ;;  %12093 = vmatpush1.bf16.msra.mxu0 %v13532_v53  ;;  %v13685_v42 = vcombine.high %v1465_v21, %v1469_v9  ;;  %v1393_v50 = vld [vmem:[%s14751_s28 + $0x1f98] sm:$0xff]  ;;  %v13684_v58 = vcombine.low %v1465_v21, %v1469_v9 }
 0x5e7   : > { %12094 = vmatprep.subr.bf16.mxu0 %v13525_v51  ;;  %v1397_v40 = vld [vmem:[%s14751_s28 + $0x1fb8] sm:$0xff] }
 0x5e8   : > { %v1457_v56 = vld [vmem:[%s14751_s28 + $0x2198] sm:$0xff]  ;;  %v13613_v26 = vcombine.high %v1393_v50, %v1397_v40  ;;  %v13612_v39 = vcombine.low %v1393_v50, %v1397_v40 }
 0x5e9   : > { %12066 = vmatpush2.bf16.msra.mxu1 %v13468_v41  ;;  %v1461_v2 = vld [vmem:[%s14751_s28 + $0x21b8] sm:$0xff] }
 0x5ea   : > { %12067 = vmatprep.subr.bf16.mxu1 %v13461_v13  ;;  %12095 = vmatpush1.bf16.msra.mxu0 %v13524_v23  ;;  %v13677_v24 = vcombine.high %v1457_v56, %v1461_v2  ;;  %v1385_v10 = vld [vmem:[%s14751_s28 + $0x1f58] sm:$0xff]  ;;  %v13676_v20 = vcombine.low %v1457_v56, %v1461_v2 }
 0x5eb   : > { %12096 = vmatprep.subr.bf16.mxu0 %v13517_v25  ;;  %v1389_v46 = vld [vmem:[%s14751_s28 + $0x1f78] sm:$0xff] }
 0x5ec   : > { %v1449_v29 = vld [vmem:[%s14751_s28 + $0x2158] sm:$0xff]  ;;  %v13605_v11 = vcombine.high %v1385_v10, %v1389_v46  ;;  %v13604_v59 = vcombine.low %v1385_v10, %v1389_v46 }
 0x5ed   : > { %12068 = vmatpush2.bf16.msra.mxu1 %v13460_v60  ;;  %v1453_v34 = vld [vmem:[%s14751_s28 + $0x2178] sm:$0xff] }
 0x5ee   : > { %12069 = vmatprep.subr.bf16.mxu1 %v13453_v47  ;;  %12097 = vmatpush1.bf16.msra.mxu0 %v13516_v61  ;;  %v13669_v30 = vcombine.high %v1449_v29, %v1453_v34  ;;  %v1377_v7 = vld [vmem:[%s14751_s28 + $0x1f18] sm:$0xff]  ;;  %v13668_v38 = vcombine.low %v1449_v29, %v1453_v34 }
 0x5ef   : > { %12098 = vmatprep.subr.bf16.mxu0 %v13509_v57  ;;  %v1381_v16 = vld [vmem:[%s14751_s28 + $0x1f38] sm:$0xff] }
 0x5f0   : > { %v14399_v32 = vld [vmem:[#allocation2 + $0x44] ss:$100 sps:$4 sm:$0xff]   ;;  %v13597_v62 = vcombine.high %v1377_v7, %v1381_v16  ;;  %v13596_v18 = vcombine.low %v1377_v7, %v1381_v16  ;;  %v14401_v16 = vld [vmem:[#allocation2 + $0x4c] ss:$100 sps:$4 sm:$0xff]  }
 0x5f1   : > { %12070 = vmatpush2.bf16.msra.mxu1 %v13452_v14  ;;  %v1441_v4 = vld [vmem:[%s14751_s28 + $0x2118] sm:$0xff] }
 0x5f2   : > { %12071 = vmatprep.subr.bf16.mxu1 %v13445_v44  ;;  %12099 = vmatpush1.bf16.msra.mxu0 %v13508_v63  ;;  %v1445_v36 = vld [vmem:[%s14751_s28 + $0x2138] sm:$0xff] }
 0x5f3   : > { %12100 = vmatprep.subr.bf16.mxu0 %v13501_v37  ;;  %v13661_v53 = vcombine.high %v1441_v4, %v1445_v36  ;;  %v1369_v41 = vld [vmem:[%s14751_s28 + $0x1ed8] sm:$0xff]  ;;  %v13660_v5 = vcombine.low %v1441_v4, %v1445_v36 }
 0x5f4   : > { %v1373_v51 = vld [vmem:[%s14751_s28 + $0x1ef8] sm:$0xff] }
 0x5f5   : > { %12072 = vmatpush2.bf16.msra.mxu1 %v13444_v8  ;;  %v1433_v1 = vld [vmem:[%s14751_s28 + $0x20d8] sm:$0xff]  ;;  %v13589_v0 = vcombine.high %v1369_v41, %v1373_v51  ;;  %v13588_v55 = vcombine.low %v1369_v41, %v1373_v51 }
 0x5f6   : > { %12073 = vmatprep.subr.bf16.mxu1 %v13437_v33  ;;  %12101 = vmatpush1.bf16.msra.mxu0 %v13500_v6  ;;  %v1437_v13 = vld [vmem:[%s14751_s28 + $0x20f8] sm:$0xff] }
 0x5f7   : > { %12102 = vmatprep.subr.bf16.mxu0 %v13621_v15  ;;  %v13653_v45 = vcombine.high %v1433_v1, %v1437_v13  ;;  %v1361_v23 = vld [vmem:[%s14751_s28 + $0x1e98] sm:$0xff]  ;;  %v13652_v27 = vcombine.low %v1433_v1, %v1437_v13 }
 0x5f8   : > { %v1365_v60 = vld [vmem:[%s14751_s28 + $0x1eb8] sm:$0xff] }
 0x5f9   : > { %12074 = vmatpush2.bf16.msra.mxu1 %v13436_v52  ;;  %v1425_v25 = vld [vmem:[%s14751_s28 + $0x2098] sm:$0xff]  ;;  %v13581_v19 = vcombine.high %v1361_v23, %v1365_v60  ;;  %v13580_v17 = vcombine.low %v1361_v23, %v1365_v60 }
 0x5fa   : > { %12129 = vmatprep.subr.bf16.mxu1 %v13685_v42  ;;  %12103 = vmatpush2.bf16.msra.mxu0 %v13620_v35  ;;  %v1429_v47 = vld [vmem:[%s14751_s28 + $0x20b8] sm:$0xff] }
 0x5fb   : > { %12104 = vmatprep.subr.bf16.mxu0 %v13613_v26  ;;  %v13645_v31 = vcombine.high %v1425_v25, %v1429_v47  ;;  %v1353_v61 = vld [vmem:[%s14751_s28 + $0x1e58] sm:$0xff]  ;;  %v13644_v43 = vcombine.low %v1425_v25, %v1429_v47 }
 0x5fc   : > { %12076 = vmatmul.mubr.bf16.vlgmr.msra.gmra.mxu1 %v14398_v54  ;;  %v1357_v14 = vld [vmem:[%s14751_s28 + $0x1e78] sm:$0xff] }
 0x5fd   : > { %12130 = vmatpush1.bf16.msra.mxu1 %v13684_v58  ;;  %12161 = vmatprep.mubr.bf16.mxu1 %v14399_v32  ;;  %v1417_v57 = vld [vmem:[%s14751_s28 + $0x2058] sm:$0xff]  ;;  %v13573_v12 = vcombine.high %v1353_v61, %v1357_v14  ;;  %v13572_v49 = vcombine.low %v1353_v61, %v1357_v14 }
 0x5fe   : > { %12131 = vmatprep.subr.bf16.mxu1 %v13677_v24  ;;  %12105 = vmatpush2.bf16.msra.mxu0 %v13612_v39  ;;  %v1421_v44 = vld [vmem:[%s14751_s28 + $0x2078] sm:$0xff] }
 0x5ff   : > { %12106 = vmatprep.subr.bf16.mxu0 %v13605_v11  ;;  %v13637_v3 = vcombine.high %v1417_v57, %v1421_v44  ;;  %v1345_v63 = vld [vmem:[%s14751_s28 + $0x1e18] sm:$0xff]  ;;  %v13636_v22 = vcombine.low %v1417_v57, %v1421_v44 }
 0x600   : > { %v1349_v8 = vld [vmem:[%s14751_s28 + $0x1e38] sm:$0xff] }
 0x601   : > { %12132 = vmatpush1.bf16.msra.mxu1 %v13676_v20  ;;  %v1409_v37 = vld [vmem:[%s14751_s28 + $0x2018] sm:$0xff]  ;;  %v13565_v21 = vcombine.high %v1345_v63, %v1349_v8  ;;  %v13564_v50 = vcombine.low %v1345_v63, %v1349_v8  ;;  %v14400_v20 = vld [vmem:[#allocation2 + $0x38] ss:$100 sps:$4 sm:$0xff]  }
 0x602   : > { %12133 = vmatprep.subr.bf16.mxu1 %v13669_v30  ;;  %12107 = vmatpush2.bf16.msra.mxu0 %v13604_v59  ;;  %v1413_v33 = vld [vmem:[%s14751_s28 + $0x2038] sm:$0xff] }
 0x603   : > { %12108 = vmatprep.subr.bf16.mxu0 %v13597_v62  ;;  %v13629_v9 = vcombine.high %v1409_v37, %v1413_v33  ;;  %v1593_v6 = vld [vmem:[%s14751_s28 + $0x25d8] sm:$0xff]  ;;  %v13628_v40 = vcombine.low %v1409_v37, %v1413_v33 }
 0x604   : > { %v1597_v52 = vld [vmem:[%s14751_s28 + $0x25f8] sm:$0xff] }
 0x605   : > { %12134 = vmatpush1.bf16.msra.mxu1 %v13668_v38  ;;  %v1529_v15 = vld [vmem:[%s14751_s28 + $0x23d8] sm:$0xff]  ;;  %v13813_v56 = vcombine.high %v1593_v6, %v1597_v52  ;;  %v13812_v10 = vcombine.low %v1593_v6, %v1597_v52 }
 0x606   : > { %12135 = vmatprep.subr.bf16.mxu1 %v13661_v53  ;;  %12109 = vmatpush2.bf16.msra.mxu0 %v13596_v18  ;;  %v1533_v42 = vld [vmem:[%s14751_s28 + $0x23f8] sm:$0xff] }
 0x607   : > { %12110 = vmatprep.subr.bf16.mxu0 %v13589_v0  ;;  %v13749_v2 = vcombine.high %v1529_v15, %v1533_v42  ;;  %v1585_v35 = vld [vmem:[%s14751_s28 + $0x2598] sm:$0xff]  ;;  %v13748_v46 = vcombine.low %v1529_v15, %v1533_v42 }
 0x608   : > { %v1589_v58 = vld [vmem:[%s14751_s28 + $0x25b8] sm:$0xff] }
 0x609   : > { %12136 = vmatpush1.bf16.msra.mxu1 %v13660_v5  ;;  %v1521_v26 = vld [vmem:[%s14751_s28 + $0x2398] sm:$0xff]  ;;  %v13805_v29 = vcombine.high %v1585_v35, %v1589_v58  ;;  %v13804_v7 = vcombine.low %v1585_v35, %v1589_v58 }
 0x60a   : > { %12137 = vmatprep.subr.bf16.mxu1 %v13653_v45  ;;  %12111 = vmatpush2.bf16.msra.mxu0 %v13588_v55  ;;  %v1525_v24 = vld [vmem:[%s14751_s28 + $0x23b8] sm:$0xff] }
 0x60b   : > { %12112 = vmatprep.subr.bf16.mxu0 %v13581_v19  ;;  %v13741_v34 = vcombine.high %v1521_v26, %v1525_v24  ;;  %v1577_v54 = vld [vmem:[%s14751_s28 + $0x2558] sm:$0xff]  ;;  %v13740_v32 = vcombine.low %v1521_v26, %v1525_v24 }
 0x60c   : > { %v1581_v39 = vld [vmem:[%s14751_s28 + $0x2578] sm:$0xff] }
 0x60d   : > { %12138 = vmatpush1.bf16.msra.mxu1 %v13652_v27  ;;  %v1513_v11 = vld [vmem:[%s14751_s28 + $0x2358] sm:$0xff]  ;;  %v13797_v4 = vcombine.high %v1577_v54, %v1581_v39  ;;  %v13796_v41 = vcombine.low %v1577_v54, %v1581_v39 }
 0x60e   : > { %12139 = vmatprep.subr.bf16.mxu1 %v13645_v31  ;;  %12113 = vmatpush2.bf16.msra.mxu0 %v13580_v17  ;;  %v1517_v30 = vld [vmem:[%s14751_s28 + $0x2378] sm:$0xff] }
 0x60f   : > { %12114 = vmatprep.subr.bf16.mxu0 %v13573_v12  ;;  %v13733_v36 = vcombine.high %v1513_v11, %v1517_v30  ;;  %v1569_v59 = vld [vmem:[%s14751_s28 + $0x2518] sm:$0xff]  ;;  %v13732_v51 = vcombine.low %v1513_v11, %v1517_v30 }
 0x610   : > { %v1573_v38 = vld [vmem:[%s14751_s28 + $0x2538] sm:$0xff] }
 0x611   : > { %12140 = vmatpush1.bf16.msra.mxu1 %v13644_v43  ;;  %v1505_v62 = vld [vmem:[%s14751_s28 + $0x2318] sm:$0xff]  ;;  %v13789_v1 = vcombine.high %v1569_v59, %v1573_v38  ;;  %v13788_v23 = vcombine.low %v1569_v59, %v1573_v38 }
 0x612   : > { %12141 = vmatprep.subr.bf16.mxu1 %v13637_v3  ;;  %12115 = vmatpush2.bf16.msra.mxu0 %v13572_v49  ;;  %v1509_v53 = vld [vmem:[%s14751_s28 + $0x2338] sm:$0xff] }
 0x613   : > { %12116 = vmatprep.subr.bf16.mxu0 %v13565_v21  ;;  %v13725_v13 = vcombine.high %v1505_v62, %v1509_v53  ;;  %v1561_v18 = vld [vmem:[%s14751_s28 + $0x24d8] sm:$0xff]  ;;  %v13724_v60 = vcombine.low %v1505_v62, %v1509_v53 }
 0x614   : > { %v1565_v5 = vld [vmem:[%s14751_s28 + $0x24f8] sm:$0xff] }
 0x615   : > { %12142 = vmatpush1.bf16.msra.mxu1 %v13636_v22  ;;  %v1497_v0 = vld [vmem:[%s14751_s28 + $0x22d8] sm:$0xff]  ;;  %v13781_v25 = vcombine.high %v1561_v18, %v1565_v5  ;;  %v13780_v61 = vcombine.low %v1561_v18, %v1565_v5 }
 0x616   : > { %12143 = vmatprep.subr.bf16.mxu1 %v13629_v9  ;;  %12117 = vmatpush2.bf16.msra.mxu0 %v13564_v50  ;;  %v1501_v45 = vld [vmem:[%s14751_s28 + $0x22f8] sm:$0xff] }
 0x617   : > { %12172 = vmatprep.subr.bf16.mxu0 %v13813_v56  ;;  %v13717_v47 = vcombine.high %v1497_v0, %v1501_v45  ;;  %v1553_v55 = vld [vmem:[%s14751_s28 + $0x2498] sm:$0xff]  ;;  %v13716_v14 = vcombine.low %v1497_v0, %v1501_v45 }
 0x618   : > { %v1557_v27 = vld [vmem:[%s14751_s28 + $0x24b8] sm:$0xff] }
 0x619   : > { %12144 = vmatpush1.bf16.msra.mxu1 %v13628_v40  ;;  %12119 = vmatmul.mubr.bf16.vlgmr.msra.gmra.mxu0 %v14400_v20  ;;  %v1489_v19 = vld [vmem:[%s14751_s28 + $0x2298] sm:$0xff]  ;;  %v13773_v57 = vcombine.high %v1553_v55, %v1557_v27  ;;  %v13772_v63 = vcombine.low %v1553_v55, %v1557_v27 }
 0x61a   : > { %12145 = vmatprep.subr.bf16.mxu1 %v13749_v2  ;;  %12173 = vmatpush1.bf16.msra.mxu0 %v13812_v10  ;;  %v1493_v31 = vld [vmem:[%s14751_s28 + $0x22b8] sm:$0xff] }
 0x61b   : > { %12204 = vmatprep.mubr.bf16.mxu0 %v14401_v16  ;;  %12174 = vmatprep.subr.bf16.mxu0 %v13805_v29  ;;  %v13709_v44 = vcombine.high %v1489_v19, %v1493_v31  ;;  %v1545_v17 = vld [vmem:[%s14751_s28 + $0x2458] sm:$0xff]  ;;  %v13708_v8 = vcombine.low %v1489_v19, %v1493_v31 }
 0x61c   : > { %v1549_v43 = vld [vmem:[%s14751_s28 + $0x2478] sm:$0xff] }
 0x61d   : > { %12146 = vmatpush2.bf16.msra.mxu1 %v13748_v46  ;;  %v1481_v12 = vld [vmem:[%s14751_s28 + $0x2258] sm:$0xff]  ;;  %v13765_v37 = vcombine.high %v1545_v17, %v1549_v43  ;;  %v13764_v6 = vcombine.low %v1545_v17, %v1549_v43 }
 0x61e   : > { %12147 = vmatprep.subr.bf16.mxu1 %v13741_v34  ;;  %12175 = vmatpush1.bf16.msra.mxu0 %v13804_v7  ;;  %v1485_v3 = vld [vmem:[%s14751_s28 + $0x2278] sm:$0xff] }
 0x61f   : > { %12176 = vmatprep.subr.bf16.mxu0 %v13797_v4  ;;  %v13701_v33 = vcombine.high %v1481_v12, %v1485_v3  ;;  %v1537_v49 = vld [vmem:[%s14751_s28 + $0x2418] sm:$0xff]  ;;  %v13700_v52 = vcombine.low %v1481_v12, %v1485_v3 }
 0x620   : > { %v1541_v22 = vld [vmem:[%s14751_s28 + $0x2438] sm:$0xff] }
 0x621   : > { %12148 = vmatpush2.bf16.msra.mxu1 %v13740_v32  ;;  %v1473_v21 = vld [vmem:[%s14751_s28 + $0x2218] sm:$0xff]  ;;  %v13757_v15 = vcombine.high %v1537_v49, %v1541_v22  ;;  %v13756_v35 = vcombine.low %v1537_v49, %v1541_v22 }
 0x622   : > { %12149 = vmatprep.subr.bf16.mxu1 %v13733_v36  ;;  %12177 = vmatpush1.bf16.msra.mxu0 %v13796_v41  ;;  %v1477_v9 = vld [vmem:[%s14751_s28 + $0x2238] sm:$0xff] }
 0x623   : > { %12178 = vmatprep.subr.bf16.mxu0 %v13789_v1  ;;  %v13693_v42 = vcombine.high %v1473_v21, %v1477_v9  ;;  %v1657_v50 = vld [vmem:[%s14751_s28 + $0x27d8] sm:$0xff]  ;;  %v13692_v58 = vcombine.low %v1473_v21, %v1477_v9 }
 0x624   : > { %v1661_v40 = vld [vmem:[%s14751_s28 + $0x27f8] sm:$0xff] }
 0x625   : > { %12150 = vmatpush2.bf16.msra.mxu1 %v13732_v51  ;;  %v1721_v56 = vld [vmem:[%s14751_s28 + $0x29d8] sm:$0xff]  ;;  %v13877_v26 = vcombine.high %v1657_v50, %v1661_v40  ;;  %v13876_v54 = vcombine.low %v1657_v50, %v1661_v40  ;;  %v14403_v51 = vld [vmem:[#allocation2 + $0x54] ss:$100 sps:$4 sm:$0xff]  }
 0x626   : > { %12151 = vmatprep.subr.bf16.mxu1 %v13725_v13  ;;  %12179 = vmatpush1.bf16.msra.mxu0 %v13788_v23  ;;  %v1725_v2 = vld [vmem:[%s14751_s28 + $0x29f8] sm:$0xff] }
 0x627   : > { %12180 = vmatprep.subr.bf16.mxu0 %v13781_v25  ;;  %v13941_v24 = vcombine.high %v1721_v56, %v1725_v2  ;;  %v1649_v10 = vld [vmem:[%s14751_s28 + $0x2798] sm:$0xff]  ;;  %v13940_v39 = vcombine.low %v1721_v56, %v1725_v2 }
 0x628   : > { %v1653_v46 = vld [vmem:[%s14751_s28 + $0x27b8] sm:$0xff] }
 0x629   : > { %12152 = vmatpush2.bf16.msra.mxu1 %v13724_v60  ;;  %v1713_v29 = vld [vmem:[%s14751_s28 + $0x2998] sm:$0xff]  ;;  %v13869_v20 = vcombine.high %v1649_v10, %v1653_v46  ;;  %v13868_v36 = vcombine.low %v1649_v10, %v1653_v46 }
 0x62a   : > { %12153 = vmatprep.subr.bf16.mxu1 %v13717_v47  ;;  %12181 = vmatpush1.bf16.msra.mxu0 %v13780_v61  ;;  %v1717_v34 = vld [vmem:[%s14751_s28 + $0x29b8] sm:$0xff] }
 0x62b   : > { %12182 = vmatprep.subr.bf16.mxu0 %v13773_v57  ;;  %v13933_v11 = vcombine.high %v1713_v29, %v1717_v34  ;;  %v1641_v30 = vld [vmem:[%s14751_s28 + $0x2758] sm:$0xff]  ;;  %v13932_v59 = vcombine.low %v1713_v29, %v1717_v34 }
 0x62c   : > { %v1645_v7 = vld [vmem:[%s14751_s28 + $0x2778] sm:$0xff] }
 0x62d   : > { %12154 = vmatpush2.bf16.msra.mxu1 %v13716_v14  ;;  %v1705_v16 = vld [vmem:[%s14751_s28 + $0x2958] sm:$0xff]  ;;  %v13861_v38 = vcombine.high %v1641_v30, %v1645_v7  ;;  %v13860_v18 = vcombine.low %v1641_v30, %v1645_v7 }
 0x62e   : > { %12155 = vmatprep.subr.bf16.mxu1 %v13709_v44  ;;  %12183 = vmatpush1.bf16.msra.mxu0 %v13772_v63  ;;  %v1709_v32 = vld [vmem:[%s14751_s28 + $0x2978] sm:$0xff] }
 0x62f   : > { %12184 = vmatprep.subr.bf16.mxu0 %v13765_v37  ;;  %v14402_v4 = vld [vmem:[#allocation2 + $0x40] ss:$100 sps:$4 sm:$0xff]   ;;  %v13925_v62 = vcombine.high %v1705_v16, %v1709_v32  ;;  %v13924_v5 = vcombine.low %v1705_v16, %v1709_v32 }
 0x630   : > { %v1633_v53 = vld [vmem:[%s14751_s28 + $0x2718] sm:$0xff] }
 0x631   : > { %12156 = vmatpush2.bf16.msra.mxu1 %v13708_v8  ;;  %v1637_v41 = vld [vmem:[%s14751_s28 + $0x2738] sm:$0xff] }
 0x632   : > { %12157 = vmatprep.subr.bf16.mxu1 %v13701_v33  ;;  %12185 = vmatpush1.bf16.msra.mxu0 %v13764_v6  ;;  %v1697_v1 = vld [vmem:[%s14751_s28 + $0x2918] sm:$0xff]  ;;  %v13853_v0 = vcombine.high %v1633_v53, %v1637_v41  ;;  %v13852_v55 = vcombine.low %v1633_v53, %v1637_v41 }
 0x633   : > { %12186 = vmatprep.subr.bf16.mxu0 %v13757_v15  ;;  %v1701_v13 = vld [vmem:[%s14751_s28 + $0x2938] sm:$0xff] }
 0x634   : > { %v13917_v45 = vcombine.high %v1697_v1, %v1701_v13  ;;  %v1625_v23 = vld [vmem:[%s14751_s28 + $0x26d8] sm:$0xff]  ;;  %v13916_v27 = vcombine.low %v1697_v1, %v1701_v13 }
 0x635   : > { %12158 = vmatpush2.bf16.msra.mxu1 %v13700_v52  ;;  %v1629_v60 = vld [vmem:[%s14751_s28 + $0x26f8] sm:$0xff] }
 0x636   : > { %12159 = vmatprep.subr.bf16.mxu1 %v13693_v42  ;;  %12187 = vmatpush1.bf16.msra.mxu0 %v13756_v35  ;;  %v1689_v25 = vld [vmem:[%s14751_s28 + $0x28d8] sm:$0xff]  ;;  %v13845_v19 = vcombine.high %v1625_v23, %v1629_v60  ;;  %v13844_v17 = vcombine.low %v1625_v23, %v1629_v60 }
 0x637   : > { %12188 = vmatprep.subr.bf16.mxu0 %v13877_v26  ;;  %v1693_v47 = vld [vmem:[%s14751_s28 + $0x28f8] sm:$0xff] }
 0x638   : > { %v13909_v31 = vcombine.high %v1689_v25, %v1693_v47  ;;  %v1617_v61 = vld [vmem:[%s14751_s28 + $0x2698] sm:$0xff]  ;;  %v13908_v43 = vcombine.low %v1689_v25, %v1693_v47 }
 0x639   : > { %12160 = vmatpush2.bf16.msra.mxu1 %v13692_v58  ;;  %v1621_v14 = vld [vmem:[%s14751_s28 + $0x26b8] sm:$0xff] }
 0x63a   : > { %12215 = vmatprep.subr.bf16.mxu1 %v13941_v24  ;;  %12189 = vmatpush2.bf16.msra.mxu0 %v13876_v54  ;;  %v1681_v57 = vld [vmem:[%s14751_s28 + $0x2898] sm:$0xff]  ;;  %v13837_v12 = vcombine.high %v1617_v61, %v1621_v14  ;;  %v13836_v49 = vcombine.low %v1617_v61, %v1621_v14 }
 0x63b   : > { %12190 = vmatprep.subr.bf16.mxu0 %v13869_v20  ;;  %v1685_v44 = vld [vmem:[%s14751_s28 + $0x28b8] sm:$0xff] }
 0x63c   : > { %12162 = vmatmul.mubr.bf16.vlgmr.msra.gmra.mxu1 %v14402_v4  ;;  %v13901_v3 = vcombine.high %v1681_v57, %v1685_v44  ;;  %v1609_v63 = vld [vmem:[%s14751_s28 + $0x2658] sm:$0xff]  ;;  %v13900_v22 = vcombine.low %v1681_v57, %v1685_v44 }
 0x63d   : > { %12216 = vmatpush1.bf16.msra.mxu1 %v13940_v39  ;;  %12247 = vmatprep.mubr.bf16.mxu1 %v14403_v51  ;;  %v1613_v8 = vld [vmem:[%s14751_s28 + $0x2678] sm:$0xff] }
 0x63e   : > { %12217 = vmatprep.subr.bf16.mxu1 %v13933_v11  ;;  %12191 = vmatpush2.bf16.msra.mxu0 %v13868_v36  ;;  %v1673_v37 = vld [vmem:[%s14751_s28 + $0x2858] sm:$0xff]  ;;  %v13829_v21 = vcombine.high %v1609_v63, %v1613_v8  ;;  %v13828_v50 = vcombine.low %v1609_v63, %v1613_v8 }
 0x63f   : > { %12192 = vmatprep.subr.bf16.mxu0 %v13861_v38  ;;  %v1677_v33 = vld [vmem:[%s14751_s28 + $0x2878] sm:$0xff] }
 0x640   : > { %v13893_v9 = vcombine.high %v1673_v37, %v1677_v33  ;;  %v1601_v6 = vld [vmem:[%s14751_s28 + $0x2618] sm:$0xff]  ;;  %v13892_v40 = vcombine.low %v1673_v37, %v1677_v33 }
 0x641   : > { %12218 = vmatpush1.bf16.msra.mxu1 %v13932_v59  ;;  %v1605_v52 = vld [vmem:[%s14751_s28 + $0x2638] sm:$0xff]  ;;  %v14404_v59 = vld [vmem:[#allocation2 + $0x48] ss:$100 sps:$4 sm:$0xff]  }
 0x642   : > { %12219 = vmatprep.subr.bf16.mxu1 %v13925_v62  ;;  %12193 = vmatpush2.bf16.msra.mxu0 %v13860_v18  ;;  %v1665_v15 = vld [vmem:[%s14751_s28 + $0x2818] sm:$0xff]  ;;  %v13821_v56 = vcombine.high %v1601_v6, %v1605_v52  ;;  %v13820_v10 = vcombine.low %v1601_v6, %v1605_v52 }
 0x643   : > { %12194 = vmatprep.subr.bf16.mxu0 %v13853_v0  ;;  %v1669_v42 = vld [vmem:[%s14751_s28 + $0x2838] sm:$0xff] }
 0x644   : > { %v13885_v2 = vcombine.high %v1665_v15, %v1669_v42  ;;  %v1849_v35 = vld [vmem:[%s14751_s28 + $0x2dd8] sm:$0xff]  ;;  %v13884_v46 = vcombine.low %v1665_v15, %v1669_v42 }
 0x645   : > { %12220 = vmatpush1.bf16.msra.mxu1 %v13924_v5  ;;  %v1853_v58 = vld [vmem:[%s14751_s28 + $0x2df8] sm:$0xff] }
 0x646   : > { %12221 = vmatprep.subr.bf16.mxu1 %v13917_v45  ;;  %12195 = vmatpush2.bf16.msra.mxu0 %v13852_v55  ;;  %v1785_v26 = vld [vmem:[%s14751_s28 + $0x2bd8] sm:$0xff]  ;;  %v14069_v29 = vcombine.high %v1849_v35, %v1853_v58  ;;  %v14068_v30 = vcombine.low %v1849_v35, %v1853_v58 }
 0x647   : > { %12196 = vmatprep.subr.bf16.mxu0 %v13845_v19  ;;  %v1789_v24 = vld [vmem:[%s14751_s28 + $0x2bf8] sm:$0xff] }
 0x648   : > { %v14005_v34 = vcombine.high %v1785_v26, %v1789_v24  ;;  %v1841_v54 = vld [vmem:[%s14751_s28 + $0x2d98] sm:$0xff]  ;;  %v14004_v7 = vcombine.low %v1785_v26, %v1789_v24 }
 0x649   : > { %12222 = vmatpush1.bf16.msra.mxu1 %v13916_v27  ;;  %v1845_v39 = vld [vmem:[%s14751_s28 + $0x2db8] sm:$0xff] }
 0x64a   : > { %12223 = vmatprep.subr.bf16.mxu1 %v13909_v31  ;;  %12197 = vmatpush2.bf16.msra.mxu0 %v13844_v17  ;;  %v1777_v20 = vld [vmem:[%s14751_s28 + $0x2b98] sm:$0xff]  ;;  %v14061_v16 = vcombine.high %v1841_v54, %v1845_v39  ;;  %v14060_v53 = vcombine.low %v1841_v54, %v1845_v39 }
 0x64b   : > { %12198 = vmatprep.subr.bf16.mxu0 %v13837_v12  ;;  %v1781_v11 = vld [vmem:[%s14751_s28 + $0x2bb8] sm:$0xff] }
 0x64c   : > { %v13997_v32 = vcombine.high %v1777_v20, %v1781_v11  ;;  %v1833_v4 = vld [vmem:[%s14751_s28 + $0x2d58] sm:$0xff]  ;;  %v13996_v51 = vcombine.low %v1777_v20, %v1781_v11 }
 0x64d   : > { %12224 = vmatpush1.bf16.msra.mxu1 %v13908_v43  ;;  %v1837_v36 = vld [vmem:[%s14751_s28 + $0x2d78] sm:$0xff] }
 0x64e   : > { %12225 = vmatprep.subr.bf16.mxu1 %v13901_v3  ;;  %12199 = vmatpush2.bf16.msra.mxu0 %v13836_v49  ;;  %v1769_v38 = vld [vmem:[%s14751_s28 + $0x2b58] sm:$0xff]  ;;  %v14053_v1 = vcombine.high %v1833_v4, %v1837_v36  ;;  %v14052_v23 = vcombine.low %v1833_v4, %v1837_v36 }
 0x64f   : > { %12200 = vmatprep.subr.bf16.mxu0 %v13829_v21  ;;  %v1773_v62 = vld [vmem:[%s14751_s28 + $0x2b78] sm:$0xff] }
 0x650   : > { %v14405_v41 = vld [vmem:[#allocation2 + $0x5c] ss:$100 sps:$4 sm:$0xff]   ;;  %v13989_v13 = vcombine.high %v1769_v38, %v1773_v62  ;;  %v13988_v60 = vcombine.low %v1769_v38, %v1773_v62 }
 0x651   : > { %12226 = vmatpush1.bf16.msra.mxu1 %v13900_v22  ;;  %v1825_v18 = vld [vmem:[%s14751_s28 + $0x2d18] sm:$0xff] }
 0x652   : > { %12227 = vmatprep.subr.bf16.mxu1 %v13893_v9  ;;  %12201 = vmatpush2.bf16.msra.mxu0 %v13828_v50  ;;  %v1829_v5 = vld [vmem:[%s14751_s28 + $0x2d38] sm:$0xff] }
 0x653   : > { %12202 = vmatprep.subr.bf16.mxu0 %v13821_v56  ;;  %v1761_v0 = vld [vmem:[%s14751_s28 + $0x2b18] sm:$0xff]  ;;  %v14045_v25 = vcombine.high %v1825_v18, %v1829_v5  ;;  %v14044_v61 = vcombine.low %v1825_v18, %v1829_v5 }
 0x654   : > { %v1765_v45 = vld [vmem:[%s14751_s28 + $0x2b38] sm:$0xff] }
 0x655   : > { %12228 = vmatpush1.bf16.msra.mxu1 %v13892_v40  ;;  %v13981_v47 = vcombine.high %v1761_v0, %v1765_v45  ;;  %v1817_v55 = vld [vmem:[%s14751_s28 + $0x2cd8] sm:$0xff]  ;;  %v13980_v14 = vcombine.low %v1761_v0, %v1765_v45 }
 0x656   : > { %12229 = vmatprep.subr.bf16.mxu1 %v13885_v2  ;;  %12203 = vmatpush2.bf16.msra.mxu0 %v13820_v10  ;;  %v1821_v27 = vld [vmem:[%s14751_s28 + $0x2cf8] sm:$0xff] }
 0x657   : > { %12258 = vmatprep.subr.bf16.mxu0 %v14069_v29  ;;  %v1753_v19 = vld [vmem:[%s14751_s28 + $0x2ad8] sm:$0xff]  ;;  %v14037_v57 = vcombine.high %v1817_v55, %v1821_v27  ;;  %v14036_v63 = vcombine.low %v1817_v55, %v1821_v27 }
 0x658   : > { %v1757_v31 = vld [vmem:[%s14751_s28 + $0x2af8] sm:$0xff] }
 0x659   : > { %12230 = vmatpush1.bf16.msra.mxu1 %v13884_v46  ;;  %12205 = vmatmul.mubr.bf16.vlgmr.msra.gmra.mxu0 %v14404_v59  ;;  %v13973_v44 = vcombine.high %v1753_v19, %v1757_v31  ;;  %v1809_v17 = vld [vmem:[%s14751_s28 + $0x2c98] sm:$0xff]  ;;  %v13972_v8 = vcombine.low %v1753_v19, %v1757_v31 }
 0x65a   : > { %12231 = vmatprep.subr.bf16.mxu1 %v14005_v34  ;;  %12259 = vmatpush1.bf16.msra.mxu0 %v14068_v30  ;;  %v1813_v43 = vld [vmem:[%s14751_s28 + $0x2cb8] sm:$0xff] }
 0x65b   : > { %12290 = vmatprep.mubr.bf16.mxu0 %v14405_v41  ;;  %12260 = vmatprep.subr.bf16.mxu0 %v14061_v16  ;;  %v1745_v12 = vld [vmem:[%s14751_s28 + $0x2a98] sm:$0xff]  ;;  %v14029_v37 = vcombine.high %v1809_v17, %v1813_v43  ;;  %v14028_v6 = vcombine.low %v1809_v17, %v1813_v43 }
 0x65c   : > { %v1749_v3 = vld [vmem:[%s14751_s28 + $0x2ab8] sm:$0xff] }
 0x65d   : > { %12232 = vmatpush2.bf16.msra.mxu1 %v14004_v7  ;;  %v13965_v33 = vcombine.high %v1745_v12, %v1749_v3  ;;  %v1801_v49 = vld [vmem:[%s14751_s28 + $0x2c58] sm:$0xff]  ;;  %v13964_v52 = vcombine.low %v1745_v12, %v1749_v3 }
 0x65e   : > { %12233 = vmatprep.subr.bf16.mxu1 %v13997_v32  ;;  %12261 = vmatpush1.bf16.msra.mxu0 %v14060_v53  ;;  %v1805_v22 = vld [vmem:[%s14751_s28 + $0x2c78] sm:$0xff] }
 0x65f   : > { %12262 = vmatprep.subr.bf16.mxu0 %v14053_v1  ;;  %v1737_v21 = vld [vmem:[%s14751_s28 + $0x2a58] sm:$0xff]  ;;  %v14021_v15 = vcombine.high %v1801_v49, %v1805_v22  ;;  %v14020_v35 = vcombine.low %v1801_v49, %v1805_v22  ;;  %v14406_v1 = vld [vmem:[#allocation2 + $0x50] ss:$100 sps:$4 sm:$0xff]  }
 0x660   : > { %v1741_v9 = vld [vmem:[%s14751_s28 + $0x2a78] sm:$0xff] }
 0x661   : > { %12234 = vmatpush2.bf16.msra.mxu1 %v13996_v51  ;;  %v13957_v42 = vcombine.high %v1737_v21, %v1741_v9  ;;  %v1793_v50 = vld [vmem:[%s14751_s28 + $0x2c18] sm:$0xff]  ;;  %v13956_v58 = vcombine.low %v1737_v21, %v1741_v9 }
 0x662   : > { %12235 = vmatprep.subr.bf16.mxu1 %v13989_v13  ;;  %12263 = vmatpush1.bf16.msra.mxu0 %v14052_v23  ;;  %v1797_v40 = vld [vmem:[%s14751_s28 + $0x2c38] sm:$0xff] }
 0x663   : > { %12264 = vmatprep.subr.bf16.mxu0 %v14045_v25  ;;  %v1729_v56 = vld [vmem:[%s14751_s28 + $0x2a18] sm:$0xff]  ;;  %v14013_v26 = vcombine.high %v1793_v50, %v1797_v40  ;;  %v14012_v54 = vcombine.low %v1793_v50, %v1797_v40 }
 0x664   : > { %v1733_v2 = vld [vmem:[%s14751_s28 + $0x2a38] sm:$0xff] }
 0x665   : > { %12236 = vmatpush2.bf16.msra.mxu1 %v13988_v60  ;;  %v13949_v24 = vcombine.high %v1729_v56, %v1733_v2  ;;  %v1913_v10 = vld [vmem:[%s14751_s28 + $0x2fd8] sm:$0xff]  ;;  %v13948_v39 = vcombine.low %v1729_v56, %v1733_v2 }
 0x666   : > { %12237 = vmatprep.subr.bf16.mxu1 %v13981_v47  ;;  %12265 = vmatpush1.bf16.msra.mxu0 %v14044_v61  ;;  %v1917_v46 = vld [vmem:[%s14751_s28 + $0x2ff8] sm:$0xff] }
 0x667   : > { %12266 = vmatprep.subr.bf16.mxu0 %v14037_v57  ;;  %v1977_v29 = vld [vmem:[%s14751_s28 + $0x31d8] sm:$0xff]  ;;  %v14133_v20 = vcombine.high %v1913_v10, %v1917_v46  ;;  %v14132_v4 = vcombine.low %v1913_v10, %v1917_v46 }
 0x668   : > { %v1981_v34 = vld [vmem:[%s14751_s28 + $0x31f8] sm:$0xff] }
 0x669   : > { %12238 = vmatpush2.bf16.msra.mxu1 %v13980_v14  ;;  %v14197_v11 = vcombine.high %v1977_v29, %v1981_v34  ;;  %v1905_v30 = vld [vmem:[%s14751_s28 + $0x2f98] sm:$0xff]  ;;  %v14196_v36 = vcombine.low %v1977_v29, %v1981_v34 }
 0x66a   : > { %12239 = vmatprep.subr.bf16.mxu1 %v13973_v44  ;;  %12267 = vmatpush1.bf16.msra.mxu0 %v14036_v63  ;;  %v1909_v7 = vld [vmem:[%s14751_s28 + $0x2fb8] sm:$0xff] }
 0x66b   : > { %12268 = vmatprep.subr.bf16.mxu0 %v14029_v37  ;;  %v1969_v16 = vld [vmem:[%s14751_s28 + $0x3198] sm:$0xff]  ;;  %v14125_v59 = vcombine.high %v1905_v30, %v1909_v7  ;;  %v14124_v13 = vcombine.low %v1905_v30, %v1909_v7 }
 0x66c   : > { %v1973_v32 = vld [vmem:[%s14751_s28 + $0x31b8] sm:$0xff] }
 0x66d   : > { %12240 = vmatpush2.bf16.msra.mxu1 %v13972_v8  ;;  %v14189_v38 = vcombine.high %v1969_v16, %v1973_v32  ;;  %v1897_v62 = vld [vmem:[%s14751_s28 + $0x2f58] sm:$0xff]  ;;  %v14188_v18 = vcombine.low %v1969_v16, %v1973_v32  ;;  %v11862_v16 = vpop.f32.mrf.mxu0 }
 0x66e   : > { %12241 = vmatprep.subr.bf16.mxu1 %v13965_v33  ;;  %12269 = vmatpush1.bf16.msra.mxu0 %v14028_v6  ;;  %v1901_v53 = vld [vmem:[%s14751_s28 + $0x2f78] sm:$0xff] }
 0x66f   : > { %12270 = vmatprep.subr.bf16.mxu0 %v14021_v15  ;;  %v1961_v41 = vld [vmem:[%s14751_s28 + $0x3158] sm:$0xff]  ;;  %v14117_v5 = vcombine.high %v1897_v62, %v1901_v53  ;;  %v14116_v47 = vcombine.low %v1897_v62, %v1901_v53 }
 0x670   : > { %v1965_v51 = vld [vmem:[%s14751_s28 + $0x3178] sm:$0xff] }
 0x671   : > { %12242 = vmatpush2.bf16.msra.mxu1 %v13964_v52  ;;  %v14181_v0 = vcombine.high %v1961_v41, %v1965_v51  ;;  %v1889_v45 = vld [vmem:[%s14751_s28 + $0x2f18] sm:$0xff]  ;;  %v14180_v55 = vcombine.low %v1961_v41, %v1965_v51 }
 0x672   : > { %12243 = vmatprep.subr.bf16.mxu1 %v13957_v42  ;;  %12271 = vmatpush1.bf16.msra.mxu0 %v14020_v35  ;;  %v1893_v23 = vld [vmem:[%s14751_s28 + $0x2f38] sm:$0xff] }
 0x673   : > { %12272 = vmatprep.subr.bf16.mxu0 %v14013_v26  ;;  %v1953_v60 = vld [vmem:[%s14751_s28 + $0x3118] sm:$0xff]  ;;  %v14109_v27 = vcombine.high %v1889_v45, %v1893_v23 }
 0x674   : > { %v1957_v25 = vld [vmem:[%s14751_s28 + $0x3138] sm:$0xff] }
 0x675   : > { %12244 = vmatpush2.bf16.msra.mxu1 %v13956_v58  ;;  %v14173_v19 = vcombine.high %v1953_v60, %v1957_v25  ;;  %v1881_v31 = vld [vmem:[%s14751_s28 + $0x2ed8] sm:$0xff]  ;;  %v14172_v44 = vcombine.low %v1953_v60, %v1957_v25 }
 0x676   : > { %12245 = vmatprep.subr.bf16.mxu1 %v13949_v24  ;;  %12273 = vmatpush1.bf16.msra.mxu0 %v14012_v54  ;;  %v1885_v61 = vld [vmem:[%s14751_s28 + $0x2ef8] sm:$0xff]  ;;  %v14407_v54 = vld [vmem:[#allocation2 + $0x58] ss:$100 sps:$4 sm:$0xff]  }
 0x677   : > { %12274 = vmatprep.subr.bf16.mxu0 %v14133_v20  ;;  %v1945_v14 = vld [vmem:[%s14751_s28 + $0x30d8] sm:$0xff]  ;;  %v14101_v17 = vcombine.high %v1881_v31, %v1885_v61  ;;  %v14100_v37 = vcombine.low %v1881_v31, %v1885_v61  ;;  %v11819_v20 = vpop.f32.mrf.mxu1 }
 0x678   : > { %v1949_v57 = vld [vmem:[%s14751_s28 + $0x30f8] sm:$0xff] }
 0x679   : > { %12246 = vmatpush2.bf16.msra.mxu1 %v13948_v39  ;;  %v14165_v43 = vcombine.high %v1945_v14, %v1949_v57  ;;  %v1873_v12 = vld [vmem:[%s14751_s28 + $0x2e98] sm:$0xff]  ;;  %v14164_v33 = vcombine.low %v1945_v14, %v1949_v57 }
 0x67a   : > { %12301 = vmatprep.subr.bf16.mxu1 %v14197_v11  ;;  %12275 = vmatpush2.bf16.msra.mxu0 %v14132_v4  ;;  %v1877_v3 = vld [vmem:[%s14751_s28 + $0x2eb8] sm:$0xff]  ;;  %v11821_v11 = vpop.f32.mrf.mxu1  ;;  %v11864_v4 = vpop.f32.mrf.mxu0 }
 0x67b   : > { %12276 = vmatprep.subr.bf16.mxu0 %v14125_v59  ;;  %v1937_v63 = vld [vmem:[%s14751_s28 + $0x3098] sm:$0xff]  ;;  %v14093_v49 = vcombine.high %v1873_v12, %v1877_v3  ;;  %v14092_v15 = vcombine.low %v1873_v12, %v1877_v3  ;;  %v11865_v12 = vadd.f32 %v11864_v4, %v11821_v11 }
 0x67c   : > { %12248 = vmatmul.mubr.bf16.vlgmr.msra.gmra.mxu1 %v14406_v1  ;;  %v1941_v8 = vld [vmem:[%s14751_s28 + $0x30b8] sm:$0xff]  ;;  %v11823_v30 = vpop.f32.mrf.mxu1  ;;  %v11866_v59 = vpop.f32.mrf.mxu0 }
 0x67d   : > { %12302 = vmatpush1.bf16.msra.mxu1 %v14196_v36  ;;  %12333 = vmatprep.mubr.bf16.mxu1 %v14586_v48  ;;  %v14108_v48 = vcombine.low %v1889_v45, %v1893_v23  ;;  %v14157_v22 = vcombine.high %v1937_v63, %v1941_v8  ;;  %v1865_v21 = vld [vmem:[%s14751_s28 + $0x2e58] sm:$0xff]  ;;  %v14156_v42 = vcombine.low %v1937_v63, %v1941_v8 }
 0x67e   : > { %12303 = vmatprep.subr.bf16.mxu1 %v14189_v38  ;;  %12277 = vmatpush2.bf16.msra.mxu0 %v14124_v13  ;;  %v1869_v9 = vld [vmem:[%s14751_s28 + $0x2e78] sm:$0xff]  ;;  %v11825_v7 = vpop.f32.mrf.mxu1  ;;  %v11868_v62 = vpop.f32.mrf.mxu0  ;;  %v11867_v8 = vadd.f32 %v11866_v59, %v11823_v30 }
 0x67f   : > { %12278 = vmatprep.subr.bf16.mxu0 %v14117_v5  ;;  %v1929_v6 = vld [vmem:[%s14751_s28 + $0x3058] sm:$0xff]  ;;  %v14085_v50 = vcombine.high %v1865_v21, %v1869_v9  ;;  %v14084_v26 = vcombine.low %v1865_v21, %v1869_v9  ;;  %v11869_v21 = vadd.f32 %v11868_v62, %v11825_v7 }
 0x680   : > { %v1933_v52 = vld [vmem:[%s14751_s28 + $0x3078] sm:$0xff]  ;;  %v11905_v32 = vpop.f32.mrf.mxu1  ;;  %v11948_v41 = vpop.f32.mrf.mxu0 }
 0x681   : > { %12304 = vmatpush1.bf16.msra.mxu1 %v14188_v18  ;;  %v14149_v40 = vcombine.high %v1929_v6, %v1933_v52  ;;  %v1857_v56 = vld [vmem:[%s14751_s28 + $0x2e18] sm:$0xff]  ;;  %v14148_v24 = vcombine.low %v1929_v6, %v1933_v52 }
 0x682   : > { %12305 = vmatprep.subr.bf16.mxu1 %v14181_v0  ;;  %12279 = vmatpush2.bf16.msra.mxu0 %v14116_v47  ;;  %v1861_v2 = vld [vmem:[%s14751_s28 + $0x2e38] sm:$0xff]  ;;  %v11907_v36 = vpop.f32.mrf.mxu1  ;;  %v11950_v1 = vpop.f32.mrf.mxu0 }
 0x683   : > { %12280 = vmatprep.subr.bf16.mxu0 %v14109_v27  ;;  %v1921_v35 = vld [vmem:[%s14751_s28 + $0x3018] sm:$0xff]  ;;  %v14077_v10 = vcombine.high %v1857_v56, %v1861_v2  ;;  %v14076_v29 = vcombine.low %v1857_v56, %v1861_v2 }
 0x684   : > { %v1925_v58 = vld [vmem:[%s14751_s28 + $0x3038] sm:$0xff]  ;;  %v11909_v38 = vpop.f32.mrf.mxu1  ;;  %v11952_v18 = vpop.f32.mrf.mxu0 }
 0x685   : > { %12306 = vmatpush1.bf16.msra.mxu1 %v14180_v55  ;;  %v14141_v46 = vcombine.high %v1921_v35, %v1925_v58  ;;  %v14140_v34 = vcombine.low %v1921_v35, %v1925_v58  ;;  %v14408_v39 = vld [vmem:[#allocation2 + $0x60] ss:$100 sps:$4 sm:$0xff]   ;;  %v11910_v9 = vadd.f32 %v11909_v38, %v11867_v8 }
 0x686   : > { %12307 = vmatprep.subr.bf16.mxu1 %v14173_v19  ;;  %12281 = vmatpush2.bf16.msra.mxu0 %v14108_v48  ;;  %v11911_v53 = vpop.f32.mrf.mxu1  ;;  %v11954_v0 = vpop.f32.mrf.mxu0 }
 0x687   : > { %12282 = vmatprep.subr.bf16.mxu0 %v14101_v17  ;;  %v11863_v17 = vadd.f32 %v11862_v16, %v11819_v20 }
 0x688   : > { %v11991_v51 = vpop.f32.mrf.mxu1 }
 0x689   : > { %12308 = vmatpush1.bf16.msra.mxu1 %v14172_v44  ;;  %v11906_v3 = vadd.f32 %v11905_v32, %v11863_v17  ;;  %v302_v32 = vsub.s32 6, %v15472_v28 }
 0x68a   : > { %12309 = vmatprep.subr.bf16.mxu1 %v14165_v43  ;;  %12283 = vmatpush2.bf16.msra.mxu0 %v14100_v37  ;;  %v11993_v13 = vpop.f32.mrf.mxu1  ;;  %v11908_v37 = vadd.f32 %v11907_v36, %v11865_v12 }
 0x68b   : > { %12284 = vmatprep.subr.bf16.mxu0 %v14093_v49 }
 0x68c   : > { %v11995_v5 = vpop.f32.mrf.mxu1  ;;  %v11951_v6 = vadd.f32 %v11950_v1, %v11908_v37 }
 0x68d   : > { %12310 = vmatpush1.bf16.msra.mxu1 %v14164_v33  ;;  %v11949_v33 = vadd.f32 %v11948_v41, %v11906_v3 }
 0x68e   : > { %12311 = vmatprep.subr.bf16.mxu1 %v14157_v22  ;;  %12285 = vmatpush2.bf16.msra.mxu0 %v14092_v15  ;;  %v11997_v45 = vpop.f32.mrf.mxu1 }
 0x68f   : > { %12286 = vmatprep.subr.bf16.mxu0 %v14085_v50  ;;  %v11992_v52 = vadd.f32 %v11991_v51, %v11949_v33  ;;  %v11953_v50 = vadd.f32 %v11952_v18, %v11910_v9 }
 0x691   : > { %12312 = vmatpush1.bf16.msra.mxu1 %v14156_v42  ;;  %v11912_v42 = vadd.f32 %v11911_v53, %v11869_v21  ;;  %v11996_v58 = vadd.f32 %v11995_v5, %v11953_v50  ;;  %v306_v53 = vsub.s32 7, %v15472_v28 }
 0x692   : > { %12313 = vmatprep.subr.bf16.mxu1 %v14149_v40  ;;  %12287 = vmatpush2.bf16.msra.mxu0 %v14084_v26  ;;  %v11994_v40 = vadd.f32 %v11993_v13, %v11951_v6 }
 0x693   : > { %12288 = vmatprep.subr.bf16.mxu0 %v14077_v10  ;;  %v11955_v35 = vadd.f32 %v11954_v0, %v11912_v42  ;;  %v14409_v0 = vld [vmem:[%s15487_s20] sm:$0xff] }
 0x695   : > { %12314 = vmatpush1.bf16.msra.mxu1 %v14148_v24 }
 0x696   : > { %12315 = vmatprep.subr.bf16.mxu1 %v14141_v46  ;;  %12289 = vmatpush2.bf16.msra.mxu0 %v14076_v29  ;;  %v11998_v46 = vadd.f32 %v11997_v45, %v11955_v35  ;;  %v303_v45 = vrot.slane %v14409_v0, %v302_v32 }
 0x699   : > { %12316 = vmatpush1.bf16.msra.mxu1 %v14140_v34  ;;  %12291 = vmatmul.mubr.bf16.vlgmr.msra.gmra.mxu0 %v14407_v54  ;;  %v12034_v23 = vpop.f32.mrf.mxu0 }
 0x69a   : > { %v12035_v56 = vadd.f32 %v12034_v23, %v11992_v52 }
 0x69b   : > { %v12036_v25 = vpop.f32.mrf.mxu0 }
 0x69c   : > { %12334 = vmatmul.mubr.bf16.vlgmr.msra.gmra.mxu1 %v14408_v39  ;;  %v12037_v26 = vadd.f32 %v12036_v25, %v11994_v40 }
 0x69d   : > { %v12038_v55 = vpop.f32.mrf.mxu0 }
 0x69e   : > { %v12039_v29 = vadd.f32 %v12038_v55, %v11996_v58 }
 0x69f   : > { %v12040_v19 = vpop.f32.mrf.mxu0 }
 0x6a0   : > { %v12041_v20 = vadd.f32 %v12040_v19, %v11998_v46  ;;  %v307_v19 = vrot.slane %v14409_v0, %v306_v53 }
 0x6bc   : > { %v12077_v60 = vpop.f32.mrf.mxu1 }
 0x6bd   : > { %v12078_v24 = vadd.f32 %v12077_v60, %v12035_v56 }
 0x6be   : > { %v12079_v47 = vpop.f32.mrf.mxu1 }
 0x6bf   : > { %v12080_v34 = vadd.f32 %v12079_v47, %v12037_v26 }
 0x6c0   : > { %v12081_v27 = vpop.f32.mrf.mxu1 }
 0x6c1   : > { %v12082_v11 = vadd.f32 %v12081_v27, %v12039_v29 }
 0x6c2   : > { %v12083_v31 = vpop.f32.mrf.mxu1 }
 0x6c3   : > { %v12084_v4 = vadd.f32 %v12083_v31, %v12041_v20 }
 0x6d9   : > { %v12120_v61 = vpop.f32.mrf.mxu0 }
 0x6da   : > { %v12121_v54 = vadd.f32 %v12120_v61, %v12078_v24 }
 0x6db   : > { %v12122_v57 = vpop.f32.mrf.mxu0 }
 0x6dc   : > { %v12123_v30 = vadd.f32 %v12122_v57, %v12080_v34 }
 0x6dd   : > { %v12124_v44 = vpop.f32.mrf.mxu0 }
 0x6de   : > { %v12125_v36 = vadd.f32 %v12124_v44, %v12082_v11 }
 0x6df   : > { %v12126_v63 = vpop.f32.mrf.mxu0 }
 0x6e0   : > { %v12127_v41 = vadd.f32 %v12126_v63, %v12084_v4 }
 0x6fc   : > { %v12163_v14 = vpop.f32.mrf.mxu1 }
 0x6fd   : > { %v12164_v7 = vadd.f32 %v12163_v14, %v12121_v54 }
 0x6fe   : > { %v12165_v48 = vpop.f32.mrf.mxu1 }
 0x6ff   : > { %v12166_v59 = vadd.f32 %v12165_v48, %v12123_v30 }
 0x700   : > { %v12167_v43 = vpop.f32.mrf.mxu1 }
 0x701   : > { %v12168_v51 = vadd.f32 %v12167_v43, %v12125_v36 }
 0x702   : > { %v12169_v49 = vpop.f32.mrf.mxu1 }
 0x703   : > { %v12170_v23 = vadd.f32 %v12169_v49, %v12127_v41 }
 0x719   : > { %v12206_v22 = vpop.f32.mrf.mxu0 }
 0x71a   : > { %v12207_v38 = vadd.f32 %v12206_v22, %v12164_v7 }
 0x71b   : > { %v12208_v2 = vpop.f32.mrf.mxu0 }
 0x71c   : > { %v12209_v1 = vadd.f32 %v12208_v2, %v12166_v59 }
 0x71d   : > { %v12210_v39 = vpop.f32.mrf.mxu0 }
 0x71e   : > { %v12211_v60 = vadd.f32 %v12210_v39, %v12168_v51 }
 0x71f   : > { %v12212_v62 = vpop.f32.mrf.mxu0 }
 0x720   : > { %v12213_v31 = vadd.f32 %v12212_v62, %v12170_v23 }
 0x73c   : > { %v12249_v15 = vpop.f32.mrf.mxu1 }
 0x73d   : > { %v12250_v13 = vadd.f32 %v12249_v15, %v12207_v38 }
 0x73e   : > { %v12251_v10 = vpop.f32.mrf.mxu1 }
 0x73f   : > { %v12252_v25 = vadd.f32 %v12251_v10, %v12209_v1 }
 0x740   : > { %v12253_v16 = vpop.f32.mrf.mxu1 }
 0x741   : > { %v12254_v61 = vadd.f32 %v12253_v16, %v12211_v60 }
 0x742   : > { %v12255_v18 = vpop.f32.mrf.mxu1 }
 0x743   : > { %v12256_v44 = vadd.f32 %v12255_v18, %v12213_v31 }
 0x759   : > { %v12292_v5 = vpop.f32.mrf.mxu0 }
 0x75a   : > { %v12293_v47 = vadd.f32 %v12292_v5, %v12250_v13 }
 0x75b   : > { %v12294_v27 = vpop.f32.mrf.mxu0 }
 0x75c   : > { %v12335_v55 = vpop.f32.mrf.mxu1  ;;  %v12295_v28 = vadd.f32 %v12294_v27, %v12252_v25 }
 0x75d   : > { %v12336_v14 = vadd.f32 %v12335_v55, %v12293_v47  ;;  %v12296_v48 = vpop.f32.mrf.mxu0 }
 0x75e   : > { %v12337_v57 = vpop.f32.mrf.mxu1  ;;  %v12297_v12 = vadd.f32 %v12296_v48, %v12254_v61 }
 0x75f   : > { %v12350_v17 = vadd.f32 %v12336_v14, %v303_v45  ;;  %v12338_v43 = vadd.f32 %v12337_v57, %v12295_v28  ;;  %v12298_v63 = vpop.f32.mrf.mxu0 }
 0x760   : > { %v12339_v3 = vpop.f32.mrf.mxu1  ;;  %v12299_v49 = vadd.f32 %v12298_v63, %v12256_v44 }
 0x761   : > { %v12401_v8 = vmax.f32 %v12350_v17, 0.0  ;;  %v12351_v37 = vadd.f32 %v12338_v43, %v307_v19  ;;  %v12340_v33 = vadd.f32 %v12339_v3, %v12297_v12 }
 0x762   : > { %v12341_v22 = vpop.f32.mrf.mxu1 }
 0x763   : > { %12417 = vst [vmem:[%s15506_s27 + $0x30] sm:$0xff] %v12401_v8  ;;  %v12402_v21 = vmax.f32 %v12351_v37, 0.0  ;;  %v12358_v9 = vadd.f32 %v12340_v33, %v303_v45  ;;  %v12342_v6 = vadd.f32 %v12341_v22, %v12299_v49 }
 0x765   : > { %12418 = vst [vmem:[%s15506_s27 + $0x38] sm:$0xff] %v12402_v21  ;;  %v12409_v52 = vmax.f32 %v12358_v9, 0.0  ;;  %v12359_v15 = vadd.f32 %v12342_v6, %v307_v19 }
 0x767   : > { %12425 = vst [vmem:[%s15506_s27 + $0x70] sm:$0xff] %v12409_v52  ;;  %v12410_v42 = vmax.f32 %v12359_v15, 0.0 }
 0x769   : > { %12426 = vst [vmem:[%s15506_s27 + $0x78] sm:$0xff] %v12410_v42 }
 0x76a   : > { %14505 = shalt.err (!%p14502_p4)
}
 0x76b   : > { %s14506_s29 = scalar_lea.hbm %s16799_s8, 2048  ;;  %s14510_s5 = scalar_lea.hbm %s16853_s3, 8192 }
 0x76c   : > { %p14507_p7 = scmp.ne.s32.totalorder %s16799_s8, %s14506_s29  ;;  %p14511_p9 = scmp.lt.s32.totalorder %s16799_s8, %s16853_s3 }
 0x76d   : > { %p14512_p10 = scmp.lt.s32.totalorder %s14510_s5, %s14506_s29 }
 0x76e   : > { %p14508_p3 = pnand %p14507_p7, %p16866_p8 }
 0x76f   : > { %p14513_p11 = por %p14512_p10, %p14511_p9 }
 0x770   : > { %p14509_p5 = pneg %p14508_p3 }
 0x772   : > { %p14514_p6 = pnand %p14513_p11, %p14509_p5 }
 0x774   : > { %14517 = shalt.err (!%p14514_p6)
}
 0x775   : > { %s14588_s27 = smov 1024   ;;  %s14589_s10 = smov 4096  }
 0x776   : > { %s14590_s6 = smov 64  }
 0x777   : > { %14216 = dma.vmem_to_hbm [thread:$0]  (%p16866_p8), %s16801_s19, 2048, %s16799_s8, %s12428_s15, %s14588_s27, %s14589_s10, %s14590_s6  }
 0x778 PF: > { %p14236_p13 = scmp.ge.s32.totalorder %s14576_s17, 2  ;;  %s12456_s4 = sand.u32 1, %s14556_s12  }
 0x779   : > { %p16867_p1 = scmp.ne.s32.totalorder %s16860_s26, 0  ;;  %s12457_s9 = scalar_lea.sflag [#allocation4], %s12456_s4 }
 0x77b   : > { %p14230_p12 = pnand %p14236_p13, %p16867_p1 }
 0x77d   : > { %p14231_p0 = pneg %p14230_p12 }
 0x77f   : > { %14551 = dma.done.wait (%p14231_p0), %s12457_s9, 2048  }
 0x780   : > { %14553 = vsyncadd (%p14231_p0), %s12457_s9, 4294965248  ;;  %s20_s17 = sadd.s32 1, %s14576_s17   ;;  %s16868_s12 = smov %s14560_s13 }
 0x781   : > { %p17_p2 = scmp.ge.s32.totalorder %s20_s17, 6   ;;  %s16869_s13 = smov %s14564_s14 }
 0x782   : > { %s16870_s14 = smov %s14658_s24  ;;  %s16871_s15 = smov %s14572_s16 }
 0x783   : > { %s16872_s16 = smov %s16874_s18  ;;  %19 = sbr.rel (!%p17_p2) target bundleno = 7 (0x7), region = 102 }
 0x788   :  { %12462 = vsyncpa [#allocation3], 1 }
 0x789   :  { %12464 = vsyncpa [#allocation3 + $0x1], 1 }
 0x78a   :  { %12465 = vsyncpa [#allocation6], 1 }
 0x78b   :  { %12467 = vsyncpa [#allocation6 + $0x1], 1 }
 0x78c   :  { %12468 = vsyncpa [#allocation4], 1 }
 0x78d   :  { %12470 = vsyncpa [#allocation4 + $0x1], 1 }

</bundles_post_ra>
